<compile_context>
chip_gen: v7x
topology: tpu7x:2x2x1
jax: 0.10.0
libtpu: 0.0.40
codegen_flags: <defaults>
</compile_context>

<pallas_src>
import jax
import jax.numpy as jnp
from jax.experimental import pallas as pl
from jax.experimental.pallas import tpu as pltpu

KSIZE = 5  # temporal extent of every Conv2d kernel (kernel_size = (5, 1))


def _vmem():
    return pl.BlockSpec(memory_space=pltpu.MemorySpace.VMEM)


# ---------- host-side weight prep: lane-dense block-diagonal conv weights ----------
def _expand_conv_w(w, n_sensors, cs_cols=False):
    """(K, Cin, Cout) -> (K, S*Cin, S*Cout), block-diagonal over the sensor axis.

    Returned per-tap k so the kernel can accumulate K small matmuls instead of
    building an im2col concat.  Rows of each tap are ordered (s, cin).  Columns
    are ordered (s, cout) by default, or (cout, s) when cs_cols=True (used for
    the last conv so its output comes out in NCHW-friendly (channel, sensor)
    lane order).
    """
    K, Cin, Cout = w.shape
    eye = jnp.eye(n_sensors, dtype=w.dtype)
    if cs_cols:
        we = jnp.einsum("kio,st->ksiot", w, eye)      # (K, S, Cin, Cout, S)
        return we.reshape(K, n_sensors * Cin, Cout * n_sensors)
    we = jnp.einsum("kio,st->ksito", w, eye)          # (K, S, Cin, S, Cout)
    return we.reshape(K, n_sensors * Cin, n_sensors * Cout)


def _expand_conv_b(b, n_sensors, cs_cols=False):
    b = b.reshape(1, -1)
    if cs_cols:
        return jnp.repeat(b, n_sensors, axis=1)       # (1, Cout*S), (c, s) order
    return jnp.tile(b, (1, n_sensors))                # (1, S*Cout), (s, c) order


def _permute_gates_ifgo_to_ifog(w):
    """Reorder the trailing 4H gate columns from torch's (i, f, g, o) to (i, f, o, g).

    Lets the kernel apply one sigmoid to the contiguous [0:3H] slice and one
    tanh to [3H:4H].  Must match the in-kernel slice order exactly.
    """
    h = w.shape[-1] // 4
    return jnp.concatenate(
        [w[..., 0 * h:1 * h],     # i
         w[..., 1 * h:2 * h],     # f
         w[..., 3 * h:4 * h],     # o
         w[..., 2 * h:3 * h]],    # g
        axis=-1)


# ------------------------------ fused kernel ------------------------------
def _make_kernel(B, T, S, C, H, in_register_permute):
    K = KSIZE
    Tp = T - 4 * (K - 1)          # time steps surviving the four (5,1) convs
    CS = C * S
    TB = Tp * B

    # (t, b_in, out_slot) triples reproducing the reference's
    # `.view(B,-1,n_classes)[:, -1, :]` row selection on the (t, b)-ordered
    # LSTM-2 output: selected flat row r = b*Tp + Tp - 1 -> t = r // B, b_in = r % B.
    # (For B>1 this quirk means out[b] need not come from batch b -- faithful
    # to the reference module.)
    capture = [((b * Tp + Tp - 1) // B, (b * Tp + Tp - 1) % B, b) for b in range(B)]

    def sigmoid(x):
        # 1/(1 + e^-x) with the approximate EUP reciprocal (perf review).
        return pl.reciprocal(1.0 + jnp.exp(-x), approx=True)

    def kernel(x_ref,
               w1, b1, w2, b2, w3, b3, w4, b4,
               wih1, whh1, bl1, wih2, whh2, bl2,
               wfc, bfc,
               o_ref, nchw_scr):
        # ---- conv stack: K accumulating lane-dense MXU matmuls per layer ----
        a = x_ref[...]                                  # (B, T, S), Cin = 1
        for wref, bref in ((w1, b1), (w2, b2), (w3, b3), (w4, b4)):
            t_in = a.shape[1]
            t_out = t_in - (K - 1)
            fin = a.shape[2]
            y = jnp.dot(a[:, 0:t_out, :].reshape(B * t_out, fin), wref[0],
                        preferred_element_type=jnp.float32)
            for k in range(1, K):
                y = y + jnp.dot(a[:, k:k + t_out, :].reshape(B * t_out, fin),
                                wref[k], preferred_element_type=jnp.float32)
            y = jnp.maximum(y + bref[...], 0.0)
            a = y.reshape(B, t_out, y.shape[-1])
        # a: (B, T', C*S) with lanes in (channel, sensor) order (conv4 cols are (c,s)),
        # i.e. a[b, t, c*S + s] == conv4_nchw[b, c, t, s].

        # ---- reproduce the reference's raw NCHW .view(T', B, C*S) ----
        if in_register_permute:
            # Transposing (t, c) yields the row-major NCHW buffer; its flat
            # reinterpretation as (T'*B, C*S) is exactly `seq`.
            seq = jnp.transpose(a.reshape(B, Tp, C, S), (0, 2, 1, 3)).reshape(TB, CS)
        else:
            # Proven fallback path: stage the NCHW buffer in VMEM as S-wide rows
            # (row (b*C+c)*T' + t holds conv4[b, c, t, :]), then reassemble seq
            # with C strided row reads + a lane concat.
            for bi in range(B):
                for c in range(C):
                    r0 = (bi * C + c) * Tp
                    nchw_scr[r0:r0 + Tp, :] = a[bi, :, c * S:(c + 1) * S]
            seq = jnp.concatenate(
                [nchw_scr[pl.ds(j, TB, stride=C), :] for j in range(C)], axis=-1)

        # ---- stacked LSTMs: hoisted input projection + fully unrolled recurrence ----
        def lstm_layer(x_seq, wih, whh, bias, capture_rows=None):
            wih_v, whh_v = wih[...], whh[...]
            # Input projection hoisted over all T'*B rows (off the recurrence).
            gx = jnp.dot(x_seq, wih_v, preferred_element_type=jnp.float32) + bias[...]
            # Pre-slice per step: no dependence on h, so these extracts stay off
            # the serial h->h critical path.
            gx_t = [gx[t * B:(t + 1) * B, :] for t in range(Tp)]
            h = jnp.zeros((B, H), jnp.float32)
            c_st = jnp.zeros((B, H), jnp.float32)
            outs = []
            picked = [None] * B if capture_rows is not None else None
            for t in range(Tp):
                # NOTE: explicit MXU staging (matmul_push_rhs keeping Whh
                # resident) left as a follow-up; jnp.dot kept here.
                g = gx_t[t] + jnp.dot(h, whh_v, preferred_element_type=jnp.float32)
                # Gates are packed (i, f, o, g) host-side -> one sigmoid over the
                # contiguous 3H lanes + one tanh.
                s_act = sigmoid(g[:, :3 * H])
                i_g = s_act[:, 0 * H:1 * H]
                f_g = s_act[:, 1 * H:2 * H]
                o_g = s_act[:, 2 * H:3 * H]
                g_g = jnp.tanh(g[:, 3 * H:4 * H])
                c_st = f_g * c_st + i_g * g_g
                h = o_g * jnp.tanh(c_st)
                if picked is None:
                    outs.append(h)
                else:
                    for (tt, bb, slot) in capture_rows:
                        if tt == t:
                            picked[slot] = h[bb:bb + 1, :]
            if picked is None:
                return jnp.concatenate(outs, axis=0)    # (T'*B, H), rows ordered (t, b)
            return jnp.concatenate(picked, axis=0)      # (B, H) -- only rows actually used

        h1 = lstm_layer(seq, wih1, whh1, bl1)
        sel = lstm_layer(h1, wih2, whh2, bl2, capture_rows=capture)

        # ---- final Linear on the selected rows only ----
        # TODO(synk): nn.Dropout treated as identity (inference mode); training-mode
        # RNG mask not implemented.
        o_ref[...] = jnp.dot(sel, wfc[...],
                             preferred_element_type=jnp.float32) + bfc[...]

    return kernel


# ------------------------------ parameters ------------------------------
def init_params(key, n_sensors, n_conv, n_lstm, n_classes):
    ks = iter(jax.random.split(key, 32))

    def normal(shape, scale=0.1):
        return scale * jax.random.normal(next(ks), shape, dtype=jnp.float32)

    convs = []
    cin = 1
    for _ in range(4):
        convs.append({"w": normal((KSIZE, cin, n_conv)),   # (K, Cin, Cout)
                      "b": normal((n_conv,))})
        cin = n_conv

    def lstm_p(in_dim):
        return {"wih": normal((in_dim, 4 * n_lstm)),       # = torch W_ih^T, gates (i,f,g,o)
                "whh": normal((n_lstm, 4 * n_lstm)),       # = torch W_hh^T, gates (i,f,g,o)
                "b": normal((1, 4 * n_lstm))}              # = bias_ih + bias_hh

    return {"convs": convs,
            "lstm1": lstm_p(n_conv * n_sensors),
            "lstm2": lstm_p(n_lstm),
            "fc": {"w": normal((n_lstm, n_classes)), "b": normal((1, n_classes))}}


def pack_inputs(params, n_sensors):
    """One-time host-side prep: block-diag conv weights (per tap) + (i,f,o,g) gate packing."""
    packed = []
    n_layers = len(params["convs"])
    for i, cp in enumerate(params["convs"]):
        cs_cols = (i == n_layers - 1)
        packed.append(_expand_conv_w(cp["w"], n_sensors, cs_cols))   # (K, S*Cin, S*Cout)
        packed.append(_expand_conv_b(cp["b"], n_sensors, cs_cols))   # (1, S*Cout)
    for name in ("lstm1", "lstm2"):
        lp = params[name]
        packed.append(_permute_gates_ifgo_to_ifog(lp["wih"]))
        packed.append(_permute_gates_ifgo_to_ifog(lp["whh"]))
        packed.append(_permute_gates_ifgo_to_ifog(lp["b"]))
    packed.extend([params["fc"]["w"], params["fc"]["b"]])
    return tuple(packed)


# ------------------------------ forward ------------------------------
def net_forward(x, packed, n_conv, n_lstm, n_classes):
    B, T, S = x.shape
    assert T - 4 * (KSIZE - 1) >= 1, "sequence too short for four (5,1) convs"
    t_prime = T - 4 * (KSIZE - 1)

    def build(in_register_permute):
        kernel = _make_kernel(B, T, S, n_conv, n_lstm, in_register_permute)
        # grid=() -> single program; footprint <1 MiB so no tiling / VMEM-limit
        # concerns on any generation.  For larger B, add a leading "parallel"
        # batch grid axis to use v7x's second TensorCore.
        return pl.pallas_call(
            kernel,
            out_shape=jax.ShapeDtypeStruct((B, n_classes), jnp.float32),
            in_specs=[_vmem()] * (1 + len(packed)),
            out_specs=_vmem(),
            scratch_shapes=[pltpu.VMEM((B * n_conv * t_prime, S), jnp.float32)],
        )

    # Prefer the in-register NCHW permutation (perf review); fall back to the
    # previously validated scratch-based permutation if this Mosaic build
    # rejects the lane relayout.
    try:
        out = build(True)(x, *packed)
        return jax.block_until_ready(out)
    except Exception:
        out = build(False)(x, *packed)
        return jax.block_until_ready(out)


if __name__ == "__main__":
    # Small shapes consistent with the module's forward:
    B, T, S = 2, 24, 8              # batch, time steps, sensor channels
    n_conv, n_lstm, n_classes = 8, 32, 6
    # After four (5,1) convs: T' = T - 16 = 8.

    key = jax.random.PRNGKey(0)
    kx, kp = jax.random.split(key)
    x = jax.random.normal(kx, (B, T, S), dtype=jnp.float32)
    params = init_params(kp, S, n_conv, n_lstm, n_classes)
    packed = pack_inputs(params, S)

    out = net_forward(x, packed, n_conv, n_lstm, n_classes)
    out = jax.block_until_ready(out)
    assert out.shape == (B, n_classes), out.shape
    print("KERNEL_OK")
</pallas_src>

<mosaic_0001>
module attributes {stable_mosaic.version = 11 : i64} {
  func.func @kernel(%arg0: memref<2x24x8xf32, #tpu.memory_space<vmem>>, %arg1: memref<5x8x64xf32, #tpu.memory_space<vmem>>, %arg2: memref<1x64xf32, #tpu.memory_space<vmem>>, %arg3: memref<5x64x64xf32, #tpu.memory_space<vmem>>, %arg4: memref<1x64xf32, #tpu.memory_space<vmem>>, %arg5: memref<5x64x64xf32, #tpu.memory_space<vmem>>, %arg6: memref<1x64xf32, #tpu.memory_space<vmem>>, %arg7: memref<5x64x64xf32, #tpu.memory_space<vmem>>, %arg8: memref<1x64xf32, #tpu.memory_space<vmem>>, %arg9: memref<64x128xf32, #tpu.memory_space<vmem>>, %arg10: memref<32x128xf32, #tpu.memory_space<vmem>>, %arg11: memref<1x128xf32, #tpu.memory_space<vmem>>, %arg12: memref<32x128xf32, #tpu.memory_space<vmem>>, %arg13: memref<32x128xf32, #tpu.memory_space<vmem>>, %arg14: memref<1x128xf32, #tpu.memory_space<vmem>>, %arg15: memref<32x6xf32, #tpu.memory_space<vmem>>, %arg16: memref<1x6xf32, #tpu.memory_space<vmem>>, %arg17: memref<2x6xf32, #tpu.memory_space<vmem>>, %arg18: memref<128x8xf32, #tpu.memory_space<vmem>>) attributes {dimension_semantics = [], scalar_prefetch = 0 : i64, scratch_operands = 1 : i64, tpu.core_type = #tpu.core_type<tc>} {
    %c0 = arith.constant 0 : index
    %c0_0 = arith.constant 0 : index
    %c0_1 = arith.constant 0 : index
    %0 = vector.load %arg0[%c0, %c0_0, %c0_1] : memref<2x24x8xf32, #tpu.memory_space<vmem>>, vector<2x24x8xf32>
    %1 = vector.extract_strided_slice %0 {offsets = [0, 0, 0], sizes = [2, 20, 8], strides = [1, 1, 1]} : vector<2x24x8xf32> to vector<2x20x8xf32>
    %2 = vector.shape_cast %1 : vector<2x20x8xf32> to vector<40x8xf32>
    %c0_2 = arith.constant 0 : index
    %c0_3 = arith.constant 0 : index
    %c0_4 = arith.constant 0 : index
    %3 = vector.load %arg1[%c0_2, %c0_3, %c0_4] : memref<5x8x64xf32, #tpu.memory_space<vmem>>, vector<1x8x64xf32>
    %4 = vector.shape_cast %3 : vector<1x8x64xf32> to vector<8x64xf32>
    %cst = arith.constant dense<0.000000e+00> : vector<40x64xf32>
    %5 = tpu.matmul %2, %4, %cst {dimension_numbers = #tpu.dot_dimension_numbers<[1], [0], [0], [1], [0, 0, 1, 1], [], []>} : vector<40x8xf32>, vector<8x64xf32>, vector<40x64xf32> -> vector<40x64xf32>
    %6 = vector.extract_strided_slice %0 {offsets = [0, 1, 0], sizes = [2, 20, 8], strides = [1, 1, 1]} : vector<2x24x8xf32> to vector<2x20x8xf32>
    %7 = vector.shape_cast %6 : vector<2x20x8xf32> to vector<40x8xf32>
    %c1 = arith.constant 1 : index
    %c0_5 = arith.constant 0 : index
    %c0_6 = arith.constant 0 : index
    %8 = vector.load %arg1[%c1, %c0_5, %c0_6] : memref<5x8x64xf32, #tpu.memory_space<vmem>>, vector<1x8x64xf32>
    %9 = vector.shape_cast %8 : vector<1x8x64xf32> to vector<8x64xf32>
    %cst_7 = arith.constant dense<0.000000e+00> : vector<40x64xf32>
    %10 = tpu.matmul %7, %9, %cst_7 {dimension_numbers = #tpu.dot_dimension_numbers<[1], [0], [0], [1], [0, 0, 1, 1], [], []>} : vector<40x8xf32>, vector<8x64xf32>, vector<40x64xf32> -> vector<40x64xf32>
    %11 = arith.addf %5, %10 : vector<40x64xf32>
    %12 = vector.extract_strided_slice %0 {offsets = [0, 2, 0], sizes = [2, 20, 8], strides = [1, 1, 1]} : vector<2x24x8xf32> to vector<2x20x8xf32>
    %13 = vector.shape_cast %12 : vector<2x20x8xf32> to vector<40x8xf32>
    %c2 = arith.constant 2 : index
    %c0_8 = arith.constant 0 : index
    %c0_9 = arith.constant 0 : index
    %14 = vector.load %arg1[%c2, %c0_8, %c0_9] : memref<5x8x64xf32, #tpu.memory_space<vmem>>, vector<1x8x64xf32>
    %15 = vector.shape_cast %14 : vector<1x8x64xf32> to vector<8x64xf32>
    %cst_10 = arith.constant dense<0.000000e+00> : vector<40x64xf32>
    %16 = tpu.matmul %13, %15, %cst_10 {dimension_numbers = #tpu.dot_dimension_numbers<[1], [0], [0], [1], [0, 0, 1, 1], [], []>} : vector<40x8xf32>, vector<8x64xf32>, vector<40x64xf32> -> vector<40x64xf32>
    %17 = arith.addf %11, %16 : vector<40x64xf32>
    %18 = vector.extract_strided_slice %0 {offsets = [0, 3, 0], sizes = [2, 20, 8], strides = [1, 1, 1]} : vector<2x24x8xf32> to vector<2x20x8xf32>
    %19 = vector.shape_cast %18 : vector<2x20x8xf32> to vector<40x8xf32>
    %c3 = arith.constant 3 : index
    %c0_11 = arith.constant 0 : index
    %c0_12 = arith.constant 0 : index
    %20 = vector.load %arg1[%c3, %c0_11, %c0_12] : memref<5x8x64xf32, #tpu.memory_space<vmem>>, vector<1x8x64xf32>
    %21 = vector.shape_cast %20 : vector<1x8x64xf32> to vector<8x64xf32>
    %cst_13 = arith.constant dense<0.000000e+00> : vector<40x64xf32>
    %22 = tpu.matmul %19, %21, %cst_13 {dimension_numbers = #tpu.dot_dimension_numbers<[1], [0], [0], [1], [0, 0, 1, 1], [], []>} : vector<40x8xf32>, vector<8x64xf32>, vector<40x64xf32> -> vector<40x64xf32>
    %23 = arith.addf %17, %22 : vector<40x64xf32>
    %24 = vector.extract_strided_slice %0 {offsets = [0, 4, 0], sizes = [2, 20, 8], strides = [1, 1, 1]} : vector<2x24x8xf32> to vector<2x20x8xf32>
    %25 = vector.shape_cast %24 : vector<2x20x8xf32> to vector<40x8xf32>
    %c4 = arith.constant 4 : index
    %c0_14 = arith.constant 0 : index
    %c0_15 = arith.constant 0 : index
    %26 = vector.load %arg1[%c4, %c0_14, %c0_15] : memref<5x8x64xf32, #tpu.memory_space<vmem>>, vector<1x8x64xf32>
    %27 = vector.shape_cast %26 : vector<1x8x64xf32> to vector<8x64xf32>
    %cst_16 = arith.constant dense<0.000000e+00> : vector<40x64xf32>
    %28 = tpu.matmul %25, %27, %cst_16 {dimension_numbers = #tpu.dot_dimension_numbers<[1], [0], [0], [1], [0, 0, 1, 1], [], []>} : vector<40x8xf32>, vector<8x64xf32>, vector<40x64xf32> -> vector<40x64xf32>
    %29 = arith.addf %23, %28 : vector<40x64xf32>
    %c0_17 = arith.constant 0 : index
    %c0_18 = arith.constant 0 : index
    %30 = vector.load %arg2[%c0_17, %c0_18] : memref<1x64xf32, #tpu.memory_space<vmem>>, vector<1x64xf32>
    %31 = vector.broadcast %30 : vector<1x64xf32> to vector<40x64xf32>
    %32 = arith.addf %29, %31 : vector<40x64xf32>
    %cst_19 = arith.constant 0.000000e+00 : f32
    %33 = vector.broadcast %cst_19 : f32 to vector<40x64xf32>
    %34 = arith.maximumf %32, %33 : vector<40x64xf32>
    %35 = vector.shape_cast %34 : vector<40x64xf32> to vector<2x20x64xf32>
    %36 = vector.extract_strided_slice %35 {offsets = [0, 0, 0], sizes = [2, 16, 64], strides = [1, 1, 1]} : vector<2x20x64xf32> to vector<2x16x64xf32>
    %37 = vector.shape_cast %36 : vector<2x16x64xf32> to vector<32x64xf32>
    %c0_20 = arith.constant 0 : index
    %c0_21 = arith.constant 0 : index
    %c0_22 = arith.constant 0 : index
    %38 = vector.load %arg3[%c0_20, %c0_21, %c0_22] : memref<5x64x64xf32, #tpu.memory_space<vmem>>, vector<1x64x64xf32>
    %39 = vector.shape_cast %38 : vector<1x64x64xf32> to vector<64x64xf32>
    %cst_23 = arith.constant dense<0.000000e+00> : vector<32x64xf32>
    %40 = tpu.matmul %37, %39, %cst_23 {dimension_numbers = #tpu.dot_dimension_numbers<[1], [0], [0], [1], [0, 0, 1, 1], [], []>} : vector<32x64xf32>, vector<64x64xf32>, vector<32x64xf32> -> vector<32x64xf32>
    %41 = vector.extract_strided_slice %35 {offsets = [0, 1, 0], sizes = [2, 16, 64], strides = [1, 1, 1]} : vector<2x20x64xf32> to vector<2x16x64xf32>
    %42 = vector.shape_cast %41 : vector<2x16x64xf32> to vector<32x64xf32>
    %c1_24 = arith.constant 1 : index
    %c0_25 = arith.constant 0 : index
    %c0_26 = arith.constant 0 : index
    %43 = vector.load %arg3[%c1_24, %c0_25, %c0_26] : memref<5x64x64xf32, #tpu.memory_space<vmem>>, vector<1x64x64xf32>
    %44 = vector.shape_cast %43 : vector<1x64x64xf32> to vector<64x64xf32>
    %cst_27 = arith.constant dense<0.000000e+00> : vector<32x64xf32>
    %45 = tpu.matmul %42, %44, %cst_27 {dimension_numbers = #tpu.dot_dimension_numbers<[1], [0], [0], [1], [0, 0, 1, 1], [], []>} : vector<32x64xf32>, vector<64x64xf32>, vector<32x64xf32> -> vector<32x64xf32>
    %46 = arith.addf %40, %45 : vector<32x64xf32>
    %47 = vector.extract_strided_slice %35 {offsets = [0, 2, 0], sizes = [2, 16, 64], strides = [1, 1, 1]} : vector<2x20x64xf32> to vector<2x16x64xf32>
    %48 = vector.shape_cast %47 : vector<2x16x64xf32> to vector<32x64xf32>
    %c2_28 = arith.constant 2 : index
    %c0_29 = arith.constant 0 : index
    %c0_30 = arith.constant 0 : index
    %49 = vector.load %arg3[%c2_28, %c0_29, %c0_30] : memref<5x64x64xf32, #tpu.memory_space<vmem>>, vector<1x64x64xf32>
    %50 = vector.shape_cast %49 : vector<1x64x64xf32> to vector<64x64xf32>
    %cst_31 = arith.constant dense<0.000000e+00> : vector<32x64xf32>
    %51 = tpu.matmul %48, %50, %cst_31 {dimension_numbers = #tpu.dot_dimension_numbers<[1], [0], [0], [1], [0, 0, 1, 1], [], []>} : vector<32x64xf32>, vector<64x64xf32>, vector<32x64xf32> -> vector<32x64xf32>
    %52 = arith.addf %46, %51 : vector<32x64xf32>
    %53 = vector.extract_strided_slice %35 {offsets = [0, 3, 0], sizes = [2, 16, 64], strides = [1, 1, 1]} : vector<2x20x64xf32> to vector<2x16x64xf32>
    %54 = vector.shape_cast %53 : vector<2x16x64xf32> to vector<32x64xf32>
    %c3_32 = arith.constant 3 : index
    %c0_33 = arith.constant 0 : index
    %c0_34 = arith.constant 0 : index
    %55 = vector.load %arg3[%c3_32, %c0_33, %c0_34] : memref<5x64x64xf32, #tpu.memory_space<vmem>>, vector<1x64x64xf32>
    %56 = vector.shape_cast %55 : vector<1x64x64xf32> to vector<64x64xf32>
    %cst_35 = arith.constant dense<0.000000e+00> : vector<32x64xf32>
    %57 = tpu.matmul %54, %56, %cst_35 {dimension_numbers = #tpu.dot_dimension_numbers<[1], [0], [0], [1], [0, 0, 1, 1], [], []>} : vector<32x64xf32>, vector<64x64xf32>, vector<32x64xf32> -> vector<32x64xf32>
    %58 = arith.addf %52, %57 : vector<32x64xf32>
    %59 = vector.extract_strided_slice %35 {offsets = [0, 4, 0], sizes = [2, 16, 64], strides = [1, 1, 1]} : vector<2x20x64xf32> to vector<2x16x64xf32>
    %60 = vector.shape_cast %59 : vector<2x16x64xf32> to vector<32x64xf32>
    %c4_36 = arith.constant 4 : index
    %c0_37 = arith.constant 0 : index
    %c0_38 = arith.constant 0 : index
    %61 = vector.load %arg3[%c4_36, %c0_37, %c0_38] : memref<5x64x64xf32, #tpu.memory_space<vmem>>, vector<1x64x64xf32>
    %62 = vector.shape_cast %61 : vector<1x64x64xf32> to vector<64x64xf32>
    %cst_39 = arith.constant dense<0.000000e+00> : vector<32x64xf32>
    %63 = tpu.matmul %60, %62, %cst_39 {dimension_numbers = #tpu.dot_dimension_numbers<[1], [0], [0], [1], [0, 0, 1, 1], [], []>} : vector<32x64xf32>, vector<64x64xf32>, vector<32x64xf32> -> vector<32x64xf32>
    %64 = arith.addf %58, %63 : vector<32x64xf32>
    %c0_40 = arith.constant 0 : index
    %c0_41 = arith.constant 0 : index
    %65 = vector.load %arg4[%c0_40, %c0_41] : memref<1x64xf32, #tpu.memory_space<vmem>>, vector<1x64xf32>
    %66 = vector.broadcast %65 : vector<1x64xf32> to vector<32x64xf32>
    %67 = arith.addf %64, %66 : vector<32x64xf32>
    %cst_42 = arith.constant 0.000000e+00 : f32
    %68 = vector.broadcast %cst_42 : f32 to vector<32x64xf32>
    %69 = arith.maximumf %67, %68 : vector<32x64xf32>
    %70 = vector.shape_cast %69 : vector<32x64xf32> to vector<2x16x64xf32>
    %71 = vector.extract_strided_slice %70 {offsets = [0, 0, 0], sizes = [2, 12, 64], strides = [1, 1, 1]} : vector<2x16x64xf32> to vector<2x12x64xf32>
    %72 = vector.shape_cast %71 : vector<2x12x64xf32> to vector<24x64xf32>
    %c0_43 = arith.constant 0 : index
    %c0_44 = arith.constant 0 : index
    %c0_45 = arith.constant 0 : index
    %73 = vector.load %arg5[%c0_43, %c0_44, %c0_45] : memref<5x64x64xf32, #tpu.memory_space<vmem>>, vector<1x64x64xf32>
    %74 = vector.shape_cast %73 : vector<1x64x64xf32> to vector<64x64xf32>
    %cst_46 = arith.constant dense<0.000000e+00> : vector<24x64xf32>
    %75 = tpu.matmul %72, %74, %cst_46 {dimension_numbers = #tpu.dot_dimension_numbers<[1], [0], [0], [1], [0, 0, 1, 1], [], []>} : vector<24x64xf32>, vector<64x64xf32>, vector<24x64xf32> -> vector<24x64xf32>
    %76 = vector.extract_strided_slice %70 {offsets = [0, 1, 0], sizes = [2, 12, 64], strides = [1, 1, 1]} : vector<2x16x64xf32> to vector<2x12x64xf32>
    %77 = vector.shape_cast %76 : vector<2x12x64xf32> to vector<24x64xf32>
    %c1_47 = arith.constant 1 : index
    %c0_48 = arith.constant 0 : index
    %c0_49 = arith.constant 0 : index
    %78 = vector.load %arg5[%c1_47, %c0_48, %c0_49] : memref<5x64x64xf32, #tpu.memory_space<vmem>>, vector<1x64x64xf32>
    %79 = vector.shape_cast %78 : vector<1x64x64xf32> to vector<64x64xf32>
    %cst_50 = arith.constant dense<0.000000e+00> : vector<24x64xf32>
    %80 = tpu.matmul %77, %79, %cst_50 {dimension_numbers = #tpu.dot_dimension_numbers<[1], [0], [0], [1], [0, 0, 1, 1], [], []>} : vector<24x64xf32>, vector<64x64xf32>, vector<24x64xf32> -> vector<24x64xf32>
    %81 = arith.addf %75, %80 : vector<24x64xf32>
    %82 = vector.extract_strided_slice %70 {offsets = [0, 2, 0], sizes = [2, 12, 64], strides = [1, 1, 1]} : vector<2x16x64xf32> to vector<2x12x64xf32>
    %83 = vector.shape_cast %82 : vector<2x12x64xf32> to vector<24x64xf32>
    %c2_51 = arith.constant 2 : index
    %c0_52 = arith.constant 0 : index
    %c0_53 = arith.constant 0 : index
    %84 = vector.load %arg5[%c2_51, %c0_52, %c0_53] : memref<5x64x64xf32, #tpu.memory_space<vmem>>, vector<1x64x64xf32>
    %85 = vector.shape_cast %84 : vector<1x64x64xf32> to vector<64x64xf32>
    %cst_54 = arith.constant dense<0.000000e+00> : vector<24x64xf32>
    %86 = tpu.matmul %83, %85, %cst_54 {dimension_numbers = #tpu.dot_dimension_numbers<[1], [0], [0], [1], [0, 0, 1, 1], [], []>} : vector<24x64xf32>, vector<64x64xf32>, vector<24x64xf32> -> vector<24x64xf32>
    %87 = arith.addf %81, %86 : vector<24x64xf32>
    %88 = vector.extract_strided_slice %70 {offsets = [0, 3, 0], sizes = [2, 12, 64], strides = [1, 1, 1]} : vector<2x16x64xf32> to vector<2x12x64xf32>
    %89 = vector.shape_cast %88 : vector<2x12x64xf32> to vector<24x64xf32>
    %c3_55 = arith.constant 3 : index
    %c0_56 = arith.constant 0 : index
    %c0_57 = arith.constant 0 : index
    %90 = vector.load %arg5[%c3_55, %c0_56, %c0_57] : memref<5x64x64xf32, #tpu.memory_space<vmem>>, vector<1x64x64xf32>
    %91 = vector.shape_cast %90 : vector<1x64x64xf32> to vector<64x64xf32>
    %cst_58 = arith.constant dense<0.000000e+00> : vector<24x64xf32>
    %92 = tpu.matmul %89, %91, %cst_58 {dimension_numbers = #tpu.dot_dimension_numbers<[1], [0], [0], [1], [0, 0, 1, 1], [], []>} : vector<24x64xf32>, vector<64x64xf32>, vector<24x64xf32> -> vector<24x64xf32>
    %93 = arith.addf %87, %92 : vector<24x64xf32>
    %94 = vector.extract_strided_slice %70 {offsets = [0, 4, 0], sizes = [2, 12, 64], strides = [1, 1, 1]} : vector<2x16x64xf32> to vector<2x12x64xf32>
    %95 = vector.shape_cast %94 : vector<2x12x64xf32> to vector<24x64xf32>
    %c4_59 = arith.constant 4 : index
    %c0_60 = arith.constant 0 : index
    %c0_61 = arith.constant 0 : index
    %96 = vector.load %arg5[%c4_59, %c0_60, %c0_61] : memref<5x64x64xf32, #tpu.memory_space<vmem>>, vector<1x64x64xf32>
    %97 = vector.shape_cast %96 : vector<1x64x64xf32> to vector<64x64xf32>
    %cst_62 = arith.constant dense<0.000000e+00> : vector<24x64xf32>
    %98 = tpu.matmul %95, %97, %cst_62 {dimension_numbers = #tpu.dot_dimension_numbers<[1], [0], [0], [1], [0, 0, 1, 1], [], []>} : vector<24x64xf32>, vector<64x64xf32>, vector<24x64xf32> -> vector<24x64xf32>
    %99 = arith.addf %93, %98 : vector<24x64xf32>
    %c0_63 = arith.constant 0 : index
    %c0_64 = arith.constant 0 : index
    %100 = vector.load %arg6[%c0_63, %c0_64] : memref<1x64xf32, #tpu.memory_space<vmem>>, vector<1x64xf32>
    %101 = vector.broadcast %100 : vector<1x64xf32> to vector<24x64xf32>
    %102 = arith.addf %99, %101 : vector<24x64xf32>
    %cst_65 = arith.constant 0.000000e+00 : f32
    %103 = vector.broadcast %cst_65 : f32 to vector<24x64xf32>
    %104 = arith.maximumf %102, %103 : vector<24x64xf32>
    %105 = vector.shape_cast %104 : vector<24x64xf32> to vector<2x12x64xf32>
    %106 = vector.extract_strided_slice %105 {offsets = [0, 0, 0], sizes = [2, 8, 64], strides = [1, 1, 1]} : vector<2x12x64xf32> to vector<2x8x64xf32>
    %107 = vector.shape_cast %106 : vector<2x8x64xf32> to vector<16x64xf32>
    %c0_66 = arith.constant 0 : index
    %c0_67 = arith.constant 0 : index
    %c0_68 = arith.constant 0 : index
    %108 = vector.load %arg7[%c0_66, %c0_67, %c0_68] : memref<5x64x64xf32, #tpu.memory_space<vmem>>, vector<1x64x64xf32>
    %109 = vector.shape_cast %108 : vector<1x64x64xf32> to vector<64x64xf32>
    %cst_69 = arith.constant dense<0.000000e+00> : vector<16x64xf32>
    %110 = tpu.matmul %107, %109, %cst_69 {dimension_numbers = #tpu.dot_dimension_numbers<[1], [0], [0], [1], [0, 0, 1, 1], [], []>} : vector<16x64xf32>, vector<64x64xf32>, vector<16x64xf32> -> vector<16x64xf32>
    %111 = vector.extract_strided_slice %105 {offsets = [0, 1, 0], sizes = [2, 8, 64], strides = [1, 1, 1]} : vector<2x12x64xf32> to vector<2x8x64xf32>
    %112 = vector.shape_cast %111 : vector<2x8x64xf32> to vector<16x64xf32>
    %c1_70 = arith.constant 1 : index
    %c0_71 = arith.constant 0 : index
    %c0_72 = arith.constant 0 : index
    %113 = vector.load %arg7[%c1_70, %c0_71, %c0_72] : memref<5x64x64xf32, #tpu.memory_space<vmem>>, vector<1x64x64xf32>
    %114 = vector.shape_cast %113 : vector<1x64x64xf32> to vector<64x64xf32>
    %cst_73 = arith.constant dense<0.000000e+00> : vector<16x64xf32>
    %115 = tpu.matmul %112, %114, %cst_73 {dimension_numbers = #tpu.dot_dimension_numbers<[1], [0], [0], [1], [0, 0, 1, 1], [], []>} : vector<16x64xf32>, vector<64x64xf32>, vector<16x64xf32> -> vector<16x64xf32>
    %116 = arith.addf %110, %115 : vector<16x64xf32>
    %117 = vector.extract_strided_slice %105 {offsets = [0, 2, 0], sizes = [2, 8, 64], strides = [1, 1, 1]} : vector<2x12x64xf32> to vector<2x8x64xf32>
    %118 = vector.shape_cast %117 : vector<2x8x64xf32> to vector<16x64xf32>
    %c2_74 = arith.constant 2 : index
    %c0_75 = arith.constant 0 : index
    %c0_76 = arith.constant 0 : index
    %119 = vector.load %arg7[%c2_74, %c0_75, %c0_76] : memref<5x64x64xf32, #tpu.memory_space<vmem>>, vector<1x64x64xf32>
    %120 = vector.shape_cast %119 : vector<1x64x64xf32> to vector<64x64xf32>
    %cst_77 = arith.constant dense<0.000000e+00> : vector<16x64xf32>
    %121 = tpu.matmul %118, %120, %cst_77 {dimension_numbers = #tpu.dot_dimension_numbers<[1], [0], [0], [1], [0, 0, 1, 1], [], []>} : vector<16x64xf32>, vector<64x64xf32>, vector<16x64xf32> -> vector<16x64xf32>
    %122 = arith.addf %116, %121 : vector<16x64xf32>
    %123 = vector.extract_strided_slice %105 {offsets = [0, 3, 0], sizes = [2, 8, 64], strides = [1, 1, 1]} : vector<2x12x64xf32> to vector<2x8x64xf32>
    %124 = vector.shape_cast %123 : vector<2x8x64xf32> to vector<16x64xf32>
    %c3_78 = arith.constant 3 : index
    %c0_79 = arith.constant 0 : index
    %c0_80 = arith.constant 0 : index
    %125 = vector.load %arg7[%c3_78, %c0_79, %c0_80] : memref<5x64x64xf32, #tpu.memory_space<vmem>>, vector<1x64x64xf32>
    %126 = vector.shape_cast %125 : vector<1x64x64xf32> to vector<64x64xf32>
    %cst_81 = arith.constant dense<0.000000e+00> : vector<16x64xf32>
    %127 = tpu.matmul %124, %126, %cst_81 {dimension_numbers = #tpu.dot_dimension_numbers<[1], [0], [0], [1], [0, 0, 1, 1], [], []>} : vector<16x64xf32>, vector<64x64xf32>, vector<16x64xf32> -> vector<16x64xf32>
    %128 = arith.addf %122, %127 : vector<16x64xf32>
    %129 = vector.extract_strided_slice %105 {offsets = [0, 4, 0], sizes = [2, 8, 64], strides = [1, 1, 1]} : vector<2x12x64xf32> to vector<2x8x64xf32>
    %130 = vector.shape_cast %129 : vector<2x8x64xf32> to vector<16x64xf32>
    %c4_82 = arith.constant 4 : index
    %c0_83 = arith.constant 0 : index
    %c0_84 = arith.constant 0 : index
    %131 = vector.load %arg7[%c4_82, %c0_83, %c0_84] : memref<5x64x64xf32, #tpu.memory_space<vmem>>, vector<1x64x64xf32>
    %132 = vector.shape_cast %131 : vector<1x64x64xf32> to vector<64x64xf32>
    %cst_85 = arith.constant dense<0.000000e+00> : vector<16x64xf32>
    %133 = tpu.matmul %130, %132, %cst_85 {dimension_numbers = #tpu.dot_dimension_numbers<[1], [0], [0], [1], [0, 0, 1, 1], [], []>} : vector<16x64xf32>, vector<64x64xf32>, vector<16x64xf32> -> vector<16x64xf32>
    %134 = arith.addf %128, %133 : vector<16x64xf32>
    %c0_86 = arith.constant 0 : index
    %c0_87 = arith.constant 0 : index
    %135 = vector.load %arg8[%c0_86, %c0_87] : memref<1x64xf32, #tpu.memory_space<vmem>>, vector<1x64xf32>
    %136 = vector.broadcast %135 : vector<1x64xf32> to vector<16x64xf32>
    %137 = arith.addf %134, %136 : vector<16x64xf32>
    %cst_88 = arith.constant 0.000000e+00 : f32
    %138 = vector.broadcast %cst_88 : f32 to vector<16x64xf32>
    %139 = arith.maximumf %137, %138 : vector<16x64xf32>
    %140 = vector.shape_cast %139 : vector<16x64xf32> to vector<2x8x64xf32>
    %141 = vector.shape_cast %140 : vector<2x8x64xf32> to vector<2x8x8x8xf32>
    %142 = tpu.transpose %141, [0, 2, 1, 3] : vector<2x8x8x8xf32> -> vector<2x8x8x8xf32>
    %143 = vector.shape_cast %142 : vector<2x8x8x8xf32> to vector<16x64xf32>
    %c0_89 = arith.constant 0 : index
    %c0_90 = arith.constant 0 : index
    %144 = vector.load %arg9[%c0_89, %c0_90] : memref<64x128xf32, #tpu.memory_space<vmem>>, vector<64x128xf32>
    %c0_91 = arith.constant 0 : index
    %c0_92 = arith.constant 0 : index
    %145 = vector.load %arg10[%c0_91, %c0_92] : memref<32x128xf32, #tpu.memory_space<vmem>>, vector<32x128xf32>
    %cst_93 = arith.constant dense<0.000000e+00> : vector<16x128xf32>
    %146 = tpu.matmul %143, %144, %cst_93 {dimension_numbers = #tpu.dot_dimension_numbers<[1], [0], [0], [1], [0, 0, 1, 1], [], []>} : vector<16x64xf32>, vector<64x128xf32>, vector<16x128xf32> -> vector<16x128xf32>
    %c0_94 = arith.constant 0 : index
    %c0_95 = arith.constant 0 : index
    %147 = vector.load %arg11[%c0_94, %c0_95] : memref<1x128xf32, #tpu.memory_space<vmem>>, vector<1x128xf32>
    %148 = vector.broadcast %147 : vector<1x128xf32> to vector<16x128xf32>
    %149 = arith.addf %146, %148 : vector<16x128xf32>
    %150 = vector.extract_strided_slice %149 {offsets = [0, 0], sizes = [2, 128], strides = [1, 1]} : vector<16x128xf32> to vector<2x128xf32>
    %151 = vector.extract_strided_slice %149 {offsets = [2, 0], sizes = [2, 128], strides = [1, 1]} : vector<16x128xf32> to vector<2x128xf32>
    %152 = vector.extract_strided_slice %149 {offsets = [4, 0], sizes = [2, 128], strides = [1, 1]} : vector<16x128xf32> to vector<2x128xf32>
    %153 = vector.extract_strided_slice %149 {offsets = [6, 0], sizes = [2, 128], strides = [1, 1]} : vector<16x128xf32> to vector<2x128xf32>
    %154 = vector.extract_strided_slice %149 {offsets = [8, 0], sizes = [2, 128], strides = [1, 1]} : vector<16x128xf32> to vector<2x128xf32>
    %155 = vector.extract_strided_slice %149 {offsets = [10, 0], sizes = [2, 128], strides = [1, 1]} : vector<16x128xf32> to vector<2x128xf32>
    %156 = vector.extract_strided_slice %149 {offsets = [12, 0], sizes = [2, 128], strides = [1, 1]} : vector<16x128xf32> to vector<2x128xf32>
    %157 = vector.extract_strided_slice %149 {offsets = [14, 0], sizes = [2, 128], strides = [1, 1]} : vector<16x128xf32> to vector<2x128xf32>
    %cst_96 = arith.constant 0.000000e+00 : f32
    %158 = vector.broadcast %cst_96 : f32 to vector<2x32xf32>
    %cst_97 = arith.constant 0.000000e+00 : f32
    %159 = vector.broadcast %cst_97 : f32 to vector<2x32xf32>
    %cst_98 = arith.constant dense<0.000000e+00> : vector<2x128xf32>
    %160 = tpu.matmul %158, %145, %cst_98 {dimension_numbers = #tpu.dot_dimension_numbers<[1], [0], [0], [1], [0, 0, 1, 1], [], []>} : vector<2x32xf32>, vector<32x128xf32>, vector<2x128xf32> -> vector<2x128xf32>
    %161 = arith.addf %150, %160 : vector<2x128xf32>
    %162 = vector.extract_strided_slice %161 {offsets = [0, 0], sizes = [2, 96], strides = [1, 1]} : vector<2x128xf32> to vector<2x96xf32>
    %cst_99 = arith.constant 0.000000e+00 : f32
    %163 = vector.broadcast %cst_99 : f32 to vector<2x96xf32>
    %164 = arith.subf %163, %162 : vector<2x96xf32>
    %165 = math.exp %164 : vector<2x96xf32>
    %cst_100 = arith.constant 1.000000e+00 : f32
    %166 = vector.broadcast %cst_100 : f32 to vector<2x96xf32>
    %167 = arith.addf %166, %165 : vector<2x96xf32>
    %168 = tpu.reciprocal %167 {approx = true} : vector<2x96xf32> -> vector<2x96xf32>
    %169 = vector.extract_strided_slice %168 {offsets = [0, 0], sizes = [2, 32], strides = [1, 1]} : vector<2x96xf32> to vector<2x32xf32>
    %170 = vector.extract_strided_slice %168 {offsets = [0, 32], sizes = [2, 32], strides = [1, 1]} : vector<2x96xf32> to vector<2x32xf32>
    %171 = vector.extract_strided_slice %168 {offsets = [0, 64], sizes = [2, 32], strides = [1, 1]} : vector<2x96xf32> to vector<2x32xf32>
    %172 = vector.extract_strided_slice %161 {offsets = [0, 96], sizes = [2, 32], strides = [1, 1]} : vector<2x128xf32> to vector<2x32xf32>
    %173 = math.tanh %172 : vector<2x32xf32>
    %174 = arith.mulf %170, %159 : vector<2x32xf32>
    %175 = arith.mulf %169, %173 : vector<2x32xf32>
    %176 = arith.addf %174, %175 : vector<2x32xf32>
    %177 = math.tanh %176 : vector<2x32xf32>
    %178 = arith.mulf %171, %177 : vector<2x32xf32>
    %cst_101 = arith.constant dense<0.000000e+00> : vector<2x128xf32>
    %179 = tpu.matmul %178, %145, %cst_101 {dimension_numbers = #tpu.dot_dimension_numbers<[1], [0], [0], [1], [0, 0, 1, 1], [], []>} : vector<2x32xf32>, vector<32x128xf32>, vector<2x128xf32> -> vector<2x128xf32>
    %180 = arith.addf %151, %179 : vector<2x128xf32>
    %181 = vector.extract_strided_slice %180 {offsets = [0, 0], sizes = [2, 96], strides = [1, 1]} : vector<2x128xf32> to vector<2x96xf32>
    %cst_102 = arith.constant 0.000000e+00 : f32
    %182 = vector.broadcast %cst_102 : f32 to vector<2x96xf32>
    %183 = arith.subf %182, %181 : vector<2x96xf32>
    %184 = math.exp %183 : vector<2x96xf32>
    %cst_103 = arith.constant 1.000000e+00 : f32
    %185 = vector.broadcast %cst_103 : f32 to vector<2x96xf32>
    %186 = arith.addf %185, %184 : vector<2x96xf32>
    %187 = tpu.reciprocal %186 {approx = true} : vector<2x96xf32> -> vector<2x96xf32>
    %188 = vector.extract_strided_slice %187 {offsets = [0, 0], sizes = [2, 32], strides = [1, 1]} : vector<2x96xf32> to vector<2x32xf32>
    %189 = vector.extract_strided_slice %187 {offsets = [0, 32], sizes = [2, 32], strides = [1, 1]} : vector<2x96xf32> to vector<2x32xf32>
    %190 = vector.extract_strided_slice %187 {offsets = [0, 64], sizes = [2, 32], strides = [1, 1]} : vector<2x96xf32> to vector<2x32xf32>
    %191 = vector.extract_strided_slice %180 {offsets = [0, 96], sizes = [2, 32], strides = [1, 1]} : vector<2x128xf32> to vector<2x32xf32>
    %192 = math.tanh %191 : vector<2x32xf32>
    %193 = arith.mulf %189, %176 : vector<2x32xf32>
    %194 = arith.mulf %188, %192 : vector<2x32xf32>
    %195 = arith.addf %193, %194 : vector<2x32xf32>
    %196 = math.tanh %195 : vector<2x32xf32>
    %197 = arith.mulf %190, %196 : vector<2x32xf32>
    %cst_104 = arith.constant dense<0.000000e+00> : vector<2x128xf32>
    %198 = tpu.matmul %197, %145, %cst_104 {dimension_numbers = #tpu.dot_dimension_numbers<[1], [0], [0], [1], [0, 0, 1, 1], [], []>} : vector<2x32xf32>, vector<32x128xf32>, vector<2x128xf32> -> vector<2x128xf32>
    %199 = arith.addf %152, %198 : vector<2x128xf32>
    %200 = vector.extract_strided_slice %199 {offsets = [0, 0], sizes = [2, 96], strides = [1, 1]} : vector<2x128xf32> to vector<2x96xf32>
    %cst_105 = arith.constant 0.000000e+00 : f32
    %201 = vector.broadcast %cst_105 : f32 to vector<2x96xf32>
    %202 = arith.subf %201, %200 : vector<2x96xf32>
    %203 = math.exp %202 : vector<2x96xf32>
    %cst_106 = arith.constant 1.000000e+00 : f32
    %204 = vector.broadcast %cst_106 : f32 to vector<2x96xf32>
    %205 = arith.addf %204, %203 : vector<2x96xf32>
    %206 = tpu.reciprocal %205 {approx = true} : vector<2x96xf32> -> vector<2x96xf32>
    %207 = vector.extract_strided_slice %206 {offsets = [0, 0], sizes = [2, 32], strides = [1, 1]} : vector<2x96xf32> to vector<2x32xf32>
    %208 = vector.extract_strided_slice %206 {offsets = [0, 32], sizes = [2, 32], strides = [1, 1]} : vector<2x96xf32> to vector<2x32xf32>
    %209 = vector.extract_strided_slice %206 {offsets = [0, 64], sizes = [2, 32], strides = [1, 1]} : vector<2x96xf32> to vector<2x32xf32>
    %210 = vector.extract_strided_slice %199 {offsets = [0, 96], sizes = [2, 32], strides = [1, 1]} : vector<2x128xf32> to vector<2x32xf32>
    %211 = math.tanh %210 : vector<2x32xf32>
    %212 = arith.mulf %208, %195 : vector<2x32xf32>
    %213 = arith.mulf %207, %211 : vector<2x32xf32>
    %214 = arith.addf %212, %213 : vector<2x32xf32>
    %215 = math.tanh %214 : vector<2x32xf32>
    %216 = arith.mulf %209, %215 : vector<2x32xf32>
    %cst_107 = arith.constant dense<0.000000e+00> : vector<2x128xf32>
    %217 = tpu.matmul %216, %145, %cst_107 {dimension_numbers = #tpu.dot_dimension_numbers<[1], [0], [0], [1], [0, 0, 1, 1], [], []>} : vector<2x32xf32>, vector<32x128xf32>, vector<2x128xf32> -> vector<2x128xf32>
    %218 = arith.addf %153, %217 : vector<2x128xf32>
    %219 = vector.extract_strided_slice %218 {offsets = [0, 0], sizes = [2, 96], strides = [1, 1]} : vector<2x128xf32> to vector<2x96xf32>
    %cst_108 = arith.constant 0.000000e+00 : f32
    %220 = vector.broadcast %cst_108 : f32 to vector<2x96xf32>
    %221 = arith.subf %220, %219 : vector<2x96xf32>
    %222 = math.exp %221 : vector<2x96xf32>
    %cst_109 = arith.constant 1.000000e+00 : f32
    %223 = vector.broadcast %cst_109 : f32 to vector<2x96xf32>
    %224 = arith.addf %223, %222 : vector<2x96xf32>
    %225 = tpu.reciprocal %224 {approx = true} : vector<2x96xf32> -> vector<2x96xf32>
    %226 = vector.extract_strided_slice %225 {offsets = [0, 0], sizes = [2, 32], strides = [1, 1]} : vector<2x96xf32> to vector<2x32xf32>
    %227 = vector.extract_strided_slice %225 {offsets = [0, 32], sizes = [2, 32], strides = [1, 1]} : vector<2x96xf32> to vector<2x32xf32>
    %228 = vector.extract_strided_slice %225 {offsets = [0, 64], sizes = [2, 32], strides = [1, 1]} : vector<2x96xf32> to vector<2x32xf32>
    %229 = vector.extract_strided_slice %218 {offsets = [0, 96], sizes = [2, 32], strides = [1, 1]} : vector<2x128xf32> to vector<2x32xf32>
    %230 = math.tanh %229 : vector<2x32xf32>
    %231 = arith.mulf %227, %214 : vector<2x32xf32>
    %232 = arith.mulf %226, %230 : vector<2x32xf32>
    %233 = arith.addf %231, %232 : vector<2x32xf32>
    %234 = math.tanh %233 : vector<2x32xf32>
    %235 = arith.mulf %228, %234 : vector<2x32xf32>
    %cst_110 = arith.constant dense<0.000000e+00> : vector<2x128xf32>
    %236 = tpu.matmul %235, %145, %cst_110 {dimension_numbers = #tpu.dot_dimension_numbers<[1], [0], [0], [1], [0, 0, 1, 1], [], []>} : vector<2x32xf32>, vector<32x128xf32>, vector<2x128xf32> -> vector<2x128xf32>
    %237 = arith.addf %154, %236 : vector<2x128xf32>
    %238 = vector.extract_strided_slice %237 {offsets = [0, 0], sizes = [2, 96], strides = [1, 1]} : vector<2x128xf32> to vector<2x96xf32>
    %cst_111 = arith.constant 0.000000e+00 : f32
    %239 = vector.broadcast %cst_111 : f32 to vector<2x96xf32>
    %240 = arith.subf %239, %238 : vector<2x96xf32>
    %241 = math.exp %240 : vector<2x96xf32>
    %cst_112 = arith.constant 1.000000e+00 : f32
    %242 = vector.broadcast %cst_112 : f32 to vector<2x96xf32>
    %243 = arith.addf %242, %241 : vector<2x96xf32>
    %244 = tpu.reciprocal %243 {approx = true} : vector<2x96xf32> -> vector<2x96xf32>
    %245 = vector.extract_strided_slice %244 {offsets = [0, 0], sizes = [2, 32], strides = [1, 1]} : vector<2x96xf32> to vector<2x32xf32>
    %246 = vector.extract_strided_slice %244 {offsets = [0, 32], sizes = [2, 32], strides = [1, 1]} : vector<2x96xf32> to vector<2x32xf32>
    %247 = vector.extract_strided_slice %244 {offsets = [0, 64], sizes = [2, 32], strides = [1, 1]} : vector<2x96xf32> to vector<2x32xf32>
    %248 = vector.extract_strided_slice %237 {offsets = [0, 96], sizes = [2, 32], strides = [1, 1]} : vector<2x128xf32> to vector<2x32xf32>
    %249 = math.tanh %248 : vector<2x32xf32>
    %250 = arith.mulf %246, %233 : vector<2x32xf32>
    %251 = arith.mulf %245, %249 : vector<2x32xf32>
    %252 = arith.addf %250, %251 : vector<2x32xf32>
    %253 = math.tanh %252 : vector<2x32xf32>
    %254 = arith.mulf %247, %253 : vector<2x32xf32>
    %cst_113 = arith.constant dense<0.000000e+00> : vector<2x128xf32>
    %255 = tpu.matmul %254, %145, %cst_113 {dimension_numbers = #tpu.dot_dimension_numbers<[1], [0], [0], [1], [0, 0, 1, 1], [], []>} : vector<2x32xf32>, vector<32x128xf32>, vector<2x128xf32> -> vector<2x128xf32>
    %256 = arith.addf %155, %255 : vector<2x128xf32>
    %257 = vector.extract_strided_slice %256 {offsets = [0, 0], sizes = [2, 96], strides = [1, 1]} : vector<2x128xf32> to vector<2x96xf32>
    %cst_114 = arith.constant 0.000000e+00 : f32
    %258 = vector.broadcast %cst_114 : f32 to vector<2x96xf32>
    %259 = arith.subf %258, %257 : vector<2x96xf32>
    %260 = math.exp %259 : vector<2x96xf32>
    %cst_115 = arith.constant 1.000000e+00 : f32
    %261 = vector.broadcast %cst_115 : f32 to vector<2x96xf32>
    %262 = arith.addf %261, %260 : vector<2x96xf32>
    %263 = tpu.reciprocal %262 {approx = true} : vector<2x96xf32> -> vector<2x96xf32>
    %264 = vector.extract_strided_slice %263 {offsets = [0, 0], sizes = [2, 32], strides = [1, 1]} : vector<2x96xf32> to vector<2x32xf32>
    %265 = vector.extract_strided_slice %263 {offsets = [0, 32], sizes = [2, 32], strides = [1, 1]} : vector<2x96xf32> to vector<2x32xf32>
    %266 = vector.extract_strided_slice %263 {offsets = [0, 64], sizes = [2, 32], strides = [1, 1]} : vector<2x96xf32> to vector<2x32xf32>
    %267 = vector.extract_strided_slice %256 {offsets = [0, 96], sizes = [2, 32], strides = [1, 1]} : vector<2x128xf32> to vector<2x32xf32>
    %268 = math.tanh %267 : vector<2x32xf32>
    %269 = arith.mulf %265, %252 : vector<2x32xf32>
    %270 = arith.mulf %264, %268 : vector<2x32xf32>
    %271 = arith.addf %269, %270 : vector<2x32xf32>
    %272 = math.tanh %271 : vector<2x32xf32>
    %273 = arith.mulf %266, %272 : vector<2x32xf32>
    %cst_116 = arith.constant dense<0.000000e+00> : vector<2x128xf32>
    %274 = tpu.matmul %273, %145, %cst_116 {dimension_numbers = #tpu.dot_dimension_numbers<[1], [0], [0], [1], [0, 0, 1, 1], [], []>} : vector<2x32xf32>, vector<32x128xf32>, vector<2x128xf32> -> vector<2x128xf32>
    %275 = arith.addf %156, %274 : vector<2x128xf32>
    %276 = vector.extract_strided_slice %275 {offsets = [0, 0], sizes = [2, 96], strides = [1, 1]} : vector<2x128xf32> to vector<2x96xf32>
    %cst_117 = arith.constant 0.000000e+00 : f32
    %277 = vector.broadcast %cst_117 : f32 to vector<2x96xf32>
    %278 = arith.subf %277, %276 : vector<2x96xf32>
    %279 = math.exp %278 : vector<2x96xf32>
    %cst_118 = arith.constant 1.000000e+00 : f32
    %280 = vector.broadcast %cst_118 : f32 to vector<2x96xf32>
    %281 = arith.addf %280, %279 : vector<2x96xf32>
    %282 = tpu.reciprocal %281 {approx = true} : vector<2x96xf32> -> vector<2x96xf32>
    %283 = vector.extract_strided_slice %282 {offsets = [0, 0], sizes = [2, 32], strides = [1, 1]} : vector<2x96xf32> to vector<2x32xf32>
    %284 = vector.extract_strided_slice %282 {offsets = [0, 32], sizes = [2, 32], strides = [1, 1]} : vector<2x96xf32> to vector<2x32xf32>
    %285 = vector.extract_strided_slice %282 {offsets = [0, 64], sizes = [2, 32], strides = [1, 1]} : vector<2x96xf32> to vector<2x32xf32>
    %286 = vector.extract_strided_slice %275 {offsets = [0, 96], sizes = [2, 32], strides = [1, 1]} : vector<2x128xf32> to vector<2x32xf32>
    %287 = math.tanh %286 : vector<2x32xf32>
    %288 = arith.mulf %284, %271 : vector<2x32xf32>
    %289 = arith.mulf %283, %287 : vector<2x32xf32>
    %290 = arith.addf %288, %289 : vector<2x32xf32>
    %291 = math.tanh %290 : vector<2x32xf32>
    %292 = arith.mulf %285, %291 : vector<2x32xf32>
    %cst_119 = arith.constant dense<0.000000e+00> : vector<2x128xf32>
    %293 = tpu.matmul %292, %145, %cst_119 {dimension_numbers = #tpu.dot_dimension_numbers<[1], [0], [0], [1], [0, 0, 1, 1], [], []>} : vector<2x32xf32>, vector<32x128xf32>, vector<2x128xf32> -> vector<2x128xf32>
    %294 = arith.addf %157, %293 : vector<2x128xf32>
    %295 = vector.extract_strided_slice %294 {offsets = [0, 0], sizes = [2, 96], strides = [1, 1]} : vector<2x128xf32> to vector<2x96xf32>
    %cst_120 = arith.constant 0.000000e+00 : f32
    %296 = vector.broadcast %cst_120 : f32 to vector<2x96xf32>
    %297 = arith.subf %296, %295 : vector<2x96xf32>
    %298 = math.exp %297 : vector<2x96xf32>
    %cst_121 = arith.constant 1.000000e+00 : f32
    %299 = vector.broadcast %cst_121 : f32 to vector<2x96xf32>
    %300 = arith.addf %299, %298 : vector<2x96xf32>
    %301 = tpu.reciprocal %300 {approx = true} : vector<2x96xf32> -> vector<2x96xf32>
    %302 = vector.extract_strided_slice %301 {offsets = [0, 0], sizes = [2, 32], strides = [1, 1]} : vector<2x96xf32> to vector<2x32xf32>
    %303 = vector.extract_strided_slice %301 {offsets = [0, 32], sizes = [2, 32], strides = [1, 1]} : vector<2x96xf32> to vector<2x32xf32>
    %304 = vector.extract_strided_slice %301 {offsets = [0, 64], sizes = [2, 32], strides = [1, 1]} : vector<2x96xf32> to vector<2x32xf32>
    %305 = vector.extract_strided_slice %294 {offsets = [0, 96], sizes = [2, 32], strides = [1, 1]} : vector<2x128xf32> to vector<2x32xf32>
    %306 = math.tanh %305 : vector<2x32xf32>
    %307 = arith.mulf %303, %290 : vector<2x32xf32>
    %308 = arith.mulf %302, %306 : vector<2x32xf32>
    %309 = arith.addf %307, %308 : vector<2x32xf32>
    %310 = math.tanh %309 : vector<2x32xf32>
    %311 = arith.mulf %304, %310 : vector<2x32xf32>
    %312 = tpu.concatenate %178, %197, %216, %235, %254, %273, %292, %311 in 0 : vector<2x32xf32>, vector<2x32xf32>, vector<2x32xf32>, vector<2x32xf32>, vector<2x32xf32>, vector<2x32xf32>, vector<2x32xf32>, vector<2x32xf32> -> vector<16x32xf32>
    %c0_122 = arith.constant 0 : index
    %c0_123 = arith.constant 0 : index
    %313 = vector.load %arg12[%c0_122, %c0_123] : memref<32x128xf32, #tpu.memory_space<vmem>>, vector<32x128xf32>
    %c0_124 = arith.constant 0 : index
    %c0_125 = arith.constant 0 : index
    %314 = vector.load %arg13[%c0_124, %c0_125] : memref<32x128xf32, #tpu.memory_space<vmem>>, vector<32x128xf32>
    %cst_126 = arith.constant dense<0.000000e+00> : vector<16x128xf32>
    %315 = tpu.matmul %312, %313, %cst_126 {dimension_numbers = #tpu.dot_dimension_numbers<[1], [0], [0], [1], [0, 0, 1, 1], [], []>} : vector<16x32xf32>, vector<32x128xf32>, vector<16x128xf32> -> vector<16x128xf32>
    %c0_127 = arith.constant 0 : index
    %c0_128 = arith.constant 0 : index
    %316 = vector.load %arg14[%c0_127, %c0_128] : memref<1x128xf32, #tpu.memory_space<vmem>>, vector<1x128xf32>
    %317 = vector.broadcast %316 : vector<1x128xf32> to vector<16x128xf32>
    %318 = arith.addf %315, %317 : vector<16x128xf32>
    %319 = vector.extract_strided_slice %318 {offsets = [0, 0], sizes = [2, 128], strides = [1, 1]} : vector<16x128xf32> to vector<2x128xf32>
    %320 = vector.extract_strided_slice %318 {offsets = [2, 0], sizes = [2, 128], strides = [1, 1]} : vector<16x128xf32> to vector<2x128xf32>
    %321 = vector.extract_strided_slice %318 {offsets = [4, 0], sizes = [2, 128], strides = [1, 1]} : vector<16x128xf32> to vector<2x128xf32>
    %322 = vector.extract_strided_slice %318 {offsets = [6, 0], sizes = [2, 128], strides = [1, 1]} : vector<16x128xf32> to vector<2x128xf32>
    %323 = vector.extract_strided_slice %318 {offsets = [8, 0], sizes = [2, 128], strides = [1, 1]} : vector<16x128xf32> to vector<2x128xf32>
    %324 = vector.extract_strided_slice %318 {offsets = [10, 0], sizes = [2, 128], strides = [1, 1]} : vector<16x128xf32> to vector<2x128xf32>
    %325 = vector.extract_strided_slice %318 {offsets = [12, 0], sizes = [2, 128], strides = [1, 1]} : vector<16x128xf32> to vector<2x128xf32>
    %326 = vector.extract_strided_slice %318 {offsets = [14, 0], sizes = [2, 128], strides = [1, 1]} : vector<16x128xf32> to vector<2x128xf32>
    %cst_129 = arith.constant 0.000000e+00 : f32
    %327 = vector.broadcast %cst_129 : f32 to vector<2x32xf32>
    %cst_130 = arith.constant 0.000000e+00 : f32
    %328 = vector.broadcast %cst_130 : f32 to vector<2x32xf32>
    %cst_131 = arith.constant dense<0.000000e+00> : vector<2x128xf32>
    %329 = tpu.matmul %327, %314, %cst_131 {dimension_numbers = #tpu.dot_dimension_numbers<[1], [0], [0], [1], [0, 0, 1, 1], [], []>} : vector<2x32xf32>, vector<32x128xf32>, vector<2x128xf32> -> vector<2x128xf32>
    %330 = arith.addf %319, %329 : vector<2x128xf32>
    %331 = vector.extract_strided_slice %330 {offsets = [0, 0], sizes = [2, 96], strides = [1, 1]} : vector<2x128xf32> to vector<2x96xf32>
    %cst_132 = arith.constant 0.000000e+00 : f32
    %332 = vector.broadcast %cst_132 : f32 to vector<2x96xf32>
    %333 = arith.subf %332, %331 : vector<2x96xf32>
    %334 = math.exp %333 : vector<2x96xf32>
    %cst_133 = arith.constant 1.000000e+00 : f32
    %335 = vector.broadcast %cst_133 : f32 to vector<2x96xf32>
    %336 = arith.addf %335, %334 : vector<2x96xf32>
    %337 = tpu.reciprocal %336 {approx = true} : vector<2x96xf32> -> vector<2x96xf32>
    %338 = vector.extract_strided_slice %337 {offsets = [0, 0], sizes = [2, 32], strides = [1, 1]} : vector<2x96xf32> to vector<2x32xf32>
    %339 = vector.extract_strided_slice %337 {offsets = [0, 32], sizes = [2, 32], strides = [1, 1]} : vector<2x96xf32> to vector<2x32xf32>
    %340 = vector.extract_strided_slice %337 {offsets = [0, 64], sizes = [2, 32], strides = [1, 1]} : vector<2x96xf32> to vector<2x32xf32>
    %341 = vector.extract_strided_slice %330 {offsets = [0, 96], sizes = [2, 32], strides = [1, 1]} : vector<2x128xf32> to vector<2x32xf32>
    %342 = math.tanh %341 : vector<2x32xf32>
    %343 = arith.mulf %339, %328 : vector<2x32xf32>
    %344 = arith.mulf %338, %342 : vector<2x32xf32>
    %345 = arith.addf %343, %344 : vector<2x32xf32>
    %346 = math.tanh %345 : vector<2x32xf32>
    %347 = arith.mulf %340, %346 : vector<2x32xf32>
    %cst_134 = arith.constant dense<0.000000e+00> : vector<2x128xf32>
    %348 = tpu.matmul %347, %314, %cst_134 {dimension_numbers = #tpu.dot_dimension_numbers<[1], [0], [0], [1], [0, 0, 1, 1], [], []>} : vector<2x32xf32>, vector<32x128xf32>, vector<2x128xf32> -> vector<2x128xf32>
    %349 = arith.addf %320, %348 : vector<2x128xf32>
    %350 = vector.extract_strided_slice %349 {offsets = [0, 0], sizes = [2, 96], strides = [1, 1]} : vector<2x128xf32> to vector<2x96xf32>
    %cst_135 = arith.constant 0.000000e+00 : f32
    %351 = vector.broadcast %cst_135 : f32 to vector<2x96xf32>
    %352 = arith.subf %351, %350 : vector<2x96xf32>
    %353 = math.exp %352 : vector<2x96xf32>
    %cst_136 = arith.constant 1.000000e+00 : f32
    %354 = vector.broadcast %cst_136 : f32 to vector<2x96xf32>
    %355 = arith.addf %354, %353 : vector<2x96xf32>
    %356 = tpu.reciprocal %355 {approx = true} : vector<2x96xf32> -> vector<2x96xf32>
    %357 = vector.extract_strided_slice %356 {offsets = [0, 0], sizes = [2, 32], strides = [1, 1]} : vector<2x96xf32> to vector<2x32xf32>
    %358 = vector.extract_strided_slice %356 {offsets = [0, 32], sizes = [2, 32], strides = [1, 1]} : vector<2x96xf32> to vector<2x32xf32>
    %359 = vector.extract_strided_slice %356 {offsets = [0, 64], sizes = [2, 32], strides = [1, 1]} : vector<2x96xf32> to vector<2x32xf32>
    %360 = vector.extract_strided_slice %349 {offsets = [0, 96], sizes = [2, 32], strides = [1, 1]} : vector<2x128xf32> to vector<2x32xf32>
    %361 = math.tanh %360 : vector<2x32xf32>
    %362 = arith.mulf %358, %345 : vector<2x32xf32>
    %363 = arith.mulf %357, %361 : vector<2x32xf32>
    %364 = arith.addf %362, %363 : vector<2x32xf32>
    %365 = math.tanh %364 : vector<2x32xf32>
    %366 = arith.mulf %359, %365 : vector<2x32xf32>
    %cst_137 = arith.constant dense<0.000000e+00> : vector<2x128xf32>
    %367 = tpu.matmul %366, %314, %cst_137 {dimension_numbers = #tpu.dot_dimension_numbers<[1], [0], [0], [1], [0, 0, 1, 1], [], []>} : vector<2x32xf32>, vector<32x128xf32>, vector<2x128xf32> -> vector<2x128xf32>
    %368 = arith.addf %321, %367 : vector<2x128xf32>
    %369 = vector.extract_strided_slice %368 {offsets = [0, 0], sizes = [2, 96], strides = [1, 1]} : vector<2x128xf32> to vector<2x96xf32>
    %cst_138 = arith.constant 0.000000e+00 : f32
    %370 = vector.broadcast %cst_138 : f32 to vector<2x96xf32>
    %371 = arith.subf %370, %369 : vector<2x96xf32>
    %372 = math.exp %371 : vector<2x96xf32>
    %cst_139 = arith.constant 1.000000e+00 : f32
    %373 = vector.broadcast %cst_139 : f32 to vector<2x96xf32>
    %374 = arith.addf %373, %372 : vector<2x96xf32>
    %375 = tpu.reciprocal %374 {approx = true} : vector<2x96xf32> -> vector<2x96xf32>
    %376 = vector.extract_strided_slice %375 {offsets = [0, 0], sizes = [2, 32], strides = [1, 1]} : vector<2x96xf32> to vector<2x32xf32>
    %377 = vector.extract_strided_slice %375 {offsets = [0, 32], sizes = [2, 32], strides = [1, 1]} : vector<2x96xf32> to vector<2x32xf32>
    %378 = vector.extract_strided_slice %375 {offsets = [0, 64], sizes = [2, 32], strides = [1, 1]} : vector<2x96xf32> to vector<2x32xf32>
    %379 = vector.extract_strided_slice %368 {offsets = [0, 96], sizes = [2, 32], strides = [1, 1]} : vector<2x128xf32> to vector<2x32xf32>
    %380 = math.tanh %379 : vector<2x32xf32>
    %381 = arith.mulf %377, %364 : vector<2x32xf32>
    %382 = arith.mulf %376, %380 : vector<2x32xf32>
    %383 = arith.addf %381, %382 : vector<2x32xf32>
    %384 = math.tanh %383 : vector<2x32xf32>
    %385 = arith.mulf %378, %384 : vector<2x32xf32>
    %cst_140 = arith.constant dense<0.000000e+00> : vector<2x128xf32>
    %386 = tpu.matmul %385, %314, %cst_140 {dimension_numbers = #tpu.dot_dimension_numbers<[1], [0], [0], [1], [0, 0, 1, 1], [], []>} : vector<2x32xf32>, vector<32x128xf32>, vector<2x128xf32> -> vector<2x128xf32>
    %387 = arith.addf %322, %386 : vector<2x128xf32>
    %388 = vector.extract_strided_slice %387 {offsets = [0, 0], sizes = [2, 96], strides = [1, 1]} : vector<2x128xf32> to vector<2x96xf32>
    %cst_141 = arith.constant 0.000000e+00 : f32
    %389 = vector.broadcast %cst_141 : f32 to vector<2x96xf32>
    %390 = arith.subf %389, %388 : vector<2x96xf32>
    %391 = math.exp %390 : vector<2x96xf32>
    %cst_142 = arith.constant 1.000000e+00 : f32
    %392 = vector.broadcast %cst_142 : f32 to vector<2x96xf32>
    %393 = arith.addf %392, %391 : vector<2x96xf32>
    %394 = tpu.reciprocal %393 {approx = true} : vector<2x96xf32> -> vector<2x96xf32>
    %395 = vector.extract_strided_slice %394 {offsets = [0, 0], sizes = [2, 32], strides = [1, 1]} : vector<2x96xf32> to vector<2x32xf32>
    %396 = vector.extract_strided_slice %394 {offsets = [0, 32], sizes = [2, 32], strides = [1, 1]} : vector<2x96xf32> to vector<2x32xf32>
    %397 = vector.extract_strided_slice %394 {offsets = [0, 64], sizes = [2, 32], strides = [1, 1]} : vector<2x96xf32> to vector<2x32xf32>
    %398 = vector.extract_strided_slice %387 {offsets = [0, 96], sizes = [2, 32], strides = [1, 1]} : vector<2x128xf32> to vector<2x32xf32>
    %399 = math.tanh %398 : vector<2x32xf32>
    %400 = arith.mulf %396, %383 : vector<2x32xf32>
    %401 = arith.mulf %395, %399 : vector<2x32xf32>
    %402 = arith.addf %400, %401 : vector<2x32xf32>
    %403 = math.tanh %402 : vector<2x32xf32>
    %404 = arith.mulf %397, %403 : vector<2x32xf32>
    %405 = vector.extract_strided_slice %404 {offsets = [1, 0], sizes = [1, 32], strides = [1, 1]} : vector<2x32xf32> to vector<1x32xf32>
    %cst_143 = arith.constant dense<0.000000e+00> : vector<2x128xf32>
    %406 = tpu.matmul %404, %314, %cst_143 {dimension_numbers = #tpu.dot_dimension_numbers<[1], [0], [0], [1], [0, 0, 1, 1], [], []>} : vector<2x32xf32>, vector<32x128xf32>, vector<2x128xf32> -> vector<2x128xf32>
    %407 = arith.addf %323, %406 : vector<2x128xf32>
    %408 = vector.extract_strided_slice %407 {offsets = [0, 0], sizes = [2, 96], strides = [1, 1]} : vector<2x128xf32> to vector<2x96xf32>
    %cst_144 = arith.constant 0.000000e+00 : f32
    %409 = vector.broadcast %cst_144 : f32 to vector<2x96xf32>
    %410 = arith.subf %409, %408 : vector<2x96xf32>
    %411 = math.exp %410 : vector<2x96xf32>
    %cst_145 = arith.constant 1.000000e+00 : f32
    %412 = vector.broadcast %cst_145 : f32 to vector<2x96xf32>
    %413 = arith.addf %412, %411 : vector<2x96xf32>
    %414 = tpu.reciprocal %413 {approx = true} : vector<2x96xf32> -> vector<2x96xf32>
    %415 = vector.extract_strided_slice %414 {offsets = [0, 0], sizes = [2, 32], strides = [1, 1]} : vector<2x96xf32> to vector<2x32xf32>
    %416 = vector.extract_strided_slice %414 {offsets = [0, 32], sizes = [2, 32], strides = [1, 1]} : vector<2x96xf32> to vector<2x32xf32>
    %417 = vector.extract_strided_slice %414 {offsets = [0, 64], sizes = [2, 32], strides = [1, 1]} : vector<2x96xf32> to vector<2x32xf32>
    %418 = vector.extract_strided_slice %407 {offsets = [0, 96], sizes = [2, 32], strides = [1, 1]} : vector<2x128xf32> to vector<2x32xf32>
    %419 = math.tanh %418 : vector<2x32xf32>
    %420 = arith.mulf %416, %402 : vector<2x32xf32>
    %421 = arith.mulf %415, %419 : vector<2x32xf32>
    %422 = arith.addf %420, %421 : vector<2x32xf32>
    %423 = math.tanh %422 : vector<2x32xf32>
    %424 = arith.mulf %417, %423 : vector<2x32xf32>
    %cst_146 = arith.constant dense<0.000000e+00> : vector<2x128xf32>
    %425 = tpu.matmul %424, %314, %cst_146 {dimension_numbers = #tpu.dot_dimension_numbers<[1], [0], [0], [1], [0, 0, 1, 1], [], []>} : vector<2x32xf32>, vector<32x128xf32>, vector<2x128xf32> -> vector<2x128xf32>
    %426 = arith.addf %324, %425 : vector<2x128xf32>
    %427 = vector.extract_strided_slice %426 {offsets = [0, 0], sizes = [2, 96], strides = [1, 1]} : vector<2x128xf32> to vector<2x96xf32>
    %cst_147 = arith.constant 0.000000e+00 : f32
    %428 = vector.broadcast %cst_147 : f32 to vector<2x96xf32>
    %429 = arith.subf %428, %427 : vector<2x96xf32>
    %430 = math.exp %429 : vector<2x96xf32>
    %cst_148 = arith.constant 1.000000e+00 : f32
    %431 = vector.broadcast %cst_148 : f32 to vector<2x96xf32>
    %432 = arith.addf %431, %430 : vector<2x96xf32>
    %433 = tpu.reciprocal %432 {approx = true} : vector<2x96xf32> -> vector<2x96xf32>
    %434 = vector.extract_strided_slice %433 {offsets = [0, 0], sizes = [2, 32], strides = [1, 1]} : vector<2x96xf32> to vector<2x32xf32>
    %435 = vector.extract_strided_slice %433 {offsets = [0, 32], sizes = [2, 32], strides = [1, 1]} : vector<2x96xf32> to vector<2x32xf32>
    %436 = vector.extract_strided_slice %433 {offsets = [0, 64], sizes = [2, 32], strides = [1, 1]} : vector<2x96xf32> to vector<2x32xf32>
    %437 = vector.extract_strided_slice %426 {offsets = [0, 96], sizes = [2, 32], strides = [1, 1]} : vector<2x128xf32> to vector<2x32xf32>
    %438 = math.tanh %437 : vector<2x32xf32>
    %439 = arith.mulf %435, %422 : vector<2x32xf32>
    %440 = arith.mulf %434, %438 : vector<2x32xf32>
    %441 = arith.addf %439, %440 : vector<2x32xf32>
    %442 = math.tanh %441 : vector<2x32xf32>
    %443 = arith.mulf %436, %442 : vector<2x32xf32>
    %cst_149 = arith.constant dense<0.000000e+00> : vector<2x128xf32>
    %444 = tpu.matmul %443, %314, %cst_149 {dimension_numbers = #tpu.dot_dimension_numbers<[1], [0], [0], [1], [0, 0, 1, 1], [], []>} : vector<2x32xf32>, vector<32x128xf32>, vector<2x128xf32> -> vector<2x128xf32>
    %445 = arith.addf %325, %444 : vector<2x128xf32>
    %446 = vector.extract_strided_slice %445 {offsets = [0, 0], sizes = [2, 96], strides = [1, 1]} : vector<2x128xf32> to vector<2x96xf32>
    %cst_150 = arith.constant 0.000000e+00 : f32
    %447 = vector.broadcast %cst_150 : f32 to vector<2x96xf32>
    %448 = arith.subf %447, %446 : vector<2x96xf32>
    %449 = math.exp %448 : vector<2x96xf32>
    %cst_151 = arith.constant 1.000000e+00 : f32
    %450 = vector.broadcast %cst_151 : f32 to vector<2x96xf32>
    %451 = arith.addf %450, %449 : vector<2x96xf32>
    %452 = tpu.reciprocal %451 {approx = true} : vector<2x96xf32> -> vector<2x96xf32>
    %453 = vector.extract_strided_slice %452 {offsets = [0, 0], sizes = [2, 32], strides = [1, 1]} : vector<2x96xf32> to vector<2x32xf32>
    %454 = vector.extract_strided_slice %452 {offsets = [0, 32], sizes = [2, 32], strides = [1, 1]} : vector<2x96xf32> to vector<2x32xf32>
    %455 = vector.extract_strided_slice %452 {offsets = [0, 64], sizes = [2, 32], strides = [1, 1]} : vector<2x96xf32> to vector<2x32xf32>
    %456 = vector.extract_strided_slice %445 {offsets = [0, 96], sizes = [2, 32], strides = [1, 1]} : vector<2x128xf32> to vector<2x32xf32>
    %457 = math.tanh %456 : vector<2x32xf32>
    %458 = arith.mulf %454, %441 : vector<2x32xf32>
    %459 = arith.mulf %453, %457 : vector<2x32xf32>
    %460 = arith.addf %458, %459 : vector<2x32xf32>
    %461 = math.tanh %460 : vector<2x32xf32>
    %462 = arith.mulf %455, %461 : vector<2x32xf32>
    %cst_152 = arith.constant dense<0.000000e+00> : vector<2x128xf32>
    %463 = tpu.matmul %462, %314, %cst_152 {dimension_numbers = #tpu.dot_dimension_numbers<[1], [0], [0], [1], [0, 0, 1, 1], [], []>} : vector<2x32xf32>, vector<32x128xf32>, vector<2x128xf32> -> vector<2x128xf32>
    %464 = arith.addf %326, %463 : vector<2x128xf32>
    %465 = vector.extract_strided_slice %464 {offsets = [0, 0], sizes = [2, 96], strides = [1, 1]} : vector<2x128xf32> to vector<2x96xf32>
    %cst_153 = arith.constant 0.000000e+00 : f32
    %466 = vector.broadcast %cst_153 : f32 to vector<2x96xf32>
    %467 = arith.subf %466, %465 : vector<2x96xf32>
    %468 = math.exp %467 : vector<2x96xf32>
    %cst_154 = arith.constant 1.000000e+00 : f32
    %469 = vector.broadcast %cst_154 : f32 to vector<2x96xf32>
    %470 = arith.addf %469, %468 : vector<2x96xf32>
    %471 = tpu.reciprocal %470 {approx = true} : vector<2x96xf32> -> vector<2x96xf32>
    %472 = vector.extract_strided_slice %471 {offsets = [0, 0], sizes = [2, 32], strides = [1, 1]} : vector<2x96xf32> to vector<2x32xf32>
    %473 = vector.extract_strided_slice %471 {offsets = [0, 32], sizes = [2, 32], strides = [1, 1]} : vector<2x96xf32> to vector<2x32xf32>
    %474 = vector.extract_strided_slice %471 {offsets = [0, 64], sizes = [2, 32], strides = [1, 1]} : vector<2x96xf32> to vector<2x32xf32>
    %475 = vector.extract_strided_slice %464 {offsets = [0, 96], sizes = [2, 32], strides = [1, 1]} : vector<2x128xf32> to vector<2x32xf32>
    %476 = math.tanh %475 : vector<2x32xf32>
    %477 = arith.mulf %473, %460 : vector<2x32xf32>
    %478 = arith.mulf %472, %476 : vector<2x32xf32>
    %479 = arith.addf %477, %478 : vector<2x32xf32>
    %480 = math.tanh %479 : vector<2x32xf32>
    %481 = arith.mulf %474, %480 : vector<2x32xf32>
    %482 = vector.extract_strided_slice %481 {offsets = [1, 0], sizes = [1, 32], strides = [1, 1]} : vector<2x32xf32> to vector<1x32xf32>
    %483 = tpu.concatenate %405, %482 in 0 : vector<1x32xf32>, vector<1x32xf32> -> vector<2x32xf32>
    %c0_155 = arith.constant 0 : index
    %c0_156 = arith.constant 0 : index
    %484 = vector.load %arg15[%c0_155, %c0_156] : memref<32x6xf32, #tpu.memory_space<vmem>>, vector<32x6xf32>
    %cst_157 = arith.constant dense<0.000000e+00> : vector<2x6xf32>
    %485 = tpu.matmul %483, %484, %cst_157 {dimension_numbers = #tpu.dot_dimension_numbers<[1], [0], [0], [1], [0, 0, 1, 1], [], []>} : vector<2x32xf32>, vector<32x6xf32>, vector<2x6xf32> -> vector<2x6xf32>
    %c0_158 = arith.constant 0 : index
    %c0_159 = arith.constant 0 : index
    %486 = vector.load %arg16[%c0_158, %c0_159] : memref<1x6xf32, #tpu.memory_space<vmem>>, vector<1x6xf32>
    %487 = vector.broadcast %486 : vector<1x6xf32> to vector<2x6xf32>
    %488 = arith.addf %485, %487 : vector<2x6xf32>
    %c0_160 = arith.constant 0 : index
    %c0_161 = arith.constant 0 : index
    %489 = vector.load %arg17[%c0_160, %c0_161] : memref<2x6xf32, #tpu.memory_space<vmem>>, vector<2x6xf32>
    tpu.vector_store %arg17[%c0_160, %c0_161], %488 {strides = array<i32>} : memref<2x6xf32, #tpu.memory_space<vmem>>, vector<2x6xf32>,
    return
  }
}

module attributes {stable_mosaic.version = 11 : i64} {
  func.func @kernel(%arg0: memref<2x24x8xf32, #tpu.memory_space<vmem>>, %arg1: memref<5x8x64xf32, #tpu.memory_space<vmem>>, %arg2: memref<1x64xf32, #tpu.memory_space<vmem>>, %arg3: memref<5x64x64xf32, #tpu.memory_space<vmem>>, %arg4: memref<1x64xf32, #tpu.memory_space<vmem>>, %arg5: memref<5x64x64xf32, #tpu.memory_space<vmem>>, %arg6: memref<1x64xf32, #tpu.memory_space<vmem>>, %arg7: memref<5x64x64xf32, #tpu.memory_space<vmem>>, %arg8: memref<1x64xf32, #tpu.memory_space<vmem>>, %arg9: memref<64x128xf32, #tpu.memory_space<vmem>>, %arg10: memref<32x128xf32, #tpu.memory_space<vmem>>, %arg11: memref<1x128xf32, #tpu.memory_space<vmem>>, %arg12: memref<32x128xf32, #tpu.memory_space<vmem>>, %arg13: memref<32x128xf32, #tpu.memory_space<vmem>>, %arg14: memref<1x128xf32, #tpu.memory_space<vmem>>, %arg15: memref<32x6xf32, #tpu.memory_space<vmem>>, %arg16: memref<1x6xf32, #tpu.memory_space<vmem>>, %arg17: memref<2x6xf32, #tpu.memory_space<vmem>>, %arg18: memref<128x8xf32, #tpu.memory_space<vmem>>) attributes {dimension_semantics = [], scalar_prefetch = 0 : i64, scratch_operands = 1 : i64, tpu.core_type = #tpu.core_type<tc>} {
    %c0 = arith.constant 0 : index
    %c0_0 = arith.constant 0 : index
    %c0_1 = arith.constant 0 : index
    %0 = vector.load %arg0[%c0, %c0_0, %c0_1] : memref<2x24x8xf32, #tpu.memory_space<vmem>>, vector<2x24x8xf32>
    %1 = vector.extract_strided_slice %0 {offsets = [0, 0, 0], sizes = [2, 20, 8], strides = [1, 1, 1]} : vector<2x24x8xf32> to vector<2x20x8xf32>
    %2 = vector.shape_cast %1 : vector<2x20x8xf32> to vector<40x8xf32>
    %c0_2 = arith.constant 0 : index
    %c0_3 = arith.constant 0 : index
    %c0_4 = arith.constant 0 : index
    %3 = vector.load %arg1[%c0_2, %c0_3, %c0_4] : memref<5x8x64xf32, #tpu.memory_space<vmem>>, vector<1x8x64xf32>
    %4 = vector.shape_cast %3 : vector<1x8x64xf32> to vector<8x64xf32>
    %cst = arith.constant dense<0.000000e+00> : vector<40x64xf32>
    %5 = tpu.matmul %2, %4, %cst {dimension_numbers = #tpu.dot_dimension_numbers<[1], [0], [0], [1], [0, 0, 1, 1], [], []>} : vector<40x8xf32>, vector<8x64xf32>, vector<40x64xf32> -> vector<40x64xf32>
    %6 = vector.extract_strided_slice %0 {offsets = [0, 1, 0], sizes = [2, 20, 8], strides = [1, 1, 1]} : vector<2x24x8xf32> to vector<2x20x8xf32>
    %7 = vector.shape_cast %6 : vector<2x20x8xf32> to vector<40x8xf32>
    %c1 = arith.constant 1 : index
    %c0_5 = arith.constant 0 : index
    %c0_6 = arith.constant 0 : index
    %8 = vector.load %arg1[%c1, %c0_5, %c0_6] : memref<5x8x64xf32, #tpu.memory_space<vmem>>, vector<1x8x64xf32>
    %9 = vector.shape_cast %8 : vector<1x8x64xf32> to vector<8x64xf32>
    %cst_7 = arith.constant dense<0.000000e+00> : vector<40x64xf32>
    %10 = tpu.matmul %7, %9, %cst_7 {dimension_numbers = #tpu.dot_dimension_numbers<[1], [0], [0], [1], [0, 0, 1, 1], [], []>} : vector<40x8xf32>, vector<8x64xf32>, vector<40x64xf32> -> vector<40x64xf32>
    %11 = arith.addf %5, %10 : vector<40x64xf32>
    %12 = vector.extract_strided_slice %0 {offsets = [0, 2, 0], sizes = [2, 20, 8], strides = [1, 1, 1]} : vector<2x24x8xf32> to vector<2x20x8xf32>
    %13 = vector.shape_cast %12 : vector<2x20x8xf32> to vector<40x8xf32>
    %c2 = arith.constant 2 : index
    %c0_8 = arith.constant 0 : index
    %c0_9 = arith.constant 0 : index
    %14 = vector.load %arg1[%c2, %c0_8, %c0_9] : memref<5x8x64xf32, #tpu.memory_space<vmem>>, vector<1x8x64xf32>
    %15 = vector.shape_cast %14 : vector<1x8x64xf32> to vector<8x64xf32>
    %cst_10 = arith.constant dense<0.000000e+00> : vector<40x64xf32>
    %16 = tpu.matmul %13, %15, %cst_10 {dimension_numbers = #tpu.dot_dimension_numbers<[1], [0], [0], [1], [0, 0, 1, 1], [], []>} : vector<40x8xf32>, vector<8x64xf32>, vector<40x64xf32> -> vector<40x64xf32>
    %17 = arith.addf %11, %16 : vector<40x64xf32>
    %18 = vector.extract_strided_slice %0 {offsets = [0, 3, 0], sizes = [2, 20, 8], strides = [1, 1, 1]} : vector<2x24x8xf32> to vector<2x20x8xf32>
    %19 = vector.shape_cast %18 : vector<2x20x8xf32> to vector<40x8xf32>
    %c3 = arith.constant 3 : index
    %c0_11 = arith.constant 0 : index
    %c0_12 = arith.constant 0 : index
    %20 = vector.load %arg1[%c3, %c0_11, %c0_12] : memref<5x8x64xf32, #tpu.memory_space<vmem>>, vector<1x8x64xf32>
    %21 = vector.shape_cast %20 : vector<1x8x64xf32> to vector<8x64xf32>
    %cst_13 = arith.constant dense<0.000000e+00> : vector<40x64xf32>
    %22 = tpu.matmul %19, %21, %cst_13 {dimension_numbers = #tpu.dot_dimension_numbers<[1], [0], [0], [1], [0, 0, 1, 1], [], []>} : vector<40x8xf32>, vector<8x64xf32>, vector<40x64xf32> -> vector<40x64xf32>
    %23 = arith.addf %17, %22 : vector<40x64xf32>
    %24 = vector.extract_strided_slice %0 {offsets = [0, 4, 0], sizes = [2, 20, 8], strides = [1, 1, 1]} : vector<2x24x8xf32> to vector<2x20x8xf32>
    %25 = vector.shape_cast %24 : vector<2x20x8xf32> to vector<40x8xf32>
    %c4 = arith.constant 4 : index
    %c0_14 = arith.constant 0 : index
    %c0_15 = arith.constant 0 : index
    %26 = vector.load %arg1[%c4, %c0_14, %c0_15] : memref<5x8x64xf32, #tpu.memory_space<vmem>>, vector<1x8x64xf32>
    %27 = vector.shape_cast %26 : vector<1x8x64xf32> to vector<8x64xf32>
    %cst_16 = arith.constant dense<0.000000e+00> : vector<40x64xf32>
    %28 = tpu.matmul %25, %27, %cst_16 {dimension_numbers = #tpu.dot_dimension_numbers<[1], [0], [0], [1], [0, 0, 1, 1], [], []>} : vector<40x8xf32>, vector<8x64xf32>, vector<40x64xf32> -> vector<40x64xf32>
    %29 = arith.addf %23, %28 : vector<40x64xf32>
    %c0_17 = arith.constant 0 : index
    %c0_18 = arith.constant 0 : index
    %30 = vector.load %arg2[%c0_17, %c0_18] : memref<1x64xf32, #tpu.memory_space<vmem>>, vector<1x64xf32>
    %31 = vector.broadcast %30 : vector<1x64xf32> to vector<40x64xf32>
    %32 = arith.addf %29, %31 : vector<40x64xf32>
    %cst_19 = arith.constant 0.000000e+00 : f32
    %33 = vector.broadcast %cst_19 : f32 to vector<40x64xf32>
    %34 = arith.maximumf %32, %33 : vector<40x64xf32>
    %35 = vector.shape_cast %34 : vector<40x64xf32> to vector<2x20x64xf32>
    %36 = vector.extract_strided_slice %35 {offsets = [0, 0, 0], sizes = [2, 16, 64], strides = [1, 1, 1]} : vector<2x20x64xf32> to vector<2x16x64xf32>
    %37 = vector.shape_cast %36 : vector<2x16x64xf32> to vector<32x64xf32>
    %c0_20 = arith.constant 0 : index
    %c0_21 = arith.constant 0 : index
    %c0_22 = arith.constant 0 : index
    %38 = vector.load %arg3[%c0_20, %c0_21, %c0_22] : memref<5x64x64xf32, #tpu.memory_space<vmem>>, vector<1x64x64xf32>
    %39 = vector.shape_cast %38 : vector<1x64x64xf32> to vector<64x64xf32>
    %cst_23 = arith.constant dense<0.000000e+00> : vector<32x64xf32>
    %40 = tpu.matmul %37, %39, %cst_23 {dimension_numbers = #tpu.dot_dimension_numbers<[1], [0], [0], [1], [0, 0, 1, 1], [], []>} : vector<32x64xf32>, vector<64x64xf32>, vector<32x64xf32> -> vector<32x64xf32>
    %41 = vector.extract_strided_slice %35 {offsets = [0, 1, 0], sizes = [2, 16, 64], strides = [1, 1, 1]} : vector<2x20x64xf32> to vector<2x16x64xf32>
    %42 = vector.shape_cast %41 : vector<2x16x64xf32> to vector<32x64xf32>
    %c1_24 = arith.constant 1 : index
    %c0_25 = arith.constant 0 : index
    %c0_26 = arith.constant 0 : index
    %43 = vector.load %arg3[%c1_24, %c0_25, %c0_26] : memref<5x64x64xf32, #tpu.memory_space<vmem>>, vector<1x64x64xf32>
    %44 = vector.shape_cast %43 : vector<1x64x64xf32> to vector<64x64xf32>
    %cst_27 = arith.constant dense<0.000000e+00> : vector<32x64xf32>
    %45 = tpu.matmul %42, %44, %cst_27 {dimension_numbers = #tpu.dot_dimension_numbers<[1], [0], [0], [1], [0, 0, 1, 1], [], []>} : vector<32x64xf32>, vector<64x64xf32>, vector<32x64xf32> -> vector<32x64xf32>
    %46 = arith.addf %40, %45 : vector<32x64xf32>
    %47 = vector.extract_strided_slice %35 {offsets = [0, 2, 0], sizes = [2, 16, 64], strides = [1, 1, 1]} : vector<2x20x64xf32> to vector<2x16x64xf32>
    %48 = vector.shape_cast %47 : vector<2x16x64xf32> to vector<32x64xf32>
    %c2_28 = arith.constant 2 : index
    %c0_29 = arith.constant 0 : index
    %c0_30 = arith.constant 0 : index
    %49 = vector.load %arg3[%c2_28, %c0_29, %c0_30] : memref<5x64x64xf32, #tpu.memory_space<vmem>>, vector<1x64x64xf32>
    %50 = vector.shape_cast %49 : vector<1x64x64xf32> to vector<64x64xf32>
    %cst_31 = arith.constant dense<0.000000e+00> : vector<32x64xf32>
    %51 = tpu.matmul %48, %50, %cst_31 {dimension_numbers = #tpu.dot_dimension_numbers<[1], [0], [0], [1], [0, 0, 1, 1], [], []>} : vector<32x64xf32>, vector<64x64xf32>, vector<32x64xf32> -> vector<32x64xf32>
    %52 = arith.addf %46, %51 : vector<32x64xf32>
    %53 = vector.extract_strided_slice %35 {offsets = [0, 3, 0], sizes = [2, 16, 64], strides = [1, 1, 1]} : vector<2x20x64xf32> to vector<2x16x64xf32>
    %54 = vector.shape_cast %53 : vector<2x16x64xf32> to vector<32x64xf32>
    %c3_32 = arith.constant 3 : index
    %c0_33 = arith.constant 0 : index
    %c0_34 = arith.constant 0 : index
    %55 = vector.load %arg3[%c3_32, %c0_33, %c0_34] : memref<5x64x64xf32, #tpu.memory_space<vmem>>, vector<1x64x64xf32>
    %56 = vector.shape_cast %55 : vector<1x64x64xf32> to vector<64x64xf32>
    %cst_35 = arith.constant dense<0.000000e+00> : vector<32x64xf32>
    %57 = tpu.matmul %54, %56, %cst_35 {dimension_numbers = #tpu.dot_dimension_numbers<[1], [0], [0], [1], [0, 0, 1, 1], [], []>} : vector<32x64xf32>, vector<64x64xf32>, vector<32x64xf32> -> vector<32x64xf32>
    %58 = arith.addf %52, %57 : vector<32x64xf32>
    %59 = vector.extract_strided_slice %35 {offsets = [0, 4, 0], sizes = [2, 16, 64], strides = [1, 1, 1]} : vector<2x20x64xf32> to vector<2x16x64xf32>
    %60 = vector.shape_cast %59 : vector<2x16x64xf32> to vector<32x64xf32>
    %c4_36 = arith.constant 4 : index
    %c0_37 = arith.constant 0 : index
    %c0_38 = arith.constant 0 : index
    %61 = vector.load %arg3[%c4_36, %c0_37, %c0_38] : memref<5x64x64xf32, #tpu.memory_space<vmem>>, vector<1x64x64xf32>
    %62 = vector.shape_cast %61 : vector<1x64x64xf32> to vector<64x64xf32>
    %cst_39 = arith.constant dense<0.000000e+00> : vector<32x64xf32>
    %63 = tpu.matmul %60, %62, %cst_39 {dimension_numbers = #tpu.dot_dimension_numbers<[1], [0], [0], [1], [0, 0, 1, 1], [], []>} : vector<32x64xf32>, vector<64x64xf32>, vector<32x64xf32> -> vector<32x64xf32>
    %64 = arith.addf %58, %63 : vector<32x64xf32>
    %c0_40 = arith.constant 0 : index
    %c0_41 = arith.constant 0 : index
    %65 = vector.load %arg4[%c0_40, %c0_41] : memref<1x64xf32, #tpu.memory_space<vmem>>, vector<1x64xf32>
    %66 = vector.broadcast %65 : vector<1x64xf32> to vector<32x64xf32>
    %67 = arith.addf %64, %66 : vector<32x64xf32>
    %cst_42 = arith.constant 0.000000e+00 : f32
    %68 = vector.broadcast %cst_42 : f32 to vector<32x64xf32>
    %69 = arith.maximumf %67, %68 : vector<32x64xf32>
    %70 = vector.shape_cast %69 : vector<32x64xf32> to vector<2x16x64xf32>
    %71 = vector.extract_strided_slice %70 {offsets = [0, 0, 0], sizes = [2, 12, 64], strides = [1, 1, 1]} : vector<2x16x64xf32> to vector<2x12x64xf32>
    %72 = vector.shape_cast %71 : vector<2x12x64xf32> to vector<24x64xf32>
    %c0_43 = arith.constant 0 : index
    %c0_44 = arith.constant 0 : index
    %c0_45 = arith.constant 0 : index
    %73 = vector.load %arg5[%c0_43, %c0_44, %c0_45] : memref<5x64x64xf32, #tpu.memory_space<vmem>>, vector<1x64x64xf32>
    %74 = vector.shape_cast %73 : vector<1x64x64xf32> to vector<64x64xf32>
    %cst_46 = arith.constant dense<0.000000e+00> : vector<24x64xf32>
    %75 = tpu.matmul %72, %74, %cst_46 {dimension_numbers = #tpu.dot_dimension_numbers<[1], [0], [0], [1], [0, 0, 1, 1], [], []>} : vector<24x64xf32>, vector<64x64xf32>, vector<24x64xf32> -> vector<24x64xf32>
    %76 = vector.extract_strided_slice %70 {offsets = [0, 1, 0], sizes = [2, 12, 64], strides = [1, 1, 1]} : vector<2x16x64xf32> to vector<2x12x64xf32>
    %77 = vector.shape_cast %76 : vector<2x12x64xf32> to vector<24x64xf32>
    %c1_47 = arith.constant 1 : index
    %c0_48 = arith.constant 0 : index
    %c0_49 = arith.constant 0 : index
    %78 = vector.load %arg5[%c1_47, %c0_48, %c0_49] : memref<5x64x64xf32, #tpu.memory_space<vmem>>, vector<1x64x64xf32>
    %79 = vector.shape_cast %78 : vector<1x64x64xf32> to vector<64x64xf32>
    %cst_50 = arith.constant dense<0.000000e+00> : vector<24x64xf32>
    %80 = tpu.matmul %77, %79, %cst_50 {dimension_numbers = #tpu.dot_dimension_numbers<[1], [0], [0], [1], [0, 0, 1, 1], [], []>} : vector<24x64xf32>, vector<64x64xf32>, vector<24x64xf32> -> vector<24x64xf32>
    %81 = arith.addf %75, %80 : vector<24x64xf32>
    %82 = vector.extract_strided_slice %70 {offsets = [0, 2, 0], sizes = [2, 12, 64], strides = [1, 1, 1]} : vector<2x16x64xf32> to vector<2x12x64xf32>
    %83 = vector.shape_cast %82 : vector<2x12x64xf32> to vector<24x64xf32>
    %c2_51 = arith.constant 2 : index
    %c0_52 = arith.constant 0 : index
    %c0_53 = arith.constant 0 : index
    %84 = vector.load %arg5[%c2_51, %c0_52, %c0_53] : memref<5x64x64xf32, #tpu.memory_space<vmem>>, vector<1x64x64xf32>
    %85 = vector.shape_cast %84 : vector<1x64x64xf32> to vector<64x64xf32>
    %cst_54 = arith.constant dense<0.000000e+00> : vector<24x64xf32>
    %86 = tpu.matmul %83, %85, %cst_54 {dimension_numbers = #tpu.dot_dimension_numbers<[1], [0], [0], [1], [0, 0, 1, 1], [], []>} : vector<24x64xf32>, vector<64x64xf32>, vector<24x64xf32> -> vector<24x64xf32>
    %87 = arith.addf %81, %86 : vector<24x64xf32>
    %88 = vector.extract_strided_slice %70 {offsets = [0, 3, 0], sizes = [2, 12, 64], strides = [1, 1, 1]} : vector<2x16x64xf32> to vector<2x12x64xf32>
    %89 = vector.shape_cast %88 : vector<2x12x64xf32> to vector<24x64xf32>
    %c3_55 = arith.constant 3 : index
    %c0_56 = arith.constant 0 : index
    %c0_57 = arith.constant 0 : index
    %90 = vector.load %arg5[%c3_55, %c0_56, %c0_57] : memref<5x64x64xf32, #tpu.memory_space<vmem>>, vector<1x64x64xf32>
    %91 = vector.shape_cast %90 : vector<1x64x64xf32> to vector<64x64xf32>
    %cst_58 = arith.constant dense<0.000000e+00> : vector<24x64xf32>
    %92 = tpu.matmul %89, %91, %cst_58 {dimension_numbers = #tpu.dot_dimension_numbers<[1], [0], [0], [1], [0, 0, 1, 1], [], []>} : vector<24x64xf32>, vector<64x64xf32>, vector<24x64xf32> -> vector<24x64xf32>
    %93 = arith.addf %87, %92 : vector<24x64xf32>
    %94 = vector.extract_strided_slice %70 {offsets = [0, 4, 0], sizes = [2, 12, 64], strides = [1, 1, 1]} : vector<2x16x64xf32> to vector<2x12x64xf32>
    %95 = vector.shape_cast %94 : vector<2x12x64xf32> to vector<24x64xf32>
    %c4_59 = arith.constant 4 : index
    %c0_60 = arith.constant 0 : index
    %c0_61 = arith.constant 0 : index
    %96 = vector.load %arg5[%c4_59, %c0_60, %c0_61] : memref<5x64x64xf32, #tpu.memory_space<vmem>>, vector<1x64x64xf32>
    %97 = vector.shape_cast %96 : vector<1x64x64xf32> to vector<64x64xf32>
    %cst_62 = arith.constant dense<0.000000e+00> : vector<24x64xf32>
    %98 = tpu.matmul %95, %97, %cst_62 {dimension_numbers = #tpu.dot_dimension_numbers<[1], [0], [0], [1], [0, 0, 1, 1], [], []>} : vector<24x64xf32>, vector<64x64xf32>, vector<24x64xf32> -> vector<24x64xf32>
    %99 = arith.addf %93, %98 : vector<24x64xf32>
    %c0_63 = arith.constant 0 : index
    %c0_64 = arith.constant 0 : index
    %100 = vector.load %arg6[%c0_63, %c0_64] : memref<1x64xf32, #tpu.memory_space<vmem>>, vector<1x64xf32>
    %101 = vector.broadcast %100 : vector<1x64xf32> to vector<24x64xf32>
    %102 = arith.addf %99, %101 : vector<24x64xf32>
    %cst_65 = arith.constant 0.000000e+00 : f32
    %103 = vector.broadcast %cst_65 : f32 to vector<24x64xf32>
    %104 = arith.maximumf %102, %103 : vector<24x64xf32>
    %105 = vector.shape_cast %104 : vector<24x64xf32> to vector<2x12x64xf32>
    %106 = vector.extract_strided_slice %105 {offsets = [0, 0, 0], sizes = [2, 8, 64], strides = [1, 1, 1]} : vector<2x12x64xf32> to vector<2x8x64xf32>
    %107 = vector.shape_cast %106 : vector<2x8x64xf32> to vector<16x64xf32>
    %c0_66 = arith.constant 0 : index
    %c0_67 = arith.constant 0 : index
    %c0_68 = arith.constant 0 : index
    %108 = vector.load %arg7[%c0_66, %c0_67, %c0_68] : memref<5x64x64xf32, #tpu.memory_space<vmem>>, vector<1x64x64xf32>
    %109 = vector.shape_cast %108 : vector<1x64x64xf32> to vector<64x64xf32>
    %cst_69 = arith.constant dense<0.000000e+00> : vector<16x64xf32>
    %110 = tpu.matmul %107, %109, %cst_69 {dimension_numbers = #tpu.dot_dimension_numbers<[1], [0], [0], [1], [0, 0, 1, 1], [], []>} : vector<16x64xf32>, vector<64x64xf32>, vector<16x64xf32> -> vector<16x64xf32>
    %111 = vector.extract_strided_slice %105 {offsets = [0, 1, 0], sizes = [2, 8, 64], strides = [1, 1, 1]} : vector<2x12x64xf32> to vector<2x8x64xf32>
    %112 = vector.shape_cast %111 : vector<2x8x64xf32> to vector<16x64xf32>
    %c1_70 = arith.constant 1 : index
    %c0_71 = arith.constant 0 : index
    %c0_72 = arith.constant 0 : index
    %113 = vector.load %arg7[%c1_70, %c0_71, %c0_72] : memref<5x64x64xf32, #tpu.memory_space<vmem>>, vector<1x64x64xf32>
    %114 = vector.shape_cast %113 : vector<1x64x64xf32> to vector<64x64xf32>
    %cst_73 = arith.constant dense<0.000000e+00> : vector<16x64xf32>
    %115 = tpu.matmul %112, %114, %cst_73 {dimension_numbers = #tpu.dot_dimension_numbers<[1], [0], [0], [1], [0, 0, 1, 1], [], []>} : vector<16x64xf32>, vector<64x64xf32>, vector<16x64xf32> -> vector<16x64xf32>
    %116 = arith.addf %110, %115 : vector<16x64xf32>
    %117 = vector.extract_strided_slice %105 {offsets = [0, 2, 0], sizes = [2, 8, 64], strides = [1, 1, 1]} : vector<2x12x64xf32> to vector<2x8x64xf32>
    %118 = vector.shape_cast %117 : vector<2x8x64xf32> to vector<16x64xf32>
    %c2_74 = arith.constant 2 : index
    %c0_75 = arith.constant 0 : index
    %c0_76 = arith.constant 0 : index
    %119 = vector.load %arg7[%c2_74, %c0_75, %c0_76] : memref<5x64x64xf32, #tpu.memory_space<vmem>>, vector<1x64x64xf32>
    %120 = vector.shape_cast %119 : vector<1x64x64xf32> to vector<64x64xf32>
    %cst_77 = arith.constant dense<0.000000e+00> : vector<16x64xf32>
    %121 = tpu.matmul %118, %120, %cst_77 {dimension_numbers = #tpu.dot_dimension_numbers<[1], [0], [0], [1], [0, 0, 1, 1], [], []>} : vector<16x64xf32>, vector<64x64xf32>, vector<16x64xf32> -> vector<16x64xf32>
    %122 = arith.addf %116, %121 : vector<16x64xf32>
    %123 = vector.extract_strided_slice %105 {offsets = [0, 3, 0], sizes = [2, 8, 64], strides = [1, 1, 1]} : vector<2x12x64xf32> to vector<2x8x64xf32>
    %124 = vector.shape_cast %123 : vector<2x8x64xf32> to vector<16x64xf32>
    %c3_78 = arith.constant 3 : index
    %c0_79 = arith.constant 0 : index
    %c0_80 = arith.constant 0 : index
    %125 = vector.load %arg7[%c3_78, %c0_79, %c0_80] : memref<5x64x64xf32, #tpu.memory_space<vmem>>, vector<1x64x64xf32>
    %126 = vector.shape_cast %125 : vector<1x64x64xf32> to vector<64x64xf32>
    %cst_81 = arith.constant dense<0.000000e+00> : vector<16x64xf32>
    %127 = tpu.matmul %124, %126, %cst_81 {dimension_numbers = #tpu.dot_dimension_numbers<[1], [0], [0], [1], [0, 0, 1, 1], [], []>} : vector<16x64xf32>, vector<64x64xf32>, vector<16x64xf32> -> vector<16x64xf32>
    %128 = arith.addf %122, %127 : vector<16x64xf32>
    %129 = vector.extract_strided_slice %105 {offsets = [0, 4, 0], sizes = [2, 8, 64], strides = [1, 1, 1]} : vector<2x12x64xf32> to vector<2x8x64xf32>
    %130 = vector.shape_cast %129 : vector<2x8x64xf32> to vector<16x64xf32>
    %c4_82 = arith.constant 4 : index
    %c0_83 = arith.constant 0 : index
    %c0_84 = arith.constant 0 : index
    %131 = vector.load %arg7[%c4_82, %c0_83, %c0_84] : memref<5x64x64xf32, #tpu.memory_space<vmem>>, vector<1x64x64xf32>
    %132 = vector.shape_cast %131 : vector<1x64x64xf32> to vector<64x64xf32>
    %cst_85 = arith.constant dense<0.000000e+00> : vector<16x64xf32>
    %133 = tpu.matmul %130, %132, %cst_85 {dimension_numbers = #tpu.dot_dimension_numbers<[1], [0], [0], [1], [0, 0, 1, 1], [], []>} : vector<16x64xf32>, vector<64x64xf32>, vector<16x64xf32> -> vector<16x64xf32>
    %134 = arith.addf %128, %133 : vector<16x64xf32>
    %c0_86 = arith.constant 0 : index
    %c0_87 = arith.constant 0 : index
    %135 = vector.load %arg8[%c0_86, %c0_87] : memref<1x64xf32, #tpu.memory_space<vmem>>, vector<1x64xf32>
    %136 = vector.broadcast %135 : vector<1x64xf32> to vector<16x64xf32>
    %137 = arith.addf %134, %136 : vector<16x64xf32>
    %cst_88 = arith.constant 0.000000e+00 : f32
    %138 = vector.broadcast %cst_88 : f32 to vector<16x64xf32>
    %139 = arith.maximumf %137, %138 : vector<16x64xf32>
    %140 = vector.shape_cast %139 : vector<16x64xf32> to vector<2x8x64xf32>
    %141 = vector.extract_strided_slice %140 {offsets = [0, 0, 0], sizes = [1, 8, 8], strides = [1, 1, 1]} : vector<2x8x64xf32> to vector<1x8x8xf32>
    %142 = vector.shape_cast %141 : vector<1x8x8xf32> to vector<8x8xf32>
    %c0_89 = arith.constant 0 : index
    %c0_90 = arith.constant 0 : index
    %143 = vector.load %arg18[%c0_89, %c0_90] : memref<128x8xf32, #tpu.memory_space<vmem>>, vector<8x8xf32>
    tpu.vector_store %arg18[%c0_89, %c0_90], %142 {strides = array<i32>} : memref<128x8xf32, #tpu.memory_space<vmem>>, vector<8x8xf32>,
    %144 = vector.extract_strided_slice %140 {offsets = [0, 0, 8], sizes = [1, 8, 8], strides = [1, 1, 1]} : vector<2x8x64xf32> to vector<1x8x8xf32>
    %145 = vector.shape_cast %144 : vector<1x8x8xf32> to vector<8x8xf32>
    %c8 = arith.constant 8 : index
    %c0_91 = arith.constant 0 : index
    %146 = vector.load %arg18[%c8, %c0_91] : memref<128x8xf32, #tpu.memory_space<vmem>>, vector<8x8xf32>
    tpu.vector_store %arg18[%c8, %c0_91], %145 {strides = array<i32>} : memref<128x8xf32, #tpu.memory_space<vmem>>, vector<8x8xf32>,
    %147 = vector.extract_strided_slice %140 {offsets = [0, 0, 16], sizes = [1, 8, 8], strides = [1, 1, 1]} : vector<2x8x64xf32> to vector<1x8x8xf32>
    %148 = vector.shape_cast %147 : vector<1x8x8xf32> to vector<8x8xf32>
    %c16 = arith.constant 16 : index
    %c0_92 = arith.constant 0 : index
    %149 = vector.load %arg18[%c16, %c0_92] : memref<128x8xf32, #tpu.memory_space<vmem>>, vector<8x8xf32>
    tpu.vector_store %arg18[%c16, %c0_92], %148 {strides = array<i32>} : memref<128x8xf32, #tpu.memory_space<vmem>>, vector<8x8xf32>,
    %150 = vector.extract_strided_slice %140 {offsets = [0, 0, 24], sizes = [1, 8, 8], strides = [1, 1, 1]} : vector<2x8x64xf32> to vector<1x8x8xf32>
    %151 = vector.shape_cast %150 : vector<1x8x8xf32> to vector<8x8xf32>
    %c24 = arith.constant 24 : index
    %c0_93 = arith.constant 0 : index
    %152 = vector.load %arg18[%c24, %c0_93] : memref<128x8xf32, #tpu.memory_space<vmem>>, vector<8x8xf32>
    tpu.vector_store %arg18[%c24, %c0_93], %151 {strides = array<i32>} : memref<128x8xf32, #tpu.memory_space<vmem>>, vector<8x8xf32>,
    %153 = vector.extract_strided_slice %140 {offsets = [0, 0, 32], sizes = [1, 8, 8], strides = [1, 1, 1]} : vector<2x8x64xf32> to vector<1x8x8xf32>
    %154 = vector.shape_cast %153 : vector<1x8x8xf32> to vector<8x8xf32>
    %c32 = arith.constant 32 : index
    %c0_94 = arith.constant 0 : index
    %155 = vector.load %arg18[%c32, %c0_94] : memref<128x8xf32, #tpu.memory_space<vmem>>, vector<8x8xf32>
    tpu.vector_store %arg18[%c32, %c0_94], %154 {strides = array<i32>} : memref<128x8xf32, #tpu.memory_space<vmem>>, vector<8x8xf32>,
    %156 = vector.extract_strided_slice %140 {offsets = [0, 0, 40], sizes = [1, 8, 8], strides = [1, 1, 1]} : vector<2x8x64xf32> to vector<1x8x8xf32>
    %157 = vector.shape_cast %156 : vector<1x8x8xf32> to vector<8x8xf32>
    %c40 = arith.constant 40 : index
    %c0_95 = arith.constant 0 : index
    %158 = vector.load %arg18[%c40, %c0_95] : memref<128x8xf32, #tpu.memory_space<vmem>>, vector<8x8xf32>
    tpu.vector_store %arg18[%c40, %c0_95], %157 {strides = array<i32>} : memref<128x8xf32, #tpu.memory_space<vmem>>, vector<8x8xf32>,
    %159 = vector.extract_strided_slice %140 {offsets = [0, 0, 48], sizes = [1, 8, 8], strides = [1, 1, 1]} : vector<2x8x64xf32> to vector<1x8x8xf32>
    %160 = vector.shape_cast %159 : vector<1x8x8xf32> to vector<8x8xf32>
    %c48 = arith.constant 48 : index
    %c0_96 = arith.constant 0 : index
    %161 = vector.load %arg18[%c48, %c0_96] : memref<128x8xf32, #tpu.memory_space<vmem>>, vector<8x8xf32>
    tpu.vector_store %arg18[%c48, %c0_96], %160 {strides = array<i32>} : memref<128x8xf32, #tpu.memory_space<vmem>>, vector<8x8xf32>,
    %162 = vector.extract_strided_slice %140 {offsets = [0, 0, 56], sizes = [1, 8, 8], strides = [1, 1, 1]} : vector<2x8x64xf32> to vector<1x8x8xf32>
    %163 = vector.shape_cast %162 : vector<1x8x8xf32> to vector<8x8xf32>
    %c56 = arith.constant 56 : index
    %c0_97 = arith.constant 0 : index
    %164 = vector.load %arg18[%c56, %c0_97] : memref<128x8xf32, #tpu.memory_space<vmem>>, vector<8x8xf32>
    tpu.vector_store %arg18[%c56, %c0_97], %163 {strides = array<i32>} : memref<128x8xf32, #tpu.memory_space<vmem>>, vector<8x8xf32>,
    %165 = vector.extract_strided_slice %140 {offsets = [1, 0, 0], sizes = [1, 8, 8], strides = [1, 1, 1]} : vector<2x8x64xf32> to vector<1x8x8xf32>
    %166 = vector.shape_cast %165 : vector<1x8x8xf32> to vector<8x8xf32>
    %c64 = arith.constant 64 : index
    %c0_98 = arith.constant 0 : index
    %167 = vector.load %arg18[%c64, %c0_98] : memref<128x8xf32, #tpu.memory_space<vmem>>, vector<8x8xf32>
    tpu.vector_store %arg18[%c64, %c0_98], %166 {strides = array<i32>} : memref<128x8xf32, #tpu.memory_space<vmem>>, vector<8x8xf32>,
    %168 = vector.extract_strided_slice %140 {offsets = [1, 0, 8], sizes = [1, 8, 8], strides = [1, 1, 1]} : vector<2x8x64xf32> to vector<1x8x8xf32>
    %169 = vector.shape_cast %168 : vector<1x8x8xf32> to vector<8x8xf32>
    %c72 = arith.constant 72 : index
    %c0_99 = arith.constant 0 : index
    %170 = vector.load %arg18[%c72, %c0_99] : memref<128x8xf32, #tpu.memory_space<vmem>>, vector<8x8xf32>
    tpu.vector_store %arg18[%c72, %c0_99], %169 {strides = array<i32>} : memref<128x8xf32, #tpu.memory_space<vmem>>, vector<8x8xf32>,
    %171 = vector.extract_strided_slice %140 {offsets = [1, 0, 16], sizes = [1, 8, 8], strides = [1, 1, 1]} : vector<2x8x64xf32> to vector<1x8x8xf32>
    %172 = vector.shape_cast %171 : vector<1x8x8xf32> to vector<8x8xf32>
    %c80 = arith.constant 80 : index
    %c0_100 = arith.constant 0 : index
    %173 = vector.load %arg18[%c80, %c0_100] : memref<128x8xf32, #tpu.memory_space<vmem>>, vector<8x8xf32>
    tpu.vector_store %arg18[%c80, %c0_100], %172 {strides = array<i32>} : memref<128x8xf32, #tpu.memory_space<vmem>>, vector<8x8xf32>,
    %174 = vector.extract_strided_slice %140 {offsets = [1, 0, 24], sizes = [1, 8, 8], strides = [1, 1, 1]} : vector<2x8x64xf32> to vector<1x8x8xf32>
    %175 = vector.shape_cast %174 : vector<1x8x8xf32> to vector<8x8xf32>
    %c88 = arith.constant 88 : index
    %c0_101 = arith.constant 0 : index
    %176 = vector.load %arg18[%c88, %c0_101] : memref<128x8xf32, #tpu.memory_space<vmem>>, vector<8x8xf32>
    tpu.vector_store %arg18[%c88, %c0_101], %175 {strides = array<i32>} : memref<128x8xf32, #tpu.memory_space<vmem>>, vector<8x8xf32>,
    %177 = vector.extract_strided_slice %140 {offsets = [1, 0, 32], sizes = [1, 8, 8], strides = [1, 1, 1]} : vector<2x8x64xf32> to vector<1x8x8xf32>
    %178 = vector.shape_cast %177 : vector<1x8x8xf32> to vector<8x8xf32>
    %c96 = arith.constant 96 : index
    %c0_102 = arith.constant 0 : index
    %179 = vector.load %arg18[%c96, %c0_102] : memref<128x8xf32, #tpu.memory_space<vmem>>, vector<8x8xf32>
    tpu.vector_store %arg18[%c96, %c0_102], %178 {strides = array<i32>} : memref<128x8xf32, #tpu.memory_space<vmem>>, vector<8x8xf32>,
    %180 = vector.extract_strided_slice %140 {offsets = [1, 0, 40], sizes = [1, 8, 8], strides = [1, 1, 1]} : vector<2x8x64xf32> to vector<1x8x8xf32>
    %181 = vector.shape_cast %180 : vector<1x8x8xf32> to vector<8x8xf32>
    %c104 = arith.constant 104 : index
    %c0_103 = arith.constant 0 : index
    %182 = vector.load %arg18[%c104, %c0_103] : memref<128x8xf32, #tpu.memory_space<vmem>>, vector<8x8xf32>
    tpu.vector_store %arg18[%c104, %c0_103], %181 {strides = array<i32>} : memref<128x8xf32, #tpu.memory_space<vmem>>, vector<8x8xf32>,
    %183 = vector.extract_strided_slice %140 {offsets = [1, 0, 48], sizes = [1, 8, 8], strides = [1, 1, 1]} : vector<2x8x64xf32> to vector<1x8x8xf32>
    %184 = vector.shape_cast %183 : vector<1x8x8xf32> to vector<8x8xf32>
    %c112 = arith.constant 112 : index
    %c0_104 = arith.constant 0 : index
    %185 = vector.load %arg18[%c112, %c0_104] : memref<128x8xf32, #tpu.memory_space<vmem>>, vector<8x8xf32>
    tpu.vector_store %arg18[%c112, %c0_104], %184 {strides = array<i32>} : memref<128x8xf32, #tpu.memory_space<vmem>>, vector<8x8xf32>,
    %186 = vector.extract_strided_slice %140 {offsets = [1, 0, 56], sizes = [1, 8, 8], strides = [1, 1, 1]} : vector<2x8x64xf32> to vector<1x8x8xf32>
    %187 = vector.shape_cast %186 : vector<1x8x8xf32> to vector<8x8xf32>
    %c120 = arith.constant 120 : index
    %c0_105 = arith.constant 0 : index
    %188 = vector.load %arg18[%c120, %c0_105] : memref<128x8xf32, #tpu.memory_space<vmem>>, vector<8x8xf32>
    tpu.vector_store %arg18[%c120, %c0_105], %187 {strides = array<i32>} : memref<128x8xf32, #tpu.memory_space<vmem>>, vector<8x8xf32>,
    %c0_106 = arith.constant 0 : index
    %c0_107 = arith.constant 0 : index
    %189 = tpu.strided_load %arg18[%c0_106, %c0_107] {strides = array<i32: 8, 1>} : memref<128x8xf32, #tpu.memory_space<vmem>>, vector<16x8xf32>
    %c1_108 = arith.constant 1 : index
    %c0_109 = arith.constant 0 : index
    %190 = tpu.strided_load %arg18[%c1_108, %c0_109] {strides = array<i32: 8, 1>} : memref<128x8xf32, #tpu.memory_space<vmem>>, vector<16x8xf32>
    %c2_110 = arith.constant 2 : index
    %c0_111 = arith.constant 0 : index
    %191 = tpu.strided_load %arg18[%c2_110, %c0_111] {strides = array<i32: 8, 1>} : memref<128x8xf32, #tpu.memory_space<vmem>>, vector<16x8xf32>
    %c3_112 = arith.constant 3 : index
    %c0_113 = arith.constant 0 : index
    %192 = tpu.strided_load %arg18[%c3_112, %c0_113] {strides = array<i32: 8, 1>} : memref<128x8xf32, #tpu.memory_space<vmem>>, vector<16x8xf32>
    %c4_114 = arith.constant 4 : index
    %c0_115 = arith.constant 0 : index
    %193 = tpu.strided_load %arg18[%c4_114, %c0_115] {strides = array<i32: 8, 1>} : memref<128x8xf32, #tpu.memory_space<vmem>>, vector<16x8xf32>
    %c5 = arith.constant 5 : index
    %c0_116 = arith.constant 0 : index
    %194 = tpu.strided_load %arg18[%c5, %c0_116] {strides = array<i32: 8, 1>} : memref<128x8xf32, #tpu.memory_space<vmem>>, vector<16x8xf32>
    %c6 = arith.constant 6 : index
    %c0_117 = arith.constant 0 : index
    %195 = tpu.strided_load %arg18[%c6, %c0_117] {strides = array<i32: 8, 1>} : memref<128x8xf32, #tpu.memory_space<vmem>>, vector<16x8xf32>
    %c7 = arith.constant 7 : index
    %c0_118 = arith.constant 0 : index
    %196 = tpu.strided_load %arg18[%c7, %c0_118] {strides = array<i32: 8, 1>} : memref<128x8xf32, #tpu.memory_space<vmem>>, vector<16x8xf32>
    %197 = tpu.concatenate %189, %190, %191, %192, %193, %194, %195, %196 in 1 : vector<16x8xf32>, vector<16x8xf32>, vector<16x8xf32>, vector<16x8xf32>, vector<16x8xf32>, vector<16x8xf32>, vector<16x8xf32>, vector<16x8xf32> -> vector<16x64xf32>
    %c0_119 = arith.constant 0 : index
    %c0_120 = arith.constant 0 : index
    %198 = vector.load %arg9[%c0_119, %c0_120] : memref<64x128xf32, #tpu.memory_space<vmem>>, vector<64x128xf32>
    %c0_121 = arith.constant 0 : index
    %c0_122 = arith.constant 0 : index
    %199 = vector.load %arg10[%c0_121, %c0_122] : memref<32x128xf32, #tpu.memory_space<vmem>>, vector<32x128xf32>
    %cst_123 = arith.constant dense<0.000000e+00> : vector<16x128xf32>
    %200 = tpu.matmul %197, %198, %cst_123 {dimension_numbers = #tpu.dot_dimension_numbers<[1], [0], [0], [1], [0, 0, 1, 1], [], []>} : vector<16x64xf32>, vector<64x128xf32>, vector<16x128xf32> -> vector<16x128xf32>
    %c0_124 = arith.constant 0 : index
    %c0_125 = arith.constant 0 : index
    %201 = vector.load %arg11[%c0_124, %c0_125] : memref<1x128xf32, #tpu.memory_space<vmem>>, vector<1x128xf32>
    %202 = vector.broadcast %201 : vector<1x128xf32> to vector<16x128xf32>
    %203 = arith.addf %200, %202 : vector<16x128xf32>
    %204 = vector.extract_strided_slice %203 {offsets = [0, 0], sizes = [2, 128], strides = [1, 1]} : vector<16x128xf32> to vector<2x128xf32>
    %205 = vector.extract_strided_slice %203 {offsets = [2, 0], sizes = [2, 128], strides = [1, 1]} : vector<16x128xf32> to vector<2x128xf32>
    %206 = vector.extract_strided_slice %203 {offsets = [4, 0], sizes = [2, 128], strides = [1, 1]} : vector<16x128xf32> to vector<2x128xf32>
    %207 = vector.extract_strided_slice %203 {offsets = [6, 0], sizes = [2, 128], strides = [1, 1]} : vector<16x128xf32> to vector<2x128xf32>
    %208 = vector.extract_strided_slice %203 {offsets = [8, 0], sizes = [2, 128], strides = [1, 1]} : vector<16x128xf32> to vector<2x128xf32>
    %209 = vector.extract_strided_slice %203 {offsets = [10, 0], sizes = [2, 128], strides = [1, 1]} : vector<16x128xf32> to vector<2x128xf32>
    %210 = vector.extract_strided_slice %203 {offsets = [12, 0], sizes = [2, 128], strides = [1, 1]} : vector<16x128xf32> to vector<2x128xf32>
    %211 = vector.extract_strided_slice %203 {offsets = [14, 0], sizes = [2, 128], strides = [1, 1]} : vector<16x128xf32> to vector<2x128xf32>
    %cst_126 = arith.constant 0.000000e+00 : f32
    %212 = vector.broadcast %cst_126 : f32 to vector<2x32xf32>
    %cst_127 = arith.constant 0.000000e+00 : f32
    %213 = vector.broadcast %cst_127 : f32 to vector<2x32xf32>
    %cst_128 = arith.constant dense<0.000000e+00> : vector<2x128xf32>
    %214 = tpu.matmul %212, %199, %cst_128 {dimension_numbers = #tpu.dot_dimension_numbers<[1], [0], [0], [1], [0, 0, 1, 1], [], []>} : vector<2x32xf32>, vector<32x128xf32>, vector<2x128xf32> -> vector<2x128xf32>
    %215 = arith.addf %204, %214 : vector<2x128xf32>
    %216 = vector.extract_strided_slice %215 {offsets = [0, 0], sizes = [2, 96], strides = [1, 1]} : vector<2x128xf32> to vector<2x96xf32>
    %cst_129 = arith.constant 0.000000e+00 : f32
    %217 = vector.broadcast %cst_129 : f32 to vector<2x96xf32>
    %218 = arith.subf %217, %216 : vector<2x96xf32>
    %219 = math.exp %218 : vector<2x96xf32>
    %cst_130 = arith.constant 1.000000e+00 : f32
    %220 = vector.broadcast %cst_130 : f32 to vector<2x96xf32>
    %221 = arith.addf %220, %219 : vector<2x96xf32>
    %222 = tpu.reciprocal %221 {approx = true} : vector<2x96xf32> -> vector<2x96xf32>
    %223 = vector.extract_strided_slice %222 {offsets = [0, 0], sizes = [2, 32], strides = [1, 1]} : vector<2x96xf32> to vector<2x32xf32>
    %224 = vector.extract_strided_slice %222 {offsets = [0, 32], sizes = [2, 32], strides = [1, 1]} : vector<2x96xf32> to vector<2x32xf32>
    %225 = vector.extract_strided_slice %222 {offsets = [0, 64], sizes = [2, 32], strides = [1, 1]} : vector<2x96xf32> to vector<2x32xf32>
    %226 = vector.extract_strided_slice %215 {offsets = [0, 96], sizes = [2, 32], strides = [1, 1]} : vector<2x128xf32> to vector<2x32xf32>
    %227 = math.tanh %226 : vector<2x32xf32>
    %228 = arith.mulf %224, %213 : vector<2x32xf32>
    %229 = arith.mulf %223, %227 : vector<2x32xf32>
    %230 = arith.addf %228, %229 : vector<2x32xf32>
    %231 = math.tanh %230 : vector<2x32xf32>
    %232 = arith.mulf %225, %231 : vector<2x32xf32>
    %cst_131 = arith.constant dense<0.000000e+00> : vector<2x128xf32>
    %233 = tpu.matmul %232, %199, %cst_131 {dimension_numbers = #tpu.dot_dimension_numbers<[1], [0], [0], [1], [0, 0, 1, 1], [], []>} : vector<2x32xf32>, vector<32x128xf32>, vector<2x128xf32> -> vector<2x128xf32>
    %234 = arith.addf %205, %233 : vector<2x128xf32>
    %235 = vector.extract_strided_slice %234 {offsets = [0, 0], sizes = [2, 96], strides = [1, 1]} : vector<2x128xf32> to vector<2x96xf32>
    %cst_132 = arith.constant 0.000000e+00 : f32
    %236 = vector.broadcast %cst_132 : f32 to vector<2x96xf32>
    %237 = arith.subf %236, %235 : vector<2x96xf32>
    %238 = math.exp %237 : vector<2x96xf32>
    %cst_133 = arith.constant 1.000000e+00 : f32
    %239 = vector.broadcast %cst_133 : f32 to vector<2x96xf32>
    %240 = arith.addf %239, %238 : vector<2x96xf32>
    %241 = tpu.reciprocal %240 {approx = true} : vector<2x96xf32> -> vector<2x96xf32>
    %242 = vector.extract_strided_slice %241 {offsets = [0, 0], sizes = [2, 32], strides = [1, 1]} : vector<2x96xf32> to vector<2x32xf32>
    %243 = vector.extract_strided_slice %241 {offsets = [0, 32], sizes = [2, 32], strides = [1, 1]} : vector<2x96xf32> to vector<2x32xf32>
    %244 = vector.extract_strided_slice %241 {offsets = [0, 64], sizes = [2, 32], strides = [1, 1]} : vector<2x96xf32> to vector<2x32xf32>
    %245 = vector.extract_strided_slice %234 {offsets = [0, 96], sizes = [2, 32], strides = [1, 1]} : vector<2x128xf32> to vector<2x32xf32>
    %246 = math.tanh %245 : vector<2x32xf32>
    %247 = arith.mulf %243, %230 : vector<2x32xf32>
    %248 = arith.mulf %242, %246 : vector<2x32xf32>
    %249 = arith.addf %247, %248 : vector<2x32xf32>
    %250 = math.tanh %249 : vector<2x32xf32>
    %251 = arith.mulf %244, %250 : vector<2x32xf32>
    %cst_134 = arith.constant dense<0.000000e+00> : vector<2x128xf32>
    %252 = tpu.matmul %251, %199, %cst_134 {dimension_numbers = #tpu.dot_dimension_numbers<[1], [0], [0], [1], [0, 0, 1, 1], [], []>} : vector<2x32xf32>, vector<32x128xf32>, vector<2x128xf32> -> vector<2x128xf32>
    %253 = arith.addf %206, %252 : vector<2x128xf32>
    %254 = vector.extract_strided_slice %253 {offsets = [0, 0], sizes = [2, 96], strides = [1, 1]} : vector<2x128xf32> to vector<2x96xf32>
    %cst_135 = arith.constant 0.000000e+00 : f32
    %255 = vector.broadcast %cst_135 : f32 to vector<2x96xf32>
    %256 = arith.subf %255, %254 : vector<2x96xf32>
    %257 = math.exp %256 : vector<2x96xf32>
    %cst_136 = arith.constant 1.000000e+00 : f32
    %258 = vector.broadcast %cst_136 : f32 to vector<2x96xf32>
    %259 = arith.addf %258, %257 : vector<2x96xf32>
    %260 = tpu.reciprocal %259 {approx = true} : vector<2x96xf32> -> vector<2x96xf32>
    %261 = vector.extract_strided_slice %260 {offsets = [0, 0], sizes = [2, 32], strides = [1, 1]} : vector<2x96xf32> to vector<2x32xf32>
    %262 = vector.extract_strided_slice %260 {offsets = [0, 32], sizes = [2, 32], strides = [1, 1]} : vector<2x96xf32> to vector<2x32xf32>
    %263 = vector.extract_strided_slice %260 {offsets = [0, 64], sizes = [2, 32], strides = [1, 1]} : vector<2x96xf32> to vector<2x32xf32>
    %264 = vector.extract_strided_slice %253 {offsets = [0, 96], sizes = [2, 32], strides = [1, 1]} : vector<2x128xf32> to vector<2x32xf32>
    %265 = math.tanh %264 : vector<2x32xf32>
    %266 = arith.mulf %262, %249 : vector<2x32xf32>
    %267 = arith.mulf %261, %265 : vector<2x32xf32>
    %268 = arith.addf %266, %267 : vector<2x32xf32>
    %269 = math.tanh %268 : vector<2x32xf32>
    %270 = arith.mulf %263, %269 : vector<2x32xf32>
    %cst_137 = arith.constant dense<0.000000e+00> : vector<2x128xf32>
    %271 = tpu.matmul %270, %199, %cst_137 {dimension_numbers = #tpu.dot_dimension_numbers<[1], [0], [0], [1], [0, 0, 1, 1], [], []>} : vector<2x32xf32>, vector<32x128xf32>, vector<2x128xf32> -> vector<2x128xf32>
    %272 = arith.addf %207, %271 : vector<2x128xf32>
    %273 = vector.extract_strided_slice %272 {offsets = [0, 0], sizes = [2, 96], strides = [1, 1]} : vector<2x128xf32> to vector<2x96xf32>
    %cst_138 = arith.constant 0.000000e+00 : f32
    %274 = vector.broadcast %cst_138 : f32 to vector<2x96xf32>
    %275 = arith.subf %274, %273 : vector<2x96xf32>
    %276 = math.exp %275 : vector<2x96xf32>
    %cst_139 = arith.constant 1.000000e+00 : f32
    %277 = vector.broadcast %cst_139 : f32 to vector<2x96xf32>
    %278 = arith.addf %277, %276 : vector<2x96xf32>
    %279 = tpu.reciprocal %278 {approx = true} : vector<2x96xf32> -> vector<2x96xf32>
    %280 = vector.extract_strided_slice %279 {offsets = [0, 0], sizes = [2, 32], strides = [1, 1]} : vector<2x96xf32> to vector<2x32xf32>
    %281 = vector.extract_strided_slice %279 {offsets = [0, 32], sizes = [2, 32], strides = [1, 1]} : vector<2x96xf32> to vector<2x32xf32>
    %282 = vector.extract_strided_slice %279 {offsets = [0, 64], sizes = [2, 32], strides = [1, 1]} : vector<2x96xf32> to vector<2x32xf32>
    %283 = vector.extract_strided_slice %272 {offsets = [0, 96], sizes = [2, 32], strides = [1, 1]} : vector<2x128xf32> to vector<2x32xf32>
    %284 = math.tanh %283 : vector<2x32xf32>
    %285 = arith.mulf %281, %268 : vector<2x32xf32>
    %286 = arith.mulf %280, %284 : vector<2x32xf32>
    %287 = arith.addf %285, %286 : vector<2x32xf32>
    %288 = math.tanh %287 : vector<2x32xf32>
    %289 = arith.mulf %282, %288 : vector<2x32xf32>
    %cst_140 = arith.constant dense<0.000000e+00> : vector<2x128xf32>
    %290 = tpu.matmul %289, %199, %cst_140 {dimension_numbers = #tpu.dot_dimension_numbers<[1], [0], [0], [1], [0, 0, 1, 1], [], []>} : vector<2x32xf32>, vector<32x128xf32>, vector<2x128xf32> -> vector<2x128xf32>
    %291 = arith.addf %208, %290 : vector<2x128xf32>
    %292 = vector.extract_strided_slice %291 {offsets = [0, 0], sizes = [2, 96], strides = [1, 1]} : vector<2x128xf32> to vector<2x96xf32>
    %cst_141 = arith.constant 0.000000e+00 : f32
    %293 = vector.broadcast %cst_141 : f32 to vector<2x96xf32>
    %294 = arith.subf %293, %292 : vector<2x96xf32>
    %295 = math.exp %294 : vector<2x96xf32>
    %cst_142 = arith.constant 1.000000e+00 : f32
    %296 = vector.broadcast %cst_142 : f32 to vector<2x96xf32>
    %297 = arith.addf %296, %295 : vector<2x96xf32>
    %298 = tpu.reciprocal %297 {approx = true} : vector<2x96xf32> -> vector<2x96xf32>
    %299 = vector.extract_strided_slice %298 {offsets = [0, 0], sizes = [2, 32], strides = [1, 1]} : vector<2x96xf32> to vector<2x32xf32>
    %300 = vector.extract_strided_slice %298 {offsets = [0, 32], sizes = [2, 32], strides = [1, 1]} : vector<2x96xf32> to vector<2x32xf32>
    %301 = vector.extract_strided_slice %298 {offsets = [0, 64], sizes = [2, 32], strides = [1, 1]} : vector<2x96xf32> to vector<2x32xf32>
    %302 = vector.extract_strided_slice %291 {offsets = [0, 96], sizes = [2, 32], strides = [1, 1]} : vector<2x128xf32> to vector<2x32xf32>
    %303 = math.tanh %302 : vector<2x32xf32>
    %304 = arith.mulf %300, %287 : vector<2x32xf32>
    %305 = arith.mulf %299, %303 : vector<2x32xf32>
    %306 = arith.addf %304, %305 : vector<2x32xf32>
    %307 = math.tanh %306 : vector<2x32xf32>
    %308 = arith.mulf %301, %307 : vector<2x32xf32>
    %cst_143 = arith.constant dense<0.000000e+00> : vector<2x128xf32>
    %309 = tpu.matmul %308, %199, %cst_143 {dimension_numbers = #tpu.dot_dimension_numbers<[1], [0], [0], [1], [0, 0, 1, 1], [], []>} : vector<2x32xf32>, vector<32x128xf32>, vector<2x128xf32> -> vector<2x128xf32>
    %310 = arith.addf %209, %309 : vector<2x128xf32>
    %311 = vector.extract_strided_slice %310 {offsets = [0, 0], sizes = [2, 96], strides = [1, 1]} : vector<2x128xf32> to vector<2x96xf32>
    %cst_144 = arith.constant 0.000000e+00 : f32
    %312 = vector.broadcast %cst_144 : f32 to vector<2x96xf32>
    %313 = arith.subf %312, %311 : vector<2x96xf32>
    %314 = math.exp %313 : vector<2x96xf32>
    %cst_145 = arith.constant 1.000000e+00 : f32
    %315 = vector.broadcast %cst_145 : f32 to vector<2x96xf32>
    %316 = arith.addf %315, %314 : vector<2x96xf32>
    %317 = tpu.reciprocal %316 {approx = true} : vector<2x96xf32> -> vector<2x96xf32>
    %318 = vector.extract_strided_slice %317 {offsets = [0, 0], sizes = [2, 32], strides = [1, 1]} : vector<2x96xf32> to vector<2x32xf32>
    %319 = vector.extract_strided_slice %317 {offsets = [0, 32], sizes = [2, 32], strides = [1, 1]} : vector<2x96xf32> to vector<2x32xf32>
    %320 = vector.extract_strided_slice %317 {offsets = [0, 64], sizes = [2, 32], strides = [1, 1]} : vector<2x96xf32> to vector<2x32xf32>
    %321 = vector.extract_strided_slice %310 {offsets = [0, 96], sizes = [2, 32], strides = [1, 1]} : vector<2x128xf32> to vector<2x32xf32>
    %322 = math.tanh %321 : vector<2x32xf32>
    %323 = arith.mulf %319, %306 : vector<2x32xf32>
    %324 = arith.mulf %318, %322 : vector<2x32xf32>
    %325 = arith.addf %323, %324 : vector<2x32xf32>
    %326 = math.tanh %325 : vector<2x32xf32>
    %327 = arith.mulf %320, %326 : vector<2x32xf32>
    %cst_146 = arith.constant dense<0.000000e+00> : vector<2x128xf32>
    %328 = tpu.matmul %327, %199, %cst_146 {dimension_numbers = #tpu.dot_dimension_numbers<[1], [0], [0], [1], [0, 0, 1, 1], [], []>} : vector<2x32xf32>, vector<32x128xf32>, vector<2x128xf32> -> vector<2x128xf32>
    %329 = arith.addf %210, %328 : vector<2x128xf32>
    %330 = vector.extract_strided_slice %329 {offsets = [0, 0], sizes = [2, 96], strides = [1, 1]} : vector<2x128xf32> to vector<2x96xf32>
    %cst_147 = arith.constant 0.000000e+00 : f32
    %331 = vector.broadcast %cst_147 : f32 to vector<2x96xf32>
    %332 = arith.subf %331, %330 : vector<2x96xf32>
    %333 = math.exp %332 : vector<2x96xf32>
    %cst_148 = arith.constant 1.000000e+00 : f32
    %334 = vector.broadcast %cst_148 : f32 to vector<2x96xf32>
    %335 = arith.addf %334, %333 : vector<2x96xf32>
    %336 = tpu.reciprocal %335 {approx = true} : vector<2x96xf32> -> vector<2x96xf32>
    %337 = vector.extract_strided_slice %336 {offsets = [0, 0], sizes = [2, 32], strides = [1, 1]} : vector<2x96xf32> to vector<2x32xf32>
    %338 = vector.extract_strided_slice %336 {offsets = [0, 32], sizes = [2, 32], strides = [1, 1]} : vector<2x96xf32> to vector<2x32xf32>
    %339 = vector.extract_strided_slice %336 {offsets = [0, 64], sizes = [2, 32], strides = [1, 1]} : vector<2x96xf32> to vector<2x32xf32>
    %340 = vector.extract_strided_slice %329 {offsets = [0, 96], sizes = [2, 32], strides = [1, 1]} : vector<2x128xf32> to vector<2x32xf32>
    %341 = math.tanh %340 : vector<2x32xf32>
    %342 = arith.mulf %338, %325 : vector<2x32xf32>
    %343 = arith.mulf %337, %341 : vector<2x32xf32>
    %344 = arith.addf %342, %343 : vector<2x32xf32>
    %345 = math.tanh %344 : vector<2x32xf32>
    %346 = arith.mulf %339, %345 : vector<2x32xf32>
    %cst_149 = arith.constant dense<0.000000e+00> : vector<2x128xf32>
    %347 = tpu.matmul %346, %199, %cst_149 {dimension_numbers = #tpu.dot_dimension_numbers<[1], [0], [0], [1], [0, 0, 1, 1], [], []>} : vector<2x32xf32>, vector<32x128xf32>, vector<2x128xf32> -> vector<2x128xf32>
    %348 = arith.addf %211, %347 : vector<2x128xf32>
    %349 = vector.extract_strided_slice %348 {offsets = [0, 0], sizes = [2, 96], strides = [1, 1]} : vector<2x128xf32> to vector<2x96xf32>
    %cst_150 = arith.constant 0.000000e+00 : f32
    %350 = vector.broadcast %cst_150 : f32 to vector<2x96xf32>
    %351 = arith.subf %350, %349 : vector<2x96xf32>
    %352 = math.exp %351 : vector<2x96xf32>
    %cst_151 = arith.constant 1.000000e+00 : f32
    %353 = vector.broadcast %cst_151 : f32 to vector<2x96xf32>
    %354 = arith.addf %353, %352 : vector<2x96xf32>
    %355 = tpu.reciprocal %354 {approx = true} : vector<2x96xf32> -> vector<2x96xf32>
    %356 = vector.extract_strided_slice %355 {offsets = [0, 0], sizes = [2, 32], strides = [1, 1]} : vector<2x96xf32> to vector<2x32xf32>
    %357 = vector.extract_strided_slice %355 {offsets = [0, 32], sizes = [2, 32], strides = [1, 1]} : vector<2x96xf32> to vector<2x32xf32>
    %358 = vector.extract_strided_slice %355 {offsets = [0, 64], sizes = [2, 32], strides = [1, 1]} : vector<2x96xf32> to vector<2x32xf32>
    %359 = vector.extract_strided_slice %348 {offsets = [0, 96], sizes = [2, 32], strides = [1, 1]} : vector<2x128xf32> to vector<2x32xf32>
    %360 = math.tanh %359 : vector<2x32xf32>
    %361 = arith.mulf %357, %344 : vector<2x32xf32>
    %362 = arith.mulf %356, %360 : vector<2x32xf32>
    %363 = arith.addf %361, %362 : vector<2x32xf32>
    %364 = math.tanh %363 : vector<2x32xf32>
    %365 = arith.mulf %358, %364 : vector<2x32xf32>
    %366 = tpu.concatenate %232, %251, %270, %289, %308, %327, %346, %365 in 0 : vector<2x32xf32>, vector<2x32xf32>, vector<2x32xf32>, vector<2x32xf32>, vector<2x32xf32>, vector<2x32xf32>, vector<2x32xf32>, vector<2x32xf32> -> vector<16x32xf32>
    %c0_152 = arith.constant 0 : index
    %c0_153 = arith.constant 0 : index
    %367 = vector.load %arg12[%c0_152, %c0_153] : memref<32x128xf32, #tpu.memory_space<vmem>>, vector<32x128xf32>
    %c0_154 = arith.constant 0 : index
    %c0_155 = arith.constant 0 : index
    %368 = vector.load %arg13[%c0_154, %c0_155] : memref<32x128xf32, #tpu.memory_space<vmem>>, vector<32x128xf32>
    %cst_156 = arith.constant dense<0.000000e+00> : vector<16x128xf32>
    %369 = tpu.matmul %366, %367, %cst_156 {dimension_numbers = #tpu.dot_dimension_numbers<[1], [0], [0], [1], [0, 0, 1, 1], [], []>} : vector<16x32xf32>, vector<32x128xf32>, vector<16x128xf32> -> vector<16x128xf32>
    %c0_157 = arith.constant 0 : index
    %c0_158 = arith.constant 0 : index
    %370 = vector.load %arg14[%c0_157, %c0_158] : memref<1x128xf32, #tpu.memory_space<vmem>>, vector<1x128xf32>
    %371 = vector.broadcast %370 : vector<1x128xf32> to vector<16x128xf32>
    %372 = arith.addf %369, %371 : vector<16x128xf32>
    %373 = vector.extract_strided_slice %372 {offsets = [0, 0], sizes = [2, 128], strides = [1, 1]} : vector<16x128xf32> to vector<2x128xf32>
    %374 = vector.extract_strided_slice %372 {offsets = [2, 0], sizes = [2, 128], strides = [1, 1]} : vector<16x128xf32> to vector<2x128xf32>
    %375 = vector.extract_strided_slice %372 {offsets = [4, 0], sizes = [2, 128], strides = [1, 1]} : vector<16x128xf32> to vector<2x128xf32>
    %376 = vector.extract_strided_slice %372 {offsets = [6, 0], sizes = [2, 128], strides = [1, 1]} : vector<16x128xf32> to vector<2x128xf32>
    %377 = vector.extract_strided_slice %372 {offsets = [8, 0], sizes = [2, 128], strides = [1, 1]} : vector<16x128xf32> to vector<2x128xf32>
    %378 = vector.extract_strided_slice %372 {offsets = [10, 0], sizes = [2, 128], strides = [1, 1]} : vector<16x128xf32> to vector<2x128xf32>
    %379 = vector.extract_strided_slice %372 {offsets = [12, 0], sizes = [2, 128], strides = [1, 1]} : vector<16x128xf32> to vector<2x128xf32>
    %380 = vector.extract_strided_slice %372 {offsets = [14, 0], sizes = [2, 128], strides = [1, 1]} : vector<16x128xf32> to vector<2x128xf32>
    %cst_159 = arith.constant 0.000000e+00 : f32
    %381 = vector.broadcast %cst_159 : f32 to vector<2x32xf32>
    %cst_160 = arith.constant 0.000000e+00 : f32
    %382 = vector.broadcast %cst_160 : f32 to vector<2x32xf32>
    %cst_161 = arith.constant dense<0.000000e+00> : vector<2x128xf32>
    %383 = tpu.matmul %381, %368, %cst_161 {dimension_numbers = #tpu.dot_dimension_numbers<[1], [0], [0], [1], [0, 0, 1, 1], [], []>} : vector<2x32xf32>, vector<32x128xf32>, vector<2x128xf32> -> vector<2x128xf32>
    %384 = arith.addf %373, %383 : vector<2x128xf32>
    %385 = vector.extract_strided_slice %384 {offsets = [0, 0], sizes = [2, 96], strides = [1, 1]} : vector<2x128xf32> to vector<2x96xf32>
    %cst_162 = arith.constant 0.000000e+00 : f32
    %386 = vector.broadcast %cst_162 : f32 to vector<2x96xf32>
    %387 = arith.subf %386, %385 : vector<2x96xf32>
    %388 = math.exp %387 : vector<2x96xf32>
    %cst_163 = arith.constant 1.000000e+00 : f32
    %389 = vector.broadcast %cst_163 : f32 to vector<2x96xf32>
    %390 = arith.addf %389, %388 : vector<2x96xf32>
    %391 = tpu.reciprocal %390 {approx = true} : vector<2x96xf32> -> vector<2x96xf32>
    %392 = vector.extract_strided_slice %391 {offsets = [0, 0], sizes = [2, 32], strides = [1, 1]} : vector<2x96xf32> to vector<2x32xf32>
    %393 = vector.extract_strided_slice %391 {offsets = [0, 32], sizes = [2, 32], strides = [1, 1]} : vector<2x96xf32> to vector<2x32xf32>
    %394 = vector.extract_strided_slice %391 {offsets = [0, 64], sizes = [2, 32], strides = [1, 1]} : vector<2x96xf32> to vector<2x32xf32>
    %395 = vector.extract_strided_slice %384 {offsets = [0, 96], sizes = [2, 32], strides = [1, 1]} : vector<2x128xf32> to vector<2x32xf32>
    %396 = math.tanh %395 : vector<2x32xf32>
    %397 = arith.mulf %393, %382 : vector<2x32xf32>
    %398 = arith.mulf %392, %396 : vector<2x32xf32>
    %399 = arith.addf %397, %398 : vector<2x32xf32>
    %400 = math.tanh %399 : vector<2x32xf32>
    %401 = arith.mulf %394, %400 : vector<2x32xf32>
    %cst_164 = arith.constant dense<0.000000e+00> : vector<2x128xf32>
    %402 = tpu.matmul %401, %368, %cst_164 {dimension_numbers = #tpu.dot_dimension_numbers<[1], [0], [0], [1], [0, 0, 1, 1], [], []>} : vector<2x32xf32>, vector<32x128xf32>, vector<2x128xf32> -> vector<2x128xf32>
    %403 = arith.addf %374, %402 : vector<2x128xf32>
    %404 = vector.extract_strided_slice %403 {offsets = [0, 0], sizes = [2, 96], strides = [1, 1]} : vector<2x128xf32> to vector<2x96xf32>
    %cst_165 = arith.constant 0.000000e+00 : f32
    %405 = vector.broadcast %cst_165 : f32 to vector<2x96xf32>
    %406 = arith.subf %405, %404 : vector<2x96xf32>
    %407 = math.exp %406 : vector<2x96xf32>
    %cst_166 = arith.constant 1.000000e+00 : f32
    %408 = vector.broadcast %cst_166 : f32 to vector<2x96xf32>
    %409 = arith.addf %408, %407 : vector<2x96xf32>
    %410 = tpu.reciprocal %409 {approx = true} : vector<2x96xf32> -> vector<2x96xf32>
    %411 = vector.extract_strided_slice %410 {offsets = [0, 0], sizes = [2, 32], strides = [1, 1]} : vector<2x96xf32> to vector<2x32xf32>
    %412 = vector.extract_strided_slice %410 {offsets = [0, 32], sizes = [2, 32], strides = [1, 1]} : vector<2x96xf32> to vector<2x32xf32>
    %413 = vector.extract_strided_slice %410 {offsets = [0, 64], sizes = [2, 32], strides = [1, 1]} : vector<2x96xf32> to vector<2x32xf32>
    %414 = vector.extract_strided_slice %403 {offsets = [0, 96], sizes = [2, 32], strides = [1, 1]} : vector<2x128xf32> to vector<2x32xf32>
    %415 = math.tanh %414 : vector<2x32xf32>
    %416 = arith.mulf %412, %399 : vector<2x32xf32>
    %417 = arith.mulf %411, %415 : vector<2x32xf32>
    %418 = arith.addf %416, %417 : vector<2x32xf32>
    %419 = math.tanh %418 : vector<2x32xf32>
    %420 = arith.mulf %413, %419 : vector<2x32xf32>
    %cst_167 = arith.constant dense<0.000000e+00> : vector<2x128xf32>
    %421 = tpu.matmul %420, %368, %cst_167 {dimension_numbers = #tpu.dot_dimension_numbers<[1], [0], [0], [1], [0, 0, 1, 1], [], []>} : vector<2x32xf32>, vector<32x128xf32>, vector<2x128xf32> -> vector<2x128xf32>
    %422 = arith.addf %375, %421 : vector<2x128xf32>
    %423 = vector.extract_strided_slice %422 {offsets = [0, 0], sizes = [2, 96], strides = [1, 1]} : vector<2x128xf32> to vector<2x96xf32>
    %cst_168 = arith.constant 0.000000e+00 : f32
    %424 = vector.broadcast %cst_168 : f32 to vector<2x96xf32>
    %425 = arith.subf %424, %423 : vector<2x96xf32>
    %426 = math.exp %425 : vector<2x96xf32>
    %cst_169 = arith.constant 1.000000e+00 : f32
    %427 = vector.broadcast %cst_169 : f32 to vector<2x96xf32>
    %428 = arith.addf %427, %426 : vector<2x96xf32>
    %429 = tpu.reciprocal %428 {approx = true} : vector<2x96xf32> -> vector<2x96xf32>
    %430 = vector.extract_strided_slice %429 {offsets = [0, 0], sizes = [2, 32], strides = [1, 1]} : vector<2x96xf32> to vector<2x32xf32>
    %431 = vector.extract_strided_slice %429 {offsets = [0, 32], sizes = [2, 32], strides = [1, 1]} : vector<2x96xf32> to vector<2x32xf32>
    %432 = vector.extract_strided_slice %429 {offsets = [0, 64], sizes = [2, 32], strides = [1, 1]} : vector<2x96xf32> to vector<2x32xf32>
    %433 = vector.extract_strided_slice %422 {offsets = [0, 96], sizes = [2, 32], strides = [1, 1]} : vector<2x128xf32> to vector<2x32xf32>
    %434 = math.tanh %433 : vector<2x32xf32>
    %435 = arith.mulf %431, %418 : vector<2x32xf32>
    %436 = arith.mulf %430, %434 : vector<2x32xf32>
    %437 = arith.addf %435, %436 : vector<2x32xf32>
    %438 = math.tanh %437 : vector<2x32xf32>
    %439 = arith.mulf %432, %438 : vector<2x32xf32>
    %cst_170 = arith.constant dense<0.000000e+00> : vector<2x128xf32>
    %440 = tpu.matmul %439, %368, %cst_170 {dimension_numbers = #tpu.dot_dimension_numbers<[1], [0], [0], [1], [0, 0, 1, 1], [], []>} : vector<2x32xf32>, vector<32x128xf32>, vector<2x128xf32> -> vector<2x128xf32>
    %441 = arith.addf %376, %440 : vector<2x128xf32>
    %442 = vector.extract_strided_slice %441 {offsets = [0, 0], sizes = [2, 96], strides = [1, 1]} : vector<2x128xf32> to vector<2x96xf32>
    %cst_171 = arith.constant 0.000000e+00 : f32
    %443 = vector.broadcast %cst_171 : f32 to vector<2x96xf32>
    %444 = arith.subf %443, %442 : vector<2x96xf32>
    %445 = math.exp %444 : vector<2x96xf32>
    %cst_172 = arith.constant 1.000000e+00 : f32
    %446 = vector.broadcast %cst_172 : f32 to vector<2x96xf32>
    %447 = arith.addf %446, %445 : vector<2x96xf32>
    %448 = tpu.reciprocal %447 {approx = true} : vector<2x96xf32> -> vector<2x96xf32>
    %449 = vector.extract_strided_slice %448 {offsets = [0, 0], sizes = [2, 32], strides = [1, 1]} : vector<2x96xf32> to vector<2x32xf32>
    %450 = vector.extract_strided_slice %448 {offsets = [0, 32], sizes = [2, 32], strides = [1, 1]} : vector<2x96xf32> to vector<2x32xf32>
    %451 = vector.extract_strided_slice %448 {offsets = [0, 64], sizes = [2, 32], strides = [1, 1]} : vector<2x96xf32> to vector<2x32xf32>
    %452 = vector.extract_strided_slice %441 {offsets = [0, 96], sizes = [2, 32], strides = [1, 1]} : vector<2x128xf32> to vector<2x32xf32>
    %453 = math.tanh %452 : vector<2x32xf32>
    %454 = arith.mulf %450, %437 : vector<2x32xf32>
    %455 = arith.mulf %449, %453 : vector<2x32xf32>
    %456 = arith.addf %454, %455 : vector<2x32xf32>
    %457 = math.tanh %456 : vector<2x32xf32>
    %458 = arith.mulf %451, %457 : vector<2x32xf32>
    %459 = vector.extract_strided_slice %458 {offsets = [1, 0], sizes = [1, 32], strides = [1, 1]} : vector<2x32xf32> to vector<1x32xf32>
    %cst_173 = arith.constant dense<0.000000e+00> : vector<2x128xf32>
    %460 = tpu.matmul %458, %368, %cst_173 {dimension_numbers = #tpu.dot_dimension_numbers<[1], [0], [0], [1], [0, 0, 1, 1], [], []>} : vector<2x32xf32>, vector<32x128xf32>, vector<2x128xf32> -> vector<2x128xf32>
    %461 = arith.addf %377, %460 : vector<2x128xf32>
    %462 = vector.extract_strided_slice %461 {offsets = [0, 0], sizes = [2, 96], strides = [1, 1]} : vector<2x128xf32> to vector<2x96xf32>
    %cst_174 = arith.constant 0.000000e+00 : f32
    %463 = vector.broadcast %cst_174 : f32 to vector<2x96xf32>
    %464 = arith.subf %463, %462 : vector<2x96xf32>
    %465 = math.exp %464 : vector<2x96xf32>
    %cst_175 = arith.constant 1.000000e+00 : f32
    %466 = vector.broadcast %cst_175 : f32 to vector<2x96xf32>
    %467 = arith.addf %466, %465 : vector<2x96xf32>
    %468 = tpu.reciprocal %467 {approx = true} : vector<2x96xf32> -> vector<2x96xf32>
    %469 = vector.extract_strided_slice %468 {offsets = [0, 0], sizes = [2, 32], strides = [1, 1]} : vector<2x96xf32> to vector<2x32xf32>
    %470 = vector.extract_strided_slice %468 {offsets = [0, 32], sizes = [2, 32], strides = [1, 1]} : vector<2x96xf32> to vector<2x32xf32>
    %471 = vector.extract_strided_slice %468 {offsets = [0, 64], sizes = [2, 32], strides = [1, 1]} : vector<2x96xf32> to vector<2x32xf32>
    %472 = vector.extract_strided_slice %461 {offsets = [0, 96], sizes = [2, 32], strides = [1, 1]} : vector<2x128xf32> to vector<2x32xf32>
    %473 = math.tanh %472 : vector<2x32xf32>
    %474 = arith.mulf %470, %456 : vector<2x32xf32>
    %475 = arith.mulf %469, %473 : vector<2x32xf32>
    %476 = arith.addf %474, %475 : vector<2x32xf32>
    %477 = math.tanh %476 : vector<2x32xf32>
    %478 = arith.mulf %471, %477 : vector<2x32xf32>
    %cst_176 = arith.constant dense<0.000000e+00> : vector<2x128xf32>
    %479 = tpu.matmul %478, %368, %cst_176 {dimension_numbers = #tpu.dot_dimension_numbers<[1], [0], [0], [1], [0, 0, 1, 1], [], []>} : vector<2x32xf32>, vector<32x128xf32>, vector<2x128xf32> -> vector<2x128xf32>
    %480 = arith.addf %378, %479 : vector<2x128xf32>
    %481 = vector.extract_strided_slice %480 {offsets = [0, 0], sizes = [2, 96], strides = [1, 1]} : vector<2x128xf32> to vector<2x96xf32>
    %cst_177 = arith.constant 0.000000e+00 : f32
    %482 = vector.broadcast %cst_177 : f32 to vector<2x96xf32>
    %483 = arith.subf %482, %481 : vector<2x96xf32>
    %484 = math.exp %483 : vector<2x96xf32>
    %cst_178 = arith.constant 1.000000e+00 : f32
    %485 = vector.broadcast %cst_178 : f32 to vector<2x96xf32>
    %486 = arith.addf %485, %484 : vector<2x96xf32>
    %487 = tpu.reciprocal %486 {approx = true} : vector<2x96xf32> -> vector<2x96xf32>
    %488 = vector.extract_strided_slice %487 {offsets = [0, 0], sizes = [2, 32], strides = [1, 1]} : vector<2x96xf32> to vector<2x32xf32>
    %489 = vector.extract_strided_slice %487 {offsets = [0, 32], sizes = [2, 32], strides = [1, 1]} : vector<2x96xf32> to vector<2x32xf32>
    %490 = vector.extract_strided_slice %487 {offsets = [0, 64], sizes = [2, 32], strides = [1, 1]} : vector<2x96xf32> to vector<2x32xf32>
    %491 = vector.extract_strided_slice %480 {offsets = [0, 96], sizes = [2, 32], strides = [1, 1]} : vector<2x128xf32> to vector<2x32xf32>
    %492 = math.tanh %491 : vector<2x32xf32>
    %493 = arith.mulf %489, %476 : vector<2x32xf32>
    %494 = arith.mulf %488, %492 : vector<2x32xf32>
    %495 = arith.addf %493, %494 : vector<2x32xf32>
    %496 = math.tanh %495 : vector<2x32xf32>
    %497 = arith.mulf %490, %496 : vector<2x32xf32>
    %cst_179 = arith.constant dense<0.000000e+00> : vector<2x128xf32>
    %498 = tpu.matmul %497, %368, %cst_179 {dimension_numbers = #tpu.dot_dimension_numbers<[1], [0], [0], [1], [0, 0, 1, 1], [], []>} : vector<2x32xf32>, vector<32x128xf32>, vector<2x128xf32> -> vector<2x128xf32>
    %499 = arith.addf %379, %498 : vector<2x128xf32>
    %500 = vector.extract_strided_slice %499 {offsets = [0, 0], sizes = [2, 96], strides = [1, 1]} : vector<2x128xf32> to vector<2x96xf32>
    %cst_180 = arith.constant 0.000000e+00 : f32
    %501 = vector.broadcast %cst_180 : f32 to vector<2x96xf32>
    %502 = arith.subf %501, %500 : vector<2x96xf32>
    %503 = math.exp %502 : vector<2x96xf32>
    %cst_181 = arith.constant 1.000000e+00 : f32
    %504 = vector.broadcast %cst_181 : f32 to vector<2x96xf32>
    %505 = arith.addf %504, %503 : vector<2x96xf32>
    %506 = tpu.reciprocal %505 {approx = true} : vector<2x96xf32> -> vector<2x96xf32>
    %507 = vector.extract_strided_slice %506 {offsets = [0, 0], sizes = [2, 32], strides = [1, 1]} : vector<2x96xf32> to vector<2x32xf32>
    %508 = vector.extract_strided_slice %506 {offsets = [0, 32], sizes = [2, 32], strides = [1, 1]} : vector<2x96xf32> to vector<2x32xf32>
    %509 = vector.extract_strided_slice %506 {offsets = [0, 64], sizes = [2, 32], strides = [1, 1]} : vector<2x96xf32> to vector<2x32xf32>
    %510 = vector.extract_strided_slice %499 {offsets = [0, 96], sizes = [2, 32], strides = [1, 1]} : vector<2x128xf32> to vector<2x32xf32>
    %511 = math.tanh %510 : vector<2x32xf32>
    %512 = arith.mulf %508, %495 : vector<2x32xf32>
    %513 = arith.mulf %507, %511 : vector<2x32xf32>
    %514 = arith.addf %512, %513 : vector<2x32xf32>
    %515 = math.tanh %514 : vector<2x32xf32>
    %516 = arith.mulf %509, %515 : vector<2x32xf32>
    %cst_182 = arith.constant dense<0.000000e+00> : vector<2x128xf32>
    %517 = tpu.matmul %516, %368, %cst_182 {dimension_numbers = #tpu.dot_dimension_numbers<[1], [0], [0], [1], [0, 0, 1, 1], [], []>} : vector<2x32xf32>, vector<32x128xf32>, vector<2x128xf32> -> vector<2x128xf32>
    %518 = arith.addf %380, %517 : vector<2x128xf32>
    %519 = vector.extract_strided_slice %518 {offsets = [0, 0], sizes = [2, 96], strides = [1, 1]} : vector<2x128xf32> to vector<2x96xf32>
    %cst_183 = arith.constant 0.000000e+00 : f32
    %520 = vector.broadcast %cst_183 : f32 to vector<2x96xf32>
    %521 = arith.subf %520, %519 : vector<2x96xf32>
    %522 = math.exp %521 : vector<2x96xf32>
    %cst_184 = arith.constant 1.000000e+00 : f32
    %523 = vector.broadcast %cst_184 : f32 to vector<2x96xf32>
    %524 = arith.addf %523, %522 : vector<2x96xf32>
    %525 = tpu.reciprocal %524 {approx = true} : vector<2x96xf32> -> vector<2x96xf32>
    %526 = vector.extract_strided_slice %525 {offsets = [0, 0], sizes = [2, 32], strides = [1, 1]} : vector<2x96xf32> to vector<2x32xf32>
    %527 = vector.extract_strided_slice %525 {offsets = [0, 32], sizes = [2, 32], strides = [1, 1]} : vector<2x96xf32> to vector<2x32xf32>
    %528 = vector.extract_strided_slice %525 {offsets = [0, 64], sizes = [2, 32], strides = [1, 1]} : vector<2x96xf32> to vector<2x32xf32>
    %529 = vector.extract_strided_slice %518 {offsets = [0, 96], sizes = [2, 32], strides = [1, 1]} : vector<2x128xf32> to vector<2x32xf32>
    %530 = math.tanh %529 : vector<2x32xf32>
    %531 = arith.mulf %527, %514 : vector<2x32xf32>
    %532 = arith.mulf %526, %530 : vector<2x32xf32>
    %533 = arith.addf %531, %532 : vector<2x32xf32>
    %534 = math.tanh %533 : vector<2x32xf32>
    %535 = arith.mulf %528, %534 : vector<2x32xf32>
    %536 = vector.extract_strided_slice %535 {offsets = [1, 0], sizes = [1, 32], strides = [1, 1]} : vector<2x32xf32> to vector<1x32xf32>
    %537 = tpu.concatenate %459, %536 in 0 : vector<1x32xf32>, vector<1x32xf32> -> vector<2x32xf32>
    %c0_185 = arith.constant 0 : index
    %c0_186 = arith.constant 0 : index
    %538 = vector.load %arg15[%c0_185, %c0_186] : memref<32x6xf32, #tpu.memory_space<vmem>>, vector<32x6xf32>
    %cst_187 = arith.constant dense<0.000000e+00> : vector<2x6xf32>
    %539 = tpu.matmul %537, %538, %cst_187 {dimension_numbers = #tpu.dot_dimension_numbers<[1], [0], [0], [1], [0, 0, 1, 1], [], []>} : vector<2x32xf32>, vector<32x6xf32>, vector<2x6xf32> -> vector<2x6xf32>
    %c0_188 = arith.constant 0 : index
    %c0_189 = arith.constant 0 : index
    %540 = vector.load %arg16[%c0_188, %c0_189] : memref<1x6xf32, #tpu.memory_space<vmem>>, vector<1x6xf32>
    %541 = vector.broadcast %540 : vector<1x6xf32> to vector<2x6xf32>
    %542 = arith.addf %539, %541 : vector<2x6xf32>
    %c0_190 = arith.constant 0 : index
    %c0_191 = arith.constant 0 : index
    %543 = vector.load %arg17[%c0_190, %c0_191] : memref<2x6xf32, #tpu.memory_space<vmem>>, vector<2x6xf32>
    tpu.vector_store %arg17[%c0_190, %c0_191], %542 {strides = array<i32>} : memref<2x6xf32, #tpu.memory_space<vmem>>, vector<2x6xf32>,
    return
  }
}

</mosaic_0001>

<bundles_post_ra>
// kernel: tpu_custom_call.1
= control target key start
LH: loop header
LB: loop body
LE: loop exit
PB: predicated region body
PF: predicated region fallthrough
CT: control target
= control target key end

     0   :  { %s8987_s0 = inlined_call_operand.vmem [shape: f32[2,24,8], index: 0, kind: input, shape index: {}]   ;;  %s8988_s1 = inlined_call_operand.vmem [shape: f32[5,8,64], index: 1, kind: input, shape index: {}]   ;;  %s8989_s2 = inlined_call_operand.vmem [shape: f32[1,64], index: 2, kind: input, shape index: {}]   ;;  %s8990_s3 = inlined_call_operand.hbm [shape: f32[5,64,64], index: 3, kind: input, shape index: {}]   ;;  %s8991_s4 = inlined_call_operand.hbm [shape: f32[1,64], index: 4, kind: input, shape index: {}]   ;;  %s8992_s5 = inlined_call_operand.hbm [shape: f32[5,64,64], index: 5, kind: input, shape index: {}]   ;;  %s8993_s6 = inlined_call_operand.hbm [shape: f32[1,64], index: 6, kind: input, shape index: {}]   ;;  %s8994_s7 = inlined_call_operand.hbm [shape: f32[5,64,64], index: 7, kind: input, shape index: {}]   ;;  %s8995_s8 = inlined_call_operand.hbm [shape: f32[1,64], index: 8, kind: input, shape index: {}]   ;;  %s8996_s9 = inlined_call_operand.vmem [shape: f32[64,128], index: 9, kind: input, shape index: {}]   ;;  %s8997_s10 = inlined_call_operand.vmem [shape: f32[32,128], index: 10, kind: input, shape index: {}]   ;;  %s8998_s11 = inlined_call_operand.hbm [shape: f32[1,128], index: 11, kind: input, shape index: {}]   ;;  %s8999_s12 = inlined_call_operand.hbm [shape: f32[32,128], index: 12, kind: input, shape index: {}]   ;;  %s9000_s13 = inlined_call_operand.hbm [shape: f32[32,128], index: 13, kind: input, shape index: {}]   ;;  %s9001_s14 = inlined_call_operand.vmem [shape: f32[1,128], index: 14, kind: input, shape index: {}]   ;;  %s9002_s15 = inlined_call_operand.vmem [shape: f32[32,6], index: 15, kind: input, shape index: {}]   ;;  %s9003_s16 = inlined_call_operand.vmem [shape: f32[1,6], index: 16, kind: input, shape index: {}]   ;;  %s9004_s17 = inlined_call_operand.hbm [shape: f32[2,6], index: 17, kind: output, shape index: {}]  }
   0x1   :  { %9007 = sst [smem:[#allocation25_spill]] %s8987_s0 }
   0x2   :  { %9008 = sst [smem:[#allocation26_spill]] %s8988_s1 }
   0x3   :  { %22 = vsyncpa [#allocation4], 0 }
   0x4   :  { %23 = vsyncpa [#allocation7], 0 }
   0x5   :  { %24 = vsyncpa [#allocation10], 0 }
   0x6   :  { %25 = vsyncpa [#allocation13], 0 }
   0x7   :  { %26 = vsyncpa [#allocation16], 0 }
   0x8   :  { %27 = vsyncpa [#allocation5], 0  ;;  %s7376_s24 = smov [#allocation6]   ;;  %s7377_s26 = smov [#allocation9]  }
   0x9   :  { %s52_s25 = sshll.u32 %s7376_s24, 4  ;;  %s74_s27 = sshll.u32 %s7377_s26, 4  ;;  %s53_s25 = int_to_ptr.vmem [resolvable:$true] %s52_s25  ;;  %s75_s27 = int_to_ptr.vmem [resolvable:$true] %s74_s27 }
   0xa   :  { %s7144_s0 = scalar_lea.hbm %s8991_s4, 16 }
   0xb   :  { %p7145_p0 = scmp.ne.s32.totalorder %s8991_s4, %s7144_s0  ;;  %p7148_p1 = scmp.lt.u32.totalorder %s7144_s0, %s8991_s4 }
   0xd   :  { %p7150_p2 = pnand %p7148_p1, %p7145_p0 }
   0xf   :  { %7153 = shalt.err (!%p7150_p2)
}
  0x10   :  { %s7154_s20 = scalar_lea.vmem %s53_s25, 16  ;;  %s7158_s21 = scalar_lea.vmem %s53_s25, 32 }
  0x11   :  { %p7155_p3 = scmp.ne.s32.totalorder %s53_s25, %s7154_s20  ;;  %p7159_p4 = scmp.lt.s32.totalorder %s53_s25, %s53_s25 }
  0x12   :  { %p7160_p5 = scmp.lt.s32.totalorder %s7158_s21, %s7154_s20 }
  0x14   :  { %p7161_p6 = por %p7160_p5, %p7159_p4 }
  0x16   :  { %p7162_p7 = pnand %p7161_p6, %p7155_p3 }
  0x18   :  { %7165 = shalt.err (!%p7162_p7)
}
  0x19   :  { %55 = dma.hbm_to_vmem [thread:$0]  %s8991_s4, 16, %s53_s25, [#allocation7]  }
  0x1a   :  { %s7166_s28 = scalar_lea.hbm %s8993_s6, 16 }
  0x1b   :  { %p7167_p8 = scmp.ne.s32.totalorder %s8993_s6, %s7166_s28  ;;  %p7170_p9 = scmp.lt.u32.totalorder %s7166_s28, %s8993_s6 }
  0x1d   :  { %p7172_p10 = pnand %p7170_p9, %p7167_p8 }
  0x1f   :  { %7175 = shalt.err (!%p7172_p10)
}
  0x20   :  { %s7176_s19 = scalar_lea.vmem %s75_s27, 16  ;;  %s7180_s1 = scalar_lea.vmem %s75_s27, 32 }
  0x21   :  { %p7177_p11 = scmp.ne.s32.totalorder %s75_s27, %s7176_s19  ;;  %p7181_p12 = scmp.lt.s32.totalorder %s75_s27, %s75_s27 }
  0x22   :  { %p7182_p13 = scmp.lt.s32.totalorder %s7180_s1, %s7176_s19 }
  0x24   :  { %p7183_p0 = por %p7182_p13, %p7181_p12 }
  0x26   :  { %p7184_p1 = pnand %p7183_p0, %p7177_p11 }
  0x28   :  { %7187 = shalt.err (!%p7184_p1)
}
  0x29   :  { %77 = dma.hbm_to_vmem [thread:$0]  %s8993_s6, 16, %s75_s27, [#allocation10]  }
  0x2a   :  { %s7378_s20 = smov [#allocation12]   ;;  %s7188_s24 = scalar_lea.hbm %s8995_s8, 16 }
  0x2b   :  { %s96_s21 = sshll.u32 %s7378_s20, 4  ;;  %p7189_p2 = scmp.ne.s32.totalorder %s8995_s8, %s7188_s24  ;;  %s97_s21 = int_to_ptr.vmem [resolvable:$true] %s96_s21 }
  0x2c   :  { %p7192_p3 = scmp.lt.u32.totalorder %s7188_s24, %s8995_s8 }
  0x2e   :  { %p7194_p4 = pnand %p7192_p3, %p7189_p2 }
  0x30   :  { %7197 = shalt.err (!%p7194_p4)
}
  0x31   :  { %s7198_s30 = scalar_lea.vmem %s97_s21, 16  ;;  %s7202_s6 = scalar_lea.vmem %s97_s21, 32 }
  0x32   :  { %p7199_p5 = scmp.ne.s32.totalorder %s97_s21, %s7198_s30  ;;  %p7203_p6 = scmp.lt.s32.totalorder %s97_s21, %s97_s21 }
  0x33   :  { %p7204_p7 = scmp.lt.s32.totalorder %s7202_s6, %s7198_s30 }
  0x35   :  { %p7205_p8 = por %p7204_p7, %p7203_p6 }
  0x37   :  { %p7206_p9 = pnand %p7205_p8, %p7199_p5 }
  0x39   :  { %7209 = shalt.err (!%p7206_p9)
}
  0x3a   :  { %99 = dma.hbm_to_vmem [thread:$0]  %s8995_s8, 16, %s97_s21, [#allocation13]  }
  0x3b   :  { %s7379_s19 = smov [#allocation15]   ;;  %s7380_s4 = smov [#allocation3]  }
  0x3c   :  { %s119_s1 = sshll.u32 %s7379_s19, 4  ;;  %s39_s25 = sshll.u32 %s7380_s4, 4  ;;  %s120_s1 = int_to_ptr.vmem [resolvable:$true] %s119_s1  ;;  %s40_s25 = int_to_ptr.vmem [resolvable:$true] %s39_s25 }
  0x3d   :  { %s7210_s23 = scalar_lea.hbm %s8999_s12, 512 }
  0x3e   :  { %p7211_p10 = scmp.ne.s32.totalorder %s8999_s12, %s7210_s23  ;;  %p7214_p11 = scmp.lt.u32.totalorder %s7210_s23, %s8999_s12 }
  0x40   :  { %p7216_p12 = pnand %p7214_p11, %p7211_p10 }
  0x42   :  { %7219 = shalt.err (!%p7216_p12)
}
  0x43   :  { %s7220_s8 = scalar_lea.vmem %s120_s1, 512  ;;  %p7225_p0 = scmp.lt.s32.totalorder %s120_s1, %s120_s1 }
  0x44   :  { %p7221_p13 = scmp.ne.s32.totalorder %s120_s1, %s7220_s8  ;;  %p7226_p1 = scmp.lt.s32.totalorder %s7220_s8, %s7220_s8 }
  0x46   :  { %p7227_p2 = por %p7226_p1, %p7225_p0 }
  0x48   :  { %p7228_p3 = pnand %p7227_p2, %p7221_p13 }
  0x4a   :  { %7231 = shalt.err (!%p7228_p3)
}
  0x4b   :  { %s7381_s21 = smov 128   ;;  %s7382_s0 = smov 8  }
  0x4c   :  { %125 = dma.hbm_to_vmem [thread:$0]  %s8999_s12, 512, %s120_s1, [#allocation16], %s7381_s21, %s7381_s21, %s7382_s0  }
  0x4d   :  { %s7232_s19 = scalar_lea.hbm %s8990_s3, 5120 }
  0x4e   :  { %p7233_p4 = scmp.ne.s32.totalorder %s8990_s3, %s7232_s19  ;;  %p7236_p5 = scmp.lt.u32.totalorder %s7232_s19, %s8990_s3 }
  0x50   :  { %p7238_p6 = pnand %p7236_p5, %p7233_p4 }
  0x52   :  { %7241 = shalt.err (!%p7238_p6)
}
  0x53   :  { %s7242_s24 = scalar_lea.vmem %s40_s25, 5120  ;;  %p7247_p8 = scmp.lt.s32.totalorder %s40_s25, %s40_s25 }
  0x54   :  { %p7243_p7 = scmp.ne.s32.totalorder %s40_s25, %s7242_s24  ;;  %p7248_p9 = scmp.lt.s32.totalorder %s7242_s24, %s7242_s24 }
  0x56   :  { %p7249_p10 = por %p7248_p9, %p7247_p8 }
  0x58   :  { %p7250_p11 = pnand %p7249_p10, %p7243_p7 }
  0x5a   :  { %7253 = shalt.err (!%p7250_p11)
}
  0x5b   :  { %45 = dma.hbm_to_vmem [thread:$0]  %s8990_s3, 5120, %s40_s25, [#allocation4], %s7381_s21, %s7381_s21, %s7382_s0  }
  0x5c   :  { %s7383_s26 = smov [#allocation8]   ;;  %s7384_s29 = smov [#allocation11]  }
  0x5d   :  { %s61_s28 = sshll.u32 %s7383_s26, 4  ;;  %s83_s8 = sshll.u32 %s7384_s29, 4  ;;  %s62_s28 = int_to_ptr.vmem [resolvable:$true] %s61_s28  ;;  %s84_s8 = int_to_ptr.vmem [resolvable:$true] %s83_s8 }
  0x5e   :  { %s7254_s27 = scalar_lea.hbm %s8992_s5, 5120 }
  0x5f   :  { %p7255_p12 = scmp.ne.s32.totalorder %s8992_s5, %s7254_s27  ;;  %p7258_p13 = scmp.lt.u32.totalorder %s7254_s27, %s8992_s5 }
  0x61   :  { %p7260_p0 = pnand %p7258_p13, %p7255_p12 }
  0x63   :  { %7263 = shalt.err (!%p7260_p0)
}
  0x64   :  { %s7264_s3 = scalar_lea.vmem %s62_s28, 5120  ;;  %p7269_p2 = scmp.lt.s32.totalorder %s62_s28, %s62_s28 }
  0x65   :  { %p7265_p1 = scmp.ne.s32.totalorder %s62_s28, %s7264_s3  ;;  %p7270_p3 = scmp.lt.s32.totalorder %s7264_s3, %s7264_s3 }
  0x67   :  { %p7271_p4 = por %p7270_p3, %p7269_p2 }
  0x69   :  { %p7272_p5 = pnand %p7271_p4, %p7265_p1 }
  0x6b   :  { %7275 = shalt.err (!%p7272_p5)
}
  0x6c   :  { %67 = dma.hbm_to_vmem [thread:$0]  %s8992_s5, 5120, %s62_s28, [#allocation7], %s7381_s21, %s7381_s21, %s7382_s0  }
  0x6d   :  { %s7276_s12 = scalar_lea.hbm %s8994_s7, 5120 }
  0x6e   :  { %p7277_p6 = scmp.ne.s32.totalorder %s8994_s7, %s7276_s12  ;;  %p7280_p7 = scmp.lt.u32.totalorder %s7276_s12, %s8994_s7 }
  0x70   :  { %p7282_p8 = pnand %p7280_p7, %p7277_p6 }
  0x72   :  { %7285 = shalt.err (!%p7282_p8)
}
  0x73   :  { %s7286_s6 = scalar_lea.vmem %s84_s8, 5120  ;;  %p7291_p10 = scmp.lt.s32.totalorder %s84_s8, %s84_s8 }
  0x74   :  { %p7287_p9 = scmp.ne.s32.totalorder %s84_s8, %s7286_s6  ;;  %p7292_p11 = scmp.lt.s32.totalorder %s7286_s6, %s7286_s6 }
  0x76   :  { %p7293_p12 = por %p7292_p11, %p7291_p10 }
  0x78   :  { %p7294_p13 = pnand %p7293_p12, %p7287_p9 }
  0x7a   :  { %7297 = shalt.err (!%p7294_p13)
}
  0x7b   :  { %89 = dma.hbm_to_vmem [thread:$0]  %s8994_s7, 5120, %s84_s8, [#allocation10], %s7381_s21, %s7381_s21, %s7382_s0  }
  0x7c   :  { %s7385_s27 = smov [#allocation14]   ;;  %s7386_s19 = smov [#allocation17]  }
  0x7d   :  { %s110_s18 = sshll.u32 %s7385_s27, 4  ;;  %s131_s4 = sshll.u32 %s7386_s19, 4  ;;  %s111_s18 = int_to_ptr.vmem [resolvable:$true] %s110_s18  ;;  %s132_s4 = int_to_ptr.vmem [resolvable:$true] %s131_s4 }
  0x7e   :  { %s7298_s25 = scalar_lea.hbm %s8998_s11, 16 }
  0x7f   :  { %p7299_p0 = scmp.ne.s32.totalorder %s8998_s11, %s7298_s25  ;;  %p7302_p1 = scmp.lt.u32.totalorder %s7298_s25, %s8998_s11 }
  0x81   :  { %p7304_p2 = pnand %p7302_p1, %p7299_p0 }
  0x83   :  { %7307 = shalt.err (!%p7304_p2)
}
  0x84   :  { %s7308_s7 = scalar_lea.vmem %s111_s18, 16  ;;  %s7312_s8 = scalar_lea.vmem %s111_s18, 32 }
  0x85   :  { %p7309_p3 = scmp.ne.s32.totalorder %s111_s18, %s7308_s7  ;;  %p7313_p4 = scmp.lt.s32.totalorder %s111_s18, %s111_s18 }
  0x86   :  { %p7314_p5 = scmp.lt.s32.totalorder %s7312_s8, %s7308_s7 }
  0x88   :  { %p7315_p6 = por %p7314_p5, %p7313_p4 }
  0x8a   :  { %p7316_p7 = pnand %p7315_p6, %p7309_p3 }
  0x8c   :  { %7319 = shalt.err (!%p7316_p7)
}
  0x8d   :  { %113 = dma.hbm_to_vmem [thread:$0]  %s8998_s11, 16, %s111_s18, [#allocation13]  }
  0x8e   :  { %s7320_s6 = scalar_lea.hbm %s9000_s13, 512 }
  0x8f   :  { %p7321_p8 = scmp.ne.s32.totalorder %s9000_s13, %s7320_s6  ;;  %p7324_p9 = scmp.lt.u32.totalorder %s7320_s6, %s9000_s13 }
  0x91   :  { %p7326_p10 = pnand %p7324_p9, %p7321_p8 }
  0x93   :  { %7329 = shalt.err (!%p7326_p10)
}
  0x94   :  { %s7330_s20 = scalar_lea.vmem %s132_s4, 512  ;;  %p7335_p12 = scmp.lt.s32.totalorder %s132_s4, %s132_s4 }
  0x95   :  { %p7331_p11 = scmp.ne.s32.totalorder %s132_s4, %s7330_s20  ;;  %p7336_p13 = scmp.lt.s32.totalorder %s7330_s20, %s7330_s20 }
  0x97   :  { %p7337_p0 = por %p7336_p13, %p7335_p12 }
  0x99   :  { %p7338_p1 = pnand %p7337_p0, %p7331_p11 }
  0x9b   :  { %7341 = shalt.err (!%p7338_p1)
}
  0x9c   :  { %137 = dma.hbm_to_vmem [thread:$0]  %s9000_s13, 512, %s132_s4, [#allocation16], %s7381_s21, %s7381_s21, %s7382_s0  }
  0x9d   :  { %7364 = dma.done.wait [#allocation4], 5120  }
  0x9e   :  { %7365 = vsyncadd [#allocation4], 4294962176 }
  0x9f   :  { %7366 = dma.done.wait [#allocation7], 5136  }
  0xa0   :  { %7367 = vsyncadd [#allocation7], 4294962160 }
  0xa1   :  { %7368 = dma.done.wait [#allocation10], 5136  }
  0xa2   :  { %7369 = vsyncadd [#allocation10], 4294962160 }
  0xa3   :  { %7370 = dma.done.wait [#allocation13], 32  }
  0xa4   :  { %7371 = vsyncadd [#allocation13], 4294967264 }
  0xa5   :  { %7372 = dma.done.wait [#allocation16], 1024  }
  0xa6   :  { %7373 = vsyncadd [#allocation16], 4294966272  ;;  %v7387_v0 = vmov 0.0   ;;  %vm7388_vm0 = vmmov 0   ;;  %vm190_vm1 = vcmask 1042432   ;;  %vm191_vm2 = vcmask 1046532  }
  0xa7   :  { %5975 = vmatprep.subr.mxu0 %v7387_v0  ;;  %5992 = vmatprep.subr.mxu1 %v7387_v0  ;;  %s9009_s4 = sld [smem:[#allocation26_spill]]  ;;  %s9010_s24 = sld [smem:[#allocation25_spill]]  ;;  %vm232_vm3 = vcmask 64512   ;;  %vm7653_vm4 = vmor %vm190_vm1, %vm191_vm2  ;;  %vm438_vm5 = vcmask 1041408   ;;  %vm439_vm6 = vcmask 1045508   ;;  %vm585_vm7 = vcmask 1040384  }
  0xa8   :  { %5977 = vmatprep.mubr.msk.f32.mxu0 %vm7388_vm0, %v7387_v0  ;;  %5994 = vmatprep.mubr.msk.f32.mxu1 %vm7388_vm0, %v7387_v0  ;;  %vm586_vm8 = vcmask 1044484   ;;  %vm7773_vm10 = vmor %vm438_vm5, %vm439_vm6  ;;  %vm918_vm11 = vcmask 523264   ;;  %s7391_s3 = smov 120   ;;  %s7392_s25 = smov 96   ;;  %vm3517_vm12 = vcmask 130048   ;;  %vm3520_vm13 = vcmask 195584  }
  0xa9   :  { %vm7753_vm9 = vmor %vm585_vm7, %vm586_vm8  ;;  %s7393_s22 = smov 104   ;;  %s7394_s23 = smov 88   ;;  %vm3523_vm14 = vcmask 261120   ;;  %vm3526_vm15 = vcmask 326656   ;;  %vm3529_vm1 = vcmask 392192   ;;  %vm3532_vm2 = vcmask 457728  }
  0xaa   :  { %s7396_s12 = smov 72   ;;  %s7399_s7 = smov 16  }
  0xab   :  { %s7400_s8 = smov 24   ;;  %s7401_s27 = smov 32  }
  0xac   :  { %s7402_s13 = smov 40   ;;  %s7404_s1 = smov 56  }
  0xad   :  { %v5523_v1 = vld [vmem:[%s9009_s4 + $0x8] sm:$0xff]  ;;  %v187_v2 = vld [vmem:[%s9009_s4] sm:$0xff]  ;;  %v7650_v7 = vld [vmem:[%s9010_s24 + $0x10] sm:$0xff] }
  0xae   :  { %v7635_v3 = vld [vmem:[%s9010_s24] sm:$0xff]  ;;  %5976 = vmatpush3.msra.mxu0 %v5523_v1  ;;  %5993 = vmatpush3.msra.mxu1 %v187_v2  ;;  %v7640_v4 = vld [vmem:[%s9010_s24 + $0x8] sm:$0xff]  ;;  %v204_v11 = vrot.slane %v7650_v7, 5  ;;  %v7666_v12 = vld [vmem:[%s9010_s24 + $0x18] sm:$0xff]  ;;  %v7670_v13 = vcombine.high %v7650_v7, %v7650_v7 }
  0xaf   :  { %v7644_v5 = vcombine.high %v7635_v3, %v7635_v3  ;;  %v5521_v6 = vrot.slane %v7635_v3, 9  ;;  %6009 = vmatprep.subr.mxu0 %v7387_v0  ;;  %v198_v9 = vrot.slane %v7640_v4, 5  ;;  %v7660_v10 = vcombine.high %v7640_v4, %v7640_v4  ;;  %6026 = vmatprep.subr.mxu1 %v7387_v0  ;;  %v7684_v18 = vld [vmem:[%s9010_s24 + $0x20] sm:$0xff]  ;;  %v5544_v19 = vld [vmem:[%s9009_s4 + $0x18] sm:$0xff]  ;;  %v7706_v30 = vld [vmem:[%s9010_s24 + $0x28] sm:$0xff]  ;;  %s7395_s24 = smov 80  }
  0xb0   :  { %v7678_v16 = vcombine.high %v7666_v12, %v7666_v12  ;;  %v5522_v17 = vrot.slane %v7666_v12, 9  ;;  %v206_v23 = vrot.slane %v204_v11, 4  ;;  %v207_v26 = vrot.slane %v7670_v13, 5  ;;  %v5536_v34 = vld [vmem:[%s9009_s4 + $0x10] sm:$0xff] }
  0xb1   :  { %v195_v14 = vrot.slane %v7644_v5, 5  ;;  %v333_v15 = vcombine.low %v7635_v3, %v7644_v5  ;;  %v200_v20 = vrot.slane %v198_v9, 4  ;;  %v201_v21 = vrot.slane %v7660_v10, 5 }
  0xb2   :  { %v334_v22 = vcombine.low %v7640_v4, %v7660_v10  ;;  %v211_v27 = vrot.slane %v7678_v16, 5  ;;  %v7701_v29 = vcombine.high %v7684_v18, %v7684_v18  ;;  %v335_v36 = vcombine.low %v7650_v7, %v7666_v12 }
  0xb3   :  { %v196_v24 = vsel %vm7653_vm4, %v5521_v6, %v195_v14  ;;  %v197_v25 = vrot.slane %v195_v14, 4  ;;  %5995 = vmatmul.mubr.msk.f32.vlgmr.msra.gmra.mrb[0].mxu1 %vm232_vm3, %v333_v15  ;;  %v203_v28 = vrot.slane %v201_v21, 4  ;;  %v202_v32 = vsel %vm7653_vm4, %v200_v20, %v201_v21 }
  0xb4   :  { %5997 = vmatprep.mubr.msk.f32.mxu1 %vm7388_vm0, %v7387_v0  ;;  %6027 = vmatpush3.msra.mxu1 %v5544_v19  ;;  %v214_v37 = vrot.slane %v7684_v18, 5  ;;  %v208_v38 = vsel %vm7653_vm4, %v206_v23, %v207_v26  ;;  %v212_v39 = vsel %vm7653_vm4, %v5522_v17, %v211_v27  ;;  %v213_v40 = vrot.slane %v211_v27, 4 }
  0xb5   :  { %v199_v31 = vsel %vm7653_vm4, %v197_v25, %v198_v9  ;;  %v205_v35 = vsel %vm7653_vm4, %v203_v28, %v204_v11  ;;  %v7727_v41 = vcombine.high %v7706_v30, %v7706_v30  ;;  %v217_v44 = vrot.slane %v7701_v29, 5 }
  0xb6   :  { %v227_v33 = vcombine.low %v196_v24, %v199_v31  ;;  %v228_v42 = vcombine.low %v202_v32, %v205_v35  ;;  %v216_v43 = vrot.slane %v214_v37, 4  ;;  %v220_v45 = vrot.slane %v7706_v30, 5 }
  0xb7   :  { %5998 = vmatmul.mubr.msk.f32.gmra.mrb[2].mxu1 %vm232_vm3, %v334_v22  ;;  %v229_v46 = vcombine.low %v208_v38, %v212_v39  ;;  %v443_v47 = vrot.slane %v7644_v5, 6  ;;  %v5542_v48 = vrot.slane %v7635_v3, 11  ;;  %v590_v49 = vrot.slane %v7644_v5, 7 }
  0xb8   :  { %5978 = vmatmul.mubr.msk.f32.vlgmr.msra.gmra.mrb[0].mxu0 %vm232_vm3, %v227_v33  ;;  %6000 = vmatprep.mubr.msk.f32.mxu1 %vm7388_vm0, %v7387_v0  ;;  %v336_v50 = vcombine.low %v7678_v16, %v7684_v18  ;;  %v219_v51 = vrot.slane %v217_v44, 4  ;;  %v222_v52 = vrot.slane %v220_v45, 4  ;;  %v223_v53 = vrot.slane %v7727_v41, 5 }
  0xb9   :  { %6010 = vmatpush3.msra.mxu0 %v5536_v34  ;;  %5980 = vmatprep.mubr.msk.f32.mxu0 %vm7388_vm0, %v7387_v0  ;;  %v215_v54 = vsel %vm7653_vm4, %v213_v40, %v214_v37  ;;  %v218_v55 = vsel %vm7653_vm4, %v216_v43, %v217_v44  ;;  %v592_v57 = vrot.slane %v590_v49, 4  ;;  %v593_v58 = vrot.slane %v7640_v4, 7 }
  0xba   :  { %6043 = vmatprep.subr.mxu0 %v7387_v0  ;;  %v337_v59 = vcombine.low %v7701_v29, %v7706_v30  ;;  %v5534_v60 = vrot.slane %v7635_v3, 10  ;;  %v445_v61 = vrot.slane %v443_v47, 4  ;;  %v446_v62 = vrot.slane %v7640_v4, 6 }
  0xbb   :  { %6001 = vmatmul.mubr.msk.f32.gmra.mrb[4].mxu1 %vm232_vm3, %v335_v36  ;;  %v449_v63 = vrot.slane %v7660_v10, 6  ;;  %v596_v1 = vrot.slane %v7660_v10, 7  ;;  %v230_v2 = vcombine.low %v215_v54, %v218_v55  ;;  %v221_v6 = vsel %vm7653_vm4, %v219_v51, %v220_v45 }
  0xbc   :  { %5981 = vmatmul.mubr.msk.f32.gmra.mrb[2].mxu0 %vm232_vm3, %v228_v42  ;;  %6003 = vmatprep.mubr.msk.f32.mxu1 %vm7388_vm0, %v7387_v0  ;;  %v224_v9 = vsel %vm7653_vm4, %v222_v52, %v223_v53  ;;  %v591_v11 = vsel %vm7753_vm9, %v5542_v48, %v590_v49  ;;  %v594_v14 = vsel %vm7753_vm9, %v592_v57, %v593_v58  ;;  %v595_v15 = vrot.slane %v593_v58, 4 }
  0xbd   :  { %5983 = vmatprep.mubr.msk.f32.mxu0 %vm7388_vm0, %v7387_v0  ;;  %v598_v17 = vrot.slane %v596_v1, 4  ;;  %v599_v19 = vrot.slane %v7650_v7, 7  ;;  %v448_v20 = vrot.slane %v446_v62, 4  ;;  %v444_v21 = vsel %vm7773_vm10, %v5534_v60, %v443_v47 }
  0xbe   :  { %v447_v22 = vsel %vm7773_vm10, %v445_v61, %v446_v62  ;;  %v451_v23 = vrot.slane %v449_v63, 4  ;;  %v452_v24 = vrot.slane %v7650_v7, 6  ;;  %v231_v25 = vcombine.low %v221_v6, %v224_v9 }
  0xbf   :  { %6004 = vmatmul.mubr.msk.f32.gmra.mrb[6].mxu1 %vm232_vm3, %v336_v50  ;;  %v622_v26 = vcombine.low %v591_v11, %v594_v14  ;;  %v601_v27 = vrot.slane %v599_v19, 4  ;;  %v602_v28 = vrot.slane %v7670_v13, 7  ;;  %v597_v31 = vsel %vm7753_vm9, %v595_v15, %v596_v1  ;;  %v5550_v50 = vld [vmem:[%s9009_s4 + $0x20] sm:$0xff] }
  0xc0   :  { %5984 = vmatmul.mubr.msk.f32.gmra.mrb[4].mxu0 %vm232_vm3, %v229_v46  ;;  %6006 = vmatprep.mubr.msk.f32.mxu1 %vm7388_vm0, %v7387_v0  ;;  %v600_v32 = vsel %vm7753_vm9, %v598_v17, %v599_v19  ;;  %v5543_v33 = vrot.slane %v7666_v12, 11  ;;  %v606_v34 = vrot.slane %v7678_v16, 7  ;;  %v475_v35 = vcombine.low %v444_v21, %v447_v22 }
  0xc1   :  { %5986 = vmatprep.mubr.msk.f32.mxu0 %vm7388_vm0, %v7387_v0  ;;  %v450_v36 = vsel %vm7773_vm10, %v448_v20, %v449_v63  ;;  %v609_v37 = vrot.slane %v7684_v18, 7  ;;  %v453_v38 = vsel %vm7773_vm10, %v451_v23, %v452_v24  ;;  %v454_v39 = vrot.slane %v452_v24, 4 }
  0xc2   :  { %v455_v40 = vrot.slane %v7670_v13, 6  ;;  %v5535_v42 = vrot.slane %v7666_v12, 10  ;;  %v623_v43 = vcombine.low %v597_v31, %v600_v32  ;;  %v459_v44 = vrot.slane %v7678_v16, 6  ;;  %v910_v32 = vld [vmem:[#allocation3 + $0x60] sm:$0xff] }
  0xc3   :  { %6007 = vmatmul.mubr.msk.f32.gmra.mrb[8].mxu1 %vm232_vm3, %v337_v59  ;;  %v603_v45 = vsel %vm7753_vm9, %v601_v27, %v602_v28  ;;  %v608_v46 = vrot.slane %v606_v34, 4  ;;  %v607_v47 = vsel %vm7753_vm9, %v5543_v33, %v606_v34  ;;  %v611_v13 = vrot.slane %v609_v37, 4  ;;  %v912_v33 = vld [vmem:[#allocation3 + $0x70] sm:$0xff]  ;;  %v913_v34 = vld [vmem:[#allocation3 + $0x78] sm:$0xff] }
  0xc4   :  { %5987 = vmatmul.mubr.msk.f32.gmra.mrb[6].mxu0 %vm232_vm3, %v230_v2  ;;  %6028 = vmatprep.mubr.msk.f32.mxu1 %vm7388_vm0, %v7387_v0  ;;  %v612_v48 = vrot.slane %v7701_v29, 7  ;;  %v615_v49 = vrot.slane %v7706_v30, 7  ;;  %v462_v16 = vrot.slane %v7684_v18, 6  ;;  %v476_v51 = vcombine.low %v450_v36, %v453_v38  ;;  %v871_v36 = vld [vmem:[#allocation3] sm:$0xff] }
  0xc5   :  { %5989 = vmatprep.mubr.msk.f32.mxu0 %vm7388_vm0, %v7387_v0  ;;  %v456_v52 = vsel %vm7773_vm10, %v454_v39, %v455_v40  ;;  %v460_v53 = vsel %vm7773_vm10, %v5535_v42, %v459_v44  ;;  %v624_v54 = vcombine.low %v603_v45, %v607_v47  ;;  %v461_v55 = vrot.slane %v459_v44, 4  ;;  %v1543_v47 = vld [vmem:[#allocation8 + $0x40] sm:$0xff] }
  0xc6   :  { %v610_v57 = vsel %vm7753_vm9, %v608_v46, %v609_v37  ;;  %v613_v58 = vsel %vm7753_vm9, %v611_v13, %v612_v48  ;;  %v614_v59 = vrot.slane %v612_v48, 4  ;;  %v617_v60 = vrot.slane %v615_v49, 4  ;;  %v872_v37 = vld [vmem:[#allocation3 + $0x8] sm:$0xff] }
  0xc7   :  { %6029 = vmatmul.mubr.msk.f32.vlgmr.msra.gmra.mrb[10].mxu1 %vm232_vm3, %v622_v26  ;;  %v618_v61 = vrot.slane %v7727_v41, 7  ;;  %v464_v62 = vrot.slane %v462_v16, 4  ;;  %v465_v63 = vrot.slane %v7701_v29, 6  ;;  %v468_v1 = vrot.slane %v7706_v30, 6  ;;  %v1544_v13 = vld [vmem:[#allocation8 + $0x48] sm:$0xff] }
  0xc8   :  { %5990 = vmatmul.mubr.msk.f32.gmra.mrb[8].mxu0 %vm232_vm3, %v231_v25  ;;  %6031 = vmatprep.mubr.msk.f32.mxu1 %vm7388_vm0, %v7387_v0  ;;  %v477_v2 = vcombine.low %v456_v52, %v460_v53  ;;  %v625_v6 = vcombine.low %v610_v57, %v613_v58  ;;  %v463_v9 = vsel %vm7773_vm10, %v461_v55, %v462_v16  ;;  %v471_v20 = vrot.slane %v7727_v41, 6 }
  0xc9   :  { %6011 = vmatprep.mubr.msk.f32.mxu0 %vm7388_vm0, %v7387_v0  ;;  %v616_v11 = vsel %vm7753_vm9, %v614_v59, %v615_v49  ;;  %v619_v14 = vsel %vm7753_vm9, %v617_v60, %v618_v61  ;;  %v466_v15 = vsel %vm7773_vm10, %v464_v62, %v465_v63  ;;  %v467_v17 = vrot.slane %v465_v63, 4 }
  0xca   :  { %v470_v19 = vrot.slane %v468_v1, 4  ;;  %v626_v21 = vcombine.low %v616_v11, %v619_v14  ;;  %v478_v22 = vcombine.low %v463_v9, %v466_v15  ;;  %v734_v26 = vcombine.low %v7644_v5, %v7640_v4 }
  0xcb   :  { %6032 = vmatmul.mubr.msk.f32.gmra.mrb[12].mxu1 %vm232_vm3, %v623_v43  ;;  %v469_v23 = vsel %vm7773_vm10, %v467_v17, %v468_v1  ;;  %v735_v27 = vcombine.low %v7660_v10, %v7650_v7  ;;  %v5551_v28 = vcombine.high %v7650_v7, %v7666_v12  ;;  %v737_v4 = vcombine.low %v7684_v18, %v7701_v29  ;;  %v906_v7 = vld [vmem:[#allocation3 + $0x40] sm:$0xff]  ;;  %v907_v10 = vld [vmem:[#allocation3 + $0x48] sm:$0xff]  ;;  %v908_v18 = vld [vmem:[#allocation3 + $0x50] sm:$0xff] }
  0xcc   :  { %6012 = vmatmul.mubr.msk.f32.vlgmr.msra.gmra.mrb[10].mxu0 %vm232_vm3, %v475_v35  ;;  %6034 = vmatprep.mubr.msk.f32.mxu1 %vm7388_vm0, %v7387_v0  ;;  %v472_v24 = vsel %vm7773_vm10, %v470_v19, %v471_v20  ;;  %v738_v5 = vcombine.low %v7706_v30, %v7727_v41  ;;  %v6607_v12 = vpack.c.bf16 %v907_v10, %v906_v7  ;;  %v909_v29 = vld [vmem:[#allocation3 + $0x58] sm:$0xff]  ;;  %v911_v30 = vld [vmem:[#allocation3 + $0x68] sm:$0xff]  ;;  %v7389_v49 = vmov 0.0|0.0  }
  0xcd   :  { %6044 = vmatpush3.msra.mxu0 %v5550_v50  ;;  %6014 = vmatprep.mubr.msk.f32.mxu0 %vm7388_vm0, %v7387_v0  ;;  %v479_v25 = vcombine.low %v469_v23, %v472_v24  ;;  %v6611_v31 = vpack.c.bf16 %v909_v29, %v908_v18  ;;  %v6615_v41 = vpack.c.bf16 %v911_v30, %v910_v32 }
  0xce   :  { %6608 = vmatprep.subr.bf16.mxu1 %v6607_v12  ;;  %v6619_v35 = vpack.c.bf16 %v913_v34, %v912_v33  ;;  %v7903_v38 = vpack.c.bf16 %v872_v37, %v871_v36  ;;  %6687 = vmatprep.subr.bf16.mxu0 %v7389_v49  ;;  %v6688_v16 = vpack.c.bf16 %v1544_v13, %v1543_v47  ;;  %v874_v47 = vld [vmem:[#allocation3 + $0x18] sm:$0xff]  ;;  %v875_v13 = vld [vmem:[#allocation3 + $0x20] sm:$0xff] }
  0xcf   :  { %6035 = vmatmul.mubr.msk.f32.gmra.mrb[14].mxu1 %vm232_vm3, %v624_v54 }
  0xd0   :  { %6015 = vmatmul.mubr.msk.f32.gmra.mrb[12].mxu0 %vm232_vm3, %v476_v51  ;;  %6037 = vmatprep.mubr.msk.f32.mxu1 %vm7388_vm0, %v7387_v0 }
  0xd1   :  { %6017 = vmatprep.mubr.msk.f32.mxu0 %vm7388_vm0, %v7387_v0  ;;  %6610 = vmatpush3.bf16.msra.mxu1 %v6607_v12 }
  0xd2   :  { %6612 = vmatprep.subr.bf16.mxu1 %v6611_v31 }
  0xd3   :  { %6038 = vmatmul.mubr.msk.f32.gmra.mrb[16].mxu1 %vm232_vm3, %v625_v6 }
  0xd4   :  { %6018 = vmatmul.mubr.msk.f32.gmra.mrb[14].mxu0 %vm232_vm3, %v477_v2  ;;  %6040 = vmatprep.mubr.msk.f32.mxu1 %vm7388_vm0, %v7387_v0 }
  0xd5   :  { %6020 = vmatprep.mubr.msk.f32.mxu0 %vm7388_vm0, %v7387_v0  ;;  %6614 = vmatpush3.bf16.msra.mxu1 %v6611_v31 }
  0xd6   :  { %6616 = vmatprep.subr.bf16.mxu1 %v6615_v41 }
  0xd7   :  { %6041 = vmatmul.mubr.msk.f32.gmra.mrb[18].mxu1 %vm232_vm3, %v626_v21 }
  0xd8   :  { %6021 = vmatmul.mubr.msk.f32.gmra.mrb[16].mxu0 %vm232_vm3, %v478_v22 }
  0xd9   :  { %6023 = vmatprep.mubr.msk.f32.mxu0 %vm7388_vm0, %v7387_v0  ;;  %6618 = vmatpush3.bf16.msra.mxu1 %v6615_v41 }
  0xda   :  { %6620 = vmatprep.subr.bf16.mxu1 %v6619_v35 }
  0xdc   :  { %6024 = vmatmul.mubr.msk.f32.gmra.mrb[18].mxu0 %vm232_vm3, %v479_v25 }
  0xdd   :  { %6045 = vmatprep.mubr.msk.f32.mxu0 %vm7388_vm0, %v7387_v0  ;;  %6622 = vmatpush3.bf16.msra.mxu1 %v6619_v35 }
  0xde   :  { %6624 = vmatprep.subr.bf16.mxu1 %v7903_v38 }
  0xe0   :  { %6046 = vmatmul.mubr.msk.f32.vlgmr.msra.gmra.mrb[20].mxu0 %vm232_vm3, %v734_v26 }
  0xe1   :  { %6048 = vmatprep.mubr.msk.f32.mxu0 %vm7388_vm0, %v7387_v0  ;;  %6689 = vmatpush3.bf16.msra.mxu0 %v6688_v16 }
  0xe2   :  { %6690 = vmatprep.subr.bf16.mxu0 %v7389_v49 }
  0xe4   :  { %6049 = vmatmul.mubr.msk.f32.gmra.mrb[22].mxu0 %vm232_vm3, %v735_v27 }
  0xe5   :  { %6051 = vmatprep.mubr.msk.f32.mxu0 %vm7388_vm0, %v7387_v0 }
  0xe8   :  { %6052 = vmatmul.mubr.msk.f32.gmra.mrb[24].mxu0 %vm232_vm3, %v5551_v28 }
  0xe9   :  { %6054 = vmatprep.mubr.msk.f32.mxu0 %vm7388_vm0, %v7387_v0 }
  0xec   :  { %6055 = vmatmul.mubr.msk.f32.gmra.mrb[26].mxu0 %vm232_vm3, %v737_v4 }
  0xed   :  { %6057 = vmatprep.mubr.msk.f32.mxu0 %vm7388_vm0, %v7387_v0 }
  0xf0   :  { %6058 = vmatmul.mubr.msk.f32.gmra.mrb[28].mxu0 %vm232_vm3, %v738_v5 }
  0xf1   :  { %6186 = vmatprep.mubr.msk.f32.mxu0 %vm7388_vm0, %v7387_v0 }
 0x186   :  { %v414_v39 = vpop.f32.mrb[0].mxu1 }
 0x187   :  { %v5996_v40 = vpop.f32.mrb[1].mxu1 }
 0x188   :  { %v7911_v40 = vld [vmem:[%s8989_s2] ss:$0 sm:$0xff]  ;;  %s7390_s2 = smov 112  }
 0x18a   :  { %v419_v42 = vpop.f32.mrb[2].mxu1 }
 0x18b   :  { %v309_v43 = vpop.f32.mrb[0].mxu0  ;;  %v5999_v44 = vpop.f32.mrb[3].mxu1 }
 0x18c   :  { %v415_v45 = vadd.f32 %v414_v39, %v309_v43  ;;  %v5979_v46 = vpop.f32.mrb[1].mxu0 }
 0x18d   :  { %v873_v46 = vld [vmem:[#allocation3 + $0x10] sm:$0xff] }
 0x18e   :  { %v424_v48 = vpop.f32.mrb[4].mxu1 }
 0x18f   :  { %v314_v50 = vpop.f32.mrb[2].mxu0  ;;  %v6002_v51 = vpop.f32.mrb[5].mxu1 }
 0x190   :  { %v420_v52 = vadd.f32 %v419_v42, %v314_v50  ;;  %v5982_v53 = vpop.f32.mrb[3].mxu0  ;;  %v876_v51 = vld [vmem:[#allocation3 + $0x28] sm:$0xff] }
 0x191   :  { %v878_v53 = vld [vmem:[#allocation3 + $0x38] sm:$0xff] }
 0x192   :  { %v429_v54 = vpop.f32.mrb[6].mxu1 }
 0x193   :  { %v319_v55 = vpop.f32.mrb[4].mxu0  ;;  %v6005_v57 = vpop.f32.mrb[7].mxu1 }
 0x194   :  { %v425_v58 = vadd.f32 %v424_v48, %v319_v55  ;;  %v5985_v59 = vpop.f32.mrb[5].mxu0 }
 0x195   :  { %v7923_v59 = vpack.c.bf16 %v876_v51, %v875_v13 }
 0x196   :  { %v434_v60 = vpop.f32.mrb[8].mxu1 }
 0x197   :  { %v324_v61 = vpop.f32.mrb[6].mxu0  ;;  %v6008_v62 = vpop.f32.mrb[9].mxu1 }
 0x198   :  { %v430_v63 = vadd.f32 %v429_v54, %v324_v61  ;;  %v5988_v1 = vpop.f32.mrb[7].mxu0 }
 0x19a   :  { %v703_v2 = vpop.f32.mrb[10].mxu1 }
 0x19b   :  { %v329_v6 = vpop.f32.mrb[8].mxu0  ;;  %v6030_v9 = vpop.f32.mrb[11].mxu1 }
 0x19c   :  { %v435_v11 = vadd.f32 %v434_v60, %v329_v6  ;;  %v5991_v14 = vpop.f32.mrb[9].mxu0 }
 0x19e   :  { %v708_v15 = vpop.f32.mrb[12].mxu1 }
 0x19f   :  { %v556_v17 = vpop.f32.mrb[10].mxu0  ;;  %v6033_v19 = vpop.f32.mrb[13].mxu1 }
 0x1a0   :  { %v580_v20 = vadd.f32 %v556_v17, %v415_v45  ;;  %v6013_v21 = vpop.f32.mrb[11].mxu0 }
 0x1a2   :  { %v727_v22 = vadd.f32 %v703_v2, %v580_v20  ;;  %v713_v23 = vpop.f32.mrb[14].mxu1 }
 0x1a3   :  { %v561_v24 = vpop.f32.mrb[12].mxu0  ;;  %v6036_v25 = vpop.f32.mrb[15].mxu1 }
 0x1a4   :  { %v581_v26 = vadd.f32 %v561_v24, %v420_v52  ;;  %v6016_v27 = vpop.f32.mrb[13].mxu0  ;;  %v877_v52 = vld [vmem:[#allocation3 + $0x30] sm:$0xff] }
 0x1a5   :  { %v7925_v60 = vpack.c.bf16 %v878_v53, %v877_v52 }
 0x1a6   :  { %v728_v28 = vadd.f32 %v708_v15, %v581_v26  ;;  %v718_v4 = vpop.f32.mrb[16].mxu1 }
 0x1a7   :  { %v566_v5 = vpop.f32.mrb[14].mxu0  ;;  %v6039_v7 = vpop.f32.mrb[17].mxu1 }
 0x1a8   :  { %v582_v10 = vadd.f32 %v566_v5, %v425_v58  ;;  %v6019_v12 = vpop.f32.mrb[15].mxu0  ;;  %v7921_v58 = vpack.c.bf16 %v874_v47, %v873_v46 }
 0x1aa   :  { %v729_v18 = vadd.f32 %v713_v23, %v582_v10  ;;  %v723_v29 = vpop.f32.mrb[18].mxu1 }
 0x1ab   :  { %v571_v31 = vpop.f32.mrb[16].mxu0  ;;  %v6042_v32 = vpop.f32.mrb[19].mxu1 }
 0x1ac   :  { %v583_v30 = vadd.f32 %v571_v31, %v430_v63  ;;  %v6022_v41 = vpop.f32.mrb[17].mxu0 }
 0x1ae   :  { %v730_v33 = vadd.f32 %v718_v4, %v583_v30 }
 0x1af   :  { %v576_v34 = vpop.f32.mrb[18].mxu0 }
 0x1b0   :  { %v584_v35 = vadd.f32 %v576_v34, %v435_v11  ;;  %v6025_v36 = vpop.f32.mrb[19].mxu0 }
 0x1b2   :  { %v731_v37 = vadd.f32 %v723_v29, %v584_v35 }
 0x1b3   :  { %v815_v39 = vpop.f32.mrb[20].mxu0 }
 0x1b4   :  { %v839_v42 = vadd.f32 %v815_v39, %v727_v22  ;;  %v6047_v43 = vpop.f32.mrb[21].mxu0 }
 0x1b6   :  { %v851_v44 = vadd.f32 %v7911_v40, %v839_v42 }
 0x1b7   :  { %v820_v45 = vpop.f32.mrb[22].mxu0 }
 0x1b8   :  { %v7914_v48 = vmax.f32 %v851_v44, 0.0  ;;  %v840_v16 = vadd.f32 %v820_v45, %v728_v28  ;;  %v6050_v50 = vpop.f32.mrb[23].mxu0 }
 0x1ba   :  { %v7918_v54 = vcombine.high %v7914_v48, %v7914_v48  ;;  %v852_v55 = vadd.f32 %v7911_v40, %v840_v16  ;;  %v5558_v1 = vrot.slane %v7914_v48, 9  ;;  %v5568_v9 = vrot.slane %v7914_v48, 10 }
 0x1bb   :  { %v825_v57 = vpop.f32.mrb[24].mxu0  ;;  %v5574_v14 = vrot.slane %v7914_v48, 11 }
 0x1bc   :  { %v7927_v61 = vmax.f32 %v852_v55, 0.0  ;;  %v841_v62 = vadd.f32 %v825_v57, %v729_v18  ;;  %v6053_v63 = vpop.f32.mrb[25].mxu0  ;;  %v881_v2 = vrot.slane %v7918_v54, 5  ;;  %v1012_v6 = vcombine.low %v7914_v48, %v7918_v54  ;;  %v1138_v48 = vld [vmem:[#allocation3 + $0x90] sm:$0xff] }
 0x1bd   :  { %v1111_v11 = vrot.slane %v7918_v54, 6  ;;  %v1247_v20 = vrot.slane %v7918_v54, 7 }
 0x1be   :  { %v7938_v15 = vcombine.high %v7927_v61, %v7927_v61  ;;  %v853_v17 = vadd.f32 %v7911_v40, %v841_v62  ;;  %v883_v19 = vrot.slane %v881_v2, 4  ;;  %v882_v22 = vsel %vm7653_vm4, %v5558_v1, %v881_v2 }
 0x1bf   :  { %v830_v21 = vpop.f32.mrb[26].mxu0  ;;  %v884_v23 = vrot.slane %v7927_v61, 5  ;;  %v1113_v24 = vrot.slane %v1111_v11, 4  ;;  %v1114_v25 = vrot.slane %v7927_v61, 6  ;;  %v7951_v5 = vsel %vm7773_vm10, %v5568_v9, %v1111_v11 }
 0x1c0   :  { %v7946_v26 = vmax.f32 %v853_v17, 0.0  ;;  %v842_v27 = vadd.f32 %v830_v21, %v730_v33  ;;  %v6056_v28 = vpop.f32.mrb[27].mxu0  ;;  %v887_v4 = vrot.slane %v7938_v15, 5  ;;  %v1117_v47 = vrot.slane %v7938_v15, 6 }
 0x1c1   :  { %v885_v7 = vsel %vm7653_vm4, %v883_v19, %v884_v23  ;;  %v886_v10 = vrot.slane %v884_v23, 4  ;;  %v7957_v12 = vsel %vm7773_vm10, %v1113_v24, %v1114_v25  ;;  %v1116_v18 = vrot.slane %v1114_v25, 4 }
 0x1c2   :  { %v7961_v29 = vcombine.high %v7946_v26, %v7946_v26  ;;  %v890_v31 = vrot.slane %v7946_v26, 5  ;;  %v1120_v32 = vrot.slane %v7946_v26, 6  ;;  %v1256_v30 = vrot.slane %v7946_v26, 7 }
 0x1c3   :  { %v1391_v41 = vcombine.low %v7938_v15, %v7946_v26  ;;  %v854_v33 = vadd.f32 %v7911_v40, %v842_v27  ;;  %v835_v34 = vpop.f32.mrb[28].mxu0  ;;  %v914_v35 = vcombine.low %v882_v22, %v885_v7  ;;  %v888_v36 = vsel %vm7653_vm4, %v886_v10, %v887_v4 }
 0x1c4   :  { %v843_v39 = vadd.f32 %v835_v34, %v731_v37  ;;  %v6059_v42 = vpop.f32.mrb[29].mxu0  ;;  %v889_v43 = vrot.slane %v887_v4, 4  ;;  %v5559_v44 = vrot.slane %v7961_v29, 9  ;;  %v1144_v45 = vcombine.low %v7951_v5, %v7957_v12  ;;  %v1278_v12 = vld [vmem:[#allocation3 + $0xf0] sm:$0xff] }
 0x1c5   :  { %v7974_v46 = vmax.f32 %v854_v33, 0.0  ;;  %6076 = vmatprep.mubr.msk.f32.mxu1 %vm918_vm11, %v914_v35  ;;  %v5569_v13 = vrot.slane %v7961_v29, 10  ;;  %v7981_v16 = vsel %vm7753_vm9, %v5574_v14, %v1247_v20  ;;  %v1249_v51 = vrot.slane %v1247_v20, 4  ;;  %v1136_v42 = vld [vmem:[#allocation3 + $0x80] sm:$0xff] }
 0x1c6   :  { %v855_v37 = vadd.f32 %v7911_v40, %v843_v39  ;;  %v891_v50 = vsel %vm7653_vm4, %v889_v43, %v890_v31  ;;  %v1250_v52 = vrot.slane %v7927_v61, 7  ;;  %v7998_v40 = vsel %vm7773_vm10, %v1116_v18, %v1117_v47  ;;  %v1137_v43 = vld [vmem:[#allocation3 + $0x88] sm:$0xff] }
 0x1c7   :  { %v7989_v53 = vcombine.high %v7974_v46, %v7974_v46  ;;  %v915_v55 = vcombine.low %v888_v36, %v891_v50  ;;  %v894_v57 = vrot.slane %v7974_v46, 5  ;;  %v1014_v62 = vcombine.low %v7961_v29, %v7974_v46 }
 0x1c8   :  { %v7994_v63 = vmax.f32 %v855_v37, 0.0  ;;  %v1119_v1 = vrot.slane %v1117_v47, 4  ;;  %v1124_v2 = vrot.slane %v7974_v46, 6  ;;  %v8042_v35 = vsel %vm7753_vm9, %v1249_v51, %v1250_v52 }
 0x1c9   :  { %6077 = vmatmul.mubr.msk.f32.vlgmr.msra.gmra.mrb[20].mxu1 %vm918_vm11, %v915_v55  ;;  %v895_v9 = vsel %vm7653_vm4, %v5559_v44, %v894_v57  ;;  %v896_v11 = vrot.slane %v894_v57, 4  ;;  %v897_v14 = vrot.slane %v7989_v53, 5  ;;  %v1127_v17 = vrot.slane %v7989_v53, 6 }
 0x1ca   :  { %6626 = vmatpush3.bf16.msra.mxu1 %v7903_v38  ;;  %v8009_v19 = vcombine.high %v7994_v63, %v7994_v63  ;;  %v900_v20 = vrot.slane %v7994_v63, 5  ;;  %v1015_v21 = vcombine.low %v7989_v53, %v7994_v63  ;;  %v8016_v22 = vsel %vm7773_vm10, %v1119_v1, %v1120_v32 }
 0x1cb   :  { %6628 = vmatprep.subr.bf16.mxu1 %v7921_v58  ;;  %v898_v23 = vsel %vm7653_vm4, %v896_v11, %v897_v14  ;;  %v899_v24 = vrot.slane %v897_v14, 4  ;;  %v1145_v38 = vcombine.low %v7998_v40, %v8016_v22  ;;  %v8025_v25 = vsel %vm7773_vm10, %v5569_v13, %v1124_v2  ;;  %v1382_v22 = vld [vmem:[#allocation3 + $0x100] sm:$0xff] }
 0x1cc   :  { %v916_v27 = vcombine.low %v895_v9, %v898_v23  ;;  %v902_v28 = vrot.slane %v900_v20, 4  ;;  %v903_v4 = vrot.slane %v8009_v19, 5  ;;  %v1126_v7 = vrot.slane %v1124_v2, 4 }
 0x1cd   :  { %v901_v10 = vsel %vm7653_vm4, %v899_v24, %v900_v20  ;;  %v1129_v18 = vrot.slane %v1127_v17, 4  ;;  %v1130_v31 = vrot.slane %v7994_v63, 6  ;;  %v1133_v32 = vrot.slane %v8009_v19, 6  ;;  %v1139_v24 = vld [vmem:[#allocation3 + $0x98] sm:$0xff] }
 0x1ce   :  { %6630 = vmatpush3.bf16.msra.mxu1 %v7921_v58  ;;  %6079 = vmatprep.mubr.msk.f32.mxu1 %vm918_vm11, %v916_v27  ;;  %v904_v33 = vsel %vm7653_vm4, %v902_v28, %v903_v4  ;;  %v8038_v34 = vsel %vm7773_vm10, %v1126_v7, %v1127_v17  ;;  %v1252_v36 = vrot.slane %v1250_v52, 4  ;;  %v1280_v13 = vcombine.low %v7981_v16, %v8042_v35  ;;  %v1388_v35 = vld [vmem:[#allocation3 + $0x130] sm:$0xff] }
 0x1cf   :  { %6632 = vmatprep.subr.bf16.mxu1 %v7923_v59  ;;  %v917_v39 = vcombine.low %v901_v10, %v904_v33  ;;  %v1146_v58 = vcombine.low %v8025_v25, %v8038_v34  ;;  %v8049_v44 = vsel %vm7773_vm10, %v1129_v18, %v1130_v31  ;;  %v1132_v47 = vrot.slane %v1130_v31, 4  ;;  %v1384_v34 = vld [vmem:[#allocation3 + $0x110] sm:$0xff] }
 0x1d0   :  { %v1253_v37 = vrot.slane %v7938_v15, 7  ;;  %v5575_v50 = vrot.slane %v7961_v29, 11  ;;  %v1260_v51 = vrot.slane %v7974_v46, 7  ;;  %v1263_v55 = vrot.slane %v7989_v53, 7 }
 0x1d1   :  { %6080 = vmatmul.mubr.msk.f32.gmra.mrb[22].mxu1 %vm918_vm11, %v917_v39  ;;  %v8059_v52 = vsel %vm7773_vm10, %v1132_v47, %v1133_v32  ;;  %v1266_v57 = vrot.slane %v7994_v63, 7  ;;  %v1269_v1 = vrot.slane %v8009_v19, 7  ;;  %v6639_v2 = vpack.c.bf16 %v1137_v43, %v1136_v42  ;;  %v1140_v39 = vld [vmem:[#allocation3 + $0xa0] sm:$0xff]  ;;  %v1141_v42 = vld [vmem:[#allocation3 + $0xa8] sm:$0xff]  ;;  %v1142_v43 = vld [vmem:[#allocation3 + $0xb0] sm:$0xff] }
 0x1d2   :  { %6634 = vmatpush3.bf16.msra.mxu1 %v7923_v59  ;;  %6098 = vmatprep.mubr.msk.f32.mxu1 %vm918_vm11, %v1012_v6  ;;  %v1147_v9 = vcombine.low %v8049_v44, %v8059_v52  ;;  %v1255_v11 = vrot.slane %v1253_v37, 4  ;;  %v8073_v14 = vsel %vm7753_vm9, %v5575_v50, %v1260_v51  ;;  %v1262_v17 = vrot.slane %v1260_v51, 4  ;;  %v1143_v44 = vld [vmem:[#allocation3 + $0xb8] sm:$0xff]  ;;  %v1272_v47 = vld [vmem:[#allocation3 + $0xc0] sm:$0xff]  ;;  %v1274_v50 = vld [vmem:[#allocation3 + $0xd0] sm:$0xff] }
 0x1d3   :  { %6636 = vmatprep.subr.bf16.mxu1 %v7925_v60  ;;  %v1265_v20 = vrot.slane %v1263_v55, 4  ;;  %v1268_v23 = vrot.slane %v1266_v57, 4  ;;  %v1390_v59 = vcombine.low %v7918_v54, %v7927_v61  ;;  %v8080_v6 = vsel %vm7753_vm9, %v1252_v36, %v1253_v37  ;;  %v1275_v51 = vld [vmem:[#allocation3 + $0xd8] sm:$0xff] }
 0x1d4   :  { %v8086_v27 = vsel %vm7753_vm9, %v1255_v11, %v1256_v30  ;;  %v1392_v28 = vcombine.low %v7974_v46, %v7989_v53  ;;  %v1393_v4 = vcombine.low %v7994_v63, %v8009_v19  ;;  %v1264_v10 = vsel %vm7753_vm9, %v1262_v17, %v1263_v55  ;;  %v1276_v55 = vld [vmem:[#allocation3 + $0xe0] sm:$0xff]  ;;  %v1977_v46 = vld [vmem:[#allocation8 + $0x128] sm:$0xff]  ;;  %v1978_v63 = vld [vmem:[#allocation8 + $0x130] sm:$0xff] }
 0x1d5   :  { %v1281_v7 = vcombine.low %v8080_v6, %v8086_v27  ;;  %v8098_v18 = vsel %vm7753_vm9, %v1265_v20, %v1266_v57  ;;  %v8102_v30 = vsel %vm7753_vm9, %v1268_v23, %v1269_v1  ;;  %v1282_v31 = vcombine.low %v8073_v14, %v1264_v10  ;;  %v1386_v1 = vld [vmem:[#allocation3 + $0x120] sm:$0xff]  ;;  %v1973_v14 = vld [vmem:[#allocation8 + $0x108] sm:$0xff]  ;;  %v1974_v20 = vld [vmem:[#allocation8 + $0x110] sm:$0xff] }
 0x1d6   :  { %6638 = vmatpush3.bf16.msra.mxu1 %v7925_v60  ;;  %v1283_v32 = vcombine.low %v8098_v18, %v8102_v30  ;;  %v1013_v33 = vcombine.low %v7927_v61, %v7938_v15  ;;  %v6643_v36 = vpack.c.bf16 %v1139_v24, %v1138_v48  ;;  %v6647_v60 = vpack.c.bf16 %v1141_v42, %v1140_v39  ;;  %v1972_v11 = vld [vmem:[#allocation8 + $0x100] sm:$0xff]  ;;  %v1975_v23 = vld [vmem:[#allocation8 + $0x118] sm:$0xff]  ;;  %v1545_v61 = vld [vmem:[#allocation8 + $0x50] sm:$0xff] }
 0x1d7   :  { %6640 = vmatprep.subr.bf16.mxu1 %v6639_v2  ;;  %v6651_v29 = vpack.c.bf16 %v1143_v44, %v1142_v43  ;;  %v6659_v52 = vpack.c.bf16 %v1275_v51, %v1274_v50  ;;  %v6736_v17 = vpack.c.bf16 %v1973_v14, %v1972_v11  ;;  %v6739_v54 = vpack.c.bf16 %v1975_v23, %v1974_v20  ;;  %v1546_v15 = vld [vmem:[#allocation8 + $0x58] sm:$0xff]  ;;  %v1548_v48 = vld [vmem:[#allocation8 + $0x68] sm:$0xff]  ;;  %v1549_v6 = vld [vmem:[#allocation8 + $0x70] sm:$0xff] }
 0x1d8   :  { %v6691_v26 = vpack.c.bf16 %v1546_v15, %v1545_v61  ;;  %v1979_v24 = vld [vmem:[#allocation8 + $0x138] sm:$0xff]  ;;  %v8164_v18 = vld [vmem:[#allocation8] sm:$0xff] }
 0x1d9   :  { %6099 = vmatmul.mubr.msk.f32.vlgmr.msra.gmra.mrb[20].mxu1 %vm918_vm11, %v1013_v33  ;;  %v1550_v27 = vld [vmem:[#allocation8 + $0x78] sm:$0xff]  ;;  %v8166_v33 = vld [vmem:[#allocation8 + $0x10] sm:$0xff]  ;;  %v8170_v42 = vld [vmem:[#allocation8 + $0x20] sm:$0xff] }
 0x1da   :  { %6101 = vmatprep.mubr.msk.f32.mxu1 %vm918_vm11, %v1014_v62  ;;  %6642 = vmatpush3.bf16.msra.mxu1 %v6639_v2  ;;  %v1273_v62 = vld [vmem:[#allocation3 + $0xc8] sm:$0xff] }
 0x1db   :  { %6644 = vmatprep.subr.bf16.mxu1 %v6643_v36  ;;  %v6655_v37 = vpack.c.bf16 %v1273_v62, %v1272_v47  ;;  %v1387_v2 = vld [vmem:[#allocation3 + $0x128] sm:$0xff]  ;;  %6692 = vmatpush3.bf16.msra.mxu0 %v6691_v26 }
 0x1dc   :  { %v6679_v16 = vpack.c.bf16 %v1387_v2, %v1386_v1  ;;  %6693 = vmatprep.subr.bf16.mxu0 %v7389_v49 }
 0x1dd   :  { %6102 = vmatmul.mubr.msk.f32.gmra.mrb[22].mxu1 %vm918_vm11, %v1015_v21  ;;  %v1277_v21 = vld [vmem:[#allocation3 + $0xe8] sm:$0xff] }
 0x1de   :  { %6646 = vmatpush3.bf16.msra.mxu1 %v6643_v36  ;;  %6120 = vmatprep.mubr.msk.f32.mxu1 %vm918_vm11, %v1144_v45  ;;  %v6663_v5 = vpack.c.bf16 %v1277_v21, %v1276_v55  ;;  %v1279_v45 = vld [vmem:[#allocation3 + $0xf8] sm:$0xff] }
 0x1df   :  { %6648 = vmatprep.subr.bf16.mxu1 %v6647_v60  ;;  %v6667_v40 = vpack.c.bf16 %v1279_v45, %v1278_v12  ;;  %v8168_v36 = vld [vmem:[#allocation8 + $0x18] sm:$0xff] }
 0x1e0   :  { %v6703_v62 = vpack.c.bf16 %v8168_v36, %v8166_v33 }
 0x1e2   :  { %6650 = vmatpush3.bf16.msra.mxu1 %v6647_v60  ;;  %v8172_v60 = vld [vmem:[#allocation8 + $0x28] sm:$0xff] }
 0x1e3   :  { %6652 = vmatprep.subr.bf16.mxu1 %v6651_v29  ;;  %v6706_v55 = vpack.c.bf16 %v8172_v60, %v8170_v42 }
 0x1e6   :  { %6654 = vmatpush3.bf16.msra.mxu1 %v6651_v29 }
 0x1e7   :  { %6656 = vmatprep.subr.bf16.mxu1 %v6655_v37 }
 0x1e9   :  { %6121 = vmatmul.mubr.msk.f32.vlgmr.msra.gmra.mrb[20].mxu1 %vm918_vm11, %v1145_v38  ;;  %v1383_v38 = vld [vmem:[#allocation3 + $0x108] sm:$0xff] }
 0x1ea   :  { %6123 = vmatprep.mubr.msk.f32.mxu1 %vm918_vm11, %v1146_v58  ;;  %6658 = vmatpush3.bf16.msra.mxu1 %v6655_v37  ;;  %v6671_v25 = vpack.c.bf16 %v1383_v38, %v1382_v22  ;;  %v1385_v58 = vld [vmem:[#allocation3 + $0x118] sm:$0xff] }
 0x1eb   :  { %6660 = vmatprep.subr.bf16.mxu1 %v6659_v52  ;;  %v6675_v57 = vpack.c.bf16 %v1385_v58, %v1384_v34 }
 0x1ed   :  { %6124 = vmatmul.mubr.msk.f32.gmra.mrb[22].mxu1 %vm918_vm11, %v1147_v9 }
 0x1ee   :  { %6662 = vmatpush3.bf16.msra.mxu1 %v6659_v52  ;;  %6142 = vmatprep.mubr.msk.f32.mxu1 %vm918_vm11, %v1280_v13  ;;  %v1389_v13 = vld [vmem:[#allocation3 + $0x138] sm:$0xff] }
 0x1ef   :  { %6664 = vmatprep.subr.bf16.mxu1 %v6663_v5  ;;  %v6683_v9 = vpack.c.bf16 %v1389_v13, %v1388_v35 }
 0x1f2   :  { %6666 = vmatpush3.bf16.msra.mxu1 %v6663_v5 }
 0x1f3   :  { %6668 = vmatprep.subr.bf16.mxu1 %v6667_v40 }
 0x1f6   :  { %6670 = vmatpush3.bf16.msra.mxu1 %v6667_v40 }
 0x1f7   :  { %6672 = vmatprep.subr.bf16.mxu1 %v6671_v25 }
 0x1f9   :  { %6143 = vmatmul.mubr.msk.f32.vlgmr.msra.gmra.mrb[20].mxu1 %vm918_vm11, %v1281_v7  ;;  %v5584_v7 = vld [vmem:[#allocation6] ss:$0 sm:$0xff] }
 0x1fa   :  { %6145 = vmatprep.mubr.msk.f32.mxu1 %vm918_vm11, %v1282_v31  ;;  %6674 = vmatpush3.bf16.msra.mxu1 %v6671_v25 }
 0x1fb   :  { %6676 = vmatprep.subr.bf16.mxu1 %v6675_v57 }
 0x1fd   :  { %6146 = vmatmul.mubr.msk.f32.gmra.mrb[22].mxu1 %vm918_vm11, %v1283_v32  ;;  %v1513_v32 = vld [vmem:[#allocation8 + $0x8] sm:$0xff] }
 0x1fe   :  { %6678 = vmatpush3.bf16.msra.mxu1 %v6675_v57  ;;  %6164 = vmatprep.mubr.msk.f32.mxu1 %vm918_vm11, %v1390_v59  ;;  %v1547_v59 = vld [vmem:[#allocation8 + $0x60] sm:$0xff]  ;;  %v6700_v47 = vpack.c.bf16 %v1513_v32, %v8164_v18 }
 0x1ff   :  { %6680 = vmatprep.subr.bf16.mxu1 %v6679_v16  ;;  %v6694_v19 = vpack.c.bf16 %v1548_v48, %v1547_v59 }
 0x201   :  { %6695 = vmatpush3.bf16.msra.mxu0 %v6694_v19 }
 0x202   :  { %6682 = vmatpush3.bf16.msra.mxu1 %v6679_v16  ;;  %6696 = vmatprep.subr.bf16.mxu0 %v7389_v49 }
 0x203   :  { %6684 = vmatprep.subr.bf16.mxu1 %v6683_v9 }
 0x206   :  { %6686 = vmatpush3.bf16.msra.mxu1 %v6683_v9 }
 0x207   :  { %6735 = vmatprep.subr.bf16.mxu1 %v7389_v49 }
 0x209   :  { %6165 = vmatmul.mubr.msk.f32.vlgmr.msra.gmra.mrb[20].mxu1 %vm918_vm11, %v1391_v41  ;;  %v1976_v41 = vld [vmem:[#allocation8 + $0x120] sm:$0xff] }
 0x20a   :  { %6167 = vmatprep.mubr.msk.f32.mxu1 %vm918_vm11, %v1392_v28  ;;  %6737 = vmatpush3.bf16.msra.mxu1 %v6736_v17  ;;  %v6742_v53 = vpack.c.bf16 %v1977_v46, %v1976_v41  ;;  %v6745_v28 = vpack.c.bf16 %v1979_v24, %v1978_v63 }
 0x20b   :  { %6738 = vmatprep.subr.bf16.mxu1 %v7389_v49 }
 0x20d   :  { %6168 = vmatmul.mubr.msk.f32.gmra.mrb[22].mxu1 %vm918_vm11, %v1393_v4  ;;  %v6697_v4 = vpack.c.bf16 %v1550_v27, %v1549_v6 }
 0x20e   :  { %6740 = vmatpush3.bf16.msra.mxu1 %v6739_v54  ;;  %6286 = vmatprep.mubr.msk.f32.mxu1 %vm7388_vm0, %v7387_v0 }
 0x20f   :  { %6741 = vmatprep.subr.bf16.mxu1 %v7389_v49  ;;  %6698 = vmatpush3.bf16.msra.mxu0 %v6697_v4 }
 0x210   :  { %6699 = vmatprep.subr.bf16.mxu0 %v7389_v49 }
 0x212   :  { %6743 = vmatpush3.bf16.msra.mxu1 %v6742_v53 }
 0x213   :  { %6744 = vmatprep.subr.bf16.mxu1 %v7389_v49 }
 0x216   :  { %6746 = vmatpush3.bf16.msra.mxu1 %v6745_v28 }
 0x2dc   :  { %v6166_v10 = vpop.f32.mrb[20].mxu1 }
 0x2dd   :  { %v1499_v30 = vadd.f32 %v6166_v10, %v5584_v7  ;;  %v1468_v31 = vpop.f32.mrb[21].mxu1 }
 0x2de   :  { %v1498_v39 = vadd.f32 %v5584_v7, %v1468_v31 }
 0x2df   :  { %v8174_v43 = vmax.f32 %v1499_v30, 0.0 }
 0x2e0   :  { %v8176_v44 = vmax.f32 %v1498_v39, 0.0  ;;  %v6169_v29 = vpop.f32.mrb[22].mxu1 }
 0x2e1   :  { %v1501_v37 = vadd.f32 %v6169_v29, %v5584_v7  ;;  %v1478_v50 = vpop.f32.mrb[23].mxu1  ;;  %v1527_v51 = vrot.slane %v8174_v43, 5  ;;  %v8184_v52 = vcombine.high %v8174_v43, %v8174_v43  ;;  %v1734_v45 = vrot.slane %v8174_v43, 6 }
 0x2e2   :  { %v8190_v21 = vcombine.high %v8176_v44, %v8176_v44  ;;  %v5585_v5 = vrot.slane %v8176_v44, 9  ;;  %v5593_v12 = vrot.slane %v8176_v44, 10  ;;  %v1500_v22 = vadd.f32 %v5584_v7, %v1478_v50 }
 0x2e3   :  { %v8195_v40 = vmax.f32 %v1501_v37, 0.0  ;;  %v1529_v38 = vrot.slane %v1527_v51, 4  ;;  %v1530_v25 = vrot.slane %v8184_v52, 5  ;;  %v5598_v57 = vrot.slane %v8176_v44, 11 }
 0x2e4   :  { %v1524_v34 = vrot.slane %v8190_v21, 5  ;;  %v1731_v58 = vrot.slane %v8190_v21, 6  ;;  %v1852_v1 = vrot.slane %v8190_v21, 7  ;;  %v8202_v2 = vmax.f32 %v1500_v22, 0.0 }
 0x2e5   :  { %v1980_v16 = vcombine.low %v8190_v21, %v8174_v43  ;;  %v8208_v35 = vcombine.high %v8195_v40, %v8195_v40  ;;  %v1531_v13 = vsel %vm7653_vm4, %v1529_v38, %v1530_v25  ;;  %v1537_v26 = vrot.slane %v8195_v40, 5 }
 0x2e6   :  { %v1525_v9 = vsel %vm7653_vm4, %v5585_v5, %v1524_v34  ;;  %v8216_v11 = vsel %vm7773_vm10, %v5593_v12, %v1731_v58  ;;  %v8220_v14 = vsel %vm7753_vm9, %v5598_v57, %v1852_v1  ;;  %v1526_v17 = vrot.slane %v1524_v34, 4  ;;  %v1518_v34 = vld [vmem:[#allocation8 + $0x30] sm:$0xff] }
 0x2e7   :  { %v8224_v20 = vcombine.high %v8202_v2, %v8202_v2  ;;  %6287 = vmatmul.mubr.msk.f32.vlgmr.msra.gmra.mrb[24].mxu1 %vm918_vm11, %v1980_v16  ;;  %v5603_v23 = vcombine.high %v8174_v43, %v8202_v2  ;;  %v1982_v54 = vcombine.low %v8195_v40, %v8208_v35  ;;  %v5586_v61 = vrot.slane %v8202_v2, 9 }
 0x2e8   :  { %6289 = vmatprep.mubr.msk.f32.mxu1 %vm7388_vm0, %v7387_v0  ;;  %v1528_v15 = vsel %vm7653_vm4, %v1526_v17, %v1527_v51  ;;  %v1540_v41 = vrot.slane %v8208_v35, 5  ;;  %v1641_v46 = vcombine.low %v8174_v43, %v8202_v2  ;;  %v1733_v63 = vrot.slane %v1731_v58, 4  ;;  %v1519_v58 = vld [vmem:[#allocation8 + $0x38] sm:$0xff] }
 0x2e9   :  { %v1551_v53 = vcombine.low %v1525_v9, %v1528_v15  ;;  %v1534_v59 = vrot.slane %v8224_v20, 5  ;;  %v1642_v48 = vcombine.low %v8224_v20, %v8195_v40  ;;  %v1539_v19 = vrot.slane %v1537_v26, 4 }
 0x2ea   :  { %v1736_v24 = vrot.slane %v1734_v45, 4  ;;  %v1737_v6 = vrot.slane %v8184_v52, 6  ;;  %v5594_v27 = vrot.slane %v8202_v2, 10  ;;  %v8251_v7 = vsel %vm7773_vm10, %v1733_v63, %v1734_v45  ;;  %v1752_v63 = vld [vmem:[#allocation8 + $0x90] sm:$0xff] }
 0x2eb   :  { %6290 = vmatmul.mubr.msk.f32.gmra.mrb[26].mxu1 %vm918_vm11, %v5603_v23  ;;  %6187 = vmatmul.mubr.msk.f32.vlgmr.msra.gmra.mrb[30].mxu0 %vm918_vm11, %v1551_v53  ;;  %v1535_v28 = vsel %vm7653_vm4, %v5586_v61, %v1534_v59  ;;  %v1536_v4 = vrot.slane %v1534_v59, 4  ;;  %v1741_v10 = vrot.slane %v8224_v20, 6  ;;  %v1541_v30 = vsel %vm7653_vm4, %v1539_v19, %v1540_v41  ;;  %v1750_v53 = vld [vmem:[#allocation8 + $0x80] sm:$0xff]  ;;  %v1751_v59 = vld [vmem:[#allocation8 + $0x88] sm:$0xff]  ;;  %v1753_v19 = vld [vmem:[#allocation8 + $0x98] sm:$0xff] }
 0x2ec   :  { %6701 = vmatpush3.bf16.msra.mxu0 %v6700_v47  ;;  %6292 = vmatprep.mubr.msk.f32.mxu1 %vm7388_vm0, %v7387_v0  ;;  %v1552_v18 = vcombine.low %v1531_v13, %v1535_v28  ;;  %v1758_v31 = vcombine.low %v8216_v11, %v8251_v7  ;;  %v1744_v32 = vrot.slane %v8195_v40, 6  ;;  %v8268_v29 = vsel %vm7773_vm10, %v1736_v24, %v1737_v6  ;;  %v1754_v6 = vld [vmem:[#allocation8 + $0xa0] sm:$0xff]  ;;  %v1757_v28 = vld [vmem:[#allocation8 + $0xb8] sm:$0xff]  ;;  %v1877_v7 = vld [vmem:[#allocation8 + $0xf0] sm:$0xff] }
 0x2ed   :  { %6189 = vmatprep.mubr.msk.f32.mxu0 %vm7388_vm0, %v7387_v0  ;;  %6702 = vmatprep.subr.bf16.mxu0 %v7389_v49  ;;  %v1538_v39 = vsel %vm7653_vm4, %v1536_v4, %v1537_v26  ;;  %v8272_v47 = vsel %vm7773_vm10, %v5594_v27, %v1741_v10  ;;  %v1743_v37 = vrot.slane %v1741_v10, 4  ;;  %v1747_v12 = vrot.slane %v8208_v35, 6  ;;  %v1755_v27 = vld [vmem:[#allocation8 + $0xa8] sm:$0xff]  ;;  %v1873_v10 = vld [vmem:[#allocation8 + $0xd0] sm:$0xff] }
 0x2ee   :  { %v1553_v50 = vcombine.low %v1538_v39, %v1541_v30  ;;  %v1759_v51 = vcombine.low %v8268_v29, %v8272_v47  ;;  %v1746_v5 = vrot.slane %v1744_v32, 4  ;;  %v1854_v22 = vrot.slane %v1852_v1, 4  ;;  %v1878_v30 = vld [vmem:[#allocation8 + $0xf8] sm:$0xff]  ;;  %v2115_v39 = vld [vmem:[#allocation11 + $0x48] sm:$0xff] }
 0x2ef   :  { %6293 = vmatmul.mubr.msk.f32.gmra.mrb[28].mxu1 %vm918_vm11, %v1982_v54  ;;  %6190 = vmatmul.mubr.msk.f32.gmra.mrb[32].mxu0 %vm918_vm11, %v1552_v18  ;;  %v8281_v45 = vsel %vm7773_vm10, %v1743_v37, %v1744_v32  ;;  %v1855_v38 = vrot.slane %v8174_v43, 7  ;;  %v1858_v25 = vrot.slane %v8184_v52, 7  ;;  %v5599_v16 = vrot.slane %v8202_v2, 11  ;;  %v1871_v43 = vld [vmem:[#allocation8 + $0xc0] sm:$0xff]  ;;  %v1872_v2 = vld [vmem:[#allocation8 + $0xc8] sm:$0xff]  ;;  %v1874_v18 = vld [vmem:[#allocation8 + $0xd8] sm:$0xff] }
 0x2f0   :  { %6704 = vmatpush3.bf16.msra.mxu0 %v6703_v62  ;;  %6192 = vmatprep.mubr.msk.f32.mxu0 %vm7388_vm0, %v7387_v0  ;;  %v8292_v57 = vsel %vm7773_vm10, %v1746_v5, %v1747_v12  ;;  %v1862_v1 = vrot.slane %v8224_v20, 7  ;;  %v1865_v13 = vrot.slane %v8195_v40, 7  ;;  %v1868_v52 = vrot.slane %v8208_v35, 7  ;;  %v1875_v20 = vld [vmem:[#allocation8 + $0xe0] sm:$0xff]  ;;  %v2116_v47 = vld [vmem:[#allocation11 + $0x50] sm:$0xff] }
 0x2f1   :  { %6705 = vmatprep.subr.bf16.mxu0 %v7389_v49  ;;  %v1760_v33 = vcombine.low %v8281_v45, %v8292_v57  ;;  %v8302_v36 = vsel %vm7753_vm9, %v1854_v22, %v1855_v38  ;;  %v1857_v62 = vrot.slane %v1855_v38, 4  ;;  %v6709_v61 = vpack.c.bf16 %v1519_v58, %v1518_v34  ;;  %v2114_v32 = vld [vmem:[#allocation11 + $0x40] sm:$0xff]  ;;  %v2117_v37 = vld [vmem:[#allocation11 + $0x58] sm:$0xff]  ;;  %v2120_v12 = vld [vmem:[#allocation11 + $0x70] sm:$0xff] }
 0x2f2   :  { %v1879_v9 = vcombine.low %v8220_v14, %v8302_v36  ;;  %v8309_v17 = vsel %vm7753_vm9, %v5599_v16, %v1862_v1  ;;  %v1864_v23 = vrot.slane %v1862_v1, 4  ;;  %v1867_v54 = vrot.slane %v1865_v13, 4  ;;  %v2118_v14 = vld [vmem:[#allocation11 + $0x60] sm:$0xff]  ;;  %v2121_v45 = vld [vmem:[#allocation11 + $0x78] sm:$0xff] }
 0x2f3   :  { %6193 = vmatmul.mubr.msk.f32.gmra.mrb[34].mxu0 %vm918_vm11, %v1553_v50  ;;  %v8314_v15 = vsel %vm7753_vm9, %v1857_v62, %v1858_v25  ;;  %v6712_v60 = vpack.c.bf16 %v1751_v59, %v1750_v53  ;;  %v6715_v24 = vpack.c.bf16 %v1753_v19, %v1752_v63  ;;  %v6727_v40 = vpack.c.bf16 %v1874_v18, %v1873_v10  ;;  %v2091_v38 = vld [vmem:[#allocation11] sm:$0xff]  ;;  %v2092_v25 = vld [vmem:[#allocation11 + $0x8] sm:$0xff] }
 0x2f4   :  { %6707 = vmatpush3.bf16.msra.mxu0 %v6706_v55  ;;  %6211 = vmatprep.mubr.msk.f32.mxu0 %vm7388_vm0, %v7387_v0  ;;  %v1880_v35 = vcombine.low %v8314_v15, %v8309_v17  ;;  %v8325_v26 = vsel %vm7753_vm9, %v1864_v23, %v1865_v13  ;;  %v1869_v41 = vsel %vm7753_vm9, %v1867_v54, %v1868_v52 }
 0x2f5   :  { %6708 = vmatprep.subr.bf16.mxu0 %v7389_v49  ;;  %v1881_v42 = vcombine.low %v8325_v26, %v1869_v41  ;;  %v1640_v55 = vcombine.low %v8176_v44, %v8190_v21  ;;  %v6718_v44 = vpack.c.bf16 %v1755_v27, %v1754_v6  ;;  %v1756_v21 = vld [vmem:[#allocation8 + $0xb0] sm:$0xff]  ;;  %v6747_v29 = vpack.c.bf16 %v2115_v39, %v2114_v32 }
 0x2f6   :  { %v6721_v4 = vpack.c.bf16 %v1757_v28, %v1756_v21  ;;  %v6751_v50 = vpack.c.bf16 %v2117_v37, %v2116_v47  ;;  %v6759_v22 = vpack.c.bf16 %v2121_v45, %v2120_v12  ;;  %v8384_v34 = vpack.c.bf16 %v2092_v25, %v2091_v38 }
 0x2f8   :  { %6710 = vmatpush3.bf16.msra.mxu0 %v6709_v61 }
 0x2f9   :  { %6711 = vmatprep.subr.bf16.mxu0 %v7389_v49 }
 0x2fb   :  { %6212 = vmatmul.mubr.msk.f32.vlgmr.msra.gmra.mrb[36].mxu0 %vm918_vm11, %v1640_v55 }
 0x2fc   :  { %6713 = vmatpush3.bf16.msra.mxu0 %v6712_v60  ;;  %6214 = vmatprep.mubr.msk.f32.mxu0 %vm7388_vm0, %v7387_v0 }
 0x2fd   :  { %6714 = vmatprep.subr.bf16.mxu0 %v7389_v49 }
 0x2ff   :  { %6215 = vmatmul.mubr.msk.f32.gmra.mrb[38].mxu0 %vm918_vm11, %v1641_v46  ;;  %v6724_v46 = vpack.c.bf16 %v1872_v2, %v1871_v43  ;;  %v5607_v2 = vld [vmem:[#allocation9] ss:$0 sm:$0xff] }
 0x300   :  { %6716 = vmatpush3.bf16.msra.mxu0 %v6715_v24  ;;  %6217 = vmatprep.mubr.msk.f32.mxu0 %vm7388_vm0, %v7387_v0 }
 0x301   :  { %6717 = vmatprep.subr.bf16.mxu0 %v7389_v49 }
 0x303   :  { %6218 = vmatmul.mubr.msk.f32.gmra.mrb[40].mxu0 %vm918_vm11, %v1642_v48  ;;  %v1876_v48 = vld [vmem:[#allocation8 + $0xe8] sm:$0xff] }
 0x304   :  { %6719 = vmatpush3.bf16.msra.mxu0 %v6718_v44  ;;  %6236 = vmatprep.mubr.msk.f32.mxu0 %vm7388_vm0, %v7387_v0  ;;  %v6730_v11 = vpack.c.bf16 %v1876_v48, %v1875_v20 }
 0x305   :  { %6720 = vmatprep.subr.bf16.mxu0 %v7389_v49 }
 0x308   :  { %6722 = vmatpush3.bf16.msra.mxu0 %v6721_v4 }
 0x309   :  { %6723 = vmatprep.subr.bf16.mxu0 %v7389_v49 }
 0x30b   :  { %6237 = vmatmul.mubr.msk.f32.vlgmr.msra.gmra.mrb[42].mxu0 %vm918_vm11, %v1758_v31  ;;  %v6733_v31 = vpack.c.bf16 %v1878_v30, %v1877_v7  ;;  %v2093_v7 = vld [vmem:[#allocation11 + $0x10] sm:$0xff]  ;;  %v2094_v30 = vld [vmem:[#allocation11 + $0x18] sm:$0xff] }
 0x30c   :  { %6725 = vmatpush3.bf16.msra.mxu0 %v6724_v46  ;;  %6239 = vmatprep.mubr.msk.f32.mxu0 %vm7388_vm0, %v7387_v0  ;;  %v6767_v37 = vpack.c.bf16 %v2094_v30, %v2093_v7  ;;  %v2096_v7 = vld [vmem:[#allocation11 + $0x28] sm:$0xff] }
 0x30d   :  { %6726 = vmatprep.subr.bf16.mxu0 %v7389_v49 }
 0x30f   :  { %6240 = vmatmul.mubr.msk.f32.gmra.mrb[44].mxu0 %vm918_vm11, %v1759_v51  ;;  %v2119_v51 = vld [vmem:[#allocation11 + $0x68] sm:$0xff] }
 0x310   :  { %6728 = vmatpush3.bf16.msra.mxu0 %v6727_v40  ;;  %6242 = vmatprep.mubr.msk.f32.mxu0 %vm7388_vm0, %v7387_v0  ;;  %v6755_v5 = vpack.c.bf16 %v2119_v51, %v2118_v14 }
 0x311   :  { %6729 = vmatprep.subr.bf16.mxu0 %v7389_v49 }
 0x313   :  { %6243 = vmatmul.mubr.msk.f32.gmra.mrb[46].mxu0 %vm918_vm11, %v1760_v33 }
 0x314   :  { %6731 = vmatpush3.bf16.msra.mxu0 %v6730_v11  ;;  %6261 = vmatprep.mubr.msk.f32.mxu0 %vm7388_vm0, %v7387_v0 }
 0x315   :  { %6732 = vmatprep.subr.bf16.mxu0 %v7389_v49 }
 0x318   :  { %6734 = vmatpush3.bf16.msra.mxu0 %v6733_v31 }
 0x319   :  { %6748 = vmatprep.subr.bf16.mxu0 %v6747_v29 }
 0x31b   :  { %6262 = vmatmul.mubr.msk.f32.vlgmr.msra.gmra.mrb[48].mxu0 %vm918_vm11, %v1879_v9 }
 0x31c   :  { %6264 = vmatprep.mubr.msk.f32.mxu0 %vm7388_vm0, %v7387_v0  ;;  %6750 = vmatpush3.bf16.msra.mxu0 %v6747_v29 }
 0x31d   :  { %6752 = vmatprep.subr.bf16.mxu0 %v6751_v50 }
 0x31f   :  { %6265 = vmatmul.mubr.msk.f32.gmra.mrb[50].mxu0 %vm918_vm11, %v1880_v35 }
 0x320   :  { %6267 = vmatprep.mubr.msk.f32.mxu0 %vm7388_vm0, %v7387_v0  ;;  %6754 = vmatpush3.bf16.msra.mxu0 %v6751_v50 }
 0x321   :  { %6756 = vmatprep.subr.bf16.mxu0 %v6755_v5 }
 0x323   :  { %6268 = vmatmul.mubr.msk.f32.gmra.mrb[52].mxu0 %vm918_vm11, %v1881_v42 }
 0x324   :  { %6758 = vmatpush3.bf16.msra.mxu0 %v6755_v5 }
 0x325   :  { %6760 = vmatprep.subr.bf16.mxu0 %v6759_v22 }
 0x328   :  { %6762 = vmatpush3.bf16.msra.mxu0 %v6759_v22 }
 0x329   :  { %6764 = vmatprep.subr.bf16.mxu0 %v8384_v34 }
 0x3ba   :  { %v2055_v58 = vpop.f32.mrb[24].mxu1 }
 0x3bb   :  { %v6288_v57 = vpop.f32.mrb[25].mxu1 }
 0x3be   :  { %v2060_v16 = vpop.f32.mrb[26].mxu1  ;;  %v1626_v1 = vpop.f32.mrb[30].mxu0 }
 0x3bf   :  { %v6291_v13 = vpop.f32.mrb[27].mxu1  ;;  %v6188_v33 = vpop.f32.mrb[31].mxu0 }
 0x3c2   :  { %v2065_v36 = vpop.f32.mrb[28].mxu1  ;;  %v1631_v62 = vpop.f32.mrb[32].mxu0 }
 0x3c3   :  { %v6294_v52 = vpop.f32.mrb[29].mxu1  ;;  %v6191_v9 = vpop.f32.mrb[33].mxu0 }
 0x3c6   :  { %v1636_v17 = vpop.f32.mrb[34].mxu0 }
 0x3c7   :  { %v6194_v23 = vpop.f32.mrb[35].mxu0 }
 0x3ce   :  { %v1715_v54 = vpop.f32.mrb[36].mxu0 }
 0x3cf   :  { %v1716_v61 = vadd.f32 %v1715_v54, %v1626_v1  ;;  %v6213_v15 = vpop.f32.mrb[37].mxu0 }
 0x3d2   :  { %v1720_v35 = vpop.f32.mrb[38].mxu0 }
 0x3d3   :  { %v1721_v26 = vadd.f32 %v1720_v35, %v1631_v62  ;;  %v6216_v41 = vpop.f32.mrb[39].mxu0 }
 0x3d6   :  { %v1725_v53 = vpop.f32.mrb[40].mxu0 }
 0x3d7   :  { %v1726_v59 = vadd.f32 %v1725_v53, %v1636_v17  ;;  %v6219_v42 = vpop.f32.mrb[41].mxu0 }
 0x3de   :  { %v1833_v60 = vpop.f32.mrb[42].mxu0 }
 0x3df   :  { %v1847_v55 = vadd.f32 %v1833_v60, %v1716_v61  ;;  %v6238_v63 = vpop.f32.mrb[43].mxu0 }
 0x3e2   :  { %v1838_v19 = vpop.f32.mrb[44].mxu0 }
 0x3e3   :  { %v1848_v24 = vadd.f32 %v1838_v19, %v1721_v26  ;;  %v6241_v6 = vpop.f32.mrb[45].mxu0 }
 0x3e6   :  { %v1843_v27 = vpop.f32.mrb[46].mxu0 }
 0x3e7   :  { %v1849_v44 = vadd.f32 %v1843_v27, %v1726_v59  ;;  %v6244_v21 = vpop.f32.mrb[47].mxu0 }
 0x3ee   :  { %v1954_v28 = vpop.f32.mrb[48].mxu0 }
 0x3ef   :  { %v1968_v4 = vadd.f32 %v1954_v28, %v1847_v55  ;;  %v6263_v43 = vpop.f32.mrb[49].mxu0 }
 0x3f1   :  { %v2069_v46 = vadd.f32 %v2055_v58, %v1968_v4 }
 0x3f2   :  { %v1959_v10 = vpop.f32.mrb[50].mxu0 }
 0x3f3   :  { %v2079_v18 = vadd.f32 %v5607_v2, %v2069_v46  ;;  %v1969_v40 = vadd.f32 %v1959_v10, %v1848_v24  ;;  %v6266_v20 = vpop.f32.mrb[51].mxu0 }
 0x3f5   :  { %v8387_v48 = vmax.f32 %v2079_v18, 0.0  ;;  %v2070_v11 = vadd.f32 %v2060_v16, %v1969_v40 }
 0x3f6   :  { %v1964_v31 = vpop.f32.mrb[52].mxu0 }
 0x3f7   :  { %v8391_v32 = vcombine.high %v8387_v48, %v8387_v48  ;;  %v2080_v39 = vadd.f32 %v5607_v2, %v2070_v11  ;;  %v1970_v29 = vadd.f32 %v1964_v31, %v1849_v44  ;;  %v6269_v47 = vpop.f32.mrb[53].mxu0  ;;  %v5608_v51 = vrot.slane %v8387_v48, 9  ;;  %v2095_v11 = vld [vmem:[#allocation11 + $0x20] sm:$0xff] }
 0x3f8   :  { %v5614_v12 = vrot.slane %v8387_v48, 10  ;;  %v5618_v22 = vrot.slane %v8387_v48, 11 }
 0x3f9   :  { %v8393_v14 = vmax.f32 %v2080_v39, 0.0  ;;  %v2071_v50 = vadd.f32 %v2065_v36, %v1970_v29  ;;  %v2101_v5 = vrot.slane %v8391_v32, 5  ;;  %v2286_v45 = vrot.slane %v8391_v32, 6  ;;  %v2098_v29 = vld [vmem:[#allocation11 + $0x38] sm:$0xff] }
 0x3fa   :  { %v2392_v38 = vrot.slane %v8391_v32, 7  ;;  %v2203_v8 = vcombine.low %v8387_v48, %v8391_v32  ;;  %v6771_v39 = vpack.c.bf16 %v2096_v7, %v2095_v11  ;;  %v2097_v48 = vld [vmem:[#allocation11 + $0x30] sm:$0xff] }
 0x3fb   :  { %v8403_v25 = vcombine.high %v8393_v14, %v8393_v14  ;;  %v2081_v58 = vadd.f32 %v5607_v2, %v2071_v50  ;;  %v2102_v57 = vsel %vm7653_vm4, %v5608_v51, %v2101_v5  ;;  %v2103_v16 = vrot.slane %v2101_v5, 4  ;;  %v2299_v50 = vld [vmem:[#allocation11 + $0x80] sm:$0xff]  ;;  %v2300_v51 = vld [vmem:[#allocation11 + $0x88] sm:$0xff]  ;;  %v2301_v5 = vld [vmem:[#allocation11 + $0x90] sm:$0xff] }
 0x3fc   :  { %v2104_v1 = vrot.slane %v8393_v14, 5  ;;  %v8410_v13 = vsel %vm7773_vm10, %v5614_v12, %v2286_v45  ;;  %v2288_v33 = vrot.slane %v2286_v45, 4  ;;  %v2289_v36 = vrot.slane %v8393_v14, 6  ;;  %v2302_v12 = vld [vmem:[#allocation11 + $0x98] sm:$0xff]  ;;  %v2303_v45 = vld [vmem:[#allocation11 + $0xa0] sm:$0xff] }
 0x3fd   :  { %v8413_v62 = vmax.f32 %v2081_v58, 0.0  ;;  %v5609_v52 = vrot.slane %v8403_v25, 9  ;;  %v5615_v9 = vrot.slane %v8403_v25, 10  ;;  %v8419_v17 = vsel %vm7753_vm9, %v5618_v22, %v2392_v38  ;;  %v2304_v22 = vld [vmem:[#allocation11 + $0xa8] sm:$0xff] }
 0x3fe   :  { %v2105_v23 = vsel %vm7653_vm4, %v2103_v16, %v2104_v1  ;;  %v2290_v54 = vsel %vm7773_vm10, %v2288_v33, %v2289_v36  ;;  %v2394_v61 = vrot.slane %v2392_v38, 4  ;;  %v2395_v15 = vrot.slane %v8393_v14, 7  ;;  %v2305_v38 = vld [vmem:[#allocation11 + $0xb0] sm:$0xff]  ;;  %v2406_v16 = vld [vmem:[#allocation11 + $0xc8] sm:$0xff]  ;;  %v2408_v33 = vld [vmem:[#allocation11 + $0xd8] sm:$0xff] }
 0x3ff   :  { %v8428_v35 = vcombine.high %v8413_v62, %v8413_v62  ;;  %v2122_v26 = vcombine.low %v2102_v57, %v2105_v23  ;;  %v2108_v41 = vrot.slane %v8413_v62, 5  ;;  %v2204_v53 = vcombine.low %v8403_v25, %v8413_v62  ;;  %v2405_v57 = vld [vmem:[#allocation11 + $0xc0] sm:$0xff]  ;;  %v2411_v23 = vld [vmem:[#allocation11 + $0xf0] sm:$0xff] }
 0x400   :  { %v2307_v59 = vcombine.low %v8410_v13, %v2290_v54  ;;  %v2293_v42 = vrot.slane %v8413_v62, 6  ;;  %v8437_v60 = vsel %vm7753_vm9, %v2394_v61, %v2395_v15  ;;  %v5619_v55 = vrot.slane %v8403_v25, 11  ;;  %v2306_v25 = vld [vmem:[#allocation11 + $0xb8] sm:$0xff]  ;;  %v2407_v13 = vld [vmem:[#allocation11 + $0xd0] sm:$0xff]  ;;  %v2497_v15 = vld [vmem:[#allocation11 + $0x100] sm:$0xff] }
 0x401   :  { %6311 = vmatprep.mubr.msk.f32.mxu0 %vm918_vm11, %v2122_v26  ;;  %v2109_v63 = vsel %vm7653_vm4, %v5609_v52, %v2108_v41  ;;  %v2110_v19 = vrot.slane %v2108_v41, 4  ;;  %v2111_v24 = vrot.slane %v8428_v35, 5  ;;  %v2296_v6 = vrot.slane %v8428_v35, 6  ;;  %v2409_v52 = vld [vmem:[#allocation11 + $0xe0] sm:$0xff]  ;;  %v2412_v54 = vld [vmem:[#allocation11 + $0xf8] sm:$0xff]  ;;  %v2498_v26 = vld [vmem:[#allocation11 + $0x108] sm:$0xff] }
 0x402   :  { %v8447_v27 = vsel %vm7773_vm10, %v5615_v9, %v2293_v42  ;;  %v2295_v44 = vrot.slane %v2293_v42, 4  ;;  %v2413_v21 = vcombine.low %v8419_v17, %v8437_v60  ;;  %v2399_v28 = vrot.slane %v8413_v62, 7  ;;  %v2410_v9 = vld [vmem:[#allocation11 + $0xe8] sm:$0xff]  ;;  %v2501_v60 = vld [vmem:[#allocation11 + $0x120] sm:$0xff] }
 0x403   :  { %v2112_v4 = vsel %vm7653_vm4, %v2110_v19, %v2111_v24  ;;  %v2402_v43 = vrot.slane %v8428_v35, 7  ;;  %v2505_v2 = vcombine.low %v8391_v32, %v8393_v14  ;;  %v2506_v46 = vcombine.low %v8413_v62, %v8428_v35  ;;  %v2503_v19 = vld [vmem:[#allocation11 + $0x130] sm:$0xff]  ;;  %v2504_v24 = vld [vmem:[#allocation11 + $0x138] sm:$0xff]  ;;  %v5624_v32 = vld [vmem:[#allocation12] ss:$0 sm:$0xff] }
 0x404   :  { %v2123_v10 = vcombine.low %v2109_v63, %v2112_v4  ;;  %v2297_v18 = vsel %vm7773_vm10, %v2295_v44, %v2296_v6  ;;  %v8463_v40 = vsel %vm7753_vm9, %v5619_v55, %v2399_v28  ;;  %v2401_v20 = vrot.slane %v2399_v28, 4  ;;  %v2502_v55 = vld [vmem:[#allocation11 + $0x128] sm:$0xff] }
 0x405   :  { %v2308_v30 = vcombine.low %v8447_v27, %v2297_v18  ;;  %v6775_v47 = vpack.c.bf16 %v2098_v29, %v2097_v48  ;;  %v6779_v56 = vpack.c.bf16 %v2300_v51, %v2299_v50  ;;  %v6791_v58 = vpack.c.bf16 %v2306_v25, %v2305_v38 }
 0x406   :  { %6312 = vmatmul.mubr.msk.f32.vlgmr.msra.gmra.mrb[54].mxu0 %vm918_vm11, %v2123_v10  ;;  %v8471_v31 = vsel %vm7753_vm9, %v2401_v20, %v2402_v43  ;;  %v6795_v1 = vpack.c.bf16 %v2406_v16, %v2405_v57  ;;  %v6799_v36 = vpack.c.bf16 %v2408_v33, %v2407_v13  ;;  %v6803_v17 = vpack.c.bf16 %v2410_v9, %v2409_v52 }
 0x407   :  { %6766 = vmatpush3.bf16.msra.mxu0 %v8384_v34  ;;  %6330 = vmatprep.mubr.msk.f32.mxu0 %vm918_vm11, %v2203_v8  ;;  %v2414_v3 = vcombine.low %v8463_v40, %v8471_v31  ;;  %v6783_v34 = vpack.c.bf16 %v2302_v12, %v2301_v5  ;;  %v6807_v61 = vpack.c.bf16 %v2412_v54, %v2411_v23  ;;  %v7397_v35 = vmov 1983009808  }
 0x408   :  { %6768 = vmatprep.subr.bf16.mxu0 %v6767_v37  ;;  %v6811_v41 = vpack.c.bf16 %v2498_v26, %v2497_v15  ;;  %v6819_v63 = vpack.c.bf16 %v2502_v55, %v2501_v60  ;;  %v6823_v6 = vpack.c.bf16 %v2504_v24, %v2503_v19  ;;  %v2646_v4 = vunpack.c.l.s4 %v7397_v35 }
 0x409   :  { %v2648_v43 = vlaneseq  ;;  %vm4472_vm4 = vcmask 1045504  }
 0x40a   :  { %v2647_v10 = vunpack.c.0.s8 %v2646_v4 }
 0x40b   :  { %6770 = vmatpush3.bf16.msra.mxu0 %v6767_v37  ;;  %v6787_v37 = vpack.c.bf16 %v2304_v22, %v2303_v45  ;;  %v2649_v18 = vshrl.u32 %v2648_v43, 7 }
 0x40c   :  { %6772 = vmatprep.subr.bf16.mxu0 %v6771_v39 }
 0x40d   :  { %v8505_v11 = vsub.s32 %v2647_v10, %v2649_v18 }
 0x40f   :  { %6774 = vmatpush3.bf16.msra.mxu0 %v6771_v39 }
 0x410   :  { %6776 = vmatprep.subr.bf16.mxu0 %v6775_v47 }
 0x413   :  { %6778 = vmatpush3.bf16.msra.mxu0 %v6775_v47 }
 0x414   :  { %6780 = vmatprep.subr.bf16.mxu0 %v6779_v56 }
 0x416   :  { %6331 = vmatmul.mubr.msk.f32.vlgmr.msra.gmra.mrb[54].mxu0 %vm918_vm11, %v2204_v53  ;;  %v2499_v53 = vld [vmem:[#allocation11 + $0x110] sm:$0xff] }
 0x417   :  { %6782 = vmatpush3.bf16.msra.mxu0 %v6779_v56  ;;  %6349 = vmatprep.mubr.msk.f32.mxu0 %vm918_vm11, %v2307_v59  ;;  %v2500_v59 = vld [vmem:[#allocation11 + $0x118] sm:$0xff] }
 0x418   :  { %6784 = vmatprep.subr.bf16.mxu0 %v6783_v34  ;;  %v6815_v42 = vpack.c.bf16 %v2500_v59, %v2499_v53 }
 0x41b   :  { %6786 = vmatpush3.bf16.msra.mxu0 %v6783_v34 }
 0x41c   :  { %6788 = vmatprep.subr.bf16.mxu0 %v6787_v37 }
 0x41f   :  { %6790 = vmatpush3.bf16.msra.mxu0 %v6787_v37 }
 0x420   :  { %6792 = vmatprep.subr.bf16.mxu0 %v6791_v58 }
 0x423   :  { %6794 = vmatpush3.bf16.msra.mxu0 %v6791_v58 }
 0x424   :  { %6796 = vmatprep.subr.bf16.mxu0 %v6795_v1 }
 0x426   :  { %6350 = vmatmul.mubr.msk.f32.vlgmr.msra.gmra.mrb[54].mxu0 %vm918_vm11, %v2308_v30 }
 0x427   :  { %6798 = vmatpush3.bf16.msra.mxu0 %v6795_v1  ;;  %6368 = vmatprep.mubr.msk.f32.mxu0 %vm918_vm11, %v2413_v21 }
 0x428   :  { %6800 = vmatprep.subr.bf16.mxu0 %v6799_v36 }
 0x42b   :  { %6802 = vmatpush3.bf16.msra.mxu0 %v6799_v36 }
 0x42c   :  { %6804 = vmatprep.subr.bf16.mxu0 %v6803_v17 }
 0x42f   :  { %6806 = vmatpush3.bf16.msra.mxu0 %v6803_v17 }
 0x430   :  { %6808 = vmatprep.subr.bf16.mxu0 %v6807_v61 }
 0x433   :  { %6810 = vmatpush3.bf16.msra.mxu0 %v6807_v61 }
 0x434   :  { %6812 = vmatprep.subr.bf16.mxu0 %v6811_v41 }
 0x436   :  { %6369 = vmatmul.mubr.msk.f32.vlgmr.msra.gmra.mrb[54].mxu0 %vm918_vm11, %v2414_v3 }
 0x437   :  { %6814 = vmatpush3.bf16.msra.mxu0 %v6811_v41  ;;  %6387 = vmatprep.mubr.msk.f32.mxu0 %vm918_vm11, %v2505_v2  ;;  %v7398_v2 = vmov 1934713408  }
 0x438   :  { %6816 = vmatprep.subr.bf16.mxu0 %v6815_v42 }
 0x43b   :  { %6818 = vmatpush3.bf16.msra.mxu0 %v6815_v42 }
 0x43c   :  { %6820 = vmatprep.subr.bf16.mxu0 %v6819_v63 }
 0x43f   :  { %6822 = vmatpush3.bf16.msra.mxu0 %v6819_v63 }
 0x440   :  { %6824 = vmatprep.subr.bf16.mxu0 %v6823_v6 }
 0x443   :  { %6826 = vmatpush3.bf16.msra.mxu0 %v6823_v6 }
 0x444   :  { %6885 = vmatprep.subr.bf16.mxu0 %v7389_v49 }
 0x446   :  { %6388 = vmatmul.mubr.msk.f32.vlgmr.msra.gmra.mrb[54].mxu0 %vm918_vm11, %v2506_v46  ;;  %v2710_v46 = vunpack.c.l.s4 %v7398_v2 }
 0x447   :  { %6494 = vmatprep.mubr.msk.f32.mxu0 %vm7388_vm0, %v7387_v0 }
 0x448   :  { %v2711_v8 = vunpack.c.0.s8 %v2710_v46 }
 0x44a   :  { %v8509_v29 = vsub.s32 %v2711_v8, %v2649_v18 }
 0x519   :  { %v6389_v14 = vpop.f32.mrb[54].mxu0 }
 0x51a   :  { %v2596_v27 = vadd.f32 %v6389_v14, %v5624_v32  ;;  %v2577_v44 = vpop.f32.mrb[55].mxu0 }
 0x51b   :  { %v2595_v28 = vadd.f32 %v5624_v32, %v2577_v44 }
 0x51c   :  { %v2598_v21 = vmax.f32 %v2596_v27, 0.0 }
 0x51d   :  { %v8496_v62 = vmax.f32 %v2595_v28, 0.0 }
 0x51e   :  { %2609 = vrot.lane.b32.xlu0 %v2598_v21, %s7390_s2  ;;  %2603 = vrot.lane.b32.xlu1 %v2598_v21, %s7391_s3 }
 0x522   :  { %2621 = vrot.lane.b32.xlu0 %v2598_v21, %s7392_s25  ;;  %2615 = vrot.lane.b32.xlu1 %v2598_v21, %s7393_s22 }
 0x526   :  { %2627 = vrot.lane.b32.xlu1 %v2598_v21, %s7394_s23  ;;  %2601 = vrot.lane.b32.xlu0 %v8496_v62, %s7391_s3 }
 0x52a   :  { %2613 = vrot.lane.b32.xlu1 %v8496_v62, %s7393_s22  ;;  %2607 = vrot.lane.b32.xlu0 %v8496_v62, %s7390_s2 }
 0x52e   :  { %2619 = vrot.lane.b32.xlu1 %v8496_v62, %s7392_s25  ;;  %2625 = vrot.lane.b32.xlu0 %v8496_v62, %s7394_s23 }
 0x532   :  { %2631 = vrot.lane.b32.xlu1 %v8496_v62, %s7395_s24  ;;  %2637 = vrot.lane.b32.xlu0 %v8496_v62, %s7396_s12 }
 0x536   :  { %2639 = vrot.lane.b32.xlu1 %v2598_v21, %s7396_s12  ;;  %2633 = vrot.lane.b32.xlu0 %v2598_v21, %s7395_s24  ;;  %s7403_s12 = smov 48  }
 0x590   :  { %v2610_v40 = vpop.permute.xlu0 %2609  ;;  %v2604_v20 = vpop.permute.xlu1 %2603 }
 0x591   :  { %v2779_v7 = vcombine.low %v2598_v21, %v2610_v40  ;;  %v2780_v30 = vcombine.high %v2598_v21, %v2610_v40 }
 0x593   :  { %v2787_v47 = vrot.slane %v2779_v7, %v8505_v11  ;;  %v2794_v50 = vrot.slane %v2780_v30, %v8505_v11 }
 0x594   :  { %v8507_v31 = vpop.permute.xlu0 %2621  ;;  %v2616_v3 = vpop.permute.xlu1 %2615 }
 0x595   :  { %v2795_v39 = vcombine.low %v2604_v20, %v2616_v3  ;;  %v2796_v48 = vcombine.high %v2604_v20, %v2616_v3 }
 0x597   :  { %v2803_v51 = vrot.slane %v2795_v39, %v8505_v11  ;;  %v2810_v56 = vrot.slane %v2796_v48, %v8505_v11 }
 0x598   :  { %v8515_v5 = vpop.permute.xlu1 %2627  ;;  %v2602_v12 = vpop.permute.xlu0 %2601 }
 0x599   :  { %v2843_v34 = vcombine.low %v2787_v47, %v2803_v51  ;;  %v2844_v45 = vcombine.high %v2787_v47, %v2803_v51  ;;  %v2859_v22 = vcombine.low %v2794_v50, %v2810_v56  ;;  %v2860_v37 = vcombine.high %v2794_v50, %v2810_v56 }
 0x59b   :  { %v2851_v38 = vrot.slane %v2843_v34, %v8509_v29  ;;  %v2858_v25 = vrot.slane %v2844_v45, %v8509_v29  ;;  %v2867_v58 = vrot.slane %v2859_v22, %v8509_v29  ;;  %v2874_v57 = vrot.slane %v2860_v37, %v8509_v29 }
 0x59c   :  { %v2614_v16 = vpop.permute.xlu1 %2613  ;;  %v2608_v1 = vpop.permute.xlu0 %2607 }
 0x59d   :  { %v5633_v13 = vcombine.low %v2851_v38, %v2858_v25  ;;  %v5635_v33 = vcombine.high %v2851_v38, %v2858_v25  ;;  %v5637_v36 = vcombine.low %v2867_v58, %v2874_v57  ;;  %v5639_v52 = vcombine.high %v2867_v58, %v2874_v57 }
 0x59e   :  { %v2659_v9 = vcombine.low %v2602_v12, %v2614_v16  ;;  %v2660_v17 = vcombine.high %v2602_v12, %v2614_v16  ;;  %v2643_v23 = vcombine.low %v8496_v62, %v2608_v1  ;;  %v2644_v54 = vcombine.high %v8496_v62, %v2608_v1 }
 0x59f   :  { %v3059_v61 = vrot.slane %v5633_v13, %v8505_v11  ;;  %v3075_v15 = vrot.slane %v5635_v33, %v8505_v11  ;;  %v8526_v26 = vrot.slane %v5637_v36, %v8505_v11  ;;  %v8529_v41 = vrot.slane %v5639_v52, %v8505_v11 }
 0x5a0   :  { %v2667_v53 = vrot.slane %v2659_v9, %v8505_v11  ;;  %v2674_v59 = vrot.slane %v2660_v17, %v8505_v11  ;;  %v2651_v42 = vrot.slane %v2643_v23, %v8505_v11  ;;  %v2658_v60 = vrot.slane %v2644_v54, %v8505_v11  ;;  %v2620_v55 = vpop.permute.xlu1 %2619  ;;  %v2626_v63 = vpop.permute.xlu0 %2625 }
 0x5a1   :  { %v3115_v19 = vcombine.low %v3059_v61, %v3075_v15  ;;  %v3147_v27 = vcombine.low %v8526_v26, %v8529_v41  ;;  %v3148_v44 = vcombine.high %v8526_v26, %v8529_v41  ;;  %v3116_v21 = vcombine.high %v3059_v61, %v3075_v15 }
 0x5a2   :  { %v2707_v24 = vcombine.low %v2651_v42, %v2667_v53  ;;  %v2708_v6 = vcombine.high %v2651_v42, %v2667_v53  ;;  %v2723_v32 = vcombine.low %v2658_v60, %v2674_v59  ;;  %v2724_v14 = vcombine.high %v2658_v60, %v2674_v59 }
 0x5a3   :  { %v8540_v28 = vrot.slane %v3115_v19, %v8509_v29  ;;  %v8558_v45 = vrot.slane %v3116_v21, %v8509_v29 }
 0x5a4   :  { %v2715_v62 = vrot.slane %v2707_v24, %v8509_v29  ;;  %v2722_v35 = vrot.slane %v2708_v6, %v8509_v29  ;;  %v2731_v4 = vrot.slane %v2723_v32, %v8509_v29  ;;  %v2738_v43 = vrot.slane %v2724_v14, %v8509_v29  ;;  %v2632_v2 = vpop.permute.xlu1 %2631  ;;  %v2638_v46 = vpop.permute.xlu0 %2637 }
 0x5a5   :  { %v2675_v10 = vcombine.low %v2620_v55, %v2632_v2  ;;  %v2676_v18 = vcombine.high %v2620_v55, %v2632_v2  ;;  %v2691_v40 = vcombine.low %v2626_v63, %v2638_v46  ;;  %v2692_v20 = vcombine.high %v2626_v63, %v2638_v46 }
 0x5a6   :  { %v5625_v8 = vcombine.low %v2715_v62, %v2722_v35  ;;  %v5627_v7 = vcombine.high %v2715_v62, %v2722_v35  ;;  %v5629_v30 = vcombine.low %v2731_v4, %v2738_v43  ;;  %v5631_v3 = vcombine.high %v2731_v4, %v2738_v43 }
 0x5a7   :  { %v2683_v39 = vrot.slane %v2675_v10, %v8505_v11  ;;  %v2690_v48 = vrot.slane %v2676_v18, %v8505_v11  ;;  %v2699_v47 = vrot.slane %v2691_v40, %v8505_v11  ;;  %v2706_v50 = vrot.slane %v2692_v20, %v8505_v11 }
 0x5a8   :  { %v2923_v51 = vrot.slane %v5625_v8, %v8505_v11  ;;  %v8552_v56 = vrot.slane %v5629_v30, %v8505_v11  ;;  %v8555_v12 = vrot.slane %v5631_v3, %v8505_v11  ;;  %v2640_v34 = vpop.permute.xlu1 %2639  ;;  %v2634_v58 = vpop.permute.xlu0 %2633  ;;  %v2939_v57 = vrot.slane %v5627_v7, %v8505_v11 }
 0x5a9   :  { %v2739_v22 = vcombine.low %v2683_v39, %v2699_v47  ;;  %v2740_v37 = vcombine.high %v2683_v39, %v2699_v47  ;;  %v2755_v38 = vcombine.low %v2690_v48, %v2706_v50  ;;  %v2756_v25 = vcombine.high %v2690_v48, %v2706_v50 }
 0x5aa   :  { %v3011_v16 = vcombine.low %v8552_v56, %v8555_v12  ;;  %v2827_v1 = vcombine.low %v8515_v5, %v2640_v34  ;;  %v2828_v13 = vcombine.high %v8515_v5, %v2640_v34  ;;  %v2811_v54 = vcombine.low %v8507_v31, %v2634_v58 }
 0x5ab   :  { %v2747_v33 = vrot.slane %v2739_v22, %v8509_v29  ;;  %v2754_v36 = vrot.slane %v2740_v37, %v8509_v29  ;;  %v2763_v52 = vrot.slane %v2755_v38, %v8509_v29  ;;  %v2770_v9 = vrot.slane %v2756_v25, %v8509_v29 }
 0x5ac   :  { %v2835_v17 = vrot.slane %v2827_v1, %v8505_v11  ;;  %v2842_v23 = vrot.slane %v2828_v13, %v8505_v11  ;;  %v2812_v61 = vcombine.high %v8507_v31, %v2634_v58  ;;  %v2819_v42 = vrot.slane %v2811_v54, %v8505_v11 }
 0x5ad   :  { %v5626_v15 = vcombine.low %v2747_v33, %v2754_v36  ;;  %v5628_v53 = vcombine.high %v2747_v33, %v2754_v36  ;;  %v5630_v59 = vcombine.low %v2763_v52, %v2770_v9  ;;  %v5632_v5 = vcombine.high %v2763_v52, %v2770_v9 }
 0x5ae   :  { %v2826_v60 = vrot.slane %v2812_v61, %v8505_v11  ;;  %v2979_v55 = vcombine.low %v2923_v51, %v2939_v57  ;;  %v2980_v63 = vcombine.high %v2923_v51, %v2939_v57  ;;  %v2875_v14 = vcombine.low %v2819_v42, %v2835_v17 }
 0x5af   :  { %v2930_v19 = vrot.slane %v5626_v15, %v8505_v11  ;;  %v2946_v24 = vrot.slane %v5628_v53, %v8505_v11  ;;  %v2962_v6 = vrot.slane %v5630_v59, %v8505_v11  ;;  %v2978_v32 = vrot.slane %v5632_v5, %v8505_v11 }
 0x5b0   :  { %v2876_v31 = vcombine.high %v2819_v42, %v2835_v17  ;;  %v2891_v21 = vcombine.low %v2826_v60, %v2842_v23  ;;  %v2892_v62 = vcombine.high %v2826_v60, %v2842_v23  ;;  %v3012_v35 = vcombine.high %v8552_v56, %v8555_v12 }
 0x5b1   :  { %v3027_v4 = vcombine.low %v2962_v6, %v2978_v32  ;;  %v2987_v43 = vrot.slane %v2979_v55, %v8509_v29  ;;  %v2994_v2 = vrot.slane %v2980_v63, %v8509_v29  ;;  %v2883_v46 = vrot.slane %v2875_v14, %v8509_v29 }
 0x5b2   :  { %v2890_v10 = vrot.slane %v2876_v31, %v8509_v29  ;;  %v2899_v18 = vrot.slane %v2891_v21, %v8509_v29  ;;  %v2906_v40 = vrot.slane %v2892_v62, %v8509_v29  ;;  %v2995_v20 = vcombine.low %v2930_v19, %v2946_v24 }
 0x5b3   :  { %v2996_v8 = vcombine.high %v2930_v19, %v2946_v24  ;;  %v5641_v7 = vcombine.low %v2987_v43, %v2994_v2  ;;  %v5643_v30 = vcombine.high %v2987_v43, %v2994_v2  ;;  %v3028_v57 = vcombine.high %v2962_v6, %v2978_v32 }
 0x5b4   :  { %v5634_v3 = vcombine.low %v2883_v46, %v2890_v10  ;;  %v5636_v39 = vcombine.high %v2883_v46, %v2890_v10  ;;  %v5638_v48 = vcombine.low %v2899_v18, %v2906_v40  ;;  %v5640_v47 = vcombine.high %v2899_v18, %v2906_v40 }
 0x5b5   :  { %v3003_v50 = vrot.slane %v2995_v20, %v8509_v29  ;;  %v3010_v51 = vrot.slane %v2996_v8, %v8509_v29  ;;  %v3195_v34 = vrot.slane %v5641_v7, %v8505_v11  ;;  %v3211_v22 = vrot.slane %v5643_v30, %v8505_v11 }
 0x5b6   :  { %v3066_v37 = vrot.slane %v5634_v3, %v8505_v11  ;;  %v3082_v38 = vrot.slane %v5636_v39, %v8505_v11  ;;  %v3098_v25 = vrot.slane %v5638_v48, %v8505_v11  ;;  %v3114_v58 = vrot.slane %v5640_v47, %v8505_v11 }
 0x5b7   :  { %v5645_v1 = vcombine.low %v3003_v50, %v3010_v51  ;;  %v5647_v13 = vcombine.high %v3003_v50, %v3010_v51  ;;  %v3251_v33 = vcombine.low %v3195_v34, %v3211_v22  ;;  %v3252_v52 = vcombine.high %v3195_v34, %v3211_v22 }
 0x5b8   :  { %v3163_v36 = vcombine.low %v3098_v25, %v3114_v58  ;;  %v3131_v9 = vcombine.low %v3066_v37, %v3082_v38  ;;  %v3132_v17 = vcombine.high %v3066_v37, %v3082_v38  ;;  %v3164_v23 = vcombine.high %v3098_v25, %v3114_v58 }
 0x5b9   :  { %v3227_v54 = vrot.slane %v5645_v1, %v8505_v11  ;;  %v3243_v61 = vrot.slane %v5647_v13, %v8505_v11  ;;  %v8598_v15 = vrot.slane %v3251_v33, %v8509_v29  ;;  %v5649_v5 = vcombine.low %v8540_v28, %v8558_v45 }
 0x5ba   :  { %v3139_v53 = vrot.slane %v3131_v9, %v8509_v29  ;;  %v3146_v59 = vrot.slane %v3132_v17, %v8509_v29  ;;  %v5651_v42 = vcombine.high %v8540_v28, %v8558_v45  ;;  %v3019_v63 = vrot.slane %v3011_v16, %v8509_v29 }
 0x5bb   :  { %v3283_v60 = vcombine.low %v3227_v54, %v3243_v61  ;;  %v3284_v55 = vcombine.high %v3227_v54, %v3243_v61  ;;  %v3026_v19 = vrot.slane %v3012_v35, %v8509_v29  ;;  %v3331_v24 = vrot.slane %v5649_v5, %v8505_v11  ;;  %v3535_v61 = vld [vmem:[%s8996_s9] sm:$0xff] }
 0x5bc   :  { %v3347_v6 = vrot.slane %v5651_v42, %v8505_v11  ;;  %v5653_v32 = vcombine.low %v3139_v53, %v3146_v59  ;;  %v5655_v14 = vcombine.high %v3139_v53, %v3146_v59  ;;  %v3035_v45 = vrot.slane %v3027_v4, %v8509_v29  ;;  %v3536_v53 = vld [vmem:[%s8996_s9 + $0x8] sm:$0xff]  ;;  %v3537_v42 = vld [vmem:[%s8996_s9 + $0x10] sm:$0xff] }
 0x5bd   :  { %v8614_v31 = vrot.slane %v3283_v60, %v8509_v29  ;;  %v3298_v28 = vrot.slane %v3284_v55, %v8509_v29  ;;  %v3042_v21 = vrot.slane %v3028_v57, %v8509_v29  ;;  %v3266_v56 = vrot.slane %v3252_v52, %v8509_v29 }
 0x5be   :  { %v3363_v12 = vrot.slane %v5653_v32, %v8505_v11  ;;  %v3379_v16 = vrot.slane %v5655_v14, %v8505_v11  ;;  %v3387_v62 = vcombine.low %v3331_v24, %v3347_v6  ;;  %v3155_v4 = vrot.slane %v3147_v27, %v8509_v29 }
 0x5bf   :  { %v3316_v35 = vcombine.high %v8598_v15, %v8614_v31  ;;  %v3315_v43 = vcombine.low %v8598_v15, %v8614_v31  ;;  %v3162_v2 = vrot.slane %v3148_v44, %v8509_v29  ;;  %v3317_v46 = vcombine.low %v3266_v56, %v3298_v28 }
 0x5c0   :  { %v3419_v10 = vcombine.low %v3363_v12, %v3379_v16  ;;  %v3388_v18 = vcombine.high %v3331_v24, %v3347_v6  ;;  %v3420_v40 = vcombine.high %v3363_v12, %v3379_v16  ;;  %v5642_v20 = vcombine.low %v3019_v63, %v3026_v19 }
 0x5c1   :  { %3461 = vrot.lane.b32.xlu0 %v3316_v35, %s7382_s0  ;;  %v5644_v8 = vcombine.high %v3019_v63, %v3026_v19  ;;  %v5646_v7 = vcombine.low %v3035_v45, %v3042_v21  ;;  %v5648_v30 = vcombine.high %v3035_v45, %v3042_v21  ;;  %v8636_v3 = vrot.slane %v3387_v62, %v8509_v29  ;;  %v3540_v45 = vld [vmem:[%s8996_s9 + $0x28] sm:$0xff] }
 0x5c2   :  { %v8639_v27 = vrot.slane %v3419_v10, %v8509_v29  ;;  %v3171_v39 = vrot.slane %v3163_v36, %v8509_v29  ;;  %v3178_v26 = vrot.slane %v3164_v23, %v8509_v29  ;;  %v3202_v41 = vrot.slane %v5642_v20, %v8505_v11  ;;  %v3543_v10 = vld [vmem:[%s8997_s10] sm:$0xff] }
 0x5c3   :  { %v3218_v44 = vrot.slane %v5644_v8, %v8505_v11  ;;  %v3234_v48 = vrot.slane %v5646_v7, %v8505_v11  ;;  %v3250_v47 = vrot.slane %v5648_v30, %v8505_v11  ;;  %v3434_v34 = vrot.slane %v3420_v40, %v8509_v29 }
 0x5c4   :  { %v3452_v50 = vcombine.high %v8636_v3, %v8639_v27  ;;  %v3451_v51 = vcombine.low %v8636_v3, %v8639_v27  ;;  %v5650_v38 = vcombine.low %v3155_v4, %v3162_v2  ;;  %v5652_v25 = vcombine.high %v3155_v4, %v3162_v2  ;;  %v3541_v4 = vld [vmem:[%s8996_s9 + $0x30] sm:$0xff]  ;;  %v5657_v3 = vld [vmem:[#allocation14] ss:$0 sm:$0xff] }
 0x5c5   :  { %3469 = vrot.lane.b32.xlu0 %v3317_v46, %s7399_s7  ;;  %v3267_v22 = vcombine.low %v3202_v41, %v3218_v44  ;;  %v3299_v37 = vcombine.low %v3234_v48, %v3250_v47  ;;  %v3402_v58 = vrot.slane %v3388_v18, %v8509_v29  ;;  %v5654_v57 = vcombine.low %v3171_v39, %v3178_v26  ;;  %v3542_v46 = vld [vmem:[%s8996_s9 + $0x38] sm:$0xff]  ;;  %v3544_v18 = vld [vmem:[%s8997_s10 + $0x8] sm:$0xff] }
 0x5c6   :  { %3463 = vrot.lane.b32.xlu1 %v3452_v50, %s7382_s0  ;;  %v5656_v1 = vcombine.high %v3171_v39, %v3178_v26  ;;  %v3318_v13 = vcombine.high %v3266_v56, %v3298_v28  ;;  %v3338_v36 = vrot.slane %v5650_v38, %v8505_v11  ;;  %v3354_v52 = vrot.slane %v5652_v25, %v8505_v11  ;;  %v3539_v28 = vld [vmem:[%s8996_s9 + $0x20] sm:$0xff]  ;;  %v3545_v39 = vld [vmem:[%s8997_s10 + $0x10] sm:$0xff]  ;;  %v3546_v26 = vld [vmem:[%s8997_s10 + $0x18] sm:$0xff]  ;;  %s7405_s10 = smov 64  }
 0x5c7   :  { %v3307_v33 = vrot.slane %v3299_v37, %v8509_v29  ;;  %v3453_v9 = vcombine.low %v3402_v58, %v3434_v34  ;;  %v3370_v17 = vrot.slane %v5654_v57, %v8505_v11  ;;  %v3275_v54 = vrot.slane %v3267_v22, %v8509_v29 }
 0x5c8   :  { %v3386_v23 = vrot.slane %v5656_v1, %v8505_v11  ;;  %v3403_v59 = vcombine.low %v3338_v36, %v3354_v52  ;;  %v3538_v11 = vld [vmem:[%s8996_s9 + $0x18] sm:$0xff]  ;;  %v3300_v55 = vcombine.high %v3234_v48, %v3250_v47  ;;  %v3454_v63 = vcombine.high %v3402_v58, %v3434_v34 }
 0x5c9   :  { %3477 = vrot.lane.b32.xlu0 %v3318_v13, %s7400_s8  ;;  %v3319_v60 = vcombine.low %v3275_v54, %v3307_v33  ;;  %v6827_v24 = vpack.c.bf16 %v3536_v53, %v3535_v61  ;;  %v3268_v6 = vcombine.high %v3202_v41, %v3218_v44  ;;  %v6831_v32 = vpack.c.bf16 %v3538_v11, %v3537_v42 }
 0x5ca   :  { %3471 = vrot.lane.b32.xlu1 %v3453_v9, %s7399_s7  ;;  %v3435_v5 = vcombine.low %v3370_v17, %v3386_v23  ;;  %v3411_v14 = vrot.slane %v3403_v59, %v8509_v29  ;;  %v3320_v21 = vcombine.high %v3275_v54, %v3307_v33  ;;  %v3314_v56 = vrot.slane %v3300_v55, %v8509_v29 }
 0x5cb   :  { %6828 = vmatprep.subr.bf16.mxu1 %v6827_v24  ;;  %v3436_v16 = vcombine.high %v3370_v17, %v3386_v23  ;;  %v3282_v62 = vrot.slane %v3268_v6, %v8509_v29  ;;  %v6835_v35 = vpack.c.bf16 %v3540_v45, %v3539_v28  ;;  %v3404_v2 = vcombine.high %v3338_v36, %v3354_v52 }
 0x5cc   :  { %v3443_v19 = vrot.slane %v3435_v5, %v8509_v29  ;;  %6830 = vmatpush3.bf16.msra.mxu1 %v6827_v24  ;;  %v8697_v7 = vpack.c.bf16 %v3544_v18, %v3543_v10  ;;  %v6839_v30 = vpack.c.bf16 %v3542_v46, %v3541_v4  ;;  %v8708_v47 = vpack.c.bf16 %v3546_v26, %v3545_v39 }
 0x5cd   :  { %3485 = vrot.lane.b32.xlu0 %v3319_v60, %s7401_s27  ;;  %6832 = vmatprep.subr.bf16.mxu1 %v6831_v32  ;;  %v3321_v40 = vcombine.low %v3282_v62, %v3314_v56  ;;  %v3450_v8 = vrot.slane %v3436_v16, %v8509_v29  ;;  %v3418_v41 = vrot.slane %v3404_v2, %v8509_v29 }
 0x5ce   :  { %3479 = vrot.lane.b32.xlu1 %v3454_v63, %s7400_s8  ;;  %v3455_v12 = vcombine.low %v3411_v14, %v3443_v19  ;;  %v3456_v20 = vcombine.high %v3411_v14, %v3443_v19  ;;  %6887 = vmatpush3.bf16.msra.mxu0 %v8697_v7  ;;  %v3322_v44 = vcombine.high %v3282_v62, %v3314_v56 }
 0x5cf   :  { %6888 = vmatprep.subr.bf16.mxu0 %v7389_v49  ;;  %v3457_v48 = vcombine.low %v3418_v41, %v3450_v8  ;;  %v3458_v50 = vcombine.high %v3418_v41, %v3450_v8 }
 0x5d0   :  { %6834 = vmatpush3.bf16.msra.mxu1 %v6831_v32 }
 0x5d1   :  { %3493 = vrot.lane.b32.xlu0 %v3320_v21, %s7402_s13  ;;  %6836 = vmatprep.subr.bf16.mxu1 %v6835_v35 }
 0x5d2   :  { %3487 = vrot.lane.b32.xlu1 %v3455_v12, %s7401_s27  ;;  %6890 = vmatpush3.bf16.msra.mxu0 %v8708_v47 }
 0x5d3   :  { %6899 = vmatprep.subr.bf16.mxu0 %v7389_v49 }
 0x5d4   :  { %6838 = vmatpush3.bf16.msra.mxu1 %v6835_v35 }
 0x5d5   :  { %3501 = vrot.lane.b32.xlu0 %v3321_v40, %s7403_s12  ;;  %6840 = vmatprep.subr.bf16.mxu1 %v6839_v30 }
 0x5d6   :  { %3495 = vrot.lane.b32.xlu1 %v3456_v20, %s7402_s13  ;;  %s7406_s13 = smov [#allocation18]  }
 0x5d7   :  { %s5508_s21 = sshll.u32 %s7406_s13, 4  ;;  %s5509_s21 = int_to_ptr.vmem [resolvable:$true] %s5508_s21 }
 0x5d8   :  { %6842 = vmatpush3.bf16.msra.mxu1 %v6839_v30  ;;  %p7347_p3 = scmp.lt.s32.totalorder %s5509_s21, %s5509_s21 }
 0x5d9   :  { %3509 = vrot.lane.b32.xlu0 %v3322_v44, %s7404_s1  ;;  %6843 = vmatprep.subr.bf16.mxu1 %v7389_v49 }
 0x5da   :  { %3503 = vrot.lane.b32.xlu1 %v3457_v48, %s7403_s12 }
 0x5de   :  { %3511 = vrot.lane.b32.xlu1 %v3458_v50, %s7404_s1 }
 0x633   :  { %v3462_v29 = vpop.permute.xlu0 %3461 }
 0x634   :  { %v3515_v13 = vsel %vm232_vm3, %v3315_v43, %v3462_v29 }
 0x637   :  { %v3470_v34 = vpop.permute.xlu0 %3469 }
 0x638   :  { %v3464_v22 = vpop.permute.xlu1 %3463  ;;  %v3518_v33 = vsel %vm3517_vm12, %v3515_v13, %v3470_v34 }
 0x639   :  { %v3516_v15 = vsel %vm232_vm3, %v3451_v51, %v3464_v22  ;;  %vm4470_vm3 = vcmask 1043456  }
 0x63b   :  { %v3478_v37 = vpop.permute.xlu0 %3477 }
 0x63c   :  { %v3472_v38 = vpop.permute.xlu1 %3471  ;;  %v3521_v52 = vsel %vm3520_vm13, %v3518_v33, %v3478_v37 }
 0x63d   :  { %v3519_v54 = vsel %vm3517_vm12, %v3516_v15, %v3472_v38 }
 0x63f   :  { %v3486_v25 = vpop.permute.xlu0 %3485 }
 0x640   :  { %v3480_v58 = vpop.permute.xlu1 %3479  ;;  %v3524_v17 = vsel %vm3523_vm14, %v3521_v52, %v3486_v25 }
 0x641   :  { %v3522_v59 = vsel %vm3520_vm13, %v3519_v54, %v3480_v58 }
 0x643   :  { %v3494_v57 = vpop.permute.xlu0 %3493 }
 0x644   :  { %v3488_v1 = vpop.permute.xlu1 %3487  ;;  %v3527_v23 = vsel %vm3526_vm15, %v3524_v17, %v3494_v57 }
 0x645   :  { %v3525_v5 = vsel %vm3523_vm14, %v3522_v59, %v3488_v1 }
 0x647   :  { %v3502_v36 = vpop.permute.xlu0 %3501 }
 0x648   :  { %v3496_v9 = vpop.permute.xlu1 %3495  ;;  %v3530_v31 = vsel %vm3529_vm1, %v3527_v23, %v3502_v36 }
 0x649   :  { %v3528_v42 = vsel %vm3526_vm15, %v3525_v5, %v3496_v9 }
 0x64b   :  { %v3510_v43 = vpop.permute.xlu0 %3509 }
 0x64c   :  { %v3504_v61 = vpop.permute.xlu1 %3503  ;;  %v3533_v53 = vsel %vm3532_vm2, %v3530_v31, %v3510_v43 }
 0x64d   :  { %6406 = vmatprep.mubr.msk.f32.mxu1 %vm918_vm11, %v3533_v53  ;;  %v3531_v11 = vsel %vm3529_vm1, %v3528_v42, %v3504_v61 }
 0x650   :  { %v3512_v60 = vpop.permute.xlu1 %3511 }
 0x651   :  { %v3534_v55 = vsel %vm3532_vm2, %v3531_v11, %v3512_v60 }
 0x652   :  { %6407 = vmatmul.mubr.msk.f32.vlgmr.msra.gmra.mrb[30].mxu1 %vm918_vm11, %v3534_v55 }
 0x653   :  { %6845 = vmatpush3.bf16.msra.mxu1 %v8697_v7  ;;  %6417 = vmatprep.mubr.msk.f32.mxu1 %vm7388_vm0, %v7387_v0 }
 0x654   :  { %6846 = vmatprep.subr.bf16.mxu1 %v7389_v49 }
 0x657   :  { %6848 = vmatpush3.bf16.msra.mxu1 %v8708_v47 }
 0x658   :  { %6849 = vmatprep.subr.bf16.mxu1 %v7389_v49 }
 0x65a   :  { %6418 = vmatmul.mubr.f32.vlgmr.msra.gmra.mrb[32].mxu1 %v7387_v0 }
 0x65b   :  { %6851 = vmatpush3.bf16.msra.mxu1 %v8697_v7  ;;  %6428 = vmatprep.mubr.msk.f32.mxu1 %vm7388_vm0, %v7387_v0 }
 0x65c   :  { %6852 = vmatprep.subr.bf16.mxu1 %v7389_v49 }
 0x65f   :  { %6854 = vmatpush3.bf16.msra.mxu1 %v8708_v47 }
 0x660   :  { %6855 = vmatprep.subr.bf16.mxu1 %v7389_v49 }
 0x725   :  { %v6408_v27 = vpop.f32.mrb[30].mxu1 }
 0x726   :  { %v8744_v51 = vadd.f32 %v6408_v27, %v5657_v3  ;;  %v3626_v63 = vpop.f32.mrb[31].mxu1 }
 0x727   :  { %v8746_v19 = vadd.f32 %v5657_v3, %v3626_v63 }
 0x72d   :  { %v3704_v24 = vpop.f32.mrb[32].mxu1 }
 0x72e   :  { %v3708_v6 = vadd.f32 %v3704_v24, %v8746_v19  ;;  %v6419_v32 = vpop.f32.mrb[33].mxu1 }
 0x730   :  { %7016 = vtanh.f32 %v3708_v6  ;;  %v3709_v28 = vsub.f32 0.0, %v3708_v6 }
 0x732   :  { %v3710_v45 = vmul.f32 1.442695, %v3709_v28 }
 0x734   :  { %7018 = vpow2.f32 %v3710_v45 }
 0x73a   :  { %v7017_v14 = vpop.eup %7016 }
 0x73b   :  { %3717 = vrot.lane.b32.xlu0 %v7017_v14, %s7401_s27 }
 0x73e   :  { %v7019_v21 = vpop.eup %7018 }
 0x73f   :  { %v3712_v56 = vadd.f32 1.0, %v7019_v21 }
 0x741   :  { %7020 = vrcp.f32 %v3712_v56 }
 0x74b   :  { %v7021_v12 = vpop.eup %7020 }
 0x74c   :  { %v3715_v35 = vmul.f32 0.0, %v7021_v12 }
 0x7ad   :  { %v3718_v16 = vpop.permute.xlu0 %3717 }
 0x7ae   :  { %v3720_v62 = vmul.f32 %v7021_v12, %v3718_v16 }
 0x7b0   :  { %3722 = vrot.lane.b32.xlu1 %v3720_v62, %s7401_s27 }
 0x822   :  { %v3723_v4 = vpop.permute.xlu1 %3722 }
 0x823   :  { %v3725_v2 = vadd.f32 %v3723_v4, %v3715_v35 }
 0x825   :  { %7022 = vtanh.f32 %v3725_v2  ;;  %v3818_v37 = vrot.slane %v3725_v2, 6 }
 0x82f   :  { %v7023_v46 = vpop.eup %7022 }
 0x830   :  { %3728 = vrot.lane.b32.xlu0 %v7023_v46, %s7401_s27 }
 0x8a2   :  { %v3729_v10 = vpop.permute.xlu0 %3728 }
 0x8a3   :  { %v8752_v18 = vmul.f32 %v7021_v12, %v3729_v10 }
 0x8a5   :  { %3733 = vrot.lane.b32.xlu1 %v8752_v18, %s7405_s10 }
 0x917   :  { %v3734_v40 = vpop.permute.xlu1 %3733 }
 0x918   :  { %6429 = vmatmul.mubr.msk.f32.vlgmr.msra.gmra.mrb[34].mxu1 %vm3523_vm14, %v3734_v40 }
 0x919   :  { %6857 = vmatpush3.bf16.msra.mxu1 %v8697_v7  ;;  %6439 = vmatprep.mubr.msk.f32.mxu1 %vm7388_vm0, %v7387_v0 }
 0x91a   :  { %6858 = vmatprep.subr.bf16.mxu1 %v7389_v49 }
 0x91d   :  { %6860 = vmatpush3.bf16.msra.mxu1 %v8708_v47 }
 0x91e   :  { %6861 = vmatprep.subr.bf16.mxu1 %v7389_v49 }
 0x9eb   :  { %v3803_v20 = vpop.f32.mrb[34].mxu1 }
 0x9ec   :  { %v3808_v8 = vrot.slane %v3803_v20, 6  ;;  %v6430_v30 = vpop.f32.mrb[35].mxu1 }
 0x9ee   :  { %v3810_v39 = vadd.f32 %v3808_v8, %v8746_v19 }
 0x9f0   :  { %7024 = vtanh.f32 %v3810_v39  ;;  %v3811_v41 = vsub.f32 0.0, %v3810_v39 }
 0x9f2   :  { %v3812_v44 = vmul.f32 1.442695, %v3811_v41 }
 0x9f4   :  { %7026 = vpow2.f32 %v3812_v44 }
 0x9fa   :  { %v7025_v26 = vpop.eup %7024 }
 0x9fb   :  { %3822 = vrot.lane.b32.xlu0 %v7025_v26, %s7401_s27 }
 0x9fe   :  { %v7027_v48 = vpop.eup %7026 }
 0x9ff   :  { %v3814_v50 = vadd.f32 1.0, %v7027_v48 }
 0xa01   :  { %7028 = vrcp.f32 %v3814_v50 }
 0xa0b   :  { %v7029_v29 = vpop.eup %7028 }
 0xa0c   :  { %v3820_v38 = vmul.f32 %v7029_v29, %v3818_v37 }
 0xa6d   :  { %v3823_v34 = vpop.permute.xlu0 %3822 }
 0xa6e   :  { %v3825_v22 = vmul.f32 %v7029_v29, %v3823_v34 }
 0xa70   :  { %3827 = vrot.lane.b32.xlu1 %v3825_v22, %s7401_s27 }
 0xae2   :  { %v3828_v25 = vpop.permute.xlu1 %3827 }
 0xae3   :  { %v3830_v58 = vadd.f32 %v3828_v25, %v3820_v38 }
 0xae5   :  { %7030 = vtanh.f32 %v3830_v58  ;;  %v3924_v42 = vrot.slane %v3830_v58, 6 }
 0xaef   :  { %v7031_v57 = vpop.eup %7030 }
 0xaf0   :  { %3833 = vrot.lane.b32.xlu0 %v7031_v57, %s7401_s27 }
 0xb62   :  { %v3834_v1 = vpop.permute.xlu0 %3833 }
 0xb63   :  { %v3836_v13 = vmul.f32 %v7029_v29, %v3834_v1 }
 0xb65   :  { %v3838_v33 = vrot.slane %v3836_v13, 2  ;;  %v4469_v24 = vsel %vm438_vm5, %v8752_v18, %v3836_v13 }
 0xb67   :  { %3839 = vrot.lane.b32.xlu1 %v3838_v33, %s7405_s10 }
 0xbd9   :  { %v3840_v36 = vpop.permute.xlu1 %3839 }
 0xbda   :  { %6440 = vmatmul.mubr.msk.f32.vlgmr.msra.gmra.mrb[36].mxu1 %vm3523_vm14, %v3840_v36 }
 0xbdb   :  { %6863 = vmatpush3.bf16.msra.mxu1 %v8697_v7  ;;  %6450 = vmatprep.mubr.msk.f32.mxu1 %vm7388_vm0, %v7387_v0 }
 0xbdc   :  { %6864 = vmatprep.subr.bf16.mxu1 %v7389_v49 }
 0xbdf   :  { %6866 = vmatpush3.bf16.msra.mxu1 %v8708_v47 }
 0xbe0   :  { %6867 = vmatprep.subr.bf16.mxu1 %v7389_v49 }
 0xcad   :  { %v3909_v52 = vpop.f32.mrb[36].mxu1 }
 0xcae   :  { %v3914_v9 = vrot.slane %v3909_v52, 4  ;;  %v6441_v17 = vpop.f32.mrb[37].mxu1 }
 0xcb0   :  { %v3916_v23 = vadd.f32 %v3914_v9, %v8746_v19 }
 0xcb2   :  { %7032 = vtanh.f32 %v3916_v23  ;;  %v3917_v31 = vsub.f32 0.0, %v3916_v23 }
 0xcb4   :  { %v3918_v43 = vmul.f32 1.442695, %v3917_v31 }
 0xcb6   :  { %7034 = vpow2.f32 %v3918_v43 }
 0xcbc   :  { %v7033_v15 = vpop.eup %7032 }
 0xcbd   :  { %3928 = vrot.lane.b32.xlu0 %v7033_v15, %s7401_s27 }
 0xcc0   :  { %v7035_v54 = vpop.eup %7034 }
 0xcc1   :  { %v3920_v61 = vadd.f32 1.0, %v7035_v54 }
 0xcc3   :  { %7036 = vrcp.f32 %v3920_v61 }
 0xccd   :  { %v7037_v53 = vpop.eup %7036 }
 0xcce   :  { %v3926_v11 = vmul.f32 %v7037_v53, %v3924_v42 }
 0xd2f   :  { %v3929_v59 = vpop.permute.xlu0 %3928 }
 0xd30   :  { %v3931_v5 = vmul.f32 %v7037_v53, %v3929_v59 }
 0xd32   :  { %3933 = vrot.lane.b32.xlu1 %v3931_v5, %s7401_s27 }
 0xda4   :  { %v3934_v60 = vpop.permute.xlu1 %3933 }
 0xda5   :  { %v3936_v55 = vadd.f32 %v3934_v60, %v3926_v11 }
 0xda7   :  { %7038 = vtanh.f32 %v3936_v55  ;;  %v4030_v18 = vrot.slane %v3936_v55, 6 }
 0xdb1   :  { %v7039_v3 = vpop.eup %7038 }
 0xdb2   :  { %3939 = vrot.lane.b32.xlu0 %v7039_v3, %s7401_s27 }
 0xe24   :  { %v3940_v27 = vpop.permute.xlu0 %3939 }
 0xe25   :  { %v3942_v63 = vmul.f32 %v7037_v53, %v3940_v27 }
 0xe27   :  { %v3944_v6 = vrot.slane %v3942_v63, 4  ;;  %v4471_v32 = vsel %vm4470_vm3, %v4469_v24, %v3942_v63 }
 0xe29   :  { %3945 = vrot.lane.b32.xlu1 %v3944_v6, %s7405_s10 }
 0xe9b   :  { %v3946_v14 = vpop.permute.xlu1 %3945 }
 0xe9c   :  { %6451 = vmatmul.mubr.msk.f32.vlgmr.msra.gmra.mrb[38].mxu1 %vm3523_vm14, %v3946_v14 }
 0xe9d   :  { %6869 = vmatpush3.bf16.msra.mxu1 %v8697_v7  ;;  %6461 = vmatprep.mubr.msk.f32.mxu1 %vm7388_vm0, %v7387_v0 }
 0xe9e   :  { %6870 = vmatprep.subr.bf16.mxu1 %v7389_v49 }
 0xea1   :  { %6872 = vmatpush3.bf16.msra.mxu1 %v8708_v47 }
 0xea2   :  { %6873 = vmatprep.subr.bf16.mxu1 %v7389_v49 }
 0xf6f   :  { %v4015_v28 = vpop.f32.mrb[38].mxu1 }
 0xf70   :  { %v4020_v45 = vrot.slane %v4015_v28, 2  ;;  %v6452_v21 = vpop.f32.mrb[39].mxu1 }
 0xf72   :  { %v4022_v56 = vadd.f32 %v4020_v45, %v8746_v19 }
 0xf74   :  { %7040 = vtanh.f32 %v4022_v56  ;;  %v4023_v16 = vsub.f32 0.0, %v4022_v56 }
 0xf76   :  { %v4024_v62 = vmul.f32 1.442695, %v4023_v16 }
 0xf78   :  { %7042 = vpow2.f32 %v4024_v62 }
 0xf7e   :  { %v7041_v12 = vpop.eup %7040 }
 0xf7f   :  { %4034 = vrot.lane.b32.xlu0 %v7041_v12, %s7401_s27 }
 0xf82   :  { %v7043_v35 = vpop.eup %7042 }
 0xf83   :  { %v4026_v4 = vadd.f32 1.0, %v7043_v35 }
 0xf85   :  { %7044 = vrcp.f32 %v4026_v4 }
 0xf8f   :  { %v7045_v2 = vpop.eup %7044 }
 0xf90   :  { %v4032_v40 = vmul.f32 %v7045_v2, %v4030_v18 }
 0xff1   :  { %v4035_v46 = vpop.permute.xlu0 %4034 }
 0xff2   :  { %v4037_v10 = vmul.f32 %v7045_v2, %v4035_v46 }
 0xff4   :  { %4039 = vrot.lane.b32.xlu1 %v4037_v10, %s7401_s27 }
0x1066   :  { %v4040_v20 = vpop.permute.xlu1 %4039 }
0x1067   :  { %v4042_v8 = vadd.f32 %v4040_v20, %v4032_v40 }
0x1069   :  { %7046 = vtanh.f32 %v4042_v8  ;;  %v4133_v13 = vrot.slane %v4042_v8, 6 }
0x1073   :  { %v7047_v19 = vpop.eup %7046 }
0x1074   :  { %4045 = vrot.lane.b32.xlu0 %v7047_v19, %s7401_s27 }
0x10e6   :  { %v4046_v30 = vpop.permute.xlu0 %4045 }
0x10e7   :  { %v4048_v39 = vmul.f32 %v7045_v2, %v4046_v30 }
0x10e9   :  { %v4050_v26 = vrot.slane %v4048_v39, 6  ;;  %v8795_v41 = vsel %vm4472_vm4, %v4471_v32, %v4048_v39 }
0x10eb   :  { %4051 = vrot.lane.b32.xlu1 %v4050_v26, %s7405_s10 }
0x115d   :  { %v4052_v44 = vpop.permute.xlu1 %4051 }
0x115e   :  { %6462 = vmatmul.mubr.msk.f32.vlgmr.msra.gmra.mrb[40].mxu1 %vm3523_vm14, %v4052_v44 }
0x115f   :  { %6875 = vmatpush3.bf16.msra.mxu1 %v8697_v7  ;;  %6472 = vmatprep.mubr.msk.f32.mxu1 %vm7388_vm0, %v7387_v0 }
0x1160   :  { %6876 = vmatprep.subr.bf16.mxu1 %v7389_v49 }
0x1163   :  { %6878 = vmatpush3.bf16.msra.mxu1 %v8708_v47 }
0x1164   :  { %6879 = vmatprep.subr.bf16.mxu1 %v7389_v49 }
0x1231   :  { %v4121_v48 = vpop.f32.mrb[40].mxu1 }
0x1232   :  { %v4125_v50 = vadd.f32 %v4121_v48, %v8744_v51  ;;  %v6463_v29 = vpop.f32.mrb[41].mxu1 }
0x1234   :  { %7048 = vtanh.f32 %v4125_v50  ;;  %v4126_v22 = vsub.f32 0.0, %v4125_v50 }
0x1236   :  { %v4127_v37 = vmul.f32 1.442695, %v4126_v22 }
0x1238   :  { %7050 = vpow2.f32 %v4127_v37 }
0x123e   :  { %v7049_v34 = vpop.eup %7048 }
0x123f   :  { %4137 = vrot.lane.b32.xlu0 %v7049_v34, %s7401_s27 }
0x1242   :  { %v7051_v38 = vpop.eup %7050 }
0x1243   :  { %v4129_v25 = vadd.f32 1.0, %v7051_v38 }
0x1245   :  { %7052 = vrcp.f32 %v4129_v25 }
0x124f   :  { %v7053_v58 = vpop.eup %7052 }
0x1250   :  { %v4135_v33 = vmul.f32 %v7053_v58, %v4133_v13 }
0x12b1   :  { %v4138_v57 = vpop.permute.xlu0 %4137 }
0x12b2   :  { %v4140_v1 = vmul.f32 %v7053_v58, %v4138_v57 }
0x12b4   :  { %4142 = vrot.lane.b32.xlu1 %v4140_v1, %s7401_s27 }
0x1326   :  { %v4143_v36 = vpop.permute.xlu1 %4142 }
0x1327   :  { %v4145_v52 = vadd.f32 %v4143_v36, %v4135_v33 }
0x1329   :  { %7054 = vtanh.f32 %v4145_v52 }
0x1333   :  { %v7055_v9 = vpop.eup %7054 }
0x1334   :  { %4148 = vrot.lane.b32.xlu0 %v7055_v9, %s7401_s27 }
0x13a6   :  { %v4149_v17 = vpop.permute.xlu0 %4148 }
0x13a7   :  { %v8809_v23 = vmul.f32 %v7053_v58, %v4149_v17 }
0x13a9   :  { %4153 = vrot.lane.b32.xlu1 %v8809_v23, %s7405_s10 }
0x141b   :  { %v4154_v15 = vpop.permute.xlu1 %4153 }
0x141c   :  { %6473 = vmatmul.mubr.msk.f32.vlgmr.msra.gmra.mrb[42].mxu1 %vm3523_vm14, %v4154_v15 }
0x141d   :  { %6881 = vmatpush3.bf16.msra.mxu1 %v8697_v7  ;;  %6483 = vmatprep.mubr.msk.f32.mxu1 %vm7388_vm0, %v7387_v0 }
0x141e   :  { %6882 = vmatprep.subr.bf16.mxu1 %v7389_v49 }
0x1421   :  { %6884 = vmatpush3.bf16.msra.mxu1 %v8708_v47  ;;  %v4238_v47 = vrot.slane %v4145_v52, 6 }
0x14ef   :  { %v4223_v31 = vpop.f32.mrb[42].mxu1 }
0x14f0   :  { %v4228_v43 = vrot.slane %v4223_v31, 6  ;;  %v6474_v54 = vpop.f32.mrb[43].mxu1  ;;  %v4477_v31 = vld [vmem:[#allocation15] sm:$0xff] }
0x14f1   :  { %v4481_v54 = vld [vmem:[#allocation17] sm:$0xff] }
0x14f2   :  { %v4230_v61 = vadd.f32 %v4228_v43, %v8744_v51  ;;  %v4478_v43 = vld [vmem:[#allocation15 + $0x8] sm:$0xff] }
0x14f4   :  { %7056 = vtanh.f32 %v4230_v61  ;;  %v4231_v59 = vsub.f32 0.0, %v4230_v61  ;;  %v6891_v61 = vpack.c.bf16 %v4478_v43, %v4477_v31 }
0x14f6   :  { %v4232_v5 = vmul.f32 1.442695, %v4231_v59  ;;  %v4479_v59 = vld [vmem:[#allocation15 + $0x10] sm:$0xff]  ;;  %6892 = vmatprep.subr.bf16.mxu1 %v6891_v61 }
0x14f8   :  { %7058 = vpow2.f32 %v4232_v5  ;;  %v4480_v5 = vld [vmem:[#allocation15 + $0x18] sm:$0xff] }
0x14fe   :  { %v7057_v53 = vpop.eup %7056 }
0x14ff   :  { %4242 = vrot.lane.b32.xlu0 %v7057_v53, %s7401_s27  ;;  %v4482_v53 = vld [vmem:[#allocation17 + $0x8] sm:$0xff] }
0x1502   :  { %v7059_v7 = vpop.eup %7058 }
0x1503   :  { %v4234_v42 = vadd.f32 1.0, %v7059_v7  ;;  %v8842_v7 = vpack.c.bf16 %v4482_v53, %v4481_v54 }
0x1505   :  { %7060 = vrcp.f32 %v4234_v42  ;;  %v6895_v42 = vpack.c.bf16 %v4480_v5, %v4479_v59 }
0x150f   :  { %v7061_v11 = vpop.eup %7060 }
0x1510   :  { %v4240_v3 = vmul.f32 %v7061_v11, %v4238_v47 }
0x1571   :  { %v4243_v60 = vpop.permute.xlu0 %4242 }
0x1572   :  { %v4245_v55 = vmul.f32 %v7061_v11, %v4243_v60 }
0x1574   :  { %4247 = vrot.lane.b32.xlu1 %v4245_v55, %s7401_s27 }
0x15e6   :  { %v4248_v27 = vpop.permute.xlu1 %4247 }
0x15e7   :  { %v4250_v63 = vadd.f32 %v4248_v27, %v4240_v3 }
0x15e9   :  { %7062 = vtanh.f32 %v4250_v63  ;;  %v4344_v40 = vrot.slane %v4250_v63, 6 }
0x15f3   :  { %v7063_v24 = vpop.eup %7062 }
0x15f4   :  { %4253 = vrot.lane.b32.xlu0 %v7063_v24, %s7401_s27 }
0x1666   :  { %v4254_v6 = vpop.permute.xlu0 %4253 }
0x1667   :  { %v4256_v32 = vmul.f32 %v7061_v11, %v4254_v6  ;;  %v4483_v11 = vld [vmem:[#allocation17 + $0x10] sm:$0xff] }
0x1669   :  { %v4258_v14 = vrot.slane %v4256_v32, 2  ;;  %v4474_v44 = vsel %vm438_vm5, %v8809_v23, %v4256_v32  ;;  %v5667_v32 = vld [vmem:[%s9001_s14] ss:$0 sm:$0xff] }
0x166b   :  { %4259 = vrot.lane.b32.xlu1 %v4258_v14, %s7405_s10 }
0x16dd   :  { %v4260_v28 = vpop.permute.xlu1 %4259 }
0x16de   :  { %6484 = vmatmul.mubr.msk.f32.vlgmr.msra.gmra.mrb[44].mxu1 %vm3523_vm14, %v4260_v28 }
0x16df   :  { %6894 = vmatpush3.bf16.msra.mxu1 %v6891_v61 }
0x16e0   :  { %6896 = vmatprep.subr.bf16.mxu1 %v6895_v42 }
0x16e3   :  { %6898 = vmatpush3.bf16.msra.mxu1 %v6895_v42 }
0x16e4   :  { %6905 = vmatprep.subr.bf16.mxu1 %v7389_v49 }
0x17b1   :  { %v4329_v45 = vpop.f32.mrb[44].mxu1 }
0x17b2   :  { %v4334_v21 = vrot.slane %v4329_v45, 4  ;;  %v6485_v56 = vpop.f32.mrb[45].mxu1 }
0x17b4   :  { %v4336_v12 = vadd.f32 %v4334_v21, %v8744_v51 }
0x17b6   :  { %7064 = vtanh.f32 %v4336_v12  ;;  %v4337_v62 = vsub.f32 0.0, %v4336_v12 }
0x17b8   :  { %v4338_v35 = vmul.f32 1.442695, %v4337_v62 }
0x17ba   :  { %7066 = vpow2.f32 %v4338_v35 }
0x17c0   :  { %v7065_v16 = vpop.eup %7064 }
0x17c1   :  { %4348 = vrot.lane.b32.xlu0 %v7065_v16, %s7401_s27 }
0x17c4   :  { %v7067_v4 = vpop.eup %7066 }
0x17c5   :  { %v4340_v2 = vadd.f32 1.0, %v7067_v4 }
0x17c7   :  { %7068 = vrcp.f32 %v4340_v2 }
0x17d1   :  { %v7069_v46 = vpop.eup %7068 }
0x17d2   :  { %v4346_v20 = vmul.f32 %v7069_v46, %v4344_v40 }
0x1833   :  { %v4349_v10 = vpop.permute.xlu0 %4348 }
0x1834   :  { %v4351_v18 = vmul.f32 %v7069_v46, %v4349_v10 }
0x1836   :  { %4353 = vrot.lane.b32.xlu1 %v4351_v18, %s7401_s27 }
0x18a8   :  { %v4354_v8 = vpop.permute.xlu1 %4353 }
0x18a9   :  { %v4356_v19 = vadd.f32 %v4354_v8, %v4346_v20 }
0x18ab   :  { %7070 = vtanh.f32 %v4356_v19  ;;  %v4450_v9 = vrot.slane %v4356_v19, 6 }
0x18b5   :  { %v7071_v30 = vpop.eup %7070 }
0x18b6   :  { %4359 = vrot.lane.b32.xlu0 %v7071_v30, %s7401_s27 }
0x1928   :  { %v4360_v39 = vpop.permute.xlu0 %4359 }
0x1929   :  { %v4362_v26 = vmul.f32 %v7069_v46, %v4360_v39 }
0x192b   :  { %v4364_v48 = vrot.slane %v4362_v26, 4  ;;  %v4475_v50 = vsel %vm4470_vm3, %v4474_v44, %v4362_v26 }
0x192d   :  { %4365 = vrot.lane.b32.xlu1 %v4364_v48, %s7405_s10 }
0x199f   :  { %v4366_v29 = vpop.permute.xlu1 %4365 }
0x19a0   :  { %6495 = vmatmul.mubr.msk.f32.vlgmr.msra.gmra.mrb[56].mxu0 %vm3523_vm14, %v4366_v29 }
0x19a1   :  { %6516 = vmatprep.mubr.msk.f32.mxu0 %vm7388_vm0, %v7387_v0  ;;  %6901 = vmatpush3.bf16.msra.mxu0 %v8842_v7 }
0x19a2   :  { %6902 = vmatprep.subr.bf16.mxu0 %v7389_v49 }
0x1a73   :  { %v4435_v34 = vpop.f32.mrb[56].mxu0 }
0x1a74   :  { %v4440_v22 = vrot.slane %v4435_v34, 2  ;;  %v6496_v37 = vpop.f32.mrb[57].mxu0 }
0x1a76   :  { %v4442_v38 = vadd.f32 %v4440_v22, %v8744_v51 }
0x1a78   :  { %7072 = vtanh.f32 %v4442_v38  ;;  %v4443_v58 = vsub.f32 0.0, %v4442_v38 }
0x1a7a   :  { %v4444_v57 = vmul.f32 1.442695, %v4443_v58 }
0x1a7c   :  { %7074 = vpow2.f32 %v4444_v57 }
0x1a82   :  { %v7073_v25 = vpop.eup %7072 }
0x1a83   :  { %4454 = vrot.lane.b32.xlu0 %v7073_v25, %s7401_s27 }
0x1a86   :  { %v7075_v1 = vpop.eup %7074 }
0x1a87   :  { %v4446_v13 = vadd.f32 1.0, %v7075_v1 }
0x1a89   :  { %7076 = vrcp.f32 %v4446_v13 }
0x1a93   :  { %v7077_v33 = vpop.eup %7076 }
0x1a94   :  { %v4452_v51 = vmul.f32 %v7077_v33, %v4450_v9 }
0x1af5   :  { %v4455_v36 = vpop.permute.xlu0 %4454 }
0x1af6   :  { %v4457_v52 = vmul.f32 %v7077_v33, %v4455_v36 }
0x1af8   :  { %4459 = vrot.lane.b32.xlu1 %v4457_v52, %s7401_s27 }
0x1afc   :  { %4494 = vrot.lane.b32.xlu1 %v8795_v41, %s7405_s10  ;;  %v4484_v41 = vld [vmem:[#allocation17 + $0x18] sm:$0xff] }
0x1afd   :  { %v8845_v60 = vpack.c.bf16 %v4484_v41, %v4483_v11 }
0x1aff   :  { %6904 = vmatpush3.bf16.msra.mxu0 %v8845_v60 }
0x1b00   :  { %6911 = vmatprep.subr.bf16.mxu0 %v7389_v49 }
0x1b02   :  { %6517 = vmatmul.mubr.f32.vlgmr.msra.gmra.mrb[58].mxu0 %v7387_v0 }
0x1b03   :  { %6913 = vmatpush3.bf16.msra.mxu0 %v8842_v7  ;;  %6538 = vmatprep.mubr.msk.f32.mxu0 %vm7388_vm0, %v7387_v0 }
0x1b04   :  { %6914 = vmatprep.subr.bf16.mxu0 %v7389_v49 }
0x1b07   :  { %6916 = vmatpush3.bf16.msra.mxu0 %v8845_v60 }
0x1b08   :  { %6923 = vmatprep.subr.bf16.mxu0 %v7389_v49 }
0x1b6a   :  { %v4460_v17 = vpop.permute.xlu1 %4459 }
0x1b6b   :  { %v4462_v23 = vadd.f32 %v4460_v17, %v4452_v51 }
0x1b6d   :  { %7078 = vtanh.f32 %v4462_v23 }
0x1b6e   :  { %v4495_v15 = vpop.permute.xlu1 %4494 }
0x1b6f   :  { %6505 = vmatprep.mubr.msk.f32.mxu1 %vm3523_vm14, %v4495_v15 }
0x1b77   :  { %v7079_v55 = vpop.eup %7078 }
0x1b78   :  { %4465 = vrot.lane.b32.xlu0 %v7079_v55, %s7401_s27 }
0x1bd5   :  { %v4643_v24 = vpop.f32.mrb[58].mxu0 }
0x1bd6   :  { %v6518_v6 = vpop.f32.mrb[59].mxu0 }
0x1bea   :  { %v4466_v47 = vpop.permute.xlu0 %4465 }
0x1beb   :  { %v4468_v3 = vmul.f32 %v7077_v33, %v4466_v47 }
0x1bed   :  { %v4476_v27 = vsel %vm4472_vm4, %v4475_v50, %v4468_v3 }
0x1bee   :  { %4496 = vrot.lane.b32.xlu0 %v4476_v27, %s7405_s10 }
0x1c60   :  { %v4497_v63 = vpop.permute.xlu0 %4496 }
0x1c61   :  { %6506 = vmatmul.mubr.msk.f32.vlgmr.msra.gmra.mrb[46].mxu1 %vm3523_vm14, %v4497_v63 }
0x1c62   :  { %6907 = vmatpush3.bf16.msra.mxu1 %v8842_v7  ;;  %6527 = vmatprep.mubr.msk.f32.mxu1 %vm7388_vm0, %v7387_v0 }
0x1c63   :  { %6908 = vmatprep.subr.bf16.mxu1 %v7389_v49 }
0x1c66   :  { %6910 = vmatpush3.bf16.msra.mxu1 %v8845_v60 }
0x1c67   :  { %6917 = vmatprep.subr.bf16.mxu1 %v7389_v49 }
0x1d34   :  { %v6507_v14 = vpop.f32.mrb[46].mxu1 }
0x1d35   :  { %v8871_v28 = vadd.f32 %v6507_v14, %v5667_v32  ;;  %v4568_v45 = vpop.f32.mrb[47].mxu1 }
0x1d36   :  { %v8873_v21 = vadd.f32 %v5667_v32, %v4568_v45 }
0x1d38   :  { %v4647_v56 = vadd.f32 %v4643_v24, %v8873_v21 }
0x1d3a   :  { %7080 = vtanh.f32 %v4647_v56  ;;  %v4648_v16 = vsub.f32 0.0, %v4647_v56 }
0x1d3c   :  { %v4649_v62 = vmul.f32 1.442695, %v4648_v16 }
0x1d3e   :  { %7082 = vpow2.f32 %v4649_v62 }
0x1d44   :  { %v7081_v12 = vpop.eup %7080 }
0x1d45   :  { %4656 = vrot.lane.b32.xlu1 %v7081_v12, %s7401_s27 }
0x1d48   :  { %v7083_v35 = vpop.eup %7082 }
0x1d49   :  { %v4651_v4 = vadd.f32 1.0, %v7083_v35 }
0x1d4b   :  { %7084 = vrcp.f32 %v4651_v4 }
0x1d55   :  { %v7085_v2 = vpop.eup %7084 }
0x1d56   :  { %v4654_v18 = vmul.f32 0.0, %v7085_v2 }
0x1db7   :  { %v4657_v46 = vpop.permute.xlu1 %4656 }
0x1db8   :  { %v4659_v10 = vmul.f32 %v7085_v2, %v4657_v46 }
0x1dba   :  { %4661 = vrot.lane.b32.xlu0 %v4659_v10, %s7401_s27 }
0x1e2c   :  { %v4662_v40 = vpop.permute.xlu0 %4661 }
0x1e2d   :  { %v4664_v20 = vadd.f32 %v4662_v40, %v4654_v18 }
0x1e2f   :  { %7086 = vtanh.f32 %v4664_v20  ;;  %v4757_v1 = vrot.slane %v4664_v20, 6 }
0x1e39   :  { %v7087_v8 = vpop.eup %7086 }
0x1e3a   :  { %4667 = vrot.lane.b32.xlu1 %v7087_v8, %s7401_s27 }
0x1eac   :  { %v4668_v19 = vpop.permute.xlu1 %4667 }
0x1ead   :  { %v4670_v30 = vmul.f32 %v7085_v2, %v4668_v19 }
0x1eaf   :  { %4672 = vrot.lane.b32.xlu0 %v4670_v30, %s7405_s10 }
0x1f21   :  { %v4673_v39 = vpop.permute.xlu0 %4672 }
0x1f22   :  { %6528 = vmatmul.mubr.msk.f32.vlgmr.msra.gmra.mrb[48].mxu1 %vm3523_vm14, %v4673_v39 }
0x1f23   :  { %6919 = vmatpush3.bf16.msra.mxu1 %v8842_v7  ;;  %6549 = vmatprep.mubr.msk.f32.mxu1 %vm7388_vm0, %v7387_v0 }
0x1f24   :  { %6920 = vmatprep.subr.bf16.mxu1 %v7389_v49 }
0x1f27   :  { %6922 = vmatpush3.bf16.msra.mxu1 %v8845_v60 }
0x1f28   :  { %6929 = vmatprep.subr.bf16.mxu1 %v7389_v49 }
0x1ff5   :  { %v4742_v26 = vpop.f32.mrb[48].mxu1 }
0x1ff6   :  { %v4747_v44 = vrot.slane %v4742_v26, 6  ;;  %v6529_v48 = vpop.f32.mrb[49].mxu1 }
0x1ff8   :  { %v4749_v50 = vadd.f32 %v4747_v44, %v8873_v21 }
0x1ffa   :  { %7088 = vtanh.f32 %v4749_v50  ;;  %v4750_v34 = vsub.f32 0.0, %v4749_v50 }
0x1ffc   :  { %v4751_v22 = vmul.f32 1.442695, %v4750_v34 }
0x1ffe   :  { %7090 = vpow2.f32 %v4751_v22 }
0x2004   :  { %v7089_v29 = vpop.eup %7088 }
0x2005   :  { %4761 = vrot.lane.b32.xlu1 %v7089_v29, %s7401_s27 }
0x2008   :  { %v7091_v37 = vpop.eup %7090 }
0x2009   :  { %v4753_v38 = vadd.f32 1.0, %v7091_v37 }
0x200b   :  { %7092 = vrcp.f32 %v4753_v38 }
0x2015   :  { %v7093_v25 = vpop.eup %7092 }
0x2016   :  { %v4759_v13 = vmul.f32 %v7093_v25, %v4757_v1 }
0x2077   :  { %v4762_v58 = vpop.permute.xlu1 %4761 }
0x2078   :  { %v4764_v57 = vmul.f32 %v7093_v25, %v4762_v58 }
0x207a   :  { %4766 = vrot.lane.b32.xlu0 %v4764_v57, %s7401_s27 }
0x20ec   :  { %v4767_v33 = vpop.permute.xlu0 %4766 }
0x20ed   :  { %v4769_v36 = vadd.f32 %v4767_v33, %v4759_v13 }
0x20ef   :  { %7094 = vtanh.f32 %v4769_v36  ;;  %v4863_v47 = vrot.slane %v4769_v36, 6 }
0x20f9   :  { %v7095_v52 = vpop.eup %7094 }
0x20fa   :  { %4772 = vrot.lane.b32.xlu1 %v7095_v52, %s7401_s27 }
0x216c   :  { %v4773_v9 = vpop.permute.xlu1 %4772 }
0x216d   :  { %v4775_v51 = vmul.f32 %v7093_v25, %v4773_v9 }
0x216f   :  { %v4777_v17 = vrot.slane %v4775_v51, 2 }
0x2171   :  { %4778 = vrot.lane.b32.xlu0 %v4777_v17, %s7405_s10 }
0x21e3   :  { %v4779_v23 = vpop.permute.xlu0 %4778 }
0x21e4   :  { %6539 = vmatmul.mubr.msk.f32.vlgmr.msra.gmra.mrb[60].mxu0 %vm3523_vm14, %v4779_v23 }
0x21e5   :  { %6925 = vmatpush3.bf16.msra.mxu0 %v8842_v7  ;;  %6560 = vmatprep.mubr.msk.f32.mxu0 %vm7388_vm0, %v7387_v0 }
0x21e6   :  { %6926 = vmatprep.subr.bf16.mxu0 %v7389_v49 }
0x21e9   :  { %6928 = vmatpush3.bf16.msra.mxu0 %v8845_v60 }
0x21ea   :  { %6935 = vmatprep.subr.bf16.mxu0 %v7389_v49 }
0x22b7   :  { %v4848_v15 = vpop.f32.mrb[60].mxu0 }
0x22b8   :  { %v4853_v31 = vrot.slane %v4848_v15, 4  ;;  %v6540_v43 = vpop.f32.mrb[61].mxu0 }
0x22ba   :  { %v4855_v54 = vadd.f32 %v4853_v31, %v8873_v21 }
0x22bc   :  { %7096 = vtanh.f32 %v4855_v54  ;;  %v4856_v53 = vsub.f32 0.0, %v4855_v54 }
0x22be   :  { %v4857_v59 = vmul.f32 1.442695, %v4856_v53 }
0x22c0   :  { %7098 = vpow2.f32 %v4857_v59 }
0x22c6   :  { %v7097_v61 = vpop.eup %7096 }
0x22c7   :  { %4867 = vrot.lane.b32.xlu1 %v7097_v61, %s7401_s27 }
0x22ca   :  { %v7099_v5 = vpop.eup %7098 }
0x22cb   :  { %v4859_v42 = vadd.f32 1.0, %v7099_v5 }
0x22cd   :  { %7100 = vrcp.f32 %v4859_v42 }
0x22d7   :  { %v7101_v11 = vpop.eup %7100 }
0x22d8   :  { %v4865_v3 = vmul.f32 %v7101_v11, %v4863_v47 }
0x2339   :  { %v4868_v41 = vpop.permute.xlu1 %4867 }
0x233a   :  { %v4870_v55 = vmul.f32 %v7101_v11, %v4868_v41 }
0x233c   :  { %4872 = vrot.lane.b32.xlu0 %v4870_v55, %s7401_s27 }
0x23ae   :  { %v4873_v27 = vpop.permute.xlu0 %4872 }
0x23af   :  { %v4875_v63 = vadd.f32 %v4873_v27, %v4865_v3 }
0x23b1   :  { %7102 = vtanh.f32 %v4875_v63  ;;  %v4969_v8 = vrot.slane %v4875_v63, 6 }
0x23bb   :  { %v7103_v24 = vpop.eup %7102 }
0x23bc   :  { %4878 = vrot.lane.b32.xlu1 %v7103_v24, %s7401_s27 }
0x242e   :  { %v4879_v6 = vpop.permute.xlu1 %4878 }
0x242f   :  { %v4881_v32 = vmul.f32 %v7101_v11, %v4879_v6 }
0x2431   :  { %v4883_v14 = vrot.slane %v4881_v32, 4 }
0x2433   :  { %4884 = vrot.lane.b32.xlu0 %v4883_v14, %s7405_s10 }
0x24a5   :  { %v4885_v45 = vpop.permute.xlu0 %4884 }
0x24a6   :  { %6550 = vmatmul.mubr.msk.f32.vlgmr.msra.gmra.mrb[50].mxu1 %vm3523_vm14, %v4885_v45 }
0x24a7   :  { %6931 = vmatpush3.bf16.msra.mxu1 %v8842_v7  ;;  %6571 = vmatprep.mubr.msk.f32.mxu1 %vm7388_vm0, %v7387_v0 }
0x24a8   :  { %6932 = vmatprep.subr.bf16.mxu1 %v7389_v49 }
0x24ab   :  { %6934 = vmatpush3.bf16.msra.mxu1 %v8845_v60 }
0x24ac   :  { %6941 = vmatprep.subr.bf16.mxu1 %v7389_v49 }
0x2579   :  { %v4954_v56 = vpop.f32.mrb[50].mxu1 }
0x257a   :  { %v4959_v12 = vrot.slane %v4954_v56, 2  ;;  %v6551_v16 = vpop.f32.mrb[51].mxu1 }
0x257c   :  { %v4961_v62 = vadd.f32 %v4959_v12, %v8873_v21 }
0x257e   :  { %7104 = vtanh.f32 %v4961_v62  ;;  %v4962_v4 = vsub.f32 0.0, %v4961_v62 }
0x2580   :  { %v4963_v2 = vmul.f32 1.442695, %v4962_v4 }
0x2582   :  { %7106 = vpow2.f32 %v4963_v2 }
0x2588   :  { %v7105_v35 = vpop.eup %7104 }
0x2589   :  { %4973 = vrot.lane.b32.xlu1 %v7105_v35, %s7401_s27 }
0x258c   :  { %v7107_v46 = vpop.eup %7106 }
0x258d   :  { %v4965_v10 = vadd.f32 1.0, %v7107_v46 }
0x258f   :  { %7108 = vrcp.f32 %v4965_v10 }
0x2599   :  { %v7109_v18 = vpop.eup %7108 }
0x259a   :  { %v4971_v19 = vmul.f32 %v7109_v18, %v4969_v8 }
0x25fb   :  { %v4974_v40 = vpop.permute.xlu1 %4973 }
0x25fc   :  { %v4976_v20 = vmul.f32 %v7109_v18, %v4974_v40 }
0x25fe   :  { %4978 = vrot.lane.b32.xlu0 %v4976_v20, %s7401_s27 }
0x2670   :  { %v4979_v30 = vpop.permute.xlu0 %4978 }
0x2671   :  { %v4981_v39 = vadd.f32 %v4979_v30, %v4971_v19 }
0x2673   :  { %7110 = vtanh.f32 %v4981_v39  ;;  %v5072_v36 = vrot.slane %v4981_v39, 6 }
0x267d   :  { %v7111_v21 = vpop.eup %7110 }
0x267e   :  { %4984 = vrot.lane.b32.xlu1 %v7111_v21, %s7401_s27 }
0x26f0   :  { %v4985_v26 = vpop.permute.xlu1 %4984 }
0x26f1   :  { %v8915_v44 = vmul.f32 %v7109_v18, %v4985_v26 }
0x26f3   :  { %v4989_v48 = vrot.slane %v8915_v44, 6 }
0x26f5   :  { %4990 = vrot.lane.b32.xlu0 %v4989_v48, %s7405_s10 }
0x2767   :  { %v4991_v50 = vpop.permute.xlu0 %4990 }
0x2768   :  { %6561 = vmatmul.mubr.msk.f32.vlgmr.msra.gmra.mrb[62].mxu0 %vm3523_vm14, %v4991_v50 }
0x2769   :  { %6937 = vmatpush3.bf16.msra.mxu0 %v8842_v7  ;;  %6582 = vmatprep.mubr.msk.f32.mxu0 %vm7388_vm0, %v7387_v0 }
0x276a   :  { %6938 = vmatprep.subr.bf16.mxu0 %v7389_v49 }
0x276d   :  { %6940 = vmatpush3.bf16.msra.mxu0 %v8845_v60 }
0x276e   :  { %6947 = vmatprep.subr.bf16.mxu0 %v7389_v49 }
0x283b   :  { %v5060_v29 = vpop.f32.mrb[62].mxu0 }
0x283c   :  { %v5064_v34 = vadd.f32 %v5060_v29, %v8871_v28  ;;  %v6562_v22 = vpop.f32.mrb[63].mxu0 }
0x283e   :  { %7112 = vtanh.f32 %v5064_v34  ;;  %v5065_v38 = vsub.f32 0.0, %v5064_v34 }
0x2840   :  { %v5066_v25 = vmul.f32 1.442695, %v5065_v38 }
0x2842   :  { %7114 = vpow2.f32 %v5066_v25 }
0x2848   :  { %v7113_v37 = vpop.eup %7112 }
0x2849   :  { %5076 = vrot.lane.b32.xlu1 %v7113_v37, %s7401_s27 }
0x284c   :  { %v7115_v58 = vpop.eup %7114 }
0x284d   :  { %v5068_v57 = vadd.f32 1.0, %v7115_v58 }
0x284f   :  { %7116 = vrcp.f32 %v5068_v57 }
0x2859   :  { %v7117_v1 = vpop.eup %7116 }
0x285a   :  { %v5074_v52 = vmul.f32 %v7117_v1, %v5072_v36 }
0x28bb   :  { %v5077_v13 = vpop.permute.xlu1 %5076 }
0x28bc   :  { %v5079_v33 = vmul.f32 %v7117_v1, %v5077_v13 }
0x28be   :  { %5081 = vrot.lane.b32.xlu0 %v5079_v33, %s7401_s27 }
0x2930   :  { %v5082_v9 = vpop.permute.xlu0 %5081 }
0x2931   :  { %v5084_v51 = vadd.f32 %v5082_v9, %v5074_v52 }
0x2933   :  { %7118 = vtanh.f32 %v5084_v51 }
0x293d   :  { %v7119_v17 = vpop.eup %7118 }
0x293e   :  { %5087 = vrot.lane.b32.xlu1 %v7119_v17, %s7401_s27 }
0x29b0   :  { %v5088_v23 = vpop.permute.xlu1 %5087 }
0x29b1   :  { %v5090_v15 = vmul.f32 %v7117_v1, %v5088_v23  ;;  %v5415_v23 = vld [vmem:[%s9002_s15 + $0x8] sm:$0xff] }
0x29b3   :  { %5092 = vrot.lane.b32.xlu0 %v5090_v15, %s7405_s10  ;;  %v5416_v15 = vld [vmem:[%s9002_s15 + $0x10] sm:$0xff] }
0x2a25   :  { %v5093_v31 = vpop.permute.xlu0 %5092 }
0x2a26   :  { %6572 = vmatmul.mubr.msk.f32.vlgmr.msra.gmra.mrb[52].mxu1 %vm3523_vm14, %v5093_v31 }
0x2a27   :  { %6943 = vmatpush3.bf16.msra.mxu1 %v8842_v7  ;;  %6593 = vmatprep.mubr.msk.f32.mxu1 %vm7388_vm0, %v7387_v0 }
0x2a28   :  { %6944 = vmatprep.subr.bf16.mxu1 %v7389_v49 }
0x2a2b   :  { %6946 = vmatpush3.bf16.msra.mxu1 %v8845_v60  ;;  %v5177_v60 = vrot.slane %v5084_v51, 6 }
0x2af9   :  { %v5162_v43 = vpop.f32.mrb[52].mxu1 }
0x2afa   :  { %v5167_v54 = vrot.slane %v5162_v43, 6  ;;  %v6573_v61 = vpop.f32.mrb[53].mxu1  ;;  %v5417_v43 = vld [vmem:[%s9002_s15 + $0x18] sm:$0xff] }
0x2afc   :  { %v5169_v53 = vadd.f32 %v5167_v54, %v8871_v28  ;;  %v6951_v54 = vpack.c.bf16 %v5417_v43, %v5416_v15 }
0x2afe   :  { %7120 = vtanh.f32 %v5169_v53  ;;  %v5170_v5 = vsub.f32 0.0, %v5169_v53 }
0x2b00   :  { %v5171_v42 = vmul.f32 1.442695, %v5170_v5  ;;  %v5408_v5 = vrot.slane %v8915_v44, 7 }
0x2b02   :  { %7122 = vpow2.f32 %v5171_v42 }
0x2b08   :  { %v7121_v59 = vpop.eup %7120 }
0x2b09   :  { %5181 = vrot.lane.b32.xlu1 %v7121_v59, %s7401_s27 }
0x2b0c   :  { %v7123_v7 = vpop.eup %7122 }
0x2b0d   :  { %v5173_v11 = vadd.f32 1.0, %v7123_v7 }
0x2b0f   :  { %7124 = vrcp.f32 %v5173_v11 }
0x2b19   :  { %v7125_v41 = vpop.eup %7124 }
0x2b1a   :  { %v5179_v3 = vmul.f32 %v7125_v41, %v5177_v60 }
0x2b7b   :  { %v5182_v55 = vpop.permute.xlu1 %5181 }
0x2b7c   :  { %v5184_v47 = vmul.f32 %v7125_v41, %v5182_v55 }
0x2b7e   :  { %5186 = vrot.lane.b32.xlu0 %v5184_v47, %s7401_s27 }
0x2bf0   :  { %v5187_v27 = vpop.permute.xlu0 %5186 }
0x2bf1   :  { %v5189_v63 = vadd.f32 %v5187_v27, %v5179_v3 }
0x2bf3   :  { %7126 = vtanh.f32 %v5189_v63 }
0x2bfd   :  { %v7127_v24 = vpop.eup %7126 }
0x2bfe   :  { %5192 = vrot.lane.b32.xlu1 %v7127_v24, %s7401_s27 }
0x2c70   :  { %v5193_v6 = vpop.permute.xlu1 %5192 }
0x2c71   :  { %v5195_v32 = vmul.f32 %v7125_v41, %v5193_v6 }
0x2c73   :  { %v5197_v14 = vrot.slane %v5195_v32, 2 }
0x2c75   :  { %5198 = vrot.lane.b32.xlu0 %v5197_v14, %s7405_s10 }
0x2ce7   :  { %v5199_v45 = vpop.permute.xlu0 %5198 }
0x2ce8   :  { %6583 = vmatmul.mubr.msk.f32.vlgmr.msra.gmra.mrb[64].mxu0 %vm3523_vm14, %v5199_v45 }
0x2ce9   :  { %6604 = vmatprep.mubr.msk.f32.mxu0 %vm7388_vm0, %v7387_v0  ;;  %v5283_v0 = vrot.slane %v5189_v63, 6  ;;  %vm5500_vm0 = vcmask 41984  }
0x2dbb   :  { %v5268_v56 = vpop.f32.mrb[64].mxu0 }
0x2dbc   :  { %v5273_v12 = vrot.slane %v5268_v56, 4  ;;  %v6584_v16 = vpop.f32.mrb[65].mxu0 }
0x2dbe   :  { %v5275_v62 = vadd.f32 %v5273_v12, %v8871_v28 }
0x2dc0   :  { %7128 = vtanh.f32 %v5275_v62  ;;  %v5276_v4 = vsub.f32 0.0, %v5275_v62 }
0x2dc2   :  { %v5277_v2 = vmul.f32 1.442695, %v5276_v4 }
0x2dc4   :  { %7130 = vpow2.f32 %v5277_v2 }
0x2dca   :  { %v7129_v35 = vpop.eup %7128 }
0x2dcb   :  { %5287 = vrot.lane.b32.xlu1 %v7129_v35, %s7401_s27 }
0x2dce   :  { %v7131_v46 = vpop.eup %7130 }
0x2dcf   :  { %v5279_v10 = vadd.f32 1.0, %v7131_v46 }
0x2dd1   :  { %7132 = vrcp.f32 %v5279_v10 }
0x2ddb   :  { %v7133_v18 = vpop.eup %7132 }
0x2ddc   :  { %v5285_v8 = vmul.f32 %v7133_v18, %v5283_v0 }
0x2e3d   :  { %v5288_v40 = vpop.permute.xlu1 %5287 }
0x2e3e   :  { %v5290_v20 = vmul.f32 %v7133_v18, %v5288_v40 }
0x2e40   :  { %5292 = vrot.lane.b32.xlu0 %v5290_v20, %s7401_s27 }
0x2eb2   :  { %v5293_v19 = vpop.permute.xlu0 %5292 }
0x2eb3   :  { %v5295_v30 = vadd.f32 %v5293_v19, %v5285_v8 }
0x2eb5   :  { %7134 = vtanh.f32 %v5295_v30  ;;  %v5389_v52 = vrot.slane %v5295_v30, 6 }
0x2ebf   :  { %v7135_v39 = vpop.eup %7134 }
0x2ec0   :  { %5298 = vrot.lane.b32.xlu1 %v7135_v39, %s7401_s27 }
0x2f32   :  { %v5299_v21 = vpop.permute.xlu1 %5298 }
0x2f33   :  { %v5301_v26 = vmul.f32 %v7133_v18, %v5299_v21 }
0x2f35   :  { %v5303_v48 = vrot.slane %v5301_v26, 4 }
0x2f37   :  { %5304 = vrot.lane.b32.xlu0 %v5303_v48, %s7405_s10 }
0x2fa9   :  { %v5305_v50 = vpop.permute.xlu0 %5304 }
0x2faa   :  { %6594 = vmatmul.mubr.msk.f32.vlgmr.msra.gmra.mrb[54].mxu1 %vm3523_vm14, %v5305_v50 }
0x307d   :  { %v5374_v29 = vpop.f32.mrb[54].mxu1 }
0x307e   :  { %v5379_v34 = vrot.slane %v5374_v29, 2  ;;  %v6595_v22 = vpop.f32.mrb[55].mxu1 }
0x3080   :  { %v5381_v37 = vadd.f32 %v5379_v34, %v8871_v28  ;;  %v5414_v28 = vld [vmem:[%s9002_s15] sm:$0xff] }
0x3081   :  { %v6948_v31 = vpack.c.bf16 %v5415_v23, %v5414_v28 }
0x3082   :  { %7136 = vtanh.f32 %v5381_v37  ;;  %v5382_v25 = vsub.f32 0.0, %v5381_v37 }
0x3083   :  { %6949 = vmatpush3.bf16.msra.mxu0 %v6948_v31 }
0x3084   :  { %v5383_v58 = vmul.f32 1.442695, %v5382_v25  ;;  %6950 = vmatprep.subr.bf16.mxu0 %v7389_v49  ;;  %v5677_v49 = vld [vmem:[%s9003_s16] ss:$0 sm:$0xff] }
0x3086   :  { %7138 = vpow2.f32 %v5383_v58 }
0x3087   :  { %6952 = vmatpush3.bf16.msra.mxu0 %v6951_v54 }
0x308c   :  { %v7137_v38 = vpop.eup %7136 }
0x308d   :  { %5393 = vrot.lane.b32.xlu1 %v7137_v38, %s7401_s27 }
0x3090   :  { %v7139_v57 = vpop.eup %7138 }
0x3091   :  { %v5385_v1 = vadd.f32 1.0, %v7139_v57 }
0x3093   :  { %7140 = vrcp.f32 %v5385_v1 }
0x309d   :  { %v7141_v13 = vpop.eup %7140 }
0x309e   :  { %v5391_v9 = vmul.f32 %v7141_v13, %v5389_v52 }
0x30ff   :  { %v5394_v33 = vpop.permute.xlu1 %5393 }
0x3100   :  { %v5396_v36 = vmul.f32 %v7141_v13, %v5394_v33 }
0x3102   :  { %5398 = vrot.lane.b32.xlu0 %v5396_v36, %s7401_s27 }
0x3174   :  { %v5399_v51 = vpop.permute.xlu0 %5398 }
0x3175   :  { %v5401_v17 = vadd.f32 %v5399_v51, %v5391_v9 }
0x3177   :  { %7142 = vtanh.f32 %v5401_v17 }
0x3181   :  { %v7143_v61 = vpop.eup %7142 }
0x3182   :  { %5404 = vrot.lane.b32.xlu1 %v7143_v61, %s7401_s27  ;;  %s7342_s27 = scalar_lea.vmem %s5509_s21, 32 }
0x3183   :  { %p7343_p2 = scmp.ne.s32.totalorder %s5509_s21, %s7342_s27  ;;  %p7348_p4 = scmp.lt.s32.totalorder %s7342_s27, %s7342_s27 }
0x3185   :  { %p7349_p5 = por %p7348_p4, %p7347_p3 }
0x3187   :  { %p7350_p6 = pnand %p7349_p5, %p7343_p2 }
0x31f4   :  { %v5405_v53 = vpop.permute.xlu1 %5404 }
0x31f5   :  { %v5407_v59 = vmul.f32 %v7141_v13, %v5405_v53 }
0x31f7   :  { %v5411_v42 = vrot.slane %v5407_v59, 6 }
0x31f9   :  { %v5413_v7 = vsel %vm585_vm7, %v5408_v5, %v5411_v42 }
0x31fa   :  { %5426 = vrot.lane.b32.xlu0 %v5413_v7, %s7405_s10 }
0x326c   :  { %v5427_v11 = vpop.permute.xlu0 %5426 }
0x326d   :  { %6605 = vmatmul.mubr.msk.f32.vlgmr.msra.gmra.mrb[66].mxu0 %vm3523_vm14, %v5427_v11 }
0x3340   :  { %v5496_v41 = vpop.f32.mrb[66].mxu0 }
0x3341   :  { %v5497_v55 = vadd.f32 %v5677_v49, %v5496_v41  ;;  %v6606_v47 = vpop.f32.mrb[67].mxu0 }
0x3343   :  { %5501 = vst.msk [vmem:[#allocation18] sm:$0x3] %vm5500_vm0, %v5497_v55 }
0x3344   :  { %7353 = shalt.err (!%p7350_p6)
}
0x3345   :  { %s7354_s3 = scalar_lea.hbm %s9004_s17, 32 }
0x3346   :  { %p7355_p7 = scmp.ne.s32.totalorder %s9004_s17, %s7354_s3  ;;  %p7358_p8 = scmp.lt.u32.totalorder %s7354_s3, %s9004_s17 }
0x3348   :  { %p7360_p9 = pnand %p7358_p8, %p7355_p7 }
0x334a   :  { %7363 = shalt.err (!%p7360_p9)
}
0x334b   :  { %5511 = dma.vmem_to_hbm [thread:$0]  %s5509_s21, 32, %s9004_s17, [#allocation5]  }
0x334c   :  { %7374 = dma.done.wait [#allocation5], 32  }
0x334d   :  { %7375 = vsyncadd [#allocation5], 4294967264 }
0x334e   :  { %5515 = vsyncpa [#allocation4], 1 }
0x334f   :  { %5516 = vsyncpa [#allocation7], 1 }
0x3350   :  { %5517 = vsyncpa [#allocation10], 1 }
0x3351   :  { %5518 = vsyncpa [#allocation13], 1 }
0x3352   :  { %5519 = vsyncpa [#allocation16], 1 }
0x3353   :  { %5520 = vsyncpa [#allocation5], 1 }

// kernel: tpu_custom_call.1
= control target key start
LH: loop header
LB: loop body
LE: loop exit
PB: predicated region body
PF: predicated region fallthrough
CT: control target
= control target key end

     0   :  { %s8056_s0 = inlined_call_operand.vmem [shape: f32[2,24,8], index: 0, kind: input, shape index: {}]   ;;  %s8057_s1 = inlined_call_operand.vmem [shape: f32[5,8,64], index: 1, kind: input, shape index: {}]   ;;  %s8058_s2 = inlined_call_operand.vmem [shape: f32[1,64], index: 2, kind: input, shape index: {}]   ;;  %s8059_s3 = inlined_call_operand.hbm [shape: f32[5,64,64], index: 3, kind: input, shape index: {}]   ;;  %s8060_s4 = inlined_call_operand.hbm [shape: f32[1,64], index: 4, kind: input, shape index: {}]   ;;  %s8061_s5 = inlined_call_operand.hbm [shape: f32[5,64,64], index: 5, kind: input, shape index: {}]   ;;  %s8062_s6 = inlined_call_operand.hbm [shape: f32[1,64], index: 6, kind: input, shape index: {}]   ;;  %s8063_s7 = inlined_call_operand.hbm [shape: f32[5,64,64], index: 7, kind: input, shape index: {}]   ;;  %s8064_s8 = inlined_call_operand.hbm [shape: f32[1,64], index: 8, kind: input, shape index: {}]   ;;  %s8065_s9 = inlined_call_operand.vmem [shape: f32[64,128], index: 9, kind: input, shape index: {}]   ;;  %s8066_s10 = inlined_call_operand.vmem [shape: f32[32,128], index: 10, kind: input, shape index: {}]   ;;  %s8067_s11 = inlined_call_operand.hbm [shape: f32[1,128], index: 11, kind: input, shape index: {}]   ;;  %s8068_s12 = inlined_call_operand.hbm [shape: f32[32,128], index: 12, kind: input, shape index: {}]   ;;  %s8069_s13 = inlined_call_operand.hbm [shape: f32[32,128], index: 13, kind: input, shape index: {}]   ;;  %s8070_s14 = inlined_call_operand.vmem [shape: f32[1,128], index: 14, kind: input, shape index: {}]   ;;  %s8071_s15 = inlined_call_operand.vmem [shape: f32[32,6], index: 15, kind: input, shape index: {}]   ;;  %s8072_s16 = inlined_call_operand.vmem [shape: f32[1,6], index: 16, kind: input, shape index: {}]   ;;  %s8073_s17 = inlined_call_operand.hbm [shape: f32[2,6], index: 17, kind: output, shape index: {}]  }
   0x1   :  { %8076 = sst [smem:[#allocation25_spill]] %s8056_s0 }
   0x2   :  { %8077 = sst [smem:[#allocation26_spill]] %s8057_s1 }
   0x3   :  { %22 = vsyncpa [#allocation4], 0 }
   0x4   :  { %23 = vsyncpa [#allocation7], 0 }
   0x5   :  { %24 = vsyncpa [#allocation10], 0 }
   0x6   :  { %25 = vsyncpa [#allocation13], 0 }
   0x7   :  { %26 = vsyncpa [#allocation16], 0 }
   0x8   :  { %27 = vsyncpa [#allocation5], 0  ;;  %s6605_s24 = smov [#allocation6]   ;;  %s6606_s26 = smov [#allocation9]  }
   0x9   :  { %s52_s25 = sshll.u32 %s6605_s24, 4  ;;  %s74_s27 = sshll.u32 %s6606_s26, 4  ;;  %s53_s25 = int_to_ptr.vmem [resolvable:$true] %s52_s25  ;;  %s75_s27 = int_to_ptr.vmem [resolvable:$true] %s74_s27 }
   0xa   :  { %s6373_s0 = scalar_lea.hbm %s8060_s4, 16 }
   0xb   :  { %p6374_p0 = scmp.ne.s32.totalorder %s8060_s4, %s6373_s0  ;;  %p6377_p1 = scmp.lt.u32.totalorder %s6373_s0, %s8060_s4 }
   0xd   :  { %p6379_p2 = pnand %p6377_p1, %p6374_p0 }
   0xf   :  { %6382 = shalt.err (!%p6379_p2)
}
  0x10   :  { %s6383_s20 = scalar_lea.vmem %s53_s25, 16  ;;  %s6387_s21 = scalar_lea.vmem %s53_s25, 32 }
  0x11   :  { %p6384_p3 = scmp.ne.s32.totalorder %s53_s25, %s6383_s20  ;;  %p6388_p4 = scmp.lt.s32.totalorder %s53_s25, %s53_s25 }
  0x12   :  { %p6389_p5 = scmp.lt.s32.totalorder %s6387_s21, %s6383_s20 }
  0x14   :  { %p6390_p6 = por %p6389_p5, %p6388_p4 }
  0x16   :  { %p6391_p7 = pnand %p6390_p6, %p6384_p3 }
  0x18   :  { %6394 = shalt.err (!%p6391_p7)
}
  0x19   :  { %55 = dma.hbm_to_vmem [thread:$0]  %s8060_s4, 16, %s53_s25, [#allocation7]  }
  0x1a   :  { %s6395_s28 = scalar_lea.hbm %s8062_s6, 16 }
  0x1b   :  { %p6396_p8 = scmp.ne.s32.totalorder %s8062_s6, %s6395_s28  ;;  %p6399_p9 = scmp.lt.u32.totalorder %s6395_s28, %s8062_s6 }
  0x1d   :  { %p6401_p10 = pnand %p6399_p9, %p6396_p8 }
  0x1f   :  { %6404 = shalt.err (!%p6401_p10)
}
  0x20   :  { %s6405_s19 = scalar_lea.vmem %s75_s27, 16  ;;  %s6409_s1 = scalar_lea.vmem %s75_s27, 32 }
  0x21   :  { %p6406_p11 = scmp.ne.s32.totalorder %s75_s27, %s6405_s19  ;;  %p6410_p12 = scmp.lt.s32.totalorder %s75_s27, %s75_s27 }
  0x22   :  { %p6411_p13 = scmp.lt.s32.totalorder %s6409_s1, %s6405_s19 }
  0x24   :  { %p6412_p0 = por %p6411_p13, %p6410_p12 }
  0x26   :  { %p6413_p1 = pnand %p6412_p0, %p6406_p11 }
  0x28   :  { %6416 = shalt.err (!%p6413_p1)
}
  0x29   :  { %77 = dma.hbm_to_vmem [thread:$0]  %s8062_s6, 16, %s75_s27, [#allocation10]  }
  0x2a   :  { %s6607_s20 = smov [#allocation12]   ;;  %s6417_s24 = scalar_lea.hbm %s8064_s8, 16 }
  0x2b   :  { %s96_s21 = sshll.u32 %s6607_s20, 4  ;;  %p6418_p2 = scmp.ne.s32.totalorder %s8064_s8, %s6417_s24  ;;  %s97_s21 = int_to_ptr.vmem [resolvable:$true] %s96_s21 }
  0x2c   :  { %p6421_p3 = scmp.lt.u32.totalorder %s6417_s24, %s8064_s8 }
  0x2e   :  { %p6423_p4 = pnand %p6421_p3, %p6418_p2 }
  0x30   :  { %6426 = shalt.err (!%p6423_p4)
}
  0x31   :  { %s6427_s30 = scalar_lea.vmem %s97_s21, 16  ;;  %s6431_s6 = scalar_lea.vmem %s97_s21, 32 }
  0x32   :  { %p6428_p5 = scmp.ne.s32.totalorder %s97_s21, %s6427_s30  ;;  %p6432_p6 = scmp.lt.s32.totalorder %s97_s21, %s97_s21 }
  0x33   :  { %p6433_p7 = scmp.lt.s32.totalorder %s6431_s6, %s6427_s30 }
  0x35   :  { %p6434_p8 = por %p6433_p7, %p6432_p6 }
  0x37   :  { %p6435_p9 = pnand %p6434_p8, %p6428_p5 }
  0x39   :  { %6438 = shalt.err (!%p6435_p9)
}
  0x3a   :  { %99 = dma.hbm_to_vmem [thread:$0]  %s8064_s8, 16, %s97_s21, [#allocation13]  }
  0x3b   :  { %s6608_s19 = smov [#allocation15]   ;;  %s6609_s4 = smov [#allocation3]  }
  0x3c   :  { %s119_s1 = sshll.u32 %s6608_s19, 4  ;;  %s39_s25 = sshll.u32 %s6609_s4, 4  ;;  %s120_s1 = int_to_ptr.vmem [resolvable:$true] %s119_s1  ;;  %s40_s25 = int_to_ptr.vmem [resolvable:$true] %s39_s25 }
  0x3d   :  { %s6439_s23 = scalar_lea.hbm %s8068_s12, 512 }
  0x3e   :  { %p6440_p10 = scmp.ne.s32.totalorder %s8068_s12, %s6439_s23  ;;  %p6443_p11 = scmp.lt.u32.totalorder %s6439_s23, %s8068_s12 }
  0x40   :  { %p6445_p12 = pnand %p6443_p11, %p6440_p10 }
  0x42   :  { %6448 = shalt.err (!%p6445_p12)
}
  0x43   :  { %s6449_s8 = scalar_lea.vmem %s120_s1, 512  ;;  %p6454_p0 = scmp.lt.s32.totalorder %s120_s1, %s120_s1 }
  0x44   :  { %p6450_p13 = scmp.ne.s32.totalorder %s120_s1, %s6449_s8  ;;  %p6455_p1 = scmp.lt.s32.totalorder %s6449_s8, %s6449_s8 }
  0x46   :  { %p6456_p2 = por %p6455_p1, %p6454_p0 }
  0x48   :  { %p6457_p3 = pnand %p6456_p2, %p6450_p13 }
  0x4a   :  { %6460 = shalt.err (!%p6457_p3)
}
  0x4b   :  { %s6610_s21 = smov 128   ;;  %s6611_s0 = smov 8  }
  0x4c   :  { %125 = dma.hbm_to_vmem [thread:$0]  %s8068_s12, 512, %s120_s1, [#allocation16], %s6610_s21, %s6610_s21, %s6611_s0  }
  0x4d   :  { %s6461_s19 = scalar_lea.hbm %s8059_s3, 5120 }
  0x4e   :  { %p6462_p4 = scmp.ne.s32.totalorder %s8059_s3, %s6461_s19  ;;  %p6465_p5 = scmp.lt.u32.totalorder %s6461_s19, %s8059_s3 }
  0x50   :  { %p6467_p6 = pnand %p6465_p5, %p6462_p4 }
  0x52   :  { %6470 = shalt.err (!%p6467_p6)
}
  0x53   :  { %s6471_s24 = scalar_lea.vmem %s40_s25, 5120  ;;  %p6476_p8 = scmp.lt.s32.totalorder %s40_s25, %s40_s25 }
  0x54   :  { %p6472_p7 = scmp.ne.s32.totalorder %s40_s25, %s6471_s24  ;;  %p6477_p9 = scmp.lt.s32.totalorder %s6471_s24, %s6471_s24 }
  0x56   :  { %p6478_p10 = por %p6477_p9, %p6476_p8 }
  0x58   :  { %p6479_p11 = pnand %p6478_p10, %p6472_p7 }
  0x5a   :  { %6482 = shalt.err (!%p6479_p11)
}
  0x5b   :  { %45 = dma.hbm_to_vmem [thread:$0]  %s8059_s3, 5120, %s40_s25, [#allocation4], %s6610_s21, %s6610_s21, %s6611_s0  }
  0x5c   :  { %s6612_s26 = smov [#allocation8]   ;;  %s6613_s29 = smov [#allocation11]  }
  0x5d   :  { %s61_s28 = sshll.u32 %s6612_s26, 4  ;;  %s83_s8 = sshll.u32 %s6613_s29, 4  ;;  %s62_s28 = int_to_ptr.vmem [resolvable:$true] %s61_s28  ;;  %s84_s8 = int_to_ptr.vmem [resolvable:$true] %s83_s8 }
  0x5e   :  { %s6483_s27 = scalar_lea.hbm %s8061_s5, 5120 }
  0x5f   :  { %p6484_p12 = scmp.ne.s32.totalorder %s8061_s5, %s6483_s27  ;;  %p6487_p13 = scmp.lt.u32.totalorder %s6483_s27, %s8061_s5 }
  0x61   :  { %p6489_p0 = pnand %p6487_p13, %p6484_p12 }
  0x63   :  { %6492 = shalt.err (!%p6489_p0)
}
  0x64   :  { %s6493_s3 = scalar_lea.vmem %s62_s28, 5120  ;;  %p6498_p2 = scmp.lt.s32.totalorder %s62_s28, %s62_s28 }
  0x65   :  { %p6494_p1 = scmp.ne.s32.totalorder %s62_s28, %s6493_s3  ;;  %p6499_p3 = scmp.lt.s32.totalorder %s6493_s3, %s6493_s3 }
  0x67   :  { %p6500_p4 = por %p6499_p3, %p6498_p2 }
  0x69   :  { %p6501_p5 = pnand %p6500_p4, %p6494_p1 }
  0x6b   :  { %6504 = shalt.err (!%p6501_p5)
}
  0x6c   :  { %67 = dma.hbm_to_vmem [thread:$0]  %s8061_s5, 5120, %s62_s28, [#allocation7], %s6610_s21, %s6610_s21, %s6611_s0  }
  0x6d   :  { %s6505_s12 = scalar_lea.hbm %s8063_s7, 5120 }
  0x6e   :  { %p6506_p6 = scmp.ne.s32.totalorder %s8063_s7, %s6505_s12  ;;  %p6509_p7 = scmp.lt.u32.totalorder %s6505_s12, %s8063_s7 }
  0x70   :  { %p6511_p8 = pnand %p6509_p7, %p6506_p6 }
  0x72   :  { %6514 = shalt.err (!%p6511_p8)
}
  0x73   :  { %s6515_s6 = scalar_lea.vmem %s84_s8, 5120  ;;  %p6520_p10 = scmp.lt.s32.totalorder %s84_s8, %s84_s8 }
  0x74   :  { %p6516_p9 = scmp.ne.s32.totalorder %s84_s8, %s6515_s6  ;;  %p6521_p11 = scmp.lt.s32.totalorder %s6515_s6, %s6515_s6 }
  0x76   :  { %p6522_p12 = por %p6521_p11, %p6520_p10 }
  0x78   :  { %p6523_p13 = pnand %p6522_p12, %p6516_p9 }
  0x7a   :  { %6526 = shalt.err (!%p6523_p13)
}
  0x7b   :  { %89 = dma.hbm_to_vmem [thread:$0]  %s8063_s7, 5120, %s84_s8, [#allocation10], %s6610_s21, %s6610_s21, %s6611_s0  }
  0x7c   :  { %s6614_s27 = smov [#allocation14]   ;;  %s6615_s19 = smov [#allocation17]  }
  0x7d   :  { %s110_s18 = sshll.u32 %s6614_s27, 4  ;;  %s131_s4 = sshll.u32 %s6615_s19, 4  ;;  %s111_s18 = int_to_ptr.vmem [resolvable:$true] %s110_s18  ;;  %s132_s4 = int_to_ptr.vmem [resolvable:$true] %s131_s4 }
  0x7e   :  { %s6527_s25 = scalar_lea.hbm %s8067_s11, 16 }
  0x7f   :  { %p6528_p0 = scmp.ne.s32.totalorder %s8067_s11, %s6527_s25  ;;  %p6531_p1 = scmp.lt.u32.totalorder %s6527_s25, %s8067_s11 }
  0x81   :  { %p6533_p2 = pnand %p6531_p1, %p6528_p0 }
  0x83   :  { %6536 = shalt.err (!%p6533_p2)
}
  0x84   :  { %s6537_s7 = scalar_lea.vmem %s111_s18, 16  ;;  %s6541_s8 = scalar_lea.vmem %s111_s18, 32 }
  0x85   :  { %p6538_p3 = scmp.ne.s32.totalorder %s111_s18, %s6537_s7  ;;  %p6542_p4 = scmp.lt.s32.totalorder %s111_s18, %s111_s18 }
  0x86   :  { %p6543_p5 = scmp.lt.s32.totalorder %s6541_s8, %s6537_s7 }
  0x88   :  { %p6544_p6 = por %p6543_p5, %p6542_p4 }
  0x8a   :  { %p6545_p7 = pnand %p6544_p6, %p6538_p3 }
  0x8c   :  { %6548 = shalt.err (!%p6545_p7)
}
  0x8d   :  { %113 = dma.hbm_to_vmem [thread:$0]  %s8067_s11, 16, %s111_s18, [#allocation13]  }
  0x8e   :  { %s6549_s6 = scalar_lea.hbm %s8069_s13, 512 }
  0x8f   :  { %p6550_p8 = scmp.ne.s32.totalorder %s8069_s13, %s6549_s6  ;;  %p6553_p9 = scmp.lt.u32.totalorder %s6549_s6, %s8069_s13 }
  0x91   :  { %p6555_p10 = pnand %p6553_p9, %p6550_p8 }
  0x93   :  { %6558 = shalt.err (!%p6555_p10)
}
  0x94   :  { %s6559_s20 = scalar_lea.vmem %s132_s4, 512  ;;  %p6564_p12 = scmp.lt.s32.totalorder %s132_s4, %s132_s4 }
  0x95   :  { %p6560_p11 = scmp.ne.s32.totalorder %s132_s4, %s6559_s20  ;;  %p6565_p13 = scmp.lt.s32.totalorder %s6559_s20, %s6559_s20 }
  0x97   :  { %p6566_p0 = por %p6565_p13, %p6564_p12 }
  0x99   :  { %p6567_p1 = pnand %p6566_p0, %p6560_p11 }
  0x9b   :  { %6570 = shalt.err (!%p6567_p1)
}
  0x9c   :  { %137 = dma.hbm_to_vmem [thread:$0]  %s8069_s13, 512, %s132_s4, [#allocation16], %s6610_s21, %s6610_s21, %s6611_s0  }
  0x9d   :  { %6593 = dma.done.wait [#allocation4], 5120  }
  0x9e   :  { %6594 = vsyncadd [#allocation4], 4294962176 }
  0x9f   :  { %6595 = dma.done.wait [#allocation7], 5136  }
  0xa0   :  { %6596 = vsyncadd [#allocation7], 4294962160 }
  0xa1   :  { %6597 = dma.done.wait [#allocation10], 5136  }
  0xa2   :  { %6598 = vsyncadd [#allocation10], 4294962160 }
  0xa3   :  { %6599 = dma.done.wait [#allocation13], 32  }
  0xa4   :  { %6600 = vsyncadd [#allocation13], 4294967264 }
  0xa5   :  { %6601 = dma.done.wait [#allocation16], 1024  }
  0xa6   :  { %6602 = vsyncadd [#allocation16], 4294966272  ;;  %v6616_v0 = vmov 0.0   ;;  %vm6617_vm0 = vmmov 0   ;;  %vm190_vm1 = vcmask 1042432   ;;  %vm191_vm2 = vcmask 1046532  }
  0xa7   :  { %5206 = vmatprep.subr.mxu0 %v6616_v0  ;;  %5223 = vmatprep.subr.mxu1 %v6616_v0  ;;  %s8078_s4 = sld [smem:[#allocation26_spill]]  ;;  %s8079_s24 = sld [smem:[#allocation25_spill]]  ;;  %vm232_vm3 = vcmask 64512   ;;  %vm6880_vm4 = vmor %vm190_vm1, %vm191_vm2  ;;  %vm438_vm5 = vcmask 1041408   ;;  %vm439_vm6 = vcmask 1045508   ;;  %vm585_vm7 = vcmask 1040384  }
  0xa8   :  { %5208 = vmatprep.mubr.msk.f32.mxu0 %vm6617_vm0, %v6616_v0  ;;  %5225 = vmatprep.mubr.msk.f32.mxu1 %vm6617_vm0, %v6616_v0  ;;  %vm586_vm8 = vcmask 1044484   ;;  %vm7000_vm10 = vmor %vm438_vm5, %vm439_vm6  ;;  %vm918_vm11 = vcmask 523264   ;;  %s6620_s3 = smov 120   ;;  %s6621_s25 = smov 96   ;;  %vm2780_vm12 = vcmask 130048   ;;  %vm2783_vm13 = vcmask 195584  }
  0xa9   :  { %vm6980_vm9 = vmor %vm585_vm7, %vm586_vm8  ;;  %s6622_s22 = smov 104   ;;  %s6623_s23 = smov 88   ;;  %vm2786_vm14 = vcmask 261120   ;;  %vm2789_vm15 = vcmask 326656   ;;  %vm2792_vm1 = vcmask 392192   ;;  %vm2795_vm2 = vcmask 457728  }
  0xaa   :  { %s6625_s12 = smov 72   ;;  %s6626_s7 = smov 16  }
  0xab   :  { %s6627_s28 = smov 24   ;;  %s6628_s18 = smov 32  }
  0xac   :  { %s6630_s1 = smov 48   ;;  %s6632_s26 = smov 64  }
  0xad   :  { %v4786_v1 = vld [vmem:[%s8078_s4 + $0x8] sm:$0xff]  ;;  %v187_v2 = vld [vmem:[%s8078_s4] sm:$0xff]  ;;  %v6877_v7 = vld [vmem:[%s8079_s24 + $0x10] sm:$0xff]  ;;  %s6633_s13 = smov [#allocation18]  }
  0xae   :  { %v6862_v3 = vld [vmem:[%s8079_s24] sm:$0xff]  ;;  %5207 = vmatpush3.msra.mxu0 %v4786_v1  ;;  %5224 = vmatpush3.msra.mxu1 %v187_v2  ;;  %v6867_v4 = vld [vmem:[%s8079_s24 + $0x8] sm:$0xff]  ;;  %v204_v11 = vrot.slane %v6877_v7, 5  ;;  %v6893_v12 = vld [vmem:[%s8079_s24 + $0x18] sm:$0xff]  ;;  %v6897_v13 = vcombine.high %v6877_v7, %v6877_v7  ;;  %s4771_s21 = sshll.u32 %s6633_s13, 4  ;;  %s4772_s21 = int_to_ptr.vmem [resolvable:$true] %s4771_s21 }
  0xaf   :  { %v6871_v5 = vcombine.high %v6862_v3, %v6862_v3  ;;  %v4784_v6 = vrot.slane %v6862_v3, 9  ;;  %5240 = vmatprep.subr.mxu0 %v6616_v0  ;;  %v198_v9 = vrot.slane %v6867_v4, 5  ;;  %v6887_v10 = vcombine.high %v6867_v4, %v6867_v4  ;;  %5257 = vmatprep.subr.mxu1 %v6616_v0  ;;  %v6911_v18 = vld [vmem:[%s8079_s24 + $0x20] sm:$0xff]  ;;  %v4807_v19 = vld [vmem:[%s8078_s4 + $0x18] sm:$0xff]  ;;  %v6933_v30 = vld [vmem:[%s8079_s24 + $0x28] sm:$0xff]  ;;  %s6624_s24 = smov 80   ;;  %p6576_p3 = scmp.lt.s32.totalorder %s4772_s21, %s4772_s21 }
  0xb0   :  { %v6905_v16 = vcombine.high %v6893_v12, %v6893_v12  ;;  %v4785_v17 = vrot.slane %v6893_v12, 9  ;;  %v206_v23 = vrot.slane %v204_v11, 4  ;;  %v207_v26 = vrot.slane %v6897_v13, 5  ;;  %v4799_v34 = vld [vmem:[%s8078_s4 + $0x10] sm:$0xff] }
  0xb1   :  { %v195_v14 = vrot.slane %v6871_v5, 5  ;;  %v333_v15 = vcombine.low %v6862_v3, %v6871_v5  ;;  %v200_v20 = vrot.slane %v198_v9, 4  ;;  %v201_v21 = vrot.slane %v6887_v10, 5 }
  0xb2   :  { %v334_v22 = vcombine.low %v6867_v4, %v6887_v10  ;;  %v211_v27 = vrot.slane %v6905_v16, 5  ;;  %v6928_v29 = vcombine.high %v6911_v18, %v6911_v18  ;;  %v335_v36 = vcombine.low %v6877_v7, %v6893_v12 }
  0xb3   :  { %v196_v24 = vsel %vm6880_vm4, %v4784_v6, %v195_v14  ;;  %v197_v25 = vrot.slane %v195_v14, 4  ;;  %5226 = vmatmul.mubr.msk.f32.vlgmr.msra.gmra.mrb[0].mxu1 %vm232_vm3, %v333_v15  ;;  %v203_v28 = vrot.slane %v201_v21, 4  ;;  %v202_v32 = vsel %vm6880_vm4, %v200_v20, %v201_v21 }
  0xb4   :  { %5228 = vmatprep.mubr.msk.f32.mxu1 %vm6617_vm0, %v6616_v0  ;;  %5258 = vmatpush3.msra.mxu1 %v4807_v19  ;;  %v214_v37 = vrot.slane %v6911_v18, 5  ;;  %v208_v38 = vsel %vm6880_vm4, %v206_v23, %v207_v26  ;;  %v212_v39 = vsel %vm6880_vm4, %v4785_v17, %v211_v27  ;;  %v213_v40 = vrot.slane %v211_v27, 4 }
  0xb5   :  { %v199_v31 = vsel %vm6880_vm4, %v197_v25, %v198_v9  ;;  %v205_v35 = vsel %vm6880_vm4, %v203_v28, %v204_v11  ;;  %v6954_v41 = vcombine.high %v6933_v30, %v6933_v30  ;;  %v217_v44 = vrot.slane %v6928_v29, 5 }
  0xb6   :  { %v227_v33 = vcombine.low %v196_v24, %v199_v31  ;;  %v228_v42 = vcombine.low %v202_v32, %v205_v35  ;;  %v216_v43 = vrot.slane %v214_v37, 4  ;;  %v220_v45 = vrot.slane %v6933_v30, 5 }
  0xb7   :  { %5229 = vmatmul.mubr.msk.f32.gmra.mrb[2].mxu1 %vm232_vm3, %v334_v22  ;;  %v229_v46 = vcombine.low %v208_v38, %v212_v39  ;;  %v443_v47 = vrot.slane %v6871_v5, 6  ;;  %v4805_v48 = vrot.slane %v6862_v3, 11  ;;  %v590_v49 = vrot.slane %v6871_v5, 7 }
  0xb8   :  { %5209 = vmatmul.mubr.msk.f32.vlgmr.msra.gmra.mrb[0].mxu0 %vm232_vm3, %v227_v33  ;;  %5231 = vmatprep.mubr.msk.f32.mxu1 %vm6617_vm0, %v6616_v0  ;;  %v336_v50 = vcombine.low %v6905_v16, %v6911_v18  ;;  %v219_v51 = vrot.slane %v217_v44, 4  ;;  %v222_v52 = vrot.slane %v220_v45, 4  ;;  %v223_v53 = vrot.slane %v6954_v41, 5 }
  0xb9   :  { %5241 = vmatpush3.msra.mxu0 %v4799_v34  ;;  %5211 = vmatprep.mubr.msk.f32.mxu0 %vm6617_vm0, %v6616_v0  ;;  %v215_v54 = vsel %vm6880_vm4, %v213_v40, %v214_v37  ;;  %v218_v55 = vsel %vm6880_vm4, %v216_v43, %v217_v44  ;;  %v592_v57 = vrot.slane %v590_v49, 4  ;;  %v593_v58 = vrot.slane %v6867_v4, 7 }
  0xba   :  { %5274 = vmatprep.subr.mxu0 %v6616_v0  ;;  %v337_v59 = vcombine.low %v6928_v29, %v6933_v30  ;;  %v4797_v60 = vrot.slane %v6862_v3, 10  ;;  %v445_v61 = vrot.slane %v443_v47, 4  ;;  %v446_v62 = vrot.slane %v6867_v4, 6 }
  0xbb   :  { %5232 = vmatmul.mubr.msk.f32.gmra.mrb[4].mxu1 %vm232_vm3, %v335_v36  ;;  %v449_v63 = vrot.slane %v6887_v10, 6  ;;  %v596_v1 = vrot.slane %v6887_v10, 7  ;;  %v230_v2 = vcombine.low %v215_v54, %v218_v55  ;;  %v221_v6 = vsel %vm6880_vm4, %v219_v51, %v220_v45 }
  0xbc   :  { %5212 = vmatmul.mubr.msk.f32.gmra.mrb[2].mxu0 %vm232_vm3, %v228_v42  ;;  %5234 = vmatprep.mubr.msk.f32.mxu1 %vm6617_vm0, %v6616_v0  ;;  %v224_v9 = vsel %vm6880_vm4, %v222_v52, %v223_v53  ;;  %v591_v11 = vsel %vm6980_vm9, %v4805_v48, %v590_v49  ;;  %v594_v14 = vsel %vm6980_vm9, %v592_v57, %v593_v58  ;;  %v595_v15 = vrot.slane %v593_v58, 4 }
  0xbd   :  { %5214 = vmatprep.mubr.msk.f32.mxu0 %vm6617_vm0, %v6616_v0  ;;  %v598_v17 = vrot.slane %v596_v1, 4  ;;  %v599_v19 = vrot.slane %v6877_v7, 7  ;;  %v448_v20 = vrot.slane %v446_v62, 4  ;;  %v444_v21 = vsel %vm7000_vm10, %v4797_v60, %v443_v47 }
  0xbe   :  { %v447_v22 = vsel %vm7000_vm10, %v445_v61, %v446_v62  ;;  %v451_v23 = vrot.slane %v449_v63, 4  ;;  %v452_v24 = vrot.slane %v6877_v7, 6  ;;  %v231_v25 = vcombine.low %v221_v6, %v224_v9 }
  0xbf   :  { %5235 = vmatmul.mubr.msk.f32.gmra.mrb[6].mxu1 %vm232_vm3, %v336_v50  ;;  %v622_v26 = vcombine.low %v591_v11, %v594_v14  ;;  %v601_v27 = vrot.slane %v599_v19, 4  ;;  %v602_v28 = vrot.slane %v6897_v13, 7  ;;  %v597_v31 = vsel %vm6980_vm9, %v595_v15, %v596_v1  ;;  %v4813_v50 = vld [vmem:[%s8078_s4 + $0x20] sm:$0xff] }
  0xc0   :  { %5215 = vmatmul.mubr.msk.f32.gmra.mrb[4].mxu0 %vm232_vm3, %v229_v46  ;;  %5237 = vmatprep.mubr.msk.f32.mxu1 %vm6617_vm0, %v6616_v0  ;;  %v600_v32 = vsel %vm6980_vm9, %v598_v17, %v599_v19  ;;  %v4806_v33 = vrot.slane %v6893_v12, 11  ;;  %v606_v34 = vrot.slane %v6905_v16, 7  ;;  %v475_v35 = vcombine.low %v444_v21, %v447_v22 }
  0xc1   :  { %5217 = vmatprep.mubr.msk.f32.mxu0 %vm6617_vm0, %v6616_v0  ;;  %v450_v36 = vsel %vm7000_vm10, %v448_v20, %v449_v63  ;;  %v609_v37 = vrot.slane %v6911_v18, 7  ;;  %v453_v38 = vsel %vm7000_vm10, %v451_v23, %v452_v24  ;;  %v454_v39 = vrot.slane %v452_v24, 4 }
  0xc2   :  { %v455_v40 = vrot.slane %v6897_v13, 6  ;;  %v4798_v42 = vrot.slane %v6893_v12, 10  ;;  %v623_v43 = vcombine.low %v597_v31, %v600_v32  ;;  %v459_v44 = vrot.slane %v6905_v16, 6  ;;  %v910_v32 = vld [vmem:[#allocation3 + $0x60] sm:$0xff] }
  0xc3   :  { %5238 = vmatmul.mubr.msk.f32.gmra.mrb[8].mxu1 %vm232_vm3, %v337_v59  ;;  %v603_v45 = vsel %vm6980_vm9, %v601_v27, %v602_v28  ;;  %v608_v46 = vrot.slane %v606_v34, 4  ;;  %v607_v47 = vsel %vm6980_vm9, %v4806_v33, %v606_v34  ;;  %v611_v13 = vrot.slane %v609_v37, 4  ;;  %v912_v33 = vld [vmem:[#allocation3 + $0x70] sm:$0xff]  ;;  %v913_v34 = vld [vmem:[#allocation3 + $0x78] sm:$0xff] }
  0xc4   :  { %5218 = vmatmul.mubr.msk.f32.gmra.mrb[6].mxu0 %vm232_vm3, %v230_v2  ;;  %5259 = vmatprep.mubr.msk.f32.mxu1 %vm6617_vm0, %v6616_v0  ;;  %v612_v48 = vrot.slane %v6928_v29, 7  ;;  %v615_v49 = vrot.slane %v6933_v30, 7  ;;  %v462_v16 = vrot.slane %v6911_v18, 6  ;;  %v476_v51 = vcombine.low %v450_v36, %v453_v38  ;;  %v871_v36 = vld [vmem:[#allocation3] sm:$0xff] }
  0xc5   :  { %5220 = vmatprep.mubr.msk.f32.mxu0 %vm6617_vm0, %v6616_v0  ;;  %v456_v52 = vsel %vm7000_vm10, %v454_v39, %v455_v40  ;;  %v460_v53 = vsel %vm7000_vm10, %v4798_v42, %v459_v44  ;;  %v624_v54 = vcombine.low %v603_v45, %v607_v47  ;;  %v461_v55 = vrot.slane %v459_v44, 4  ;;  %v1543_v47 = vld [vmem:[#allocation8 + $0x40] sm:$0xff] }
  0xc6   :  { %v610_v57 = vsel %vm6980_vm9, %v608_v46, %v609_v37  ;;  %v613_v58 = vsel %vm6980_vm9, %v611_v13, %v612_v48  ;;  %v614_v59 = vrot.slane %v612_v48, 4  ;;  %v617_v60 = vrot.slane %v615_v49, 4  ;;  %v872_v37 = vld [vmem:[#allocation3 + $0x8] sm:$0xff] }
  0xc7   :  { %5260 = vmatmul.mubr.msk.f32.vlgmr.msra.gmra.mrb[10].mxu1 %vm232_vm3, %v622_v26  ;;  %v618_v61 = vrot.slane %v6954_v41, 7  ;;  %v464_v62 = vrot.slane %v462_v16, 4  ;;  %v465_v63 = vrot.slane %v6928_v29, 6  ;;  %v468_v1 = vrot.slane %v6933_v30, 6  ;;  %v1544_v13 = vld [vmem:[#allocation8 + $0x48] sm:$0xff] }
  0xc8   :  { %5221 = vmatmul.mubr.msk.f32.gmra.mrb[8].mxu0 %vm232_vm3, %v231_v25  ;;  %5262 = vmatprep.mubr.msk.f32.mxu1 %vm6617_vm0, %v6616_v0  ;;  %v477_v2 = vcombine.low %v456_v52, %v460_v53  ;;  %v625_v6 = vcombine.low %v610_v57, %v613_v58  ;;  %v463_v9 = vsel %vm7000_vm10, %v461_v55, %v462_v16  ;;  %v471_v20 = vrot.slane %v6954_v41, 6 }
  0xc9   :  { %5242 = vmatprep.mubr.msk.f32.mxu0 %vm6617_vm0, %v6616_v0  ;;  %v616_v11 = vsel %vm6980_vm9, %v614_v59, %v615_v49  ;;  %v619_v14 = vsel %vm6980_vm9, %v617_v60, %v618_v61  ;;  %v466_v15 = vsel %vm7000_vm10, %v464_v62, %v465_v63  ;;  %v467_v17 = vrot.slane %v465_v63, 4 }
  0xca   :  { %v470_v19 = vrot.slane %v468_v1, 4  ;;  %v626_v21 = vcombine.low %v616_v11, %v619_v14  ;;  %v478_v22 = vcombine.low %v463_v9, %v466_v15  ;;  %v734_v26 = vcombine.low %v6871_v5, %v6867_v4 }
  0xcb   :  { %5263 = vmatmul.mubr.msk.f32.gmra.mrb[12].mxu1 %vm232_vm3, %v623_v43  ;;  %v469_v23 = vsel %vm7000_vm10, %v467_v17, %v468_v1  ;;  %v735_v27 = vcombine.low %v6887_v10, %v6877_v7  ;;  %v4814_v28 = vcombine.high %v6877_v7, %v6893_v12  ;;  %v737_v4 = vcombine.low %v6911_v18, %v6928_v29  ;;  %v906_v7 = vld [vmem:[#allocation3 + $0x40] sm:$0xff]  ;;  %v907_v10 = vld [vmem:[#allocation3 + $0x48] sm:$0xff]  ;;  %v908_v18 = vld [vmem:[#allocation3 + $0x50] sm:$0xff] }
  0xcc   :  { %5243 = vmatmul.mubr.msk.f32.vlgmr.msra.gmra.mrb[10].mxu0 %vm232_vm3, %v475_v35  ;;  %5265 = vmatprep.mubr.msk.f32.mxu1 %vm6617_vm0, %v6616_v0  ;;  %v472_v24 = vsel %vm7000_vm10, %v470_v19, %v471_v20  ;;  %v738_v5 = vcombine.low %v6933_v30, %v6954_v41  ;;  %v5838_v12 = vpack.c.bf16 %v907_v10, %v906_v7  ;;  %v909_v29 = vld [vmem:[#allocation3 + $0x58] sm:$0xff]  ;;  %v911_v30 = vld [vmem:[#allocation3 + $0x68] sm:$0xff]  ;;  %v6618_v49 = vmov 0.0|0.0  }
  0xcd   :  { %5275 = vmatpush3.msra.mxu0 %v4813_v50  ;;  %5245 = vmatprep.mubr.msk.f32.mxu0 %vm6617_vm0, %v6616_v0  ;;  %v479_v25 = vcombine.low %v469_v23, %v472_v24  ;;  %v5842_v31 = vpack.c.bf16 %v909_v29, %v908_v18  ;;  %v5846_v41 = vpack.c.bf16 %v911_v30, %v910_v32 }
  0xce   :  { %5839 = vmatprep.subr.bf16.mxu1 %v5838_v12  ;;  %v5850_v35 = vpack.c.bf16 %v913_v34, %v912_v33  ;;  %v7130_v38 = vpack.c.bf16 %v872_v37, %v871_v36  ;;  %5918 = vmatprep.subr.bf16.mxu0 %v6618_v49  ;;  %v5919_v16 = vpack.c.bf16 %v1544_v13, %v1543_v47  ;;  %v874_v47 = vld [vmem:[#allocation3 + $0x18] sm:$0xff]  ;;  %v875_v13 = vld [vmem:[#allocation3 + $0x20] sm:$0xff] }
  0xcf   :  { %5266 = vmatmul.mubr.msk.f32.gmra.mrb[14].mxu1 %vm232_vm3, %v624_v54 }
  0xd0   :  { %5246 = vmatmul.mubr.msk.f32.gmra.mrb[12].mxu0 %vm232_vm3, %v476_v51  ;;  %5268 = vmatprep.mubr.msk.f32.mxu1 %vm6617_vm0, %v6616_v0 }
  0xd1   :  { %5248 = vmatprep.mubr.msk.f32.mxu0 %vm6617_vm0, %v6616_v0  ;;  %5841 = vmatpush3.bf16.msra.mxu1 %v5838_v12 }
  0xd2   :  { %5843 = vmatprep.subr.bf16.mxu1 %v5842_v31 }
  0xd3   :  { %5269 = vmatmul.mubr.msk.f32.gmra.mrb[16].mxu1 %vm232_vm3, %v625_v6 }
  0xd4   :  { %5249 = vmatmul.mubr.msk.f32.gmra.mrb[14].mxu0 %vm232_vm3, %v477_v2  ;;  %5271 = vmatprep.mubr.msk.f32.mxu1 %vm6617_vm0, %v6616_v0 }
  0xd5   :  { %5251 = vmatprep.mubr.msk.f32.mxu0 %vm6617_vm0, %v6616_v0  ;;  %5845 = vmatpush3.bf16.msra.mxu1 %v5842_v31 }
  0xd6   :  { %5847 = vmatprep.subr.bf16.mxu1 %v5846_v41 }
  0xd7   :  { %5272 = vmatmul.mubr.msk.f32.gmra.mrb[18].mxu1 %vm232_vm3, %v626_v21 }
  0xd8   :  { %5252 = vmatmul.mubr.msk.f32.gmra.mrb[16].mxu0 %vm232_vm3, %v478_v22 }
  0xd9   :  { %5254 = vmatprep.mubr.msk.f32.mxu0 %vm6617_vm0, %v6616_v0  ;;  %5849 = vmatpush3.bf16.msra.mxu1 %v5846_v41 }
  0xda   :  { %5851 = vmatprep.subr.bf16.mxu1 %v5850_v35 }
  0xdc   :  { %5255 = vmatmul.mubr.msk.f32.gmra.mrb[18].mxu0 %vm232_vm3, %v479_v25 }
  0xdd   :  { %5276 = vmatprep.mubr.msk.f32.mxu0 %vm6617_vm0, %v6616_v0  ;;  %5853 = vmatpush3.bf16.msra.mxu1 %v5850_v35 }
  0xde   :  { %5855 = vmatprep.subr.bf16.mxu1 %v7130_v38 }
  0xe0   :  { %5277 = vmatmul.mubr.msk.f32.vlgmr.msra.gmra.mrb[20].mxu0 %vm232_vm3, %v734_v26 }
  0xe1   :  { %5279 = vmatprep.mubr.msk.f32.mxu0 %vm6617_vm0, %v6616_v0  ;;  %5920 = vmatpush3.bf16.msra.mxu0 %v5919_v16 }
  0xe2   :  { %5921 = vmatprep.subr.bf16.mxu0 %v6618_v49 }
  0xe4   :  { %5280 = vmatmul.mubr.msk.f32.gmra.mrb[22].mxu0 %vm232_vm3, %v735_v27 }
  0xe5   :  { %5282 = vmatprep.mubr.msk.f32.mxu0 %vm6617_vm0, %v6616_v0 }
  0xe8   :  { %5283 = vmatmul.mubr.msk.f32.gmra.mrb[24].mxu0 %vm232_vm3, %v4814_v28 }
  0xe9   :  { %5285 = vmatprep.mubr.msk.f32.mxu0 %vm6617_vm0, %v6616_v0 }
  0xec   :  { %5286 = vmatmul.mubr.msk.f32.gmra.mrb[26].mxu0 %vm232_vm3, %v737_v4 }
  0xed   :  { %5288 = vmatprep.mubr.msk.f32.mxu0 %vm6617_vm0, %v6616_v0 }
  0xf0   :  { %5289 = vmatmul.mubr.msk.f32.gmra.mrb[28].mxu0 %vm232_vm3, %v738_v5 }
  0xf1   :  { %5417 = vmatprep.mubr.msk.f32.mxu0 %vm6617_vm0, %v6616_v0 }
 0x186   :  { %v414_v39 = vpop.f32.mrb[0].mxu1 }
 0x187   :  { %v5227_v40 = vpop.f32.mrb[1].mxu1 }
 0x188   :  { %v7138_v40 = vld [vmem:[%s8058_s2] ss:$0 sm:$0xff]  ;;  %s6619_s2 = smov 112  }
 0x18a   :  { %v419_v42 = vpop.f32.mrb[2].mxu1 }
 0x18b   :  { %v309_v43 = vpop.f32.mrb[0].mxu0  ;;  %v5230_v44 = vpop.f32.mrb[3].mxu1 }
 0x18c   :  { %v415_v45 = vadd.f32 %v414_v39, %v309_v43  ;;  %v5210_v46 = vpop.f32.mrb[1].mxu0 }
 0x18d   :  { %v873_v46 = vld [vmem:[#allocation3 + $0x10] sm:$0xff] }
 0x18e   :  { %v424_v48 = vpop.f32.mrb[4].mxu1 }
 0x18f   :  { %v314_v50 = vpop.f32.mrb[2].mxu0  ;;  %v5233_v51 = vpop.f32.mrb[5].mxu1 }
 0x190   :  { %v420_v52 = vadd.f32 %v419_v42, %v314_v50  ;;  %v5213_v53 = vpop.f32.mrb[3].mxu0  ;;  %v876_v51 = vld [vmem:[#allocation3 + $0x28] sm:$0xff] }
 0x191   :  { %v878_v53 = vld [vmem:[#allocation3 + $0x38] sm:$0xff] }
 0x192   :  { %v429_v54 = vpop.f32.mrb[6].mxu1 }
 0x193   :  { %v319_v55 = vpop.f32.mrb[4].mxu0  ;;  %v5236_v57 = vpop.f32.mrb[7].mxu1 }
 0x194   :  { %v425_v58 = vadd.f32 %v424_v48, %v319_v55  ;;  %v5216_v59 = vpop.f32.mrb[5].mxu0 }
 0x195   :  { %v7150_v59 = vpack.c.bf16 %v876_v51, %v875_v13 }
 0x196   :  { %v434_v60 = vpop.f32.mrb[8].mxu1 }
 0x197   :  { %v324_v61 = vpop.f32.mrb[6].mxu0  ;;  %v5239_v62 = vpop.f32.mrb[9].mxu1 }
 0x198   :  { %v430_v63 = vadd.f32 %v429_v54, %v324_v61  ;;  %v5219_v1 = vpop.f32.mrb[7].mxu0 }
 0x19a   :  { %v703_v2 = vpop.f32.mrb[10].mxu1 }
 0x19b   :  { %v329_v6 = vpop.f32.mrb[8].mxu0  ;;  %v5261_v9 = vpop.f32.mrb[11].mxu1 }
 0x19c   :  { %v435_v11 = vadd.f32 %v434_v60, %v329_v6  ;;  %v5222_v14 = vpop.f32.mrb[9].mxu0 }
 0x19e   :  { %v708_v15 = vpop.f32.mrb[12].mxu1 }
 0x19f   :  { %v556_v17 = vpop.f32.mrb[10].mxu0  ;;  %v5264_v19 = vpop.f32.mrb[13].mxu1 }
 0x1a0   :  { %v580_v20 = vadd.f32 %v556_v17, %v415_v45  ;;  %v5244_v21 = vpop.f32.mrb[11].mxu0 }
 0x1a2   :  { %v727_v22 = vadd.f32 %v703_v2, %v580_v20  ;;  %v713_v23 = vpop.f32.mrb[14].mxu1 }
 0x1a3   :  { %v561_v24 = vpop.f32.mrb[12].mxu0  ;;  %v5267_v25 = vpop.f32.mrb[15].mxu1 }
 0x1a4   :  { %v581_v26 = vadd.f32 %v561_v24, %v420_v52  ;;  %v5247_v27 = vpop.f32.mrb[13].mxu0  ;;  %v877_v52 = vld [vmem:[#allocation3 + $0x30] sm:$0xff] }
 0x1a5   :  { %v7152_v60 = vpack.c.bf16 %v878_v53, %v877_v52 }
 0x1a6   :  { %v728_v28 = vadd.f32 %v708_v15, %v581_v26  ;;  %v718_v4 = vpop.f32.mrb[16].mxu1 }
 0x1a7   :  { %v566_v5 = vpop.f32.mrb[14].mxu0  ;;  %v5270_v7 = vpop.f32.mrb[17].mxu1 }
 0x1a8   :  { %v582_v10 = vadd.f32 %v566_v5, %v425_v58  ;;  %v5250_v12 = vpop.f32.mrb[15].mxu0  ;;  %v7148_v58 = vpack.c.bf16 %v874_v47, %v873_v46 }
 0x1aa   :  { %v729_v18 = vadd.f32 %v713_v23, %v582_v10  ;;  %v723_v29 = vpop.f32.mrb[18].mxu1 }
 0x1ab   :  { %v571_v31 = vpop.f32.mrb[16].mxu0  ;;  %v5273_v32 = vpop.f32.mrb[19].mxu1 }
 0x1ac   :  { %v583_v30 = vadd.f32 %v571_v31, %v430_v63  ;;  %v5253_v41 = vpop.f32.mrb[17].mxu0 }
 0x1ae   :  { %v730_v33 = vadd.f32 %v718_v4, %v583_v30 }
 0x1af   :  { %v576_v34 = vpop.f32.mrb[18].mxu0 }
 0x1b0   :  { %v584_v35 = vadd.f32 %v576_v34, %v435_v11  ;;  %v5256_v36 = vpop.f32.mrb[19].mxu0 }
 0x1b2   :  { %v731_v37 = vadd.f32 %v723_v29, %v584_v35 }
 0x1b3   :  { %v815_v39 = vpop.f32.mrb[20].mxu0 }
 0x1b4   :  { %v839_v42 = vadd.f32 %v815_v39, %v727_v22  ;;  %v5278_v43 = vpop.f32.mrb[21].mxu0 }
 0x1b6   :  { %v851_v44 = vadd.f32 %v7138_v40, %v839_v42 }
 0x1b7   :  { %v820_v45 = vpop.f32.mrb[22].mxu0 }
 0x1b8   :  { %v7141_v48 = vmax.f32 %v851_v44, 0.0  ;;  %v840_v16 = vadd.f32 %v820_v45, %v728_v28  ;;  %v5281_v50 = vpop.f32.mrb[23].mxu0 }
 0x1ba   :  { %v7145_v54 = vcombine.high %v7141_v48, %v7141_v48  ;;  %v852_v55 = vadd.f32 %v7138_v40, %v840_v16  ;;  %v4821_v1 = vrot.slane %v7141_v48, 9  ;;  %v4831_v9 = vrot.slane %v7141_v48, 10 }
 0x1bb   :  { %v825_v57 = vpop.f32.mrb[24].mxu0  ;;  %v4837_v14 = vrot.slane %v7141_v48, 11 }
 0x1bc   :  { %v7154_v61 = vmax.f32 %v852_v55, 0.0  ;;  %v841_v62 = vadd.f32 %v825_v57, %v729_v18  ;;  %v5284_v63 = vpop.f32.mrb[25].mxu0  ;;  %v881_v2 = vrot.slane %v7145_v54, 5  ;;  %v1012_v6 = vcombine.low %v7141_v48, %v7145_v54  ;;  %v1138_v48 = vld [vmem:[#allocation3 + $0x90] sm:$0xff] }
 0x1bd   :  { %v1111_v11 = vrot.slane %v7145_v54, 6  ;;  %v1247_v20 = vrot.slane %v7145_v54, 7 }
 0x1be   :  { %v7165_v15 = vcombine.high %v7154_v61, %v7154_v61  ;;  %v853_v17 = vadd.f32 %v7138_v40, %v841_v62  ;;  %v883_v19 = vrot.slane %v881_v2, 4  ;;  %v882_v22 = vsel %vm6880_vm4, %v4821_v1, %v881_v2 }
 0x1bf   :  { %v830_v21 = vpop.f32.mrb[26].mxu0  ;;  %v884_v23 = vrot.slane %v7154_v61, 5  ;;  %v1113_v24 = vrot.slane %v1111_v11, 4  ;;  %v1114_v25 = vrot.slane %v7154_v61, 6  ;;  %v7178_v5 = vsel %vm7000_vm10, %v4831_v9, %v1111_v11 }
 0x1c0   :  { %v7173_v26 = vmax.f32 %v853_v17, 0.0  ;;  %v842_v27 = vadd.f32 %v830_v21, %v730_v33  ;;  %v5287_v28 = vpop.f32.mrb[27].mxu0  ;;  %v887_v4 = vrot.slane %v7165_v15, 5  ;;  %v1117_v47 = vrot.slane %v7165_v15, 6 }
 0x1c1   :  { %v885_v7 = vsel %vm6880_vm4, %v883_v19, %v884_v23  ;;  %v886_v10 = vrot.slane %v884_v23, 4  ;;  %v7184_v12 = vsel %vm7000_vm10, %v1113_v24, %v1114_v25  ;;  %v1116_v18 = vrot.slane %v1114_v25, 4 }
 0x1c2   :  { %v7188_v29 = vcombine.high %v7173_v26, %v7173_v26  ;;  %v890_v31 = vrot.slane %v7173_v26, 5  ;;  %v1120_v32 = vrot.slane %v7173_v26, 6  ;;  %v1256_v30 = vrot.slane %v7173_v26, 7 }
 0x1c3   :  { %v1391_v41 = vcombine.low %v7165_v15, %v7173_v26  ;;  %v854_v33 = vadd.f32 %v7138_v40, %v842_v27  ;;  %v835_v34 = vpop.f32.mrb[28].mxu0  ;;  %v914_v35 = vcombine.low %v882_v22, %v885_v7  ;;  %v888_v36 = vsel %vm6880_vm4, %v886_v10, %v887_v4 }
 0x1c4   :  { %v843_v39 = vadd.f32 %v835_v34, %v731_v37  ;;  %v5290_v42 = vpop.f32.mrb[29].mxu0  ;;  %v889_v43 = vrot.slane %v887_v4, 4  ;;  %v4822_v44 = vrot.slane %v7188_v29, 9  ;;  %v1144_v45 = vcombine.low %v7178_v5, %v7184_v12  ;;  %v1278_v12 = vld [vmem:[#allocation3 + $0xf0] sm:$0xff] }
 0x1c5   :  { %v7201_v46 = vmax.f32 %v854_v33, 0.0  ;;  %5307 = vmatprep.mubr.msk.f32.mxu1 %vm918_vm11, %v914_v35  ;;  %v4832_v13 = vrot.slane %v7188_v29, 10  ;;  %v7208_v16 = vsel %vm6980_vm9, %v4837_v14, %v1247_v20  ;;  %v1249_v51 = vrot.slane %v1247_v20, 4  ;;  %v1136_v42 = vld [vmem:[#allocation3 + $0x80] sm:$0xff] }
 0x1c6   :  { %v855_v37 = vadd.f32 %v7138_v40, %v843_v39  ;;  %v891_v50 = vsel %vm6880_vm4, %v889_v43, %v890_v31  ;;  %v1250_v52 = vrot.slane %v7154_v61, 7  ;;  %v7225_v40 = vsel %vm7000_vm10, %v1116_v18, %v1117_v47  ;;  %v1137_v43 = vld [vmem:[#allocation3 + $0x88] sm:$0xff] }
 0x1c7   :  { %v7216_v53 = vcombine.high %v7201_v46, %v7201_v46  ;;  %v915_v55 = vcombine.low %v888_v36, %v891_v50  ;;  %v894_v57 = vrot.slane %v7201_v46, 5  ;;  %v1014_v62 = vcombine.low %v7188_v29, %v7201_v46 }
 0x1c8   :  { %v7221_v63 = vmax.f32 %v855_v37, 0.0  ;;  %v1119_v1 = vrot.slane %v1117_v47, 4  ;;  %v1124_v2 = vrot.slane %v7201_v46, 6  ;;  %v7269_v35 = vsel %vm6980_vm9, %v1249_v51, %v1250_v52 }
 0x1c9   :  { %5308 = vmatmul.mubr.msk.f32.vlgmr.msra.gmra.mrb[20].mxu1 %vm918_vm11, %v915_v55  ;;  %v895_v9 = vsel %vm6880_vm4, %v4822_v44, %v894_v57  ;;  %v896_v11 = vrot.slane %v894_v57, 4  ;;  %v897_v14 = vrot.slane %v7216_v53, 5  ;;  %v1127_v17 = vrot.slane %v7216_v53, 6 }
 0x1ca   :  { %5857 = vmatpush3.bf16.msra.mxu1 %v7130_v38  ;;  %v7236_v19 = vcombine.high %v7221_v63, %v7221_v63  ;;  %v900_v20 = vrot.slane %v7221_v63, 5  ;;  %v1015_v21 = vcombine.low %v7216_v53, %v7221_v63  ;;  %v7243_v22 = vsel %vm7000_vm10, %v1119_v1, %v1120_v32 }
 0x1cb   :  { %5859 = vmatprep.subr.bf16.mxu1 %v7148_v58  ;;  %v898_v23 = vsel %vm6880_vm4, %v896_v11, %v897_v14  ;;  %v899_v24 = vrot.slane %v897_v14, 4  ;;  %v1145_v38 = vcombine.low %v7225_v40, %v7243_v22  ;;  %v7252_v25 = vsel %vm7000_vm10, %v4832_v13, %v1124_v2  ;;  %v1382_v22 = vld [vmem:[#allocation3 + $0x100] sm:$0xff] }
 0x1cc   :  { %v916_v27 = vcombine.low %v895_v9, %v898_v23  ;;  %v902_v28 = vrot.slane %v900_v20, 4  ;;  %v903_v4 = vrot.slane %v7236_v19, 5  ;;  %v1126_v7 = vrot.slane %v1124_v2, 4 }
 0x1cd   :  { %v901_v10 = vsel %vm6880_vm4, %v899_v24, %v900_v20  ;;  %v1129_v18 = vrot.slane %v1127_v17, 4  ;;  %v1130_v31 = vrot.slane %v7221_v63, 6  ;;  %v1133_v32 = vrot.slane %v7236_v19, 6  ;;  %v1139_v24 = vld [vmem:[#allocation3 + $0x98] sm:$0xff] }
 0x1ce   :  { %5861 = vmatpush3.bf16.msra.mxu1 %v7148_v58  ;;  %5310 = vmatprep.mubr.msk.f32.mxu1 %vm918_vm11, %v916_v27  ;;  %v904_v33 = vsel %vm6880_vm4, %v902_v28, %v903_v4  ;;  %v7265_v34 = vsel %vm7000_vm10, %v1126_v7, %v1127_v17  ;;  %v1252_v36 = vrot.slane %v1250_v52, 4  ;;  %v1280_v13 = vcombine.low %v7208_v16, %v7269_v35  ;;  %v1388_v35 = vld [vmem:[#allocation3 + $0x130] sm:$0xff] }
 0x1cf   :  { %5863 = vmatprep.subr.bf16.mxu1 %v7150_v59  ;;  %v917_v39 = vcombine.low %v901_v10, %v904_v33  ;;  %v1146_v58 = vcombine.low %v7252_v25, %v7265_v34  ;;  %v7276_v44 = vsel %vm7000_vm10, %v1129_v18, %v1130_v31  ;;  %v1132_v47 = vrot.slane %v1130_v31, 4  ;;  %v1384_v34 = vld [vmem:[#allocation3 + $0x110] sm:$0xff] }
 0x1d0   :  { %v1253_v37 = vrot.slane %v7165_v15, 7  ;;  %v4838_v50 = vrot.slane %v7188_v29, 11  ;;  %v1260_v51 = vrot.slane %v7201_v46, 7  ;;  %v1263_v55 = vrot.slane %v7216_v53, 7 }
 0x1d1   :  { %5311 = vmatmul.mubr.msk.f32.gmra.mrb[22].mxu1 %vm918_vm11, %v917_v39  ;;  %v7286_v52 = vsel %vm7000_vm10, %v1132_v47, %v1133_v32  ;;  %v1266_v57 = vrot.slane %v7221_v63, 7  ;;  %v1269_v1 = vrot.slane %v7236_v19, 7  ;;  %v5870_v2 = vpack.c.bf16 %v1137_v43, %v1136_v42  ;;  %v1140_v39 = vld [vmem:[#allocation3 + $0xa0] sm:$0xff]  ;;  %v1141_v42 = vld [vmem:[#allocation3 + $0xa8] sm:$0xff]  ;;  %v1142_v43 = vld [vmem:[#allocation3 + $0xb0] sm:$0xff] }
 0x1d2   :  { %5865 = vmatpush3.bf16.msra.mxu1 %v7150_v59  ;;  %5329 = vmatprep.mubr.msk.f32.mxu1 %vm918_vm11, %v1012_v6  ;;  %v1147_v9 = vcombine.low %v7276_v44, %v7286_v52  ;;  %v1255_v11 = vrot.slane %v1253_v37, 4  ;;  %v7300_v14 = vsel %vm6980_vm9, %v4838_v50, %v1260_v51  ;;  %v1262_v17 = vrot.slane %v1260_v51, 4  ;;  %v1143_v44 = vld [vmem:[#allocation3 + $0xb8] sm:$0xff]  ;;  %v1272_v47 = vld [vmem:[#allocation3 + $0xc0] sm:$0xff]  ;;  %v1274_v50 = vld [vmem:[#allocation3 + $0xd0] sm:$0xff] }
 0x1d3   :  { %5867 = vmatprep.subr.bf16.mxu1 %v7152_v60  ;;  %v1265_v20 = vrot.slane %v1263_v55, 4  ;;  %v1268_v23 = vrot.slane %v1266_v57, 4  ;;  %v1390_v59 = vcombine.low %v7145_v54, %v7154_v61  ;;  %v7307_v6 = vsel %vm6980_vm9, %v1252_v36, %v1253_v37  ;;  %v1275_v51 = vld [vmem:[#allocation3 + $0xd8] sm:$0xff] }
 0x1d4   :  { %v7313_v27 = vsel %vm6980_vm9, %v1255_v11, %v1256_v30  ;;  %v1392_v28 = vcombine.low %v7201_v46, %v7216_v53  ;;  %v1393_v4 = vcombine.low %v7221_v63, %v7236_v19  ;;  %v1264_v10 = vsel %vm6980_vm9, %v1262_v17, %v1263_v55  ;;  %v1276_v55 = vld [vmem:[#allocation3 + $0xe0] sm:$0xff]  ;;  %v1977_v46 = vld [vmem:[#allocation8 + $0x128] sm:$0xff]  ;;  %v1978_v63 = vld [vmem:[#allocation8 + $0x130] sm:$0xff] }
 0x1d5   :  { %v1281_v7 = vcombine.low %v7307_v6, %v7313_v27  ;;  %v7325_v18 = vsel %vm6980_vm9, %v1265_v20, %v1266_v57  ;;  %v7329_v30 = vsel %vm6980_vm9, %v1268_v23, %v1269_v1  ;;  %v1282_v31 = vcombine.low %v7300_v14, %v1264_v10  ;;  %v1386_v1 = vld [vmem:[#allocation3 + $0x120] sm:$0xff]  ;;  %v1973_v14 = vld [vmem:[#allocation8 + $0x108] sm:$0xff]  ;;  %v1974_v20 = vld [vmem:[#allocation8 + $0x110] sm:$0xff] }
 0x1d6   :  { %5869 = vmatpush3.bf16.msra.mxu1 %v7152_v60  ;;  %v1283_v32 = vcombine.low %v7325_v18, %v7329_v30  ;;  %v1013_v33 = vcombine.low %v7154_v61, %v7165_v15  ;;  %v5874_v36 = vpack.c.bf16 %v1139_v24, %v1138_v48  ;;  %v5878_v60 = vpack.c.bf16 %v1141_v42, %v1140_v39  ;;  %v1972_v11 = vld [vmem:[#allocation8 + $0x100] sm:$0xff]  ;;  %v1975_v23 = vld [vmem:[#allocation8 + $0x118] sm:$0xff]  ;;  %v1545_v61 = vld [vmem:[#allocation8 + $0x50] sm:$0xff] }
 0x1d7   :  { %5871 = vmatprep.subr.bf16.mxu1 %v5870_v2  ;;  %v5882_v29 = vpack.c.bf16 %v1143_v44, %v1142_v43  ;;  %v5890_v52 = vpack.c.bf16 %v1275_v51, %v1274_v50  ;;  %v5967_v17 = vpack.c.bf16 %v1973_v14, %v1972_v11  ;;  %v5970_v54 = vpack.c.bf16 %v1975_v23, %v1974_v20  ;;  %v1546_v15 = vld [vmem:[#allocation8 + $0x58] sm:$0xff]  ;;  %v1548_v48 = vld [vmem:[#allocation8 + $0x68] sm:$0xff]  ;;  %v1549_v6 = vld [vmem:[#allocation8 + $0x70] sm:$0xff] }
 0x1d8   :  { %v5922_v26 = vpack.c.bf16 %v1546_v15, %v1545_v61  ;;  %v1979_v24 = vld [vmem:[#allocation8 + $0x138] sm:$0xff]  ;;  %v7391_v18 = vld [vmem:[#allocation8] sm:$0xff] }
 0x1d9   :  { %5330 = vmatmul.mubr.msk.f32.vlgmr.msra.gmra.mrb[20].mxu1 %vm918_vm11, %v1013_v33  ;;  %v1550_v27 = vld [vmem:[#allocation8 + $0x78] sm:$0xff]  ;;  %v7393_v33 = vld [vmem:[#allocation8 + $0x10] sm:$0xff]  ;;  %v7397_v42 = vld [vmem:[#allocation8 + $0x20] sm:$0xff] }
 0x1da   :  { %5332 = vmatprep.mubr.msk.f32.mxu1 %vm918_vm11, %v1014_v62  ;;  %5873 = vmatpush3.bf16.msra.mxu1 %v5870_v2  ;;  %v1273_v62 = vld [vmem:[#allocation3 + $0xc8] sm:$0xff] }
 0x1db   :  { %5875 = vmatprep.subr.bf16.mxu1 %v5874_v36  ;;  %v5886_v37 = vpack.c.bf16 %v1273_v62, %v1272_v47  ;;  %v1387_v2 = vld [vmem:[#allocation3 + $0x128] sm:$0xff]  ;;  %5923 = vmatpush3.bf16.msra.mxu0 %v5922_v26 }
 0x1dc   :  { %v5910_v16 = vpack.c.bf16 %v1387_v2, %v1386_v1  ;;  %5924 = vmatprep.subr.bf16.mxu0 %v6618_v49 }
 0x1dd   :  { %5333 = vmatmul.mubr.msk.f32.gmra.mrb[22].mxu1 %vm918_vm11, %v1015_v21  ;;  %v1277_v21 = vld [vmem:[#allocation3 + $0xe8] sm:$0xff] }
 0x1de   :  { %5877 = vmatpush3.bf16.msra.mxu1 %v5874_v36  ;;  %5351 = vmatprep.mubr.msk.f32.mxu1 %vm918_vm11, %v1144_v45  ;;  %v5894_v5 = vpack.c.bf16 %v1277_v21, %v1276_v55  ;;  %v1279_v45 = vld [vmem:[#allocation3 + $0xf8] sm:$0xff] }
 0x1df   :  { %5879 = vmatprep.subr.bf16.mxu1 %v5878_v60  ;;  %v5898_v40 = vpack.c.bf16 %v1279_v45, %v1278_v12  ;;  %v7395_v36 = vld [vmem:[#allocation8 + $0x18] sm:$0xff] }
 0x1e0   :  { %v5934_v62 = vpack.c.bf16 %v7395_v36, %v7393_v33 }
 0x1e2   :  { %5881 = vmatpush3.bf16.msra.mxu1 %v5878_v60  ;;  %v7399_v60 = vld [vmem:[#allocation8 + $0x28] sm:$0xff] }
 0x1e3   :  { %5883 = vmatprep.subr.bf16.mxu1 %v5882_v29  ;;  %v5937_v55 = vpack.c.bf16 %v7399_v60, %v7397_v42 }
 0x1e6   :  { %5885 = vmatpush3.bf16.msra.mxu1 %v5882_v29 }
 0x1e7   :  { %5887 = vmatprep.subr.bf16.mxu1 %v5886_v37 }
 0x1e9   :  { %5352 = vmatmul.mubr.msk.f32.vlgmr.msra.gmra.mrb[20].mxu1 %vm918_vm11, %v1145_v38  ;;  %v1383_v38 = vld [vmem:[#allocation3 + $0x108] sm:$0xff] }
 0x1ea   :  { %5354 = vmatprep.mubr.msk.f32.mxu1 %vm918_vm11, %v1146_v58  ;;  %5889 = vmatpush3.bf16.msra.mxu1 %v5886_v37  ;;  %v5902_v25 = vpack.c.bf16 %v1383_v38, %v1382_v22  ;;  %v1385_v58 = vld [vmem:[#allocation3 + $0x118] sm:$0xff] }
 0x1eb   :  { %5891 = vmatprep.subr.bf16.mxu1 %v5890_v52  ;;  %v5906_v57 = vpack.c.bf16 %v1385_v58, %v1384_v34 }
 0x1ed   :  { %5355 = vmatmul.mubr.msk.f32.gmra.mrb[22].mxu1 %vm918_vm11, %v1147_v9 }
 0x1ee   :  { %5893 = vmatpush3.bf16.msra.mxu1 %v5890_v52  ;;  %5373 = vmatprep.mubr.msk.f32.mxu1 %vm918_vm11, %v1280_v13  ;;  %v1389_v13 = vld [vmem:[#allocation3 + $0x138] sm:$0xff] }
 0x1ef   :  { %5895 = vmatprep.subr.bf16.mxu1 %v5894_v5  ;;  %v5914_v9 = vpack.c.bf16 %v1389_v13, %v1388_v35 }
 0x1f2   :  { %5897 = vmatpush3.bf16.msra.mxu1 %v5894_v5 }
 0x1f3   :  { %5899 = vmatprep.subr.bf16.mxu1 %v5898_v40 }
 0x1f6   :  { %5901 = vmatpush3.bf16.msra.mxu1 %v5898_v40 }
 0x1f7   :  { %5903 = vmatprep.subr.bf16.mxu1 %v5902_v25 }
 0x1f9   :  { %5374 = vmatmul.mubr.msk.f32.vlgmr.msra.gmra.mrb[20].mxu1 %vm918_vm11, %v1281_v7  ;;  %v4847_v7 = vld [vmem:[#allocation6] ss:$0 sm:$0xff] }
 0x1fa   :  { %5376 = vmatprep.mubr.msk.f32.mxu1 %vm918_vm11, %v1282_v31  ;;  %5905 = vmatpush3.bf16.msra.mxu1 %v5902_v25 }
 0x1fb   :  { %5907 = vmatprep.subr.bf16.mxu1 %v5906_v57 }
 0x1fd   :  { %5377 = vmatmul.mubr.msk.f32.gmra.mrb[22].mxu1 %vm918_vm11, %v1283_v32  ;;  %v1513_v32 = vld [vmem:[#allocation8 + $0x8] sm:$0xff] }
 0x1fe   :  { %5909 = vmatpush3.bf16.msra.mxu1 %v5906_v57  ;;  %5395 = vmatprep.mubr.msk.f32.mxu1 %vm918_vm11, %v1390_v59  ;;  %v1547_v59 = vld [vmem:[#allocation8 + $0x60] sm:$0xff]  ;;  %v5931_v47 = vpack.c.bf16 %v1513_v32, %v7391_v18 }
 0x1ff   :  { %5911 = vmatprep.subr.bf16.mxu1 %v5910_v16  ;;  %v5925_v19 = vpack.c.bf16 %v1548_v48, %v1547_v59 }
 0x201   :  { %5926 = vmatpush3.bf16.msra.mxu0 %v5925_v19 }
 0x202   :  { %5913 = vmatpush3.bf16.msra.mxu1 %v5910_v16  ;;  %5927 = vmatprep.subr.bf16.mxu0 %v6618_v49 }
 0x203   :  { %5915 = vmatprep.subr.bf16.mxu1 %v5914_v9 }
 0x206   :  { %5917 = vmatpush3.bf16.msra.mxu1 %v5914_v9 }
 0x207   :  { %5966 = vmatprep.subr.bf16.mxu1 %v6618_v49 }
 0x209   :  { %5396 = vmatmul.mubr.msk.f32.vlgmr.msra.gmra.mrb[20].mxu1 %vm918_vm11, %v1391_v41  ;;  %v1976_v41 = vld [vmem:[#allocation8 + $0x120] sm:$0xff] }
 0x20a   :  { %5398 = vmatprep.mubr.msk.f32.mxu1 %vm918_vm11, %v1392_v28  ;;  %5968 = vmatpush3.bf16.msra.mxu1 %v5967_v17  ;;  %v5973_v53 = vpack.c.bf16 %v1977_v46, %v1976_v41  ;;  %v5976_v28 = vpack.c.bf16 %v1979_v24, %v1978_v63 }
 0x20b   :  { %5969 = vmatprep.subr.bf16.mxu1 %v6618_v49 }
 0x20d   :  { %5399 = vmatmul.mubr.msk.f32.gmra.mrb[22].mxu1 %vm918_vm11, %v1393_v4  ;;  %v5928_v4 = vpack.c.bf16 %v1550_v27, %v1549_v6 }
 0x20e   :  { %5971 = vmatpush3.bf16.msra.mxu1 %v5970_v54  ;;  %5517 = vmatprep.mubr.msk.f32.mxu1 %vm6617_vm0, %v6616_v0 }
 0x20f   :  { %5972 = vmatprep.subr.bf16.mxu1 %v6618_v49  ;;  %5929 = vmatpush3.bf16.msra.mxu0 %v5928_v4 }
 0x210   :  { %5930 = vmatprep.subr.bf16.mxu0 %v6618_v49 }
 0x212   :  { %5974 = vmatpush3.bf16.msra.mxu1 %v5973_v53 }
 0x213   :  { %5975 = vmatprep.subr.bf16.mxu1 %v6618_v49 }
 0x216   :  { %5977 = vmatpush3.bf16.msra.mxu1 %v5976_v28 }
 0x2dc   :  { %v5397_v10 = vpop.f32.mrb[20].mxu1 }
 0x2dd   :  { %v1499_v30 = vadd.f32 %v5397_v10, %v4847_v7  ;;  %v1468_v31 = vpop.f32.mrb[21].mxu1 }
 0x2de   :  { %v1498_v39 = vadd.f32 %v4847_v7, %v1468_v31 }
 0x2df   :  { %v7401_v43 = vmax.f32 %v1499_v30, 0.0 }
 0x2e0   :  { %v7403_v44 = vmax.f32 %v1498_v39, 0.0  ;;  %v5400_v29 = vpop.f32.mrb[22].mxu1 }
 0x2e1   :  { %v1501_v37 = vadd.f32 %v5400_v29, %v4847_v7  ;;  %v1478_v50 = vpop.f32.mrb[23].mxu1  ;;  %v1527_v51 = vrot.slane %v7401_v43, 5  ;;  %v7411_v52 = vcombine.high %v7401_v43, %v7401_v43  ;;  %v1734_v45 = vrot.slane %v7401_v43, 6 }
 0x2e2   :  { %v7417_v21 = vcombine.high %v7403_v44, %v7403_v44  ;;  %v4848_v5 = vrot.slane %v7403_v44, 9  ;;  %v4856_v12 = vrot.slane %v7403_v44, 10  ;;  %v1500_v22 = vadd.f32 %v4847_v7, %v1478_v50 }
 0x2e3   :  { %v7422_v40 = vmax.f32 %v1501_v37, 0.0  ;;  %v1529_v38 = vrot.slane %v1527_v51, 4  ;;  %v1530_v25 = vrot.slane %v7411_v52, 5  ;;  %v4861_v57 = vrot.slane %v7403_v44, 11 }
 0x2e4   :  { %v1524_v34 = vrot.slane %v7417_v21, 5  ;;  %v1731_v58 = vrot.slane %v7417_v21, 6  ;;  %v1852_v1 = vrot.slane %v7417_v21, 7  ;;  %v7429_v2 = vmax.f32 %v1500_v22, 0.0 }
 0x2e5   :  { %v1980_v16 = vcombine.low %v7417_v21, %v7401_v43  ;;  %v7435_v35 = vcombine.high %v7422_v40, %v7422_v40  ;;  %v1531_v13 = vsel %vm6880_vm4, %v1529_v38, %v1530_v25  ;;  %v1537_v26 = vrot.slane %v7422_v40, 5 }
 0x2e6   :  { %v1525_v9 = vsel %vm6880_vm4, %v4848_v5, %v1524_v34  ;;  %v7443_v11 = vsel %vm7000_vm10, %v4856_v12, %v1731_v58  ;;  %v7447_v14 = vsel %vm6980_vm9, %v4861_v57, %v1852_v1  ;;  %v1526_v17 = vrot.slane %v1524_v34, 4  ;;  %v1518_v34 = vld [vmem:[#allocation8 + $0x30] sm:$0xff] }
 0x2e7   :  { %v7451_v20 = vcombine.high %v7429_v2, %v7429_v2  ;;  %5518 = vmatmul.mubr.msk.f32.vlgmr.msra.gmra.mrb[24].mxu1 %vm918_vm11, %v1980_v16  ;;  %v4866_v23 = vcombine.high %v7401_v43, %v7429_v2  ;;  %v1982_v54 = vcombine.low %v7422_v40, %v7435_v35  ;;  %v4849_v61 = vrot.slane %v7429_v2, 9 }
 0x2e8   :  { %5520 = vmatprep.mubr.msk.f32.mxu1 %vm6617_vm0, %v6616_v0  ;;  %v1528_v15 = vsel %vm6880_vm4, %v1526_v17, %v1527_v51  ;;  %v1540_v41 = vrot.slane %v7435_v35, 5  ;;  %v1641_v46 = vcombine.low %v7401_v43, %v7429_v2  ;;  %v1733_v63 = vrot.slane %v1731_v58, 4  ;;  %v1519_v58 = vld [vmem:[#allocation8 + $0x38] sm:$0xff] }
 0x2e9   :  { %v1551_v53 = vcombine.low %v1525_v9, %v1528_v15  ;;  %v1534_v59 = vrot.slane %v7451_v20, 5  ;;  %v1642_v48 = vcombine.low %v7451_v20, %v7422_v40  ;;  %v1539_v19 = vrot.slane %v1537_v26, 4 }
 0x2ea   :  { %v1736_v24 = vrot.slane %v1734_v45, 4  ;;  %v1737_v6 = vrot.slane %v7411_v52, 6  ;;  %v4857_v27 = vrot.slane %v7429_v2, 10  ;;  %v7478_v7 = vsel %vm7000_vm10, %v1733_v63, %v1734_v45  ;;  %v1752_v63 = vld [vmem:[#allocation8 + $0x90] sm:$0xff] }
 0x2eb   :  { %5521 = vmatmul.mubr.msk.f32.gmra.mrb[26].mxu1 %vm918_vm11, %v4866_v23  ;;  %5418 = vmatmul.mubr.msk.f32.vlgmr.msra.gmra.mrb[30].mxu0 %vm918_vm11, %v1551_v53  ;;  %v1535_v28 = vsel %vm6880_vm4, %v4849_v61, %v1534_v59  ;;  %v1536_v4 = vrot.slane %v1534_v59, 4  ;;  %v1741_v10 = vrot.slane %v7451_v20, 6  ;;  %v1541_v30 = vsel %vm6880_vm4, %v1539_v19, %v1540_v41  ;;  %v1750_v53 = vld [vmem:[#allocation8 + $0x80] sm:$0xff]  ;;  %v1751_v59 = vld [vmem:[#allocation8 + $0x88] sm:$0xff]  ;;  %v1753_v19 = vld [vmem:[#allocation8 + $0x98] sm:$0xff] }
 0x2ec   :  { %5932 = vmatpush3.bf16.msra.mxu0 %v5931_v47  ;;  %5523 = vmatprep.mubr.msk.f32.mxu1 %vm6617_vm0, %v6616_v0  ;;  %v1552_v18 = vcombine.low %v1531_v13, %v1535_v28  ;;  %v1758_v31 = vcombine.low %v7443_v11, %v7478_v7  ;;  %v1744_v32 = vrot.slane %v7422_v40, 6  ;;  %v7495_v29 = vsel %vm7000_vm10, %v1736_v24, %v1737_v6  ;;  %v1754_v6 = vld [vmem:[#allocation8 + $0xa0] sm:$0xff]  ;;  %v1757_v28 = vld [vmem:[#allocation8 + $0xb8] sm:$0xff]  ;;  %v1877_v7 = vld [vmem:[#allocation8 + $0xf0] sm:$0xff] }
 0x2ed   :  { %5420 = vmatprep.mubr.msk.f32.mxu0 %vm6617_vm0, %v6616_v0  ;;  %5933 = vmatprep.subr.bf16.mxu0 %v6618_v49  ;;  %v1538_v39 = vsel %vm6880_vm4, %v1536_v4, %v1537_v26  ;;  %v7499_v47 = vsel %vm7000_vm10, %v4857_v27, %v1741_v10  ;;  %v1743_v37 = vrot.slane %v1741_v10, 4  ;;  %v1747_v12 = vrot.slane %v7435_v35, 6  ;;  %v1755_v27 = vld [vmem:[#allocation8 + $0xa8] sm:$0xff]  ;;  %v1873_v10 = vld [vmem:[#allocation8 + $0xd0] sm:$0xff] }
 0x2ee   :  { %v1553_v50 = vcombine.low %v1538_v39, %v1541_v30  ;;  %v1759_v51 = vcombine.low %v7495_v29, %v7499_v47  ;;  %v1746_v5 = vrot.slane %v1744_v32, 4  ;;  %v1854_v22 = vrot.slane %v1852_v1, 4  ;;  %v1878_v30 = vld [vmem:[#allocation8 + $0xf8] sm:$0xff]  ;;  %v2115_v39 = vld [vmem:[#allocation11 + $0x48] sm:$0xff] }
 0x2ef   :  { %5524 = vmatmul.mubr.msk.f32.gmra.mrb[28].mxu1 %vm918_vm11, %v1982_v54  ;;  %5421 = vmatmul.mubr.msk.f32.gmra.mrb[32].mxu0 %vm918_vm11, %v1552_v18  ;;  %v7508_v45 = vsel %vm7000_vm10, %v1743_v37, %v1744_v32  ;;  %v1855_v38 = vrot.slane %v7401_v43, 7  ;;  %v1858_v25 = vrot.slane %v7411_v52, 7  ;;  %v4862_v16 = vrot.slane %v7429_v2, 11  ;;  %v1871_v43 = vld [vmem:[#allocation8 + $0xc0] sm:$0xff]  ;;  %v1872_v2 = vld [vmem:[#allocation8 + $0xc8] sm:$0xff]  ;;  %v1874_v18 = vld [vmem:[#allocation8 + $0xd8] sm:$0xff] }
 0x2f0   :  { %5935 = vmatpush3.bf16.msra.mxu0 %v5934_v62  ;;  %5423 = vmatprep.mubr.msk.f32.mxu0 %vm6617_vm0, %v6616_v0  ;;  %v7519_v57 = vsel %vm7000_vm10, %v1746_v5, %v1747_v12  ;;  %v1862_v1 = vrot.slane %v7451_v20, 7  ;;  %v1865_v13 = vrot.slane %v7422_v40, 7  ;;  %v1868_v52 = vrot.slane %v7435_v35, 7  ;;  %v1875_v20 = vld [vmem:[#allocation8 + $0xe0] sm:$0xff]  ;;  %v2116_v47 = vld [vmem:[#allocation11 + $0x50] sm:$0xff] }
 0x2f1   :  { %5936 = vmatprep.subr.bf16.mxu0 %v6618_v49  ;;  %v1760_v33 = vcombine.low %v7508_v45, %v7519_v57  ;;  %v7529_v36 = vsel %vm6980_vm9, %v1854_v22, %v1855_v38  ;;  %v1857_v62 = vrot.slane %v1855_v38, 4  ;;  %v5940_v61 = vpack.c.bf16 %v1519_v58, %v1518_v34  ;;  %v2114_v32 = vld [vmem:[#allocation11 + $0x40] sm:$0xff]  ;;  %v2117_v37 = vld [vmem:[#allocation11 + $0x58] sm:$0xff]  ;;  %v2120_v12 = vld [vmem:[#allocation11 + $0x70] sm:$0xff] }
 0x2f2   :  { %v1879_v9 = vcombine.low %v7447_v14, %v7529_v36  ;;  %v7536_v17 = vsel %vm6980_vm9, %v4862_v16, %v1862_v1  ;;  %v1864_v23 = vrot.slane %v1862_v1, 4  ;;  %v1867_v54 = vrot.slane %v1865_v13, 4  ;;  %v2118_v14 = vld [vmem:[#allocation11 + $0x60] sm:$0xff]  ;;  %v2121_v45 = vld [vmem:[#allocation11 + $0x78] sm:$0xff] }
 0x2f3   :  { %5424 = vmatmul.mubr.msk.f32.gmra.mrb[34].mxu0 %vm918_vm11, %v1553_v50  ;;  %v7541_v15 = vsel %vm6980_vm9, %v1857_v62, %v1858_v25  ;;  %v5943_v60 = vpack.c.bf16 %v1751_v59, %v1750_v53  ;;  %v5946_v24 = vpack.c.bf16 %v1753_v19, %v1752_v63  ;;  %v5958_v40 = vpack.c.bf16 %v1874_v18, %v1873_v10  ;;  %v2091_v38 = vld [vmem:[#allocation11] sm:$0xff]  ;;  %v2092_v25 = vld [vmem:[#allocation11 + $0x8] sm:$0xff] }
 0x2f4   :  { %5938 = vmatpush3.bf16.msra.mxu0 %v5937_v55  ;;  %5442 = vmatprep.mubr.msk.f32.mxu0 %vm6617_vm0, %v6616_v0  ;;  %v1880_v35 = vcombine.low %v7541_v15, %v7536_v17  ;;  %v7552_v26 = vsel %vm6980_vm9, %v1864_v23, %v1865_v13  ;;  %v1869_v41 = vsel %vm6980_vm9, %v1867_v54, %v1868_v52 }
 0x2f5   :  { %5939 = vmatprep.subr.bf16.mxu0 %v6618_v49  ;;  %v1881_v42 = vcombine.low %v7552_v26, %v1869_v41  ;;  %v1640_v55 = vcombine.low %v7403_v44, %v7417_v21  ;;  %v5949_v44 = vpack.c.bf16 %v1755_v27, %v1754_v6  ;;  %v1756_v21 = vld [vmem:[#allocation8 + $0xb0] sm:$0xff]  ;;  %v5978_v29 = vpack.c.bf16 %v2115_v39, %v2114_v32 }
 0x2f6   :  { %v5952_v4 = vpack.c.bf16 %v1757_v28, %v1756_v21  ;;  %v5982_v50 = vpack.c.bf16 %v2117_v37, %v2116_v47  ;;  %v5990_v22 = vpack.c.bf16 %v2121_v45, %v2120_v12  ;;  %v7611_v34 = vpack.c.bf16 %v2092_v25, %v2091_v38 }
 0x2f8   :  { %5941 = vmatpush3.bf16.msra.mxu0 %v5940_v61 }
 0x2f9   :  { %5942 = vmatprep.subr.bf16.mxu0 %v6618_v49 }
 0x2fb   :  { %5443 = vmatmul.mubr.msk.f32.vlgmr.msra.gmra.mrb[36].mxu0 %vm918_vm11, %v1640_v55 }
 0x2fc   :  { %5944 = vmatpush3.bf16.msra.mxu0 %v5943_v60  ;;  %5445 = vmatprep.mubr.msk.f32.mxu0 %vm6617_vm0, %v6616_v0 }
 0x2fd   :  { %5945 = vmatprep.subr.bf16.mxu0 %v6618_v49 }
 0x2ff   :  { %5446 = vmatmul.mubr.msk.f32.gmra.mrb[38].mxu0 %vm918_vm11, %v1641_v46  ;;  %v5955_v46 = vpack.c.bf16 %v1872_v2, %v1871_v43  ;;  %v4870_v2 = vld [vmem:[#allocation9] ss:$0 sm:$0xff] }
 0x300   :  { %5947 = vmatpush3.bf16.msra.mxu0 %v5946_v24  ;;  %5448 = vmatprep.mubr.msk.f32.mxu0 %vm6617_vm0, %v6616_v0 }
 0x301   :  { %5948 = vmatprep.subr.bf16.mxu0 %v6618_v49 }
 0x303   :  { %5449 = vmatmul.mubr.msk.f32.gmra.mrb[40].mxu0 %vm918_vm11, %v1642_v48  ;;  %v1876_v48 = vld [vmem:[#allocation8 + $0xe8] sm:$0xff] }
 0x304   :  { %5950 = vmatpush3.bf16.msra.mxu0 %v5949_v44  ;;  %5467 = vmatprep.mubr.msk.f32.mxu0 %vm6617_vm0, %v6616_v0  ;;  %v5961_v11 = vpack.c.bf16 %v1876_v48, %v1875_v20 }
 0x305   :  { %5951 = vmatprep.subr.bf16.mxu0 %v6618_v49 }
 0x308   :  { %5953 = vmatpush3.bf16.msra.mxu0 %v5952_v4 }
 0x309   :  { %5954 = vmatprep.subr.bf16.mxu0 %v6618_v49 }
 0x30b   :  { %5468 = vmatmul.mubr.msk.f32.vlgmr.msra.gmra.mrb[42].mxu0 %vm918_vm11, %v1758_v31  ;;  %v5964_v31 = vpack.c.bf16 %v1878_v30, %v1877_v7  ;;  %v2093_v7 = vld [vmem:[#allocation11 + $0x10] sm:$0xff]  ;;  %v2094_v30 = vld [vmem:[#allocation11 + $0x18] sm:$0xff] }
 0x30c   :  { %5956 = vmatpush3.bf16.msra.mxu0 %v5955_v46  ;;  %5470 = vmatprep.mubr.msk.f32.mxu0 %vm6617_vm0, %v6616_v0  ;;  %v5998_v37 = vpack.c.bf16 %v2094_v30, %v2093_v7  ;;  %v2096_v7 = vld [vmem:[#allocation11 + $0x28] sm:$0xff] }
 0x30d   :  { %5957 = vmatprep.subr.bf16.mxu0 %v6618_v49 }
 0x30f   :  { %5471 = vmatmul.mubr.msk.f32.gmra.mrb[44].mxu0 %vm918_vm11, %v1759_v51  ;;  %v2119_v51 = vld [vmem:[#allocation11 + $0x68] sm:$0xff] }
 0x310   :  { %5959 = vmatpush3.bf16.msra.mxu0 %v5958_v40  ;;  %5473 = vmatprep.mubr.msk.f32.mxu0 %vm6617_vm0, %v6616_v0  ;;  %v5986_v5 = vpack.c.bf16 %v2119_v51, %v2118_v14 }
 0x311   :  { %5960 = vmatprep.subr.bf16.mxu0 %v6618_v49 }
 0x313   :  { %5474 = vmatmul.mubr.msk.f32.gmra.mrb[46].mxu0 %vm918_vm11, %v1760_v33 }
 0x314   :  { %5962 = vmatpush3.bf16.msra.mxu0 %v5961_v11  ;;  %5492 = vmatprep.mubr.msk.f32.mxu0 %vm6617_vm0, %v6616_v0 }
 0x315   :  { %5963 = vmatprep.subr.bf16.mxu0 %v6618_v49 }
 0x318   :  { %5965 = vmatpush3.bf16.msra.mxu0 %v5964_v31 }
 0x319   :  { %5979 = vmatprep.subr.bf16.mxu0 %v5978_v29 }
 0x31b   :  { %5493 = vmatmul.mubr.msk.f32.vlgmr.msra.gmra.mrb[48].mxu0 %vm918_vm11, %v1879_v9 }
 0x31c   :  { %5495 = vmatprep.mubr.msk.f32.mxu0 %vm6617_vm0, %v6616_v0  ;;  %5981 = vmatpush3.bf16.msra.mxu0 %v5978_v29 }
 0x31d   :  { %5983 = vmatprep.subr.bf16.mxu0 %v5982_v50 }
 0x31f   :  { %5496 = vmatmul.mubr.msk.f32.gmra.mrb[50].mxu0 %vm918_vm11, %v1880_v35 }
 0x320   :  { %5498 = vmatprep.mubr.msk.f32.mxu0 %vm6617_vm0, %v6616_v0  ;;  %5985 = vmatpush3.bf16.msra.mxu0 %v5982_v50 }
 0x321   :  { %5987 = vmatprep.subr.bf16.mxu0 %v5986_v5 }
 0x323   :  { %5499 = vmatmul.mubr.msk.f32.gmra.mrb[52].mxu0 %vm918_vm11, %v1881_v42 }
 0x324   :  { %5989 = vmatpush3.bf16.msra.mxu0 %v5986_v5 }
 0x325   :  { %5991 = vmatprep.subr.bf16.mxu0 %v5990_v22 }
 0x328   :  { %5993 = vmatpush3.bf16.msra.mxu0 %v5990_v22 }
 0x329   :  { %5995 = vmatprep.subr.bf16.mxu0 %v7611_v34 }
 0x3ba   :  { %v2055_v58 = vpop.f32.mrb[24].mxu1 }
 0x3bb   :  { %v5519_v57 = vpop.f32.mrb[25].mxu1 }
 0x3be   :  { %v2060_v16 = vpop.f32.mrb[26].mxu1  ;;  %v1626_v1 = vpop.f32.mrb[30].mxu0 }
 0x3bf   :  { %v5522_v13 = vpop.f32.mrb[27].mxu1  ;;  %v5419_v33 = vpop.f32.mrb[31].mxu0 }
 0x3c2   :  { %v2065_v36 = vpop.f32.mrb[28].mxu1  ;;  %v1631_v62 = vpop.f32.mrb[32].mxu0 }
 0x3c3   :  { %v5525_v52 = vpop.f32.mrb[29].mxu1  ;;  %v5422_v9 = vpop.f32.mrb[33].mxu0 }
 0x3c6   :  { %v1636_v17 = vpop.f32.mrb[34].mxu0 }
 0x3c7   :  { %v5425_v23 = vpop.f32.mrb[35].mxu0 }
 0x3ce   :  { %v1715_v54 = vpop.f32.mrb[36].mxu0 }
 0x3cf   :  { %v1716_v61 = vadd.f32 %v1715_v54, %v1626_v1  ;;  %v5444_v15 = vpop.f32.mrb[37].mxu0 }
 0x3d2   :  { %v1720_v35 = vpop.f32.mrb[38].mxu0 }
 0x3d3   :  { %v1721_v26 = vadd.f32 %v1720_v35, %v1631_v62  ;;  %v5447_v41 = vpop.f32.mrb[39].mxu0 }
 0x3d6   :  { %v1725_v53 = vpop.f32.mrb[40].mxu0 }
 0x3d7   :  { %v1726_v59 = vadd.f32 %v1725_v53, %v1636_v17  ;;  %v5450_v42 = vpop.f32.mrb[41].mxu0 }
 0x3de   :  { %v1833_v60 = vpop.f32.mrb[42].mxu0 }
 0x3df   :  { %v1847_v55 = vadd.f32 %v1833_v60, %v1716_v61  ;;  %v5469_v63 = vpop.f32.mrb[43].mxu0 }
 0x3e2   :  { %v1838_v19 = vpop.f32.mrb[44].mxu0 }
 0x3e3   :  { %v1848_v24 = vadd.f32 %v1838_v19, %v1721_v26  ;;  %v5472_v6 = vpop.f32.mrb[45].mxu0 }
 0x3e6   :  { %v1843_v27 = vpop.f32.mrb[46].mxu0 }
 0x3e7   :  { %v1849_v44 = vadd.f32 %v1843_v27, %v1726_v59  ;;  %v5475_v21 = vpop.f32.mrb[47].mxu0 }
 0x3ee   :  { %v1954_v28 = vpop.f32.mrb[48].mxu0 }
 0x3ef   :  { %v1968_v4 = vadd.f32 %v1954_v28, %v1847_v55  ;;  %v5494_v43 = vpop.f32.mrb[49].mxu0 }
 0x3f1   :  { %v2069_v46 = vadd.f32 %v2055_v58, %v1968_v4 }
 0x3f2   :  { %v1959_v10 = vpop.f32.mrb[50].mxu0 }
 0x3f3   :  { %v2079_v18 = vadd.f32 %v4870_v2, %v2069_v46  ;;  %v1969_v40 = vadd.f32 %v1959_v10, %v1848_v24  ;;  %v5497_v20 = vpop.f32.mrb[51].mxu0 }
 0x3f5   :  { %v7614_v48 = vmax.f32 %v2079_v18, 0.0  ;;  %v2070_v11 = vadd.f32 %v2060_v16, %v1969_v40 }
 0x3f6   :  { %v1964_v31 = vpop.f32.mrb[52].mxu0 }
 0x3f7   :  { %v7618_v32 = vcombine.high %v7614_v48, %v7614_v48  ;;  %v2080_v39 = vadd.f32 %v4870_v2, %v2070_v11  ;;  %v1970_v29 = vadd.f32 %v1964_v31, %v1849_v44  ;;  %v5500_v47 = vpop.f32.mrb[53].mxu0  ;;  %v4871_v51 = vrot.slane %v7614_v48, 9  ;;  %v2095_v11 = vld [vmem:[#allocation11 + $0x20] sm:$0xff] }
 0x3f8   :  { %v4877_v12 = vrot.slane %v7614_v48, 10  ;;  %v4881_v22 = vrot.slane %v7614_v48, 11 }
 0x3f9   :  { %v7620_v14 = vmax.f32 %v2080_v39, 0.0  ;;  %v2071_v50 = vadd.f32 %v2065_v36, %v1970_v29  ;;  %v2101_v5 = vrot.slane %v7618_v32, 5  ;;  %v2286_v45 = vrot.slane %v7618_v32, 6  ;;  %v2098_v29 = vld [vmem:[#allocation11 + $0x38] sm:$0xff] }
 0x3fa   :  { %v2392_v38 = vrot.slane %v7618_v32, 7  ;;  %v2203_v8 = vcombine.low %v7614_v48, %v7618_v32  ;;  %v6002_v39 = vpack.c.bf16 %v2096_v7, %v2095_v11  ;;  %v2097_v48 = vld [vmem:[#allocation11 + $0x30] sm:$0xff] }
 0x3fb   :  { %v7630_v25 = vcombine.high %v7620_v14, %v7620_v14  ;;  %v2081_v58 = vadd.f32 %v4870_v2, %v2071_v50  ;;  %v2102_v57 = vsel %vm6880_vm4, %v4871_v51, %v2101_v5  ;;  %v2103_v16 = vrot.slane %v2101_v5, 4  ;;  %v2299_v50 = vld [vmem:[#allocation11 + $0x80] sm:$0xff]  ;;  %v2300_v51 = vld [vmem:[#allocation11 + $0x88] sm:$0xff]  ;;  %v2301_v5 = vld [vmem:[#allocation11 + $0x90] sm:$0xff] }
 0x3fc   :  { %v2104_v1 = vrot.slane %v7620_v14, 5  ;;  %v7637_v13 = vsel %vm7000_vm10, %v4877_v12, %v2286_v45  ;;  %v2288_v33 = vrot.slane %v2286_v45, 4  ;;  %v2289_v36 = vrot.slane %v7620_v14, 6  ;;  %v2302_v12 = vld [vmem:[#allocation11 + $0x98] sm:$0xff]  ;;  %v2303_v45 = vld [vmem:[#allocation11 + $0xa0] sm:$0xff] }
 0x3fd   :  { %v7640_v62 = vmax.f32 %v2081_v58, 0.0  ;;  %v4872_v52 = vrot.slane %v7630_v25, 9  ;;  %v4878_v9 = vrot.slane %v7630_v25, 10  ;;  %v7646_v17 = vsel %vm6980_vm9, %v4881_v22, %v2392_v38  ;;  %v2304_v22 = vld [vmem:[#allocation11 + $0xa8] sm:$0xff] }
 0x3fe   :  { %v2105_v23 = vsel %vm6880_vm4, %v2103_v16, %v2104_v1  ;;  %v2290_v54 = vsel %vm7000_vm10, %v2288_v33, %v2289_v36  ;;  %v2394_v61 = vrot.slane %v2392_v38, 4  ;;  %v2395_v15 = vrot.slane %v7620_v14, 7  ;;  %v2305_v38 = vld [vmem:[#allocation11 + $0xb0] sm:$0xff]  ;;  %v2406_v16 = vld [vmem:[#allocation11 + $0xc8] sm:$0xff]  ;;  %v2408_v33 = vld [vmem:[#allocation11 + $0xd8] sm:$0xff] }
 0x3ff   :  { %v7655_v35 = vcombine.high %v7640_v62, %v7640_v62  ;;  %v2122_v26 = vcombine.low %v2102_v57, %v2105_v23  ;;  %v2108_v41 = vrot.slane %v7640_v62, 5  ;;  %v2204_v53 = vcombine.low %v7630_v25, %v7640_v62  ;;  %v2405_v57 = vld [vmem:[#allocation11 + $0xc0] sm:$0xff]  ;;  %v2411_v23 = vld [vmem:[#allocation11 + $0xf0] sm:$0xff] }
 0x400   :  { %v2307_v59 = vcombine.low %v7637_v13, %v2290_v54  ;;  %v2293_v42 = vrot.slane %v7640_v62, 6  ;;  %v7664_v60 = vsel %vm6980_vm9, %v2394_v61, %v2395_v15  ;;  %v4882_v55 = vrot.slane %v7630_v25, 11  ;;  %v2306_v25 = vld [vmem:[#allocation11 + $0xb8] sm:$0xff]  ;;  %v2407_v13 = vld [vmem:[#allocation11 + $0xd0] sm:$0xff]  ;;  %v2497_v15 = vld [vmem:[#allocation11 + $0x100] sm:$0xff] }
 0x401   :  { %5542 = vmatprep.mubr.msk.f32.mxu0 %vm918_vm11, %v2122_v26  ;;  %v2109_v63 = vsel %vm6880_vm4, %v4872_v52, %v2108_v41  ;;  %v2110_v19 = vrot.slane %v2108_v41, 4  ;;  %v2111_v24 = vrot.slane %v7655_v35, 5  ;;  %v2296_v6 = vrot.slane %v7655_v35, 6  ;;  %v2409_v52 = vld [vmem:[#allocation11 + $0xe0] sm:$0xff]  ;;  %v2412_v54 = vld [vmem:[#allocation11 + $0xf8] sm:$0xff]  ;;  %v2498_v26 = vld [vmem:[#allocation11 + $0x108] sm:$0xff] }
 0x402   :  { %v7674_v27 = vsel %vm7000_vm10, %v4878_v9, %v2293_v42  ;;  %v2295_v44 = vrot.slane %v2293_v42, 4  ;;  %v2413_v21 = vcombine.low %v7646_v17, %v7664_v60  ;;  %v2399_v28 = vrot.slane %v7640_v62, 7  ;;  %v2410_v9 = vld [vmem:[#allocation11 + $0xe8] sm:$0xff]  ;;  %v2501_v60 = vld [vmem:[#allocation11 + $0x120] sm:$0xff] }
 0x403   :  { %v2112_v4 = vsel %vm6880_vm4, %v2110_v19, %v2111_v24  ;;  %v2402_v43 = vrot.slane %v7655_v35, 7  ;;  %v2505_v2 = vcombine.low %v7618_v32, %v7620_v14  ;;  %v2506_v46 = vcombine.low %v7640_v62, %v7655_v35  ;;  %v2503_v19 = vld [vmem:[#allocation11 + $0x130] sm:$0xff]  ;;  %v2504_v24 = vld [vmem:[#allocation11 + $0x138] sm:$0xff]  ;;  %v4887_v32 = vld [vmem:[#allocation12] ss:$0 sm:$0xff] }
 0x404   :  { %v2123_v10 = vcombine.low %v2109_v63, %v2112_v4  ;;  %v2297_v18 = vsel %vm7000_vm10, %v2295_v44, %v2296_v6  ;;  %v7690_v40 = vsel %vm6980_vm9, %v4882_v55, %v2399_v28  ;;  %v2401_v20 = vrot.slane %v2399_v28, 4  ;;  %v2502_v55 = vld [vmem:[#allocation11 + $0x128] sm:$0xff] }
 0x405   :  { %v2308_v30 = vcombine.low %v7674_v27, %v2297_v18  ;;  %v6006_v47 = vpack.c.bf16 %v2098_v29, %v2097_v48  ;;  %v6010_v56 = vpack.c.bf16 %v2300_v51, %v2299_v50  ;;  %v6022_v58 = vpack.c.bf16 %v2306_v25, %v2305_v38  ;;  %v2799_v38 = vld [vmem:[%s8065_s9 + $0x8] sm:$0xff]  ;;  %v2800_v25 = vld [vmem:[%s8065_s9 + $0x10] sm:$0xff] }
 0x406   :  { %5543 = vmatmul.mubr.msk.f32.vlgmr.msra.gmra.mrb[54].mxu0 %vm918_vm11, %v2123_v10  ;;  %v7698_v31 = vsel %vm6980_vm9, %v2401_v20, %v2402_v43  ;;  %v6026_v1 = vpack.c.bf16 %v2406_v16, %v2405_v57  ;;  %v6030_v36 = vpack.c.bf16 %v2408_v33, %v2407_v13  ;;  %v6034_v17 = vpack.c.bf16 %v2410_v9, %v2409_v52  ;;  %v2802_v52 = vld [vmem:[%s8065_s9 + $0x20] sm:$0xff]  ;;  %v2803_v9 = vld [vmem:[%s8065_s9 + $0x28] sm:$0xff] }
 0x407   :  { %5997 = vmatpush3.bf16.msra.mxu0 %v7611_v34  ;;  %5561 = vmatprep.mubr.msk.f32.mxu0 %vm918_vm11, %v2203_v8  ;;  %v2414_v3 = vcombine.low %v7690_v40, %v7698_v31  ;;  %v6014_v34 = vpack.c.bf16 %v2302_v12, %v2301_v5  ;;  %v6038_v61 = vpack.c.bf16 %v2412_v54, %v2411_v23  ;;  %vm3735_vm4 = vcmask 1045504  }
 0x408   :  { %5999 = vmatprep.subr.bf16.mxu0 %v5998_v37  ;;  %v6042_v41 = vpack.c.bf16 %v2498_v26, %v2497_v15  ;;  %v6050_v63 = vpack.c.bf16 %v2502_v55, %v2501_v60  ;;  %v6054_v6 = vpack.c.bf16 %v2504_v24, %v2503_v19 }
 0x40b   :  { %6001 = vmatpush3.bf16.msra.mxu0 %v5998_v37  ;;  %v6018_v37 = vpack.c.bf16 %v2304_v22, %v2303_v45 }
 0x40c   :  { %6003 = vmatprep.subr.bf16.mxu0 %v6002_v39 }
 0x40f   :  { %6005 = vmatpush3.bf16.msra.mxu0 %v6002_v39 }
 0x410   :  { %6007 = vmatprep.subr.bf16.mxu0 %v6006_v47 }
 0x413   :  { %6009 = vmatpush3.bf16.msra.mxu0 %v6006_v47 }
 0x414   :  { %6011 = vmatprep.subr.bf16.mxu0 %v6010_v56 }
 0x416   :  { %5562 = vmatmul.mubr.msk.f32.vlgmr.msra.gmra.mrb[54].mxu0 %vm918_vm11, %v2204_v53  ;;  %v2499_v53 = vld [vmem:[#allocation11 + $0x110] sm:$0xff] }
 0x417   :  { %6013 = vmatpush3.bf16.msra.mxu0 %v6010_v56  ;;  %5580 = vmatprep.mubr.msk.f32.mxu0 %vm918_vm11, %v2307_v59  ;;  %v2500_v59 = vld [vmem:[#allocation11 + $0x118] sm:$0xff] }
 0x418   :  { %6015 = vmatprep.subr.bf16.mxu0 %v6014_v34  ;;  %v6046_v42 = vpack.c.bf16 %v2500_v59, %v2499_v53  ;;  %v2804_v53 = vld [vmem:[%s8065_s9 + $0x30] sm:$0xff]  ;;  %v2805_v59 = vld [vmem:[%s8065_s9 + $0x38] sm:$0xff] }
 0x41b   :  { %6017 = vmatpush3.bf16.msra.mxu0 %v6014_v34 }
 0x41c   :  { %6019 = vmatprep.subr.bf16.mxu0 %v6018_v37 }
 0x41f   :  { %6021 = vmatpush3.bf16.msra.mxu0 %v6018_v37  ;;  %v2798_v37 = vld [vmem:[%s8065_s9] sm:$0xff] }
 0x420   :  { %6023 = vmatprep.subr.bf16.mxu0 %v6022_v58  ;;  %v6058_v16 = vpack.c.bf16 %v2799_v38, %v2798_v37 }
 0x422   :  { %6059 = vmatprep.subr.bf16.mxu1 %v6058_v16 }
 0x423   :  { %6025 = vmatpush3.bf16.msra.mxu0 %v6022_v58  ;;  %6061 = vmatpush3.bf16.msra.mxu1 %v6058_v16 }
 0x424   :  { %6027 = vmatprep.subr.bf16.mxu0 %v6026_v1 }
 0x426   :  { %5581 = vmatmul.mubr.msk.f32.vlgmr.msra.gmra.mrb[54].mxu0 %vm918_vm11, %v2308_v30 }
 0x427   :  { %6029 = vmatpush3.bf16.msra.mxu0 %v6026_v1  ;;  %5599 = vmatprep.mubr.msk.f32.mxu0 %vm918_vm11, %v2413_v21  ;;  %v2801_v1 = vld [vmem:[%s8065_s9 + $0x18] sm:$0xff] }
 0x428   :  { %6031 = vmatprep.subr.bf16.mxu0 %v6030_v36 }
 0x42b   :  { %6033 = vmatpush3.bf16.msra.mxu0 %v6030_v36  ;;  %v6062_v36 = vpack.c.bf16 %v2801_v1, %v2800_v25 }
 0x42c   :  { %6035 = vmatprep.subr.bf16.mxu0 %v6034_v17 }
 0x42d   :  { %6063 = vmatprep.subr.bf16.mxu1 %v6062_v36 }
 0x42e   :  { %6065 = vmatpush3.bf16.msra.mxu1 %v6062_v36 }
 0x42f   :  { %6037 = vmatpush3.bf16.msra.mxu0 %v6034_v17 }
 0x430   :  { %6039 = vmatprep.subr.bf16.mxu0 %v6038_v61 }
 0x433   :  { %6041 = vmatpush3.bf16.msra.mxu0 %v6038_v61 }
 0x434   :  { %6043 = vmatprep.subr.bf16.mxu0 %v6042_v41 }
 0x436   :  { %5600 = vmatmul.mubr.msk.f32.vlgmr.msra.gmra.mrb[54].mxu0 %vm918_vm11, %v2414_v3 }
 0x437   :  { %6045 = vmatpush3.bf16.msra.mxu0 %v6042_v41  ;;  %5618 = vmatprep.mubr.msk.f32.mxu0 %vm918_vm11, %v2505_v2  ;;  %v6066_v41 = vpack.c.bf16 %v2803_v9, %v2802_v52 }
 0x438   :  { %6047 = vmatprep.subr.bf16.mxu0 %v6046_v42 }
 0x439   :  { %6067 = vmatprep.subr.bf16.mxu1 %v6066_v41 }
 0x43a   :  { %6069 = vmatpush3.bf16.msra.mxu1 %v6066_v41 }
 0x43b   :  { %6049 = vmatpush3.bf16.msra.mxu0 %v6046_v42 }
 0x43c   :  { %6051 = vmatprep.subr.bf16.mxu0 %v6050_v63 }
 0x43f   :  { %6053 = vmatpush3.bf16.msra.mxu0 %v6050_v63 }
 0x440   :  { %6055 = vmatprep.subr.bf16.mxu0 %v6054_v6 }
 0x443   :  { %6057 = vmatpush3.bf16.msra.mxu0 %v6054_v6  ;;  %v6070_v6 = vpack.c.bf16 %v2805_v59, %v2804_v53  ;;  %v4888_v53 = vld [vmem:[#allocation14] ss:$0 sm:$0xff] }
 0x444   :  { %6116 = vmatprep.subr.bf16.mxu0 %v6618_v49 }
 0x445   :  { %6071 = vmatprep.subr.bf16.mxu1 %v6070_v6 }
 0x446   :  { %5619 = vmatmul.mubr.msk.f32.vlgmr.msra.gmra.mrb[54].mxu0 %vm918_vm11, %v2506_v46  ;;  %6073 = vmatpush3.bf16.msra.mxu1 %v6070_v6 }
 0x447   :  { %5725 = vmatprep.mubr.msk.f32.mxu0 %vm6617_vm0, %v6616_v0  ;;  %6074 = vmatprep.subr.bf16.mxu1 %v6618_v49 }
 0x519   :  { %v5620_v14 = vpop.f32.mrb[54].mxu0 }
 0x51a   :  { %v2596_v27 = vadd.f32 %v5620_v14, %v4887_v32  ;;  %v2577_v44 = vpop.f32.mrb[55].mxu0  ;;  %v2807_v14 = vld [vmem:[%s8066_s10 + $0x8] sm:$0xff] }
 0x51b   :  { %v2595_v21 = vadd.f32 %v4887_v32, %v2577_v44  ;;  %v2806_v32 = vld [vmem:[%s8066_s10] sm:$0xff] }
 0x51c   :  { %v2598_v28 = vmax.f32 %v2596_v27, 0.0 }
 0x51d   :  { %v2597_v4 = vmax.f32 %v2595_v21, 0.0  ;;  %v7773_v21 = vpack.c.bf16 %v2807_v14, %v2806_v32 }
 0x51e   :  { %2629 = vst.msk [vmem:[#allocation2 + $0x40] sm:$0xff] %vm232_vm3, %v2598_v28  ;;  %2635 = vrot.lane.b32.xlu0 %v2598_v28, %s6619_s2  ;;  %2631 = vrot.lane.b32.xlu1 %v2598_v28, %s6620_s3 }
 0x51f   :  { %2599 = vst.msk [vmem:[#allocation2] sm:$0xff] %vm232_vm3, %v2597_v4  ;;  %6118 = vmatpush3.bf16.msra.mxu0 %v7773_v21 }
 0x520   :  { %6119 = vmatprep.subr.bf16.mxu0 %v6618_v49 }
 0x522   :  { %2643 = vrot.lane.b32.xlu0 %v2598_v28, %s6621_s25  ;;  %2639 = vrot.lane.b32.xlu1 %v2598_v28, %s6622_s22 }
 0x526   :  { %2647 = vrot.lane.b32.xlu1 %v2598_v28, %s6623_s23  ;;  %2601 = vrot.lane.b32.xlu0 %v2597_v4, %s6620_s3  ;;  %s6629_s3 = smov 40  }
 0x52a   :  { %2609 = vrot.lane.b32.xlu1 %v2597_v4, %s6622_s22  ;;  %2605 = vrot.lane.b32.xlu0 %v2597_v4, %s6619_s2 }
 0x52e   :  { %2613 = vrot.lane.b32.xlu1 %v2597_v4, %s6621_s25  ;;  %2617 = vrot.lane.b32.xlu0 %v2597_v4, %s6623_s23 }
 0x532   :  { %2621 = vrot.lane.b32.xlu1 %v2597_v4, %s6624_s24  ;;  %2625 = vrot.lane.b32.xlu0 %v2597_v4, %s6625_s12 }
 0x536   :  { %2655 = vrot.lane.b32.xlu1 %v2598_v28, %s6625_s12  ;;  %2651 = vrot.lane.b32.xlu0 %v2598_v28, %s6624_s24 }
 0x590   :  { %v2636_v62 = vpop.permute.xlu0 %2635  ;;  %v2632_v35 = vpop.permute.xlu1 %2631 }
 0x591   :  { %2638 = vst.msk [vmem:[#allocation2 + $0x50] sm:$0xff] %vm232_vm3, %v2636_v62  ;;  %2634 = vst.msk [vmem:[#allocation2 + $0x48] sm:$0xff] %vm232_vm3, %v2632_v35  ;;  %v2808_v62 = vld [vmem:[%s8066_s10 + $0x10] sm:$0xff]  ;;  %v2809_v35 = vld [vmem:[%s8066_s10 + $0x18] sm:$0xff]  ;;  %s6631_s10 = smov 56  }
 0x594   :  { %v2644_v43 = vpop.permute.xlu0 %2643  ;;  %v2640_v2 = vpop.permute.xlu1 %2639 }
 0x595   :  { %2646 = vst.msk [vmem:[#allocation2 + $0x60] sm:$0xff] %vm232_vm3, %v2644_v43  ;;  %2642 = vst.msk [vmem:[#allocation2 + $0x58] sm:$0xff] %vm232_vm3, %v2640_v2 }
 0x598   :  { %v2648_v46 = vpop.permute.xlu1 %2647  ;;  %v2602_v10 = vpop.permute.xlu0 %2601 }
 0x599   :  { %2650 = vst.msk [vmem:[#allocation2 + $0x68] sm:$0xff] %vm232_vm3, %v2648_v46  ;;  %2604 = vst.msk [vmem:[#allocation2 + $0x8] sm:$0xff] %vm232_vm3, %v2602_v10 }
 0x59c   :  { %v2610_v18 = vpop.permute.xlu1 %2609  ;;  %v2606_v40 = vpop.permute.xlu0 %2605  ;;  %v2671_v47 = vld [vmem:[#allocation2 + $0x41] ss:$8 sm:$0xf]  ;;  %v2679_v45 = vld [vmem:[#allocation2 + $0x42] ss:$8 sm:$0xf] }
 0x59d   :  { %2612 = vst.msk [vmem:[#allocation2 + $0x18] sm:$0xff] %vm232_vm3, %v2610_v18  ;;  %2608 = vst.msk [vmem:[#allocation2 + $0x10] sm:$0xff] %vm232_vm3, %v2606_v40  ;;  %v2687_v17 = vld [vmem:[#allocation2 + $0x43] ss:$8 sm:$0xf]  ;;  %v7782_v18 = vpack.c.bf16 %v2809_v35, %v2808_v62 }
 0x59e   :  { %v2695_v42 = vld [vmem:[#allocation2 + $0x44] ss:$8 sm:$0xf]  ;;  %v2703_v27 = vld [vmem:[#allocation2 + $0x45] ss:$8 sm:$0xf] }
 0x59f   :  { %v2711_v46 = vld [vmem:[#allocation2 + $0x46] ss:$8 sm:$0xf]  ;;  %6121 = vmatpush3.bf16.msra.mxu0 %v7782_v18 }
 0x5a0   :  { %v2614_v20 = vpop.permute.xlu1 %2613  ;;  %v2618_v8 = vpop.permute.xlu0 %2617  ;;  %6130 = vmatprep.subr.bf16.mxu0 %v6618_v49 }
 0x5a1   :  { %2616 = vst.msk [vmem:[#allocation2 + $0x20] sm:$0xff] %vm232_vm3, %v2614_v20  ;;  %2620 = vst.msk [vmem:[#allocation2 + $0x28] sm:$0xff] %vm232_vm3, %v2618_v8 }
 0x5a4   :  { %v2622_v11 = vpop.permute.xlu1 %2621  ;;  %v2626_v7 = vpop.permute.xlu0 %2625  ;;  %v2667_v3 = vld [vmem:[#allocation2 + $0x1] ss:$8 sm:$0xf]  ;;  %v2675_v51 = vld [vmem:[#allocation2 + $0x2] ss:$8 sm:$0xf] }
 0x5a5   :  { %2624 = vst.msk [vmem:[#allocation2 + $0x30] sm:$0xff] %vm232_vm3, %v2622_v11  ;;  %2628 = vst.msk [vmem:[#allocation2 + $0x38] sm:$0xff] %vm232_vm3, %v2626_v7  ;;  %v2683_v22 = vld [vmem:[#allocation2 + $0x3] ss:$8 sm:$0xf] }
 0x5a6   :  { %v2691_v23 = vld [vmem:[#allocation2 + $0x4] ss:$8 sm:$0xf]  ;;  %v2699_v60 = vld [vmem:[#allocation2 + $0x5] ss:$8 sm:$0xf] }
 0x5a7   :  { %v2707_v44 = vld [vmem:[#allocation2 + $0x6] ss:$8 sm:$0xf]  ;;  %v2715_v10 = vld [vmem:[#allocation2 + $0x7] ss:$8 sm:$0xf] }
 0x5a8   :  { %v2656_v30 = vpop.permute.xlu1 %2655  ;;  %v2652_v31 = vpop.permute.xlu0 %2651  ;;  %v2719_v11 = vld [vmem:[#allocation2 + $0x47] ss:$8 sm:$0xf] }
 0x5a9   :  { %2658 = vst.msk [vmem:[#allocation2 + $0x78] sm:$0xff] %vm232_vm3, %v2656_v30  ;;  %2654 = vst.msk [vmem:[#allocation2 + $0x70] sm:$0xff] %vm232_vm3, %v2652_v31 }
 0x5ac   :  { %v2668_v39 = vld [vmem:[#allocation2 + $0x1] ss:$8 sm:$0xf0]  ;;  %v2676_v29 = vld [vmem:[#allocation2 + $0x2] ss:$8 sm:$0xf0] }
 0x5ad   :  { %v2669_v48 = vor.u32 %v2668_v39, %v2667_v3  ;;  %v2677_v5 = vor.u32 %v2676_v29, %v2675_v51  ;;  %v2684_v34 = vld [vmem:[#allocation2 + $0x3] ss:$8 sm:$0xf0]  ;;  %v2692_v33 = vld [vmem:[#allocation2 + $0x4] ss:$8 sm:$0xf0] }
 0x5ae   :  { %v2685_v57 = vor.u32 %v2684_v34, %v2683_v22  ;;  %v2693_v61 = vor.u32 %v2692_v33, %v2691_v23  ;;  %v2700_v26 = vld [vmem:[#allocation2 + $0x5] ss:$8 sm:$0xf0]  ;;  %v2708_v24 = vld [vmem:[#allocation2 + $0x6] ss:$8 sm:$0xf0] }
 0x5af   :  { %2724 = vrot.lane.b32.xlu0 %v2669_v48, %s6611_s0  ;;  %v2701_v63 = vor.u32 %v2700_v26, %v2699_v60  ;;  %v2709_v4 = vor.u32 %v2708_v24, %v2707_v44  ;;  %v2716_v2 = vld [vmem:[#allocation2 + $0x7] ss:$8 sm:$0xf0]  ;;  %v2659_v51 = vld [vmem:[#allocation2] ss:$8 sm:$0xf] }
 0x5b0   :  { %v2672_v50 = vld [vmem:[#allocation2 + $0x41] ss:$8 sm:$0xf0]  ;;  %v2680_v12 = vld [vmem:[#allocation2 + $0x42] ss:$8 sm:$0xf0]  ;;  %v2717_v20 = vor.u32 %v2716_v2, %v2715_v10 }
 0x5b1   :  { %v2673_v56 = vor.u32 %v2672_v50, %v2671_v47  ;;  %v2681_v58 = vor.u32 %v2680_v12, %v2679_v45  ;;  %v2688_v13 = vld [vmem:[#allocation2 + $0x43] ss:$8 sm:$0xf0]  ;;  %v2696_v15 = vld [vmem:[#allocation2 + $0x44] ss:$8 sm:$0xf0] }
 0x5b2   :  { %v2689_v54 = vor.u32 %v2688_v13, %v2687_v17  ;;  %v2697_v55 = vor.u32 %v2696_v15, %v2695_v42  ;;  %v2704_v19 = vld [vmem:[#allocation2 + $0x45] ss:$8 sm:$0xf0]  ;;  %v2712_v43 = vld [vmem:[#allocation2 + $0x46] ss:$8 sm:$0xf0] }
 0x5b3   :  { %2726 = vrot.lane.b32.xlu1 %v2673_v56, %s6611_s0  ;;  %2732 = vrot.lane.b32.xlu0 %v2677_v5, %s6626_s7  ;;  %v2705_v28 = vor.u32 %v2704_v19, %v2703_v27  ;;  %v2713_v40 = vor.u32 %v2712_v43, %v2711_v46  ;;  %v2720_v8 = vld [vmem:[#allocation2 + $0x47] ss:$8 sm:$0xf0]  ;;  %v2660_v50 = vld [vmem:[#allocation2] ss:$8 sm:$0xf0] }
 0x5b4   :  { %v2721_v7 = vor.u32 %v2720_v8, %v2719_v11  ;;  %v2661_v12 = vor.u32 %v2660_v50, %v2659_v51  ;;  %v2664_v34 = vld [vmem:[#allocation2 + $0x40] ss:$8 sm:$0xf0] }
 0x5b5   :  { %v2663_v22 = vld [vmem:[#allocation2 + $0x40] ss:$8 sm:$0xf] }
 0x5b7   :  { %2734 = vrot.lane.b32.xlu1 %v2681_v58, %s6626_s7  ;;  %2740 = vrot.lane.b32.xlu0 %v2685_v57, %s6627_s28  ;;  %v2665_v58 = vor.u32 %v2664_v34, %v2663_v22 }
 0x5bb   :  { %2742 = vrot.lane.b32.xlu1 %v2689_v54, %s6627_s28  ;;  %2748 = vrot.lane.b32.xlu0 %v2693_v61, %s6628_s18 }
 0x5bf   :  { %2750 = vrot.lane.b32.xlu1 %v2697_v55, %s6628_s18  ;;  %2756 = vrot.lane.b32.xlu0 %v2701_v63, %s6629_s3 }
 0x5c3   :  { %2758 = vrot.lane.b32.xlu1 %v2705_v28, %s6629_s3  ;;  %2764 = vrot.lane.b32.xlu0 %v2709_v4, %s6630_s1 }
 0x5c7   :  { %2766 = vrot.lane.b32.xlu1 %v2713_v40, %s6630_s1  ;;  %2772 = vrot.lane.b32.xlu0 %v2717_v20, %s6631_s10 }
 0x5cb   :  { %2774 = vrot.lane.b32.xlu1 %v2721_v7, %s6631_s10 }
 0x621   :  { %v2725_v30 = vpop.permute.xlu0 %2724 }
 0x622   :  { %v2778_v45 = vsel %vm232_vm3, %v2661_v12, %v2725_v30 }
 0x625   :  { %v2727_v31 = vpop.permute.xlu1 %2726  ;;  %v2733_v3 = vpop.permute.xlu0 %2732 }
 0x626   :  { %v2781_v37 = vsel %vm2780_vm12, %v2778_v45, %v2733_v3  ;;  %v2779_v1 = vsel %vm232_vm3, %v2665_v58, %v2727_v31  ;;  %vm3733_vm3 = vcmask 1043456  }
 0x629   :  { %v2735_v39 = vpop.permute.xlu1 %2734  ;;  %v2741_v48 = vpop.permute.xlu0 %2740 }
 0x62a   :  { %v2784_v57 = vsel %vm2783_vm13, %v2781_v37, %v2741_v48  ;;  %v2782_v33 = vsel %vm2780_vm12, %v2779_v1, %v2735_v39 }
 0x62d   :  { %v2743_v29 = vpop.permute.xlu1 %2742  ;;  %v2749_v47 = vpop.permute.xlu0 %2748 }
 0x62e   :  { %v2787_v16 = vsel %vm2786_vm14, %v2784_v57, %v2749_v47  ;;  %v2785_v17 = vsel %vm2783_vm13, %v2782_v33, %v2743_v29 }
 0x631   :  { %v2751_v56 = vpop.permute.xlu1 %2750  ;;  %v2757_v5 = vpop.permute.xlu0 %2756 }
 0x632   :  { %v2790_v13 = vsel %vm2789_vm15, %v2787_v16, %v2757_v5  ;;  %v2788_v54 = vsel %vm2786_vm14, %v2785_v17, %v2751_v56 }
 0x635   :  { %v2759_v38 = vpop.permute.xlu1 %2758  ;;  %v2765_v25 = vpop.permute.xlu0 %2764 }
 0x636   :  { %v2793_v36 = vsel %vm2792_vm1, %v2790_v13, %v2765_v25  ;;  %v2791_v61 = vsel %vm2789_vm15, %v2788_v54, %v2759_v38 }
 0x639   :  { %v2767_v52 = vpop.permute.xlu1 %2766  ;;  %v2773_v9 = vpop.permute.xlu0 %2772 }
 0x63a   :  { %v2796_v23 = vsel %vm2795_vm2, %v2793_v36, %v2773_v9  ;;  %v2794_v15 = vsel %vm2792_vm1, %v2791_v61, %v2767_v52 }
 0x63b   :  { %5637 = vmatprep.mubr.msk.f32.mxu1 %vm918_vm11, %v2796_v23 }
 0x63d   :  { %v2775_v26 = vpop.permute.xlu1 %2774 }
 0x63e   :  { %v2797_v41 = vsel %vm2795_vm2, %v2794_v15, %v2775_v26 }
 0x63f   :  { %5638 = vmatmul.mubr.msk.f32.vlgmr.msra.gmra.mrb[30].mxu1 %vm918_vm11, %v2797_v41 }
 0x640   :  { %6076 = vmatpush3.bf16.msra.mxu1 %v7773_v21  ;;  %5648 = vmatprep.mubr.msk.f32.mxu1 %vm6617_vm0, %v6616_v0 }
 0x641   :  { %6077 = vmatprep.subr.bf16.mxu1 %v6618_v49 }
 0x644   :  { %6079 = vmatpush3.bf16.msra.mxu1 %v7782_v18 }
 0x645   :  { %6080 = vmatprep.subr.bf16.mxu1 %v6618_v49 }
 0x647   :  { %5649 = vmatmul.mubr.f32.vlgmr.msra.gmra.mrb[32].mxu1 %v6616_v0 }
 0x648   :  { %6082 = vmatpush3.bf16.msra.mxu1 %v7773_v21  ;;  %5659 = vmatprep.mubr.msk.f32.mxu1 %vm6617_vm0, %v6616_v0 }
 0x649   :  { %6083 = vmatprep.subr.bf16.mxu1 %v6618_v49 }
 0x64c   :  { %6085 = vmatpush3.bf16.msra.mxu1 %v7782_v18 }
 0x64d   :  { %6086 = vmatprep.subr.bf16.mxu1 %v6618_v49 }
 0x712   :  { %v5639_v59 = vpop.f32.mrb[30].mxu1 }
 0x713   :  { %v7813_v42 = vadd.f32 %v5639_v59, %v4888_v53  ;;  %v2889_v60 = vpop.f32.mrb[31].mxu1 }
 0x714   :  { %v7815_v55 = vadd.f32 %v4888_v53, %v2889_v60 }
 0x71a   :  { %v2967_v63 = vpop.f32.mrb[32].mxu1 }
 0x71b   :  { %v2971_v19 = vadd.f32 %v2967_v63, %v7815_v55  ;;  %v5650_v24 = vpop.f32.mrb[33].mxu1 }
 0x71d   :  { %6245 = vtanh.f32 %v2971_v19  ;;  %v2972_v32 = vsub.f32 0.0, %v2971_v19 }
 0x71f   :  { %v2973_v14 = vmul.f32 1.442695, %v2972_v32 }
 0x721   :  { %6247 = vpow2.f32 %v2973_v14 }
 0x727   :  { %v6246_v6 = vpop.eup %6245 }
 0x728   :  { %2980 = vrot.lane.b32.xlu0 %v6246_v6, %s6628_s18 }
 0x72b   :  { %v6248_v27 = vpop.eup %6247 }
 0x72c   :  { %v2975_v44 = vadd.f32 1.0, %v6248_v27 }
 0x72e   :  { %6249 = vrcp.f32 %v2975_v44 }
 0x738   :  { %v6250_v28 = vpop.eup %6249 }
 0x739   :  { %v2978_v35 = vmul.f32 0.0, %v6250_v28 }
 0x79a   :  { %v2981_v4 = vpop.permute.xlu0 %2980 }
 0x79b   :  { %v2983_v62 = vmul.f32 %v6250_v28, %v2981_v4 }
 0x79d   :  { %2985 = vrot.lane.b32.xlu1 %v2983_v62, %s6628_s18 }
 0x80f   :  { %v2986_v43 = vpop.permute.xlu1 %2985 }
 0x810   :  { %v2988_v2 = vadd.f32 %v2986_v43, %v2978_v35 }
 0x812   :  { %6251 = vtanh.f32 %v2988_v2  ;;  %v3081_v56 = vrot.slane %v2988_v2, 6 }
 0x81c   :  { %v6252_v46 = vpop.eup %6251 }
 0x81d   :  { %2991 = vrot.lane.b32.xlu0 %v6252_v46, %s6628_s18 }
 0x88f   :  { %v2992_v10 = vpop.permute.xlu0 %2991 }
 0x890   :  { %v7821_v40 = vmul.f32 %v6250_v28, %v2992_v10 }
 0x892   :  { %2996 = vrot.lane.b32.xlu1 %v7821_v40, %s6632_s26 }
 0x904   :  { %v2997_v20 = vpop.permute.xlu1 %2996 }
 0x905   :  { %5660 = vmatmul.mubr.msk.f32.vlgmr.msra.gmra.mrb[34].mxu1 %vm2786_vm14, %v2997_v20 }
 0x906   :  { %6088 = vmatpush3.bf16.msra.mxu1 %v7773_v21  ;;  %5670 = vmatprep.mubr.msk.f32.mxu1 %vm6617_vm0, %v6616_v0 }
 0x907   :  { %6089 = vmatprep.subr.bf16.mxu1 %v6618_v49 }
 0x90a   :  { %6091 = vmatpush3.bf16.msra.mxu1 %v7782_v18 }
 0x90b   :  { %6092 = vmatprep.subr.bf16.mxu1 %v6618_v49 }
 0x9d8   :  { %v3066_v8 = vpop.f32.mrb[34].mxu1 }
 0x9d9   :  { %v3071_v11 = vrot.slane %v3066_v8, 6  ;;  %v5661_v7 = vpop.f32.mrb[35].mxu1 }
 0x9db   :  { %v3073_v30 = vadd.f32 %v3071_v11, %v7815_v55 }
 0x9dd   :  { %6253 = vtanh.f32 %v3073_v30  ;;  %v3074_v3 = vsub.f32 0.0, %v3073_v30 }
 0x9df   :  { %v3075_v39 = vmul.f32 1.442695, %v3074_v3 }
 0x9e1   :  { %6255 = vpow2.f32 %v3075_v39 }
 0x9e7   :  { %v6254_v31 = vpop.eup %6253 }
 0x9e8   :  { %3085 = vrot.lane.b32.xlu0 %v6254_v31, %s6628_s18 }
 0x9eb   :  { %v6256_v48 = vpop.eup %6255 }
 0x9ec   :  { %v3077_v29 = vadd.f32 1.0, %v6256_v48 }
 0x9ee   :  { %6257 = vrcp.f32 %v3077_v29 }
 0x9f8   :  { %v6258_v47 = vpop.eup %6257 }
 0x9f9   :  { %v3083_v5 = vmul.f32 %v6258_v47, %v3081_v56 }
 0xa5a   :  { %v3086_v50 = vpop.permute.xlu0 %3085 }
 0xa5b   :  { %v3088_v51 = vmul.f32 %v6258_v47, %v3086_v50 }
 0xa5d   :  { %3090 = vrot.lane.b32.xlu1 %v3088_v51, %s6628_s18 }
 0xacf   :  { %v3091_v12 = vpop.permute.xlu1 %3090 }
 0xad0   :  { %v3093_v34 = vadd.f32 %v3091_v12, %v3083_v5 }
 0xad2   :  { %6259 = vtanh.f32 %v3093_v34  ;;  %v3187_v61 = vrot.slane %v3093_v34, 6 }
 0xadc   :  { %v6260_v45 = vpop.eup %6259 }
 0xadd   :  { %3096 = vrot.lane.b32.xlu0 %v6260_v45, %s6628_s18 }
 0xb4f   :  { %v3097_v22 = vpop.permute.xlu0 %3096 }
 0xb50   :  { %v3099_v37 = vmul.f32 %v6258_v47, %v3097_v22 }
 0xb52   :  { %v3101_v38 = vrot.slane %v3099_v37, 2  ;;  %v3732_v63 = vsel %vm438_vm5, %v7821_v40, %v3099_v37 }
 0xb54   :  { %3102 = vrot.lane.b32.xlu1 %v3101_v38, %s6632_s26 }
 0xbc6   :  { %v3103_v25 = vpop.permute.xlu1 %3102 }
 0xbc7   :  { %5671 = vmatmul.mubr.msk.f32.vlgmr.msra.gmra.mrb[36].mxu1 %vm2786_vm14, %v3103_v25 }
 0xbc8   :  { %6094 = vmatpush3.bf16.msra.mxu1 %v7773_v21  ;;  %5681 = vmatprep.mubr.msk.f32.mxu1 %vm6617_vm0, %v6616_v0 }
 0xbc9   :  { %6095 = vmatprep.subr.bf16.mxu1 %v6618_v49 }
 0xbcc   :  { %6097 = vmatpush3.bf16.msra.mxu1 %v7782_v18 }
 0xbcd   :  { %6098 = vmatprep.subr.bf16.mxu1 %v6618_v49 }
 0xc9a   :  { %v3172_v58 = vpop.f32.mrb[36].mxu1 }
 0xc9b   :  { %v3177_v57 = vrot.slane %v3172_v58, 4  ;;  %v5672_v16 = vpop.f32.mrb[37].mxu1 }
 0xc9d   :  { %v3179_v1 = vadd.f32 %v3177_v57, %v7815_v55 }
 0xc9f   :  { %6261 = vtanh.f32 %v3179_v1  ;;  %v3180_v33 = vsub.f32 0.0, %v3179_v1 }
 0xca1   :  { %v3181_v36 = vmul.f32 1.442695, %v3180_v33 }
 0xca3   :  { %6263 = vpow2.f32 %v3181_v36 }
 0xca9   :  { %v6262_v13 = vpop.eup %6261 }
 0xcaa   :  { %3191 = vrot.lane.b32.xlu0 %v6262_v13, %s6628_s18 }
 0xcad   :  { %v6264_v52 = vpop.eup %6263 }
 0xcae   :  { %v3183_v9 = vadd.f32 1.0, %v6264_v52 }
 0xcb0   :  { %6265 = vrcp.f32 %v3183_v9 }
 0xcba   :  { %v6266_v17 = vpop.eup %6265 }
 0xcbb   :  { %v3189_v15 = vmul.f32 %v6266_v17, %v3187_v61 }
 0xd1c   :  { %v3192_v23 = vpop.permute.xlu0 %3191 }
 0xd1d   :  { %v3194_v54 = vmul.f32 %v6266_v17, %v3192_v23 }
 0xd1f   :  { %3196 = vrot.lane.b32.xlu1 %v3194_v54, %s6628_s18 }
 0xd91   :  { %v3197_v26 = vpop.permute.xlu1 %3196 }
 0xd92   :  { %v3199_v41 = vadd.f32 %v3197_v26, %v3189_v15 }
 0xd94   :  { %6267 = vtanh.f32 %v3199_v41  ;;  %v3293_v40 = vrot.slane %v3199_v41, 6 }
 0xd9e   :  { %v6268_v53 = vpop.eup %6267 }
 0xd9f   :  { %3202 = vrot.lane.b32.xlu0 %v6268_v53, %s6628_s18 }
 0xe11   :  { %v3203_v59 = vpop.permute.xlu0 %3202 }
 0xe12   :  { %v3205_v60 = vmul.f32 %v6266_v17, %v3203_v59 }
 0xe14   :  { %v3207_v19 = vrot.slane %v3205_v60, 4  ;;  %v3734_v24 = vsel %vm3733_vm3, %v3732_v63, %v3205_v60 }
 0xe16   :  { %3208 = vrot.lane.b32.xlu1 %v3207_v19, %s6632_s26 }
 0xe88   :  { %v3209_v6 = vpop.permute.xlu1 %3208 }
 0xe89   :  { %5682 = vmatmul.mubr.msk.f32.vlgmr.msra.gmra.mrb[38].mxu1 %vm2786_vm14, %v3209_v6 }
 0xe8a   :  { %6100 = vmatpush3.bf16.msra.mxu1 %v7773_v21  ;;  %5692 = vmatprep.mubr.msk.f32.mxu1 %vm6617_vm0, %v6616_v0 }
 0xe8b   :  { %6101 = vmatprep.subr.bf16.mxu1 %v6618_v49 }
 0xe8e   :  { %6103 = vmatpush3.bf16.msra.mxu1 %v7782_v18 }
 0xe8f   :  { %6104 = vmatprep.subr.bf16.mxu1 %v6618_v49 }
 0xf5c   :  { %v3278_v32 = vpop.f32.mrb[38].mxu1 }
 0xf5d   :  { %v3283_v14 = vrot.slane %v3278_v32, 2  ;;  %v5683_v27 = vpop.f32.mrb[39].mxu1 }
 0xf5f   :  { %v3285_v44 = vadd.f32 %v3283_v14, %v7815_v55 }
 0xf61   :  { %6269 = vtanh.f32 %v3285_v44  ;;  %v3286_v4 = vsub.f32 0.0, %v3285_v44 }
 0xf63   :  { %v3287_v62 = vmul.f32 1.442695, %v3286_v4 }
 0xf65   :  { %6271 = vpow2.f32 %v3287_v62 }
 0xf6b   :  { %v6270_v28 = vpop.eup %6269 }
 0xf6c   :  { %3297 = vrot.lane.b32.xlu0 %v6270_v28, %s6628_s18 }
 0xf6f   :  { %v6272_v35 = vpop.eup %6271 }
 0xf70   :  { %v3289_v43 = vadd.f32 1.0, %v6272_v35 }
 0xf72   :  { %6273 = vrcp.f32 %v3289_v43 }
 0xf7c   :  { %v6274_v2 = vpop.eup %6273 }
 0xf7d   :  { %v3295_v20 = vmul.f32 %v6274_v2, %v3293_v40 }
 0xfde   :  { %v3298_v46 = vpop.permute.xlu0 %3297 }
 0xfdf   :  { %v3300_v10 = vmul.f32 %v6274_v2, %v3298_v46 }
 0xfe1   :  { %3302 = vrot.lane.b32.xlu1 %v3300_v10, %s6628_s18 }
0x1053   :  { %v3303_v8 = vpop.permute.xlu1 %3302 }
0x1054   :  { %v3305_v11 = vadd.f32 %v3303_v8, %v3295_v20 }
0x1056   :  { %6275 = vtanh.f32 %v3305_v11  ;;  %v3396_v37 = vrot.slane %v3305_v11, 6 }
0x1060   :  { %v6276_v55 = vpop.eup %6275 }
0x1061   :  { %3308 = vrot.lane.b32.xlu0 %v6276_v55, %s6628_s18 }
0x10d3   :  { %v3309_v7 = vpop.permute.xlu0 %3308 }
0x10d4   :  { %v3311_v30 = vmul.f32 %v6274_v2, %v3309_v7 }
0x10d6   :  { %v3313_v31 = vrot.slane %v3311_v30, 6  ;;  %v7864_v3 = vsel %vm3735_vm4, %v3734_v24, %v3311_v30 }
0x10d8   :  { %3314 = vrot.lane.b32.xlu1 %v3313_v31, %s6632_s26 }
0x114a   :  { %v3315_v39 = vpop.permute.xlu1 %3314 }
0x114b   :  { %5693 = vmatmul.mubr.msk.f32.vlgmr.msra.gmra.mrb[40].mxu1 %vm2786_vm14, %v3315_v39 }
0x114c   :  { %6106 = vmatpush3.bf16.msra.mxu1 %v7773_v21  ;;  %5703 = vmatprep.mubr.msk.f32.mxu1 %vm6617_vm0, %v6616_v0 }
0x114d   :  { %6107 = vmatprep.subr.bf16.mxu1 %v6618_v49 }
0x1150   :  { %6109 = vmatpush3.bf16.msra.mxu1 %v7782_v18 }
0x1151   :  { %6110 = vmatprep.subr.bf16.mxu1 %v6618_v49 }
0x121e   :  { %v3384_v48 = vpop.f32.mrb[40].mxu1 }
0x121f   :  { %v3388_v29 = vadd.f32 %v3384_v48, %v7813_v42  ;;  %v5694_v47 = vpop.f32.mrb[41].mxu1 }
0x1221   :  { %6277 = vtanh.f32 %v3388_v29  ;;  %v3389_v51 = vsub.f32 0.0, %v3388_v29 }
0x1223   :  { %v3390_v56 = vmul.f32 1.442695, %v3389_v51 }
0x1225   :  { %6279 = vpow2.f32 %v3390_v56 }
0x122b   :  { %v6278_v50 = vpop.eup %6277 }
0x122c   :  { %3400 = vrot.lane.b32.xlu0 %v6278_v50, %s6628_s18 }
0x122f   :  { %v6280_v5 = vpop.eup %6279 }
0x1230   :  { %v3392_v12 = vadd.f32 1.0, %v6280_v5 }
0x1232   :  { %6281 = vrcp.f32 %v3392_v12 }
0x123c   :  { %v6282_v34 = vpop.eup %6281 }
0x123d   :  { %v3398_v38 = vmul.f32 %v6282_v34, %v3396_v37 }
0x129e   :  { %v3401_v45 = vpop.permute.xlu0 %3400 }
0x129f   :  { %v3403_v22 = vmul.f32 %v6282_v34, %v3401_v45 }
0x12a1   :  { %3405 = vrot.lane.b32.xlu1 %v3403_v22, %s6628_s18 }
0x1313   :  { %v3406_v25 = vpop.permute.xlu1 %3405 }
0x1314   :  { %v3408_v58 = vadd.f32 %v3406_v25, %v3398_v38 }
0x1316   :  { %6283 = vtanh.f32 %v3408_v58 }
0x1320   :  { %v6284_v57 = vpop.eup %6283 }
0x1321   :  { %3411 = vrot.lane.b32.xlu0 %v6284_v57, %s6628_s18 }
0x1393   :  { %v3412_v16 = vpop.permute.xlu0 %3411 }
0x1394   :  { %v7878_v1 = vmul.f32 %v6282_v34, %v3412_v16 }
0x1396   :  { %3416 = vrot.lane.b32.xlu1 %v7878_v1, %s6632_s26 }
0x1408   :  { %v3417_v13 = vpop.permute.xlu1 %3416 }
0x1409   :  { %5704 = vmatmul.mubr.msk.f32.vlgmr.msra.gmra.mrb[42].mxu1 %vm2786_vm14, %v3417_v13 }
0x140a   :  { %6112 = vmatpush3.bf16.msra.mxu1 %v7773_v21  ;;  %5714 = vmatprep.mubr.msk.f32.mxu1 %vm6617_vm0, %v6616_v0 }
0x140b   :  { %6113 = vmatprep.subr.bf16.mxu1 %v6618_v49 }
0x140e   :  { %6115 = vmatpush3.bf16.msra.mxu1 %v7782_v18  ;;  %v3501_v18 = vrot.slane %v3408_v58, 6 }
0x14dc   :  { %v3486_v33 = vpop.f32.mrb[42].mxu1 }
0x14dd   :  { %v3491_v36 = vrot.slane %v3486_v33, 6  ;;  %v5705_v52 = vpop.f32.mrb[43].mxu1  ;;  %v3740_v33 = vld [vmem:[#allocation15] sm:$0xff] }
0x14de   :  { %v3744_v52 = vld [vmem:[#allocation17] sm:$0xff] }
0x14df   :  { %v3493_v9 = vadd.f32 %v3491_v36, %v7813_v42  ;;  %v3741_v36 = vld [vmem:[#allocation15 + $0x8] sm:$0xff] }
0x14e1   :  { %6285 = vtanh.f32 %v3493_v9  ;;  %v3494_v23 = vsub.f32 0.0, %v3493_v9  ;;  %v6122_v9 = vpack.c.bf16 %v3741_v36, %v3740_v33 }
0x14e3   :  { %v3495_v54 = vmul.f32 1.442695, %v3494_v23  ;;  %v3742_v23 = vld [vmem:[#allocation15 + $0x10] sm:$0xff]  ;;  %6123 = vmatprep.subr.bf16.mxu1 %v6122_v9 }
0x14e5   :  { %6287 = vpow2.f32 %v3495_v54  ;;  %v3743_v54 = vld [vmem:[#allocation15 + $0x18] sm:$0xff] }
0x14eb   :  { %v6286_v17 = vpop.eup %6285 }
0x14ec   :  { %3505 = vrot.lane.b32.xlu0 %v6286_v17, %s6628_s18  ;;  %v3745_v17 = vld [vmem:[#allocation17 + $0x8] sm:$0xff] }
0x14ef   :  { %v6288_v21 = vpop.eup %6287 }
0x14f0   :  { %v3497_v61 = vadd.f32 1.0, %v6288_v21  ;;  %v7911_v21 = vpack.c.bf16 %v3745_v17, %v3744_v52 }
0x14f2   :  { %6289 = vrcp.f32 %v3497_v61  ;;  %v6126_v61 = vpack.c.bf16 %v3743_v54, %v3742_v23 }
0x14fc   :  { %v6290_v15 = vpop.eup %6289 }
0x14fd   :  { %v3503_v53 = vmul.f32 %v6290_v15, %v3501_v18 }
0x155e   :  { %v3506_v26 = vpop.permute.xlu0 %3505 }
0x155f   :  { %v3508_v41 = vmul.f32 %v6290_v15, %v3506_v26 }
0x1561   :  { %3510 = vrot.lane.b32.xlu1 %v3508_v41, %s6628_s18 }
0x15d3   :  { %v3511_v59 = vpop.permute.xlu1 %3510 }
0x15d4   :  { %v3513_v60 = vadd.f32 %v3511_v59, %v3503_v53 }
0x15d6   :  { %6291 = vtanh.f32 %v3513_v60  ;;  %v3607_v20 = vrot.slane %v3513_v60, 6 }
0x15e0   :  { %v6292_v63 = vpop.eup %6291 }
0x15e1   :  { %3516 = vrot.lane.b32.xlu0 %v6292_v63, %s6628_s18 }
0x1653   :  { %v3517_v19 = vpop.permute.xlu0 %3516 }
0x1654   :  { %v3519_v24 = vmul.f32 %v6290_v15, %v3517_v19  ;;  %v3746_v15 = vld [vmem:[#allocation17 + $0x10] sm:$0xff] }
0x1656   :  { %v3521_v6 = vrot.slane %v3519_v24, 2  ;;  %v3737_v39 = vsel %vm438_vm5, %v7878_v1, %v3519_v24  ;;  %v4898_v24 = vld [vmem:[%s8070_s14] ss:$0 sm:$0xff] }
0x1658   :  { %3522 = vrot.lane.b32.xlu1 %v3521_v6, %s6632_s26 }
0x16ca   :  { %v3523_v32 = vpop.permute.xlu1 %3522 }
0x16cb   :  { %5715 = vmatmul.mubr.msk.f32.vlgmr.msra.gmra.mrb[44].mxu1 %vm2786_vm14, %v3523_v32 }
0x16cc   :  { %6125 = vmatpush3.bf16.msra.mxu1 %v6122_v9 }
0x16cd   :  { %6127 = vmatprep.subr.bf16.mxu1 %v6126_v61 }
0x16d0   :  { %6129 = vmatpush3.bf16.msra.mxu1 %v6126_v61 }
0x16d1   :  { %6136 = vmatprep.subr.bf16.mxu1 %v6618_v49 }
0x179e   :  { %v3592_v14 = vpop.f32.mrb[44].mxu1 }
0x179f   :  { %v3597_v27 = vrot.slane %v3592_v14, 4  ;;  %v5716_v44 = vpop.f32.mrb[45].mxu1 }
0x17a1   :  { %v3599_v28 = vadd.f32 %v3597_v27, %v7813_v42 }
0x17a3   :  { %6293 = vtanh.f32 %v3599_v28  ;;  %v3600_v62 = vsub.f32 0.0, %v3599_v28 }
0x17a5   :  { %v3601_v35 = vmul.f32 1.442695, %v3600_v62 }
0x17a7   :  { %6295 = vpow2.f32 %v3601_v35 }
0x17ad   :  { %v6294_v4 = vpop.eup %6293 }
0x17ae   :  { %3611 = vrot.lane.b32.xlu0 %v6294_v4, %s6628_s18 }
0x17b1   :  { %v6296_v43 = vpop.eup %6295 }
0x17b2   :  { %v3603_v2 = vadd.f32 1.0, %v6296_v43 }
0x17b4   :  { %6297 = vrcp.f32 %v3603_v2 }
0x17be   :  { %v6298_v46 = vpop.eup %6297 }
0x17bf   :  { %v3609_v8 = vmul.f32 %v6298_v46, %v3607_v20 }
0x1820   :  { %v3612_v10 = vpop.permute.xlu0 %3611 }
0x1821   :  { %v3614_v40 = vmul.f32 %v6298_v46, %v3612_v10 }
0x1823   :  { %3616 = vrot.lane.b32.xlu1 %v3614_v40, %s6628_s18 }
0x1895   :  { %v3617_v11 = vpop.permute.xlu1 %3616 }
0x1896   :  { %v3619_v55 = vadd.f32 %v3617_v11, %v3609_v8 }
0x1898   :  { %6299 = vtanh.f32 %v3619_v55  ;;  %v3713_v57 = vrot.slane %v3619_v55, 6 }
0x18a2   :  { %v6300_v7 = vpop.eup %6299 }
0x18a3   :  { %3622 = vrot.lane.b32.xlu0 %v6300_v7, %s6628_s18 }
0x1915   :  { %v3623_v30 = vpop.permute.xlu0 %3622 }
0x1916   :  { %v3625_v31 = vmul.f32 %v6298_v46, %v3623_v30 }
0x1918   :  { %v3627_v48 = vrot.slane %v3625_v31, 4  ;;  %v3738_v29 = vsel %vm3733_vm3, %v3737_v39, %v3625_v31 }
0x191a   :  { %3628 = vrot.lane.b32.xlu1 %v3627_v48, %s6632_s26 }
0x198c   :  { %v3629_v47 = vpop.permute.xlu1 %3628 }
0x198d   :  { %5726 = vmatmul.mubr.msk.f32.vlgmr.msra.gmra.mrb[56].mxu0 %vm2786_vm14, %v3629_v47 }
0x198e   :  { %5747 = vmatprep.mubr.msk.f32.mxu0 %vm6617_vm0, %v6616_v0  ;;  %6132 = vmatpush3.bf16.msra.mxu0 %v7911_v21 }
0x198f   :  { %6133 = vmatprep.subr.bf16.mxu0 %v6618_v49 }
0x1a60   :  { %v3698_v50 = vpop.f32.mrb[56].mxu0 }
0x1a61   :  { %v3703_v51 = vrot.slane %v3698_v50, 2  ;;  %v5727_v56 = vpop.f32.mrb[57].mxu0 }
0x1a63   :  { %v3705_v5 = vadd.f32 %v3703_v51, %v7813_v42 }
0x1a65   :  { %6301 = vtanh.f32 %v3705_v5  ;;  %v3706_v34 = vsub.f32 0.0, %v3705_v5 }
0x1a67   :  { %v3707_v45 = vmul.f32 1.442695, %v3706_v34 }
0x1a69   :  { %6303 = vpow2.f32 %v3707_v45 }
0x1a6f   :  { %v6302_v12 = vpop.eup %6301 }
0x1a70   :  { %3717 = vrot.lane.b32.xlu0 %v6302_v12, %s6628_s18 }
0x1a73   :  { %v6304_v22 = vpop.eup %6303 }
0x1a74   :  { %v3709_v37 = vadd.f32 1.0, %v6304_v22 }
0x1a76   :  { %6305 = vrcp.f32 %v3709_v37 }
0x1a80   :  { %v6306_v38 = vpop.eup %6305 }
0x1a81   :  { %v3715_v42 = vmul.f32 %v6306_v38, %v3713_v57 }
0x1ae2   :  { %v3718_v25 = vpop.permute.xlu0 %3717 }
0x1ae3   :  { %v3720_v58 = vmul.f32 %v6306_v38, %v3718_v25 }
0x1ae5   :  { %3722 = vrot.lane.b32.xlu1 %v3720_v58, %s6628_s18 }
0x1ae9   :  { %3757 = vrot.lane.b32.xlu1 %v7864_v3, %s6632_s26  ;;  %v3747_v3 = vld [vmem:[#allocation17 + $0x18] sm:$0xff] }
0x1aea   :  { %v7914_v26 = vpack.c.bf16 %v3747_v3, %v3746_v15 }
0x1aec   :  { %6135 = vmatpush3.bf16.msra.mxu0 %v7914_v26 }
0x1aed   :  { %6142 = vmatprep.subr.bf16.mxu0 %v6618_v49 }
0x1aef   :  { %5748 = vmatmul.mubr.f32.vlgmr.msra.gmra.mrb[58].mxu0 %v6616_v0 }
0x1af0   :  { %6144 = vmatpush3.bf16.msra.mxu0 %v7911_v21  ;;  %5769 = vmatprep.mubr.msk.f32.mxu0 %vm6617_vm0, %v6616_v0 }
0x1af1   :  { %6145 = vmatprep.subr.bf16.mxu0 %v6618_v49 }
0x1af4   :  { %6147 = vmatpush3.bf16.msra.mxu0 %v7914_v26 }
0x1af5   :  { %6154 = vmatprep.subr.bf16.mxu0 %v6618_v49 }
0x1b57   :  { %v3723_v16 = vpop.permute.xlu1 %3722 }
0x1b58   :  { %v3725_v1 = vadd.f32 %v3723_v16, %v3715_v42 }
0x1b5a   :  { %6307 = vtanh.f32 %v3725_v1 }
0x1b5b   :  { %v3758_v13 = vpop.permute.xlu1 %3757 }
0x1b5c   :  { %5736 = vmatprep.mubr.msk.f32.mxu1 %vm2786_vm14, %v3758_v13 }
0x1b64   :  { %v6308_v41 = vpop.eup %6307 }
0x1b65   :  { %3728 = vrot.lane.b32.xlu0 %v6308_v41, %s6628_s18 }
0x1bc2   :  { %v3906_v63 = vpop.f32.mrb[58].mxu0 }
0x1bc3   :  { %v5749_v19 = vpop.f32.mrb[59].mxu0 }
0x1bd7   :  { %v3729_v18 = vpop.permute.xlu0 %3728 }
0x1bd8   :  { %v3731_v53 = vmul.f32 %v6306_v38, %v3729_v18 }
0x1bda   :  { %v3739_v59 = vsel %vm3735_vm4, %v3738_v29, %v3731_v53 }
0x1bdb   :  { %3759 = vrot.lane.b32.xlu0 %v3739_v59, %s6632_s26 }
0x1c4d   :  { %v3760_v60 = vpop.permute.xlu0 %3759 }
0x1c4e   :  { %5737 = vmatmul.mubr.msk.f32.vlgmr.msra.gmra.mrb[46].mxu1 %vm2786_vm14, %v3760_v60 }
0x1c4f   :  { %6138 = vmatpush3.bf16.msra.mxu1 %v7911_v21  ;;  %5758 = vmatprep.mubr.msk.f32.mxu1 %vm6617_vm0, %v6616_v0 }
0x1c50   :  { %6139 = vmatprep.subr.bf16.mxu1 %v6618_v49 }
0x1c53   :  { %6141 = vmatpush3.bf16.msra.mxu1 %v7914_v26 }
0x1c54   :  { %6148 = vmatprep.subr.bf16.mxu1 %v6618_v49 }
0x1d21   :  { %v5738_v6 = vpop.f32.mrb[46].mxu1 }
0x1d22   :  { %v7940_v32 = vadd.f32 %v5738_v6, %v4898_v24  ;;  %v3831_v14 = vpop.f32.mrb[47].mxu1 }
0x1d23   :  { %v7942_v27 = vadd.f32 %v4898_v24, %v3831_v14 }
0x1d25   :  { %v3910_v44 = vadd.f32 %v3906_v63, %v7942_v27 }
0x1d27   :  { %6309 = vtanh.f32 %v3910_v44  ;;  %v3911_v4 = vsub.f32 0.0, %v3910_v44 }
0x1d29   :  { %v3912_v62 = vmul.f32 1.442695, %v3911_v4 }
0x1d2b   :  { %6311 = vpow2.f32 %v3912_v62 }
0x1d31   :  { %v6310_v28 = vpop.eup %6309 }
0x1d32   :  { %3919 = vrot.lane.b32.xlu1 %v6310_v28, %s6628_s18 }
0x1d35   :  { %v6312_v35 = vpop.eup %6311 }
0x1d36   :  { %v3914_v43 = vadd.f32 1.0, %v6312_v35 }
0x1d38   :  { %6313 = vrcp.f32 %v3914_v43 }
0x1d42   :  { %v6314_v2 = vpop.eup %6313 }
0x1d43   :  { %v3917_v40 = vmul.f32 0.0, %v6314_v2 }
0x1da4   :  { %v3920_v46 = vpop.permute.xlu1 %3919 }
0x1da5   :  { %v3922_v10 = vmul.f32 %v6314_v2, %v3920_v46 }
0x1da7   :  { %3924 = vrot.lane.b32.xlu0 %v3922_v10, %s6628_s18 }
0x1e19   :  { %v3925_v20 = vpop.permute.xlu0 %3924 }
0x1e1a   :  { %v3927_v8 = vadd.f32 %v3925_v20, %v3917_v40 }
0x1e1c   :  { %6315 = vtanh.f32 %v3927_v8  ;;  %v4020_v22 = vrot.slane %v3927_v8, 6 }
0x1e26   :  { %v6316_v11 = vpop.eup %6315 }
0x1e27   :  { %3930 = vrot.lane.b32.xlu1 %v6316_v11, %s6628_s18 }
0x1e99   :  { %v3931_v55 = vpop.permute.xlu1 %3930 }
0x1e9a   :  { %v3933_v7 = vmul.f32 %v6314_v2, %v3931_v55 }
0x1e9c   :  { %3935 = vrot.lane.b32.xlu0 %v3933_v7, %s6632_s26 }
0x1f0e   :  { %v3936_v30 = vpop.permute.xlu0 %3935 }
0x1f0f   :  { %5759 = vmatmul.mubr.msk.f32.vlgmr.msra.gmra.mrb[48].mxu1 %vm2786_vm14, %v3936_v30 }
0x1f10   :  { %6150 = vmatpush3.bf16.msra.mxu1 %v7911_v21  ;;  %5780 = vmatprep.mubr.msk.f32.mxu1 %vm6617_vm0, %v6616_v0 }
0x1f11   :  { %6151 = vmatprep.subr.bf16.mxu1 %v6618_v49 }
0x1f14   :  { %6153 = vmatpush3.bf16.msra.mxu1 %v7914_v26 }
0x1f15   :  { %6160 = vmatprep.subr.bf16.mxu1 %v6618_v49 }
0x1fe2   :  { %v4005_v31 = vpop.f32.mrb[48].mxu1 }
0x1fe3   :  { %v4010_v39 = vrot.slane %v4005_v31, 6  ;;  %v5760_v48 = vpop.f32.mrb[49].mxu1 }
0x1fe5   :  { %v4012_v29 = vadd.f32 %v4010_v39, %v7942_v27 }
0x1fe7   :  { %6317 = vtanh.f32 %v4012_v29  ;;  %v4013_v50 = vsub.f32 0.0, %v4012_v29 }
0x1fe9   :  { %v4014_v51 = vmul.f32 1.442695, %v4013_v50 }
0x1feb   :  { %6319 = vpow2.f32 %v4014_v51 }
0x1ff1   :  { %v6318_v47 = vpop.eup %6317 }
0x1ff2   :  { %4024 = vrot.lane.b32.xlu1 %v6318_v47, %s6628_s18 }
0x1ff5   :  { %v6320_v56 = vpop.eup %6319 }
0x1ff6   :  { %v4016_v5 = vadd.f32 1.0, %v6320_v56 }
0x1ff8   :  { %6321 = vrcp.f32 %v4016_v5 }
0x2002   :  { %v6322_v12 = vpop.eup %6321 }
0x2003   :  { %v4022_v37 = vmul.f32 %v6322_v12, %v4020_v22 }
0x2064   :  { %v4025_v34 = vpop.permute.xlu1 %4024 }
0x2065   :  { %v4027_v45 = vmul.f32 %v6322_v12, %v4025_v34 }
0x2067   :  { %4029 = vrot.lane.b32.xlu0 %v4027_v45, %s6628_s18 }
0x20d9   :  { %v4030_v38 = vpop.permute.xlu0 %4029 }
0x20da   :  { %v4032_v25 = vadd.f32 %v4030_v38, %v4022_v37 }
0x20dc   :  { %6323 = vtanh.f32 %v4032_v25  ;;  %v4126_v18 = vrot.slane %v4032_v25, 6 }
0x20e6   :  { %v6324_v58 = vpop.eup %6323 }
0x20e7   :  { %4035 = vrot.lane.b32.xlu1 %v6324_v58, %s6628_s18 }
0x2159   :  { %v4036_v57 = vpop.permute.xlu1 %4035 }
0x215a   :  { %v4038_v42 = vmul.f32 %v6322_v12, %v4036_v57 }
0x215c   :  { %v4040_v16 = vrot.slane %v4038_v42, 2 }
0x215e   :  { %4041 = vrot.lane.b32.xlu0 %v4040_v16, %s6632_s26 }
0x21d0   :  { %v4042_v1 = vpop.permute.xlu0 %4041 }
0x21d1   :  { %5770 = vmatmul.mubr.msk.f32.vlgmr.msra.gmra.mrb[60].mxu0 %vm2786_vm14, %v4042_v1 }
0x21d2   :  { %6156 = vmatpush3.bf16.msra.mxu0 %v7911_v21  ;;  %5791 = vmatprep.mubr.msk.f32.mxu0 %vm6617_vm0, %v6616_v0 }
0x21d3   :  { %6157 = vmatprep.subr.bf16.mxu0 %v6618_v49 }
0x21d6   :  { %6159 = vmatpush3.bf16.msra.mxu0 %v7914_v26 }
0x21d7   :  { %6166 = vmatprep.subr.bf16.mxu0 %v6618_v49 }
0x22a4   :  { %v4111_v13 = vpop.f32.mrb[60].mxu0 }
0x22a5   :  { %v4116_v33 = vrot.slane %v4111_v13, 4  ;;  %v5771_v36 = vpop.f32.mrb[61].mxu0 }
0x22a7   :  { %v4118_v52 = vadd.f32 %v4116_v33, %v7942_v27 }
0x22a9   :  { %6325 = vtanh.f32 %v4118_v52  ;;  %v4119_v17 = vsub.f32 0.0, %v4118_v52 }
0x22ab   :  { %v4120_v23 = vmul.f32 1.442695, %v4119_v17 }
0x22ad   :  { %6327 = vpow2.f32 %v4120_v23 }
0x22b3   :  { %v6326_v9 = vpop.eup %6325 }
0x22b4   :  { %4130 = vrot.lane.b32.xlu1 %v6326_v9, %s6628_s18 }
0x22b7   :  { %v6328_v54 = vpop.eup %6327 }
0x22b8   :  { %v4122_v61 = vadd.f32 1.0, %v6328_v54 }
0x22ba   :  { %6329 = vrcp.f32 %v4122_v61 }
0x22c4   :  { %v6330_v15 = vpop.eup %6329 }
0x22c5   :  { %v4128_v53 = vmul.f32 %v6330_v15, %v4126_v18 }
0x2326   :  { %v4131_v3 = vpop.permute.xlu1 %4130 }
0x2327   :  { %v4133_v41 = vmul.f32 %v6330_v15, %v4131_v3 }
0x2329   :  { %4135 = vrot.lane.b32.xlu0 %v4133_v41, %s6628_s18 }
0x239b   :  { %v4136_v59 = vpop.permute.xlu0 %4135 }
0x239c   :  { %v4138_v60 = vadd.f32 %v4136_v59, %v4128_v53 }
0x239e   :  { %6331 = vtanh.f32 %v4138_v60  ;;  %v4232_v11 = vrot.slane %v4138_v60, 6 }
0x23a8   :  { %v6332_v63 = vpop.eup %6331 }
0x23a9   :  { %4141 = vrot.lane.b32.xlu1 %v6332_v63, %s6628_s18 }
0x241b   :  { %v4142_v19 = vpop.permute.xlu1 %4141 }
0x241c   :  { %v4144_v24 = vmul.f32 %v6330_v15, %v4142_v19 }
0x241e   :  { %v4146_v6 = vrot.slane %v4144_v24, 4 }
0x2420   :  { %4147 = vrot.lane.b32.xlu0 %v4146_v6, %s6632_s26 }
0x2492   :  { %v4148_v14 = vpop.permute.xlu0 %4147 }
0x2493   :  { %5781 = vmatmul.mubr.msk.f32.vlgmr.msra.gmra.mrb[50].mxu1 %vm2786_vm14, %v4148_v14 }
0x2494   :  { %6162 = vmatpush3.bf16.msra.mxu1 %v7911_v21  ;;  %5802 = vmatprep.mubr.msk.f32.mxu1 %vm6617_vm0, %v6616_v0 }
0x2495   :  { %6163 = vmatprep.subr.bf16.mxu1 %v6618_v49 }
0x2498   :  { %6165 = vmatpush3.bf16.msra.mxu1 %v7914_v26 }
0x2499   :  { %6172 = vmatprep.subr.bf16.mxu1 %v6618_v49 }
0x2566   :  { %v4217_v44 = vpop.f32.mrb[50].mxu1 }
0x2567   :  { %v4222_v28 = vrot.slane %v4217_v44, 2  ;;  %v5782_v4 = vpop.f32.mrb[51].mxu1 }
0x2569   :  { %v4224_v62 = vadd.f32 %v4222_v28, %v7942_v27 }
0x256b   :  { %6333 = vtanh.f32 %v4224_v62  ;;  %v4225_v43 = vsub.f32 0.0, %v4224_v62 }
0x256d   :  { %v4226_v2 = vmul.f32 1.442695, %v4225_v43 }
0x256f   :  { %6335 = vpow2.f32 %v4226_v2 }
0x2575   :  { %v6334_v35 = vpop.eup %6333 }
0x2576   :  { %4236 = vrot.lane.b32.xlu1 %v6334_v35, %s6628_s18 }
0x2579   :  { %v6336_v46 = vpop.eup %6335 }
0x257a   :  { %v4228_v10 = vadd.f32 1.0, %v6336_v46 }
0x257c   :  { %6337 = vrcp.f32 %v4228_v10 }
0x2586   :  { %v6338_v40 = vpop.eup %6337 }
0x2587   :  { %v4234_v55 = vmul.f32 %v6338_v40, %v4232_v11 }
0x25e8   :  { %v4237_v20 = vpop.permute.xlu1 %4236 }
0x25e9   :  { %v4239_v8 = vmul.f32 %v6338_v40, %v4237_v20 }
0x25eb   :  { %4241 = vrot.lane.b32.xlu0 %v4239_v8, %s6628_s18 }
0x265d   :  { %v4242_v7 = vpop.permute.xlu0 %4241 }
0x265e   :  { %v4244_v30 = vadd.f32 %v4242_v7, %v4234_v55 }
0x2660   :  { %6339 = vtanh.f32 %v4244_v30  ;;  %v4335_v25 = vrot.slane %v4244_v30, 6 }
0x266a   :  { %v6340_v27 = vpop.eup %6339 }
0x266b   :  { %4247 = vrot.lane.b32.xlu1 %v6340_v27, %s6628_s18 }
0x26dd   :  { %v4248_v31 = vpop.permute.xlu1 %4247 }
0x26de   :  { %v7984_v39 = vmul.f32 %v6338_v40, %v4248_v31 }
0x26e0   :  { %v4252_v48 = vrot.slane %v7984_v39, 6 }
0x26e2   :  { %4253 = vrot.lane.b32.xlu0 %v4252_v48, %s6632_s26 }
0x2754   :  { %v4254_v29 = vpop.permute.xlu0 %4253 }
0x2755   :  { %5792 = vmatmul.mubr.msk.f32.vlgmr.msra.gmra.mrb[62].mxu0 %vm2786_vm14, %v4254_v29 }
0x2756   :  { %6168 = vmatpush3.bf16.msra.mxu0 %v7911_v21  ;;  %5813 = vmatprep.mubr.msk.f32.mxu0 %vm6617_vm0, %v6616_v0 }
0x2757   :  { %6169 = vmatprep.subr.bf16.mxu0 %v6618_v49 }
0x275a   :  { %6171 = vmatpush3.bf16.msra.mxu0 %v7914_v26 }
0x275b   :  { %6178 = vmatprep.subr.bf16.mxu0 %v6618_v49 }
0x2828   :  { %v4323_v47 = vpop.f32.mrb[62].mxu0 }
0x2829   :  { %v4327_v50 = vadd.f32 %v4323_v47, %v7940_v32  ;;  %v5793_v51 = vpop.f32.mrb[63].mxu0 }
0x282b   :  { %6341 = vtanh.f32 %v4327_v50  ;;  %v4328_v5 = vsub.f32 0.0, %v4327_v50 }
0x282d   :  { %v4329_v12 = vmul.f32 1.442695, %v4328_v5 }
0x282f   :  { %6343 = vpow2.f32 %v4329_v12 }
0x2835   :  { %v6342_v56 = vpop.eup %6341 }
0x2836   :  { %4339 = vrot.lane.b32.xlu1 %v6342_v56, %s6628_s18 }
0x2839   :  { %v6344_v34 = vpop.eup %6343 }
0x283a   :  { %v4331_v45 = vadd.f32 1.0, %v6344_v34 }
0x283c   :  { %6345 = vrcp.f32 %v4331_v45 }
0x2846   :  { %v6346_v22 = vpop.eup %6345 }
0x2847   :  { %v4337_v58 = vmul.f32 %v6346_v22, %v4335_v25 }
0x28a8   :  { %v4340_v37 = vpop.permute.xlu1 %4339 }
0x28a9   :  { %v4342_v38 = vmul.f32 %v6346_v22, %v4340_v37 }
0x28ab   :  { %4344 = vrot.lane.b32.xlu0 %v4342_v38, %s6628_s18 }
0x291d   :  { %v4345_v57 = vpop.permute.xlu0 %4344 }
0x291e   :  { %v4347_v42 = vadd.f32 %v4345_v57, %v4337_v58 }
0x2920   :  { %6347 = vtanh.f32 %v4347_v42 }
0x292a   :  { %v6348_v16 = vpop.eup %6347 }
0x292b   :  { %4350 = vrot.lane.b32.xlu1 %v6348_v16, %s6628_s18 }
0x299d   :  { %v4351_v1 = vpop.permute.xlu1 %4350 }
0x299e   :  { %v4353_v13 = vmul.f32 %v6346_v22, %v4351_v1  ;;  %v4678_v1 = vld [vmem:[%s8071_s15 + $0x8] sm:$0xff] }
0x29a0   :  { %4355 = vrot.lane.b32.xlu0 %v4353_v13, %s6632_s26  ;;  %v4679_v13 = vld [vmem:[%s8071_s15 + $0x10] sm:$0xff] }
0x2a12   :  { %v4356_v33 = vpop.permute.xlu0 %4355 }
0x2a13   :  { %5803 = vmatmul.mubr.msk.f32.vlgmr.msra.gmra.mrb[52].mxu1 %vm2786_vm14, %v4356_v33 }
0x2a14   :  { %6174 = vmatpush3.bf16.msra.mxu1 %v7911_v21  ;;  %5824 = vmatprep.mubr.msk.f32.mxu1 %vm6617_vm0, %v6616_v0 }
0x2a15   :  { %6175 = vmatprep.subr.bf16.mxu1 %v6618_v49 }
0x2a18   :  { %6177 = vmatpush3.bf16.msra.mxu1 %v7914_v26  ;;  %v4440_v26 = vrot.slane %v4347_v42, 6 }
0x2ae6   :  { %v4425_v36 = vpop.f32.mrb[52].mxu1 }
0x2ae7   :  { %v4430_v52 = vrot.slane %v4425_v36, 6  ;;  %v5804_v9 = vpop.f32.mrb[53].mxu1  ;;  %v4680_v36 = vld [vmem:[%s8071_s15 + $0x18] sm:$0xff] }
0x2ae9   :  { %v4432_v17 = vadd.f32 %v4430_v52, %v7940_v32  ;;  %v6182_v52 = vpack.c.bf16 %v4680_v36, %v4679_v13 }
0x2aeb   :  { %6349 = vtanh.f32 %v4432_v17  ;;  %v4433_v54 = vsub.f32 0.0, %v4432_v17 }
0x2aed   :  { %v4434_v61 = vmul.f32 1.442695, %v4433_v54  ;;  %v4671_v54 = vrot.slane %v7984_v39, 7 }
0x2aef   :  { %6351 = vpow2.f32 %v4434_v61 }
0x2af5   :  { %v6350_v23 = vpop.eup %6349 }
0x2af6   :  { %4444 = vrot.lane.b32.xlu1 %v6350_v23, %s6628_s18 }
0x2af9   :  { %v6352_v21 = vpop.eup %6351 }
0x2afa   :  { %v4436_v15 = vadd.f32 1.0, %v6352_v21 }
0x2afc   :  { %6353 = vrcp.f32 %v4436_v15 }
0x2b06   :  { %v6354_v3 = vpop.eup %6353 }
0x2b07   :  { %v4442_v53 = vmul.f32 %v6354_v3, %v4440_v26 }
0x2b68   :  { %v4445_v41 = vpop.permute.xlu1 %4444 }
0x2b69   :  { %v4447_v18 = vmul.f32 %v6354_v3, %v4445_v41 }
0x2b6b   :  { %4449 = vrot.lane.b32.xlu0 %v4447_v18, %s6628_s18 }
0x2bdd   :  { %v4450_v59 = vpop.permute.xlu0 %4449 }
0x2bde   :  { %v4452_v60 = vadd.f32 %v4450_v59, %v4442_v53 }
0x2be0   :  { %6355 = vtanh.f32 %v4452_v60 }
0x2bea   :  { %v6356_v63 = vpop.eup %6355 }
0x2beb   :  { %4455 = vrot.lane.b32.xlu1 %v6356_v63, %s6628_s18 }
0x2c5d   :  { %v4456_v19 = vpop.permute.xlu1 %4455 }
0x2c5e   :  { %v4458_v24 = vmul.f32 %v6354_v3, %v4456_v19 }
0x2c60   :  { %v4460_v6 = vrot.slane %v4458_v24, 2 }
0x2c62   :  { %4461 = vrot.lane.b32.xlu0 %v4460_v6, %s6632_s26 }
0x2cd4   :  { %v4462_v14 = vpop.permute.xlu0 %4461 }
0x2cd5   :  { %5814 = vmatmul.mubr.msk.f32.vlgmr.msra.gmra.mrb[64].mxu0 %vm2786_vm14, %v4462_v14 }
0x2cd6   :  { %5835 = vmatprep.mubr.msk.f32.mxu0 %vm6617_vm0, %v6616_v0  ;;  %v4546_v0 = vrot.slane %v4452_v60, 6  ;;  %vm4763_vm0 = vcmask 41984  }
0x2da8   :  { %v4531_v44 = vpop.f32.mrb[64].mxu0 }
0x2da9   :  { %v4536_v28 = vrot.slane %v4531_v44, 4  ;;  %v5815_v4 = vpop.f32.mrb[65].mxu0 }
0x2dab   :  { %v4538_v62 = vadd.f32 %v4536_v28, %v7940_v32 }
0x2dad   :  { %6357 = vtanh.f32 %v4538_v62  ;;  %v4539_v43 = vsub.f32 0.0, %v4538_v62 }
0x2daf   :  { %v4540_v2 = vmul.f32 1.442695, %v4539_v43 }
0x2db1   :  { %6359 = vpow2.f32 %v4540_v2 }
0x2db7   :  { %v6358_v35 = vpop.eup %6357 }
0x2db8   :  { %4550 = vrot.lane.b32.xlu1 %v6358_v35, %s6628_s18 }
0x2dbb   :  { %v6360_v46 = vpop.eup %6359 }
0x2dbc   :  { %v4542_v10 = vadd.f32 1.0, %v6360_v46 }
0x2dbe   :  { %6361 = vrcp.f32 %v4542_v10 }
0x2dc8   :  { %v6362_v40 = vpop.eup %6361 }
0x2dc9   :  { %v4548_v11 = vmul.f32 %v6362_v40, %v4546_v0 }
0x2e2a   :  { %v4551_v20 = vpop.permute.xlu1 %4550 }
0x2e2b   :  { %v4553_v8 = vmul.f32 %v6362_v40, %v4551_v20 }
0x2e2d   :  { %4555 = vrot.lane.b32.xlu0 %v4553_v8, %s6628_s18 }
0x2e9f   :  { %v4556_v55 = vpop.permute.xlu0 %4555 }
0x2ea0   :  { %v4558_v7 = vadd.f32 %v4556_v55, %v4548_v11 }
0x2ea2   :  { %6363 = vtanh.f32 %v4558_v7  ;;  %v4652_v58 = vrot.slane %v4558_v7, 6 }
0x2eac   :  { %v6364_v30 = vpop.eup %6363 }
0x2ead   :  { %4561 = vrot.lane.b32.xlu1 %v6364_v30, %s6628_s18 }
0x2f1f   :  { %v4562_v27 = vpop.permute.xlu1 %4561 }
0x2f20   :  { %v4564_v31 = vmul.f32 %v6362_v40, %v4562_v27 }
0x2f22   :  { %v4566_v48 = vrot.slane %v4564_v31, 4 }
0x2f24   :  { %4567 = vrot.lane.b32.xlu0 %v4566_v48, %s6632_s26 }
0x2f96   :  { %v4568_v29 = vpop.permute.xlu0 %4567 }
0x2f97   :  { %5825 = vmatmul.mubr.msk.f32.vlgmr.msra.gmra.mrb[54].mxu1 %vm2786_vm14, %v4568_v29 }
0x306a   :  { %v4637_v47 = vpop.f32.mrb[54].mxu1 }
0x306b   :  { %v4642_v50 = vrot.slane %v4637_v47, 2  ;;  %v5826_v51 = vpop.f32.mrb[55].mxu1 }
0x306d   :  { %v4644_v56 = vadd.f32 %v4642_v50, %v7940_v32  ;;  %v4677_v32 = vld [vmem:[%s8071_s15] sm:$0xff] }
0x306e   :  { %v6179_v33 = vpack.c.bf16 %v4678_v1, %v4677_v32 }
0x306f   :  { %6365 = vtanh.f32 %v4644_v56  ;;  %v4645_v12 = vsub.f32 0.0, %v4644_v56 }
0x3070   :  { %6180 = vmatpush3.bf16.msra.mxu0 %v6179_v33 }
0x3071   :  { %v4646_v34 = vmul.f32 1.442695, %v4645_v12  ;;  %6181 = vmatprep.subr.bf16.mxu0 %v6618_v49  ;;  %v4908_v49 = vld [vmem:[%s8072_s16] ss:$0 sm:$0xff] }
0x3073   :  { %6367 = vpow2.f32 %v4646_v34 }
0x3074   :  { %6183 = vmatpush3.bf16.msra.mxu0 %v6182_v52 }
0x3079   :  { %v6366_v5 = vpop.eup %6365 }
0x307a   :  { %4656 = vrot.lane.b32.xlu1 %v6366_v5, %s6628_s18 }
0x307d   :  { %v6368_v45 = vpop.eup %6367 }
0x307e   :  { %v4648_v22 = vadd.f32 1.0, %v6368_v45 }
0x3080   :  { %6369 = vrcp.f32 %v4648_v22 }
0x308a   :  { %v6370_v37 = vpop.eup %6369 }
0x308b   :  { %v4654_v57 = vmul.f32 %v6370_v37, %v4652_v58 }
0x30ec   :  { %v4657_v38 = vpop.permute.xlu1 %4656 }
0x30ed   :  { %v4659_v25 = vmul.f32 %v6370_v37, %v4657_v38 }
0x30ef   :  { %4661 = vrot.lane.b32.xlu0 %v4659_v25, %s6628_s18 }
0x3161   :  { %v4662_v42 = vpop.permute.xlu0 %4661 }
0x3162   :  { %v4664_v16 = vadd.f32 %v4662_v42, %v4654_v57 }
0x3164   :  { %6371 = vtanh.f32 %v4664_v16 }
0x316e   :  { %v6372_v9 = vpop.eup %6371 }
0x316f   :  { %4667 = vrot.lane.b32.xlu1 %v6372_v9, %s6628_s18  ;;  %s6571_s18 = scalar_lea.vmem %s4772_s21, 32 }
0x3170   :  { %p6572_p2 = scmp.ne.s32.totalorder %s4772_s21, %s6571_s18  ;;  %p6577_p4 = scmp.lt.s32.totalorder %s6571_s18, %s6571_s18 }
0x3172   :  { %p6578_p5 = por %p6577_p4, %p6576_p3 }
0x3174   :  { %p6579_p6 = pnand %p6578_p5, %p6572_p2 }
0x31e1   :  { %v4668_v17 = vpop.permute.xlu1 %4667 }
0x31e2   :  { %v4670_v23 = vmul.f32 %v6370_v37, %v4668_v17 }
0x31e4   :  { %v4674_v61 = vrot.slane %v4670_v23, 6 }
0x31e6   :  { %v4676_v21 = vsel %vm585_vm7, %v4671_v54, %v4674_v61 }
0x31e7   :  { %4689 = vrot.lane.b32.xlu0 %v4676_v21, %s6632_s26 }
0x3259   :  { %v4690_v15 = vpop.permute.xlu0 %4689 }
0x325a   :  { %5836 = vmatmul.mubr.msk.f32.vlgmr.msra.gmra.mrb[66].mxu0 %vm2786_vm14, %v4690_v15 }
0x332d   :  { %v4759_v3 = vpop.f32.mrb[66].mxu0 }
0x332e   :  { %v4760_v41 = vadd.f32 %v4908_v49, %v4759_v3  ;;  %v5837_v18 = vpop.f32.mrb[67].mxu0 }
0x3330   :  { %4764 = vst.msk [vmem:[#allocation18] sm:$0x3] %vm4763_vm0, %v4760_v41 }
0x3331   :  { %6582 = shalt.err (!%p6579_p6)
}
0x3332   :  { %s6583_s3 = scalar_lea.hbm %s8073_s17, 32 }
0x3333   :  { %p6584_p7 = scmp.ne.s32.totalorder %s8073_s17, %s6583_s3  ;;  %p6587_p8 = scmp.lt.u32.totalorder %s6583_s3, %s8073_s17 }
0x3335   :  { %p6589_p9 = pnand %p6587_p8, %p6584_p7 }
0x3337   :  { %6592 = shalt.err (!%p6589_p9)
}
0x3338   :  { %4774 = dma.vmem_to_hbm [thread:$0]  %s4772_s21, 32, %s8073_s17, [#allocation5]  }
0x3339   :  { %6603 = dma.done.wait [#allocation5], 32  }
0x333a   :  { %6604 = vsyncadd [#allocation5], 4294967264 }
0x333b   :  { %4778 = vsyncpa [#allocation4], 1 }
0x333c   :  { %4779 = vsyncpa [#allocation7], 1 }
0x333d   :  { %4780 = vsyncpa [#allocation10], 1 }
0x333e   :  { %4781 = vsyncpa [#allocation13], 1 }
0x333f   :  { %4782 = vsyncpa [#allocation16], 1 }
0x3340   :  { %4783 = vsyncpa [#allocation5], 1 }

</bundles_post_ra>
